<compile_context>
chip_gen: v6e
topology: v6e:2x2x1
jax: 0.10.0
libtpu: 0.0.40
codegen_flags: <defaults>
</compile_context>

<pallas_src>
import functools

import jax
import jax.numpy as jnp
from jax import lax
from jax.experimental import pallas as pl
from jax.experimental.pallas import tpu as pltpu


def _round_up(x, m):
    return ((x + m - 1) // m) * m


def _pick_group(n_imgs, lanes_per_img, max_lanes=8192):
    """Images per grid block: keep >=2 grid steps (v7x dual-TC) and bounded lanes."""
    best = 1
    for d in range(1, n_imgs + 1):
        if n_imgs % d:
            continue
        if d * lanes_per_img > max_lanes:
            continue
        if n_imgs >= 2 and n_imgs // d < 2:
            continue
        best = d
    return best


# ----------------------------------------------------------------------------
# Pallas kernels
# ----------------------------------------------------------------------------
def _conv3x3_tap_kernel(*refs, offsets, cin, cout, keep, use_prelu, use_res):
    """Fused 3x3 conv in padded-flat layout.

    x_ref : (keep + cin, T)   storage dtype (bf16/f32), border lanes are zero
    w_ref : (9, cout, cin)    f32 tap weights (tap t = dy*3+dx)
    b_ref : (cout, 1) f32, m_ref : (1, T) f32 validity mask
    [a_ref: (cout, 1) f32 PReLU]  [r_ref: (cout, T) residual]
    o_ref : (keep + cout, T)
    """
    x_ref, w_ref, b_ref, m_ref = refs[0], refs[1], refs[2], refs[3]
    idx = 4
    a_ref = None
    r_ref = None
    if use_prelu:
        a_ref = refs[idx]
        idx += 1
    if use_res:
        r_ref = refs[idx]
        idx += 1
    o_ref = refs[idx]

    if keep:
        # ResBlock splice: untouched leading channels pass straight through.
        o_ref[0:keep, :] = x_ref[0:keep, :]

    x = x_ref[keep:keep + cin, :].astype(jnp.float32)          # (cin, T)
    t_lanes = x.shape[1]
    acc = None
    for t, off in enumerate(offsets):
        # result[:, m] = x[:, m + off]  (valid lanes never wrap; pads are masked)
        xt = x if off == 0 else pltpu.roll(x, shift=(-off) % t_lanes, axis=1)
        wt = w_ref[t].astype(jnp.float32)                       # (cout, cin)
        contrib = jnp.dot(wt, xt, preferred_element_type=jnp.float32)
        acc = contrib if acc is None else acc + contrib

    y = acc + b_ref[...].astype(jnp.float32)
    if use_res:
        y = y + r_ref[...].astype(jnp.float32)
    if use_prelu:
        a = a_ref[...].astype(jnp.float32)
        y = jnp.where(y >= 0, y, a * y)
    y = y * m_ref[...].astype(jnp.float32)                      # zero the border
    o_ref[keep:keep + cout, :] = y.astype(o_ref.dtype)


def _warp_concat_kernel(ft_ref, f0c_ref, w0_ref, f1c_ref, w1_ref, fl_ref, o_ref,
                        *, cf, c):
    """Fused bilinear combine of both warps + channel concat (padded-flat layout).

    ft_ref : (cf, T)    passthrough feature (zero at border lanes)
    f*c_ref: (4*c, T)   corner-gathered copies of f0 / f1
    w*_ref : (4, T)     bilinear weights, pre-multiplied by the border mask
    fl_ref : (rows, T)  [up_flow0 ; up_flow1 ; zero pad rows]
    o_ref  : (cf + 2*c + rows, T)
    """
    o_ref[0:cf, :] = ft_ref[...].astype(o_ref.dtype)
    for fc_ref, w_ref, off in ((f0c_ref, w0_ref, cf), (f1c_ref, w1_ref, cf + c)):
        acc = (w_ref[0:1, :].astype(jnp.float32)
               * fc_ref[0:c, :].astype(jnp.float32))
        for k in range(1, 4):
            acc = acc + (w_ref[k:k + 1, :].astype(jnp.float32)
                         * fc_ref[k * c:(k + 1) * c, :].astype(jnp.float32))
        o_ref[off:off + c, :] = acc.astype(o_ref.dtype)
    o_ref[cf + 2 * c:, :] = fl_ref[...].astype(o_ref.dtype)


# ----------------------------------------------------------------------------
# Pallas wrappers
# ----------------------------------------------------------------------------
def conv3x3_padded_flat(x_pf, w9, b, mask, offsets, *, gS, alpha=None,
                        residual=None, keep=0, out_dtype=None):
    rows_in, M = x_pf.shape
    _, cout, cin = w9.shape
    assert rows_in == keep + cin
    assert cout % 8 == 0 and keep % 8 == 0
    rows_out = keep + cout
    out_dtype = x_pf.dtype if out_dtype is None else out_dtype

    args = [x_pf, w9.astype(jnp.float32),
            b.astype(jnp.float32).reshape(cout, 1), mask]
    in_specs = [
        pl.BlockSpec((rows_in, gS), lambda i: (0, i)),
        pl.BlockSpec((9, cout, cin), lambda i: (0, 0, 0)),
        pl.BlockSpec((cout, 1), lambda i: (0, 0)),
        pl.BlockSpec((1, gS), lambda i: (0, i)),
    ]
    if alpha is not None:
        args.append(alpha.astype(jnp.float32).reshape(cout, 1))
        in_specs.append(pl.BlockSpec((cout, 1), lambda i: (0, 0)))
    if residual is not None:
        args.append(residual)
        in_specs.append(pl.BlockSpec((cout, gS), lambda i: (0, i)))

    kernel = functools.partial(
        _conv3x3_tap_kernel, offsets=tuple(offsets), cin=cin, cout=cout,
        keep=keep, use_prelu=alpha is not None, use_res=residual is not None)

    return pl.pallas_call(
        kernel,
        out_shape=jax.ShapeDtypeStruct((rows_out, M), out_dtype),
        grid=(M // gS,),
        in_specs=in_specs,
        out_specs=pl.BlockSpec((rows_out, gS), lambda i: (0, i)),
        compiler_params=pltpu.CompilerParams(dimension_semantics=("parallel",)),
    )(*args)


def warp_concat_padded_flat(ft_pf, f0c, w0, f1c, w1, fl_pf, *, gS, out_dtype):
    cf, M = ft_pf.shape
    c = f0c.shape[0] // 4
    rows_out = cf + 2 * c + fl_pf.shape[0]

    args = [ft_pf, f0c, w0, f1c, w1, fl_pf]
    in_specs = [pl.BlockSpec((a.shape[0], gS), lambda i: (0, i)) for a in args]

    return pl.pallas_call(
        functools.partial(_warp_concat_kernel, cf=cf, c=c),
        out_shape=jax.ShapeDtypeStruct((rows_out, M), out_dtype),
        grid=(M // gS,),
        in_specs=in_specs,
        out_specs=pl.BlockSpec((rows_out, gS), lambda i: (0, i)),
        compiler_params=pltpu.CompilerParams(dimension_semantics=("parallel",)),
    )(*args)


# ----------------------------------------------------------------------------
# Plain-JAX glue: layouts, warp gathers, weight prep
# ----------------------------------------------------------------------------
def _to_padded_flat(x_cnhw, S):
    """(C, N, H, W) -> (C, N*S) with a 1-pixel zero border and zero lane tail."""
    C, N, H, W = x_cnhw.shape
    Hp, Wp = H + 2, W + 2
    xp = jnp.pad(x_cnhw, ((0, 0), (0, 0), (1, 1), (1, 1)))
    xp = xp.reshape(C, N, Hp * Wp)
    xp = jnp.pad(xp, ((0, 0), (0, 0), (0, S - Hp * Wp)))
    return xp.reshape(C, N * S)


def _valid_mask(N, H, W, S):
    Hp, Wp = H + 2, W + 2
    m = jnp.zeros((Hp, Wp), jnp.float32).at[1:H + 1, 1:W + 1].set(1.0)
    m = jnp.pad(m.reshape(Hp * Wp), (0, S - Hp * Wp))
    return jnp.tile(m, (N,)).reshape(1, N * S)


def _warp_gather_padded(f_nchw, flow_nchw, S, mask, store_dtype):
    """Bilinear corner gathers + weights (border padding, pixel-offset flow),
    emitted directly in the padded-flat layout.  Weights are pre-masked so the
    warped channels are exactly zero at the border / tail lanes."""
    N, C, H, W = f_nchw.shape
    Hp, Wp = H + 2, W + 2
    flow_p = jnp.pad(flow_nchw, ((0, 0), (0, 0), (1, 1), (1, 1)))
    fx = flow_p[:, 0]
    fy = flow_p[:, 1]
    gx = jnp.arange(Wp, dtype=jnp.float32)[None, None, :] - 1.0
    gy = jnp.arange(Hp, dtype=jnp.float32)[None, :, None] - 1.0

    x = jnp.clip(gx + fx, 0.0, float(W - 1))
    y = jnp.clip(gy + fy, 0.0, float(H - 1))
    x0f = jnp.floor(x)
    y0f = jnp.floor(y)
    wx = x - x0f
    wy = y - y0f
    x0 = x0f.astype(jnp.int32)
    y0 = y0f.astype(jnp.int32)
    x1 = jnp.minimum(x0 + 1, W - 1)
    y1 = jnp.minimum(y0 + 1, H - 1)

    wts = jnp.stack([(1 - wy) * (1 - wx), (1 - wy) * wx,
                     wy * (1 - wx), wy * wx], axis=0).reshape(4, N, Hp * Wp)
    wts = jnp.pad(wts, ((0, 0), (0, 0), (0, S - Hp * Wp))).reshape(4, N * S)
    wts = wts * mask

    flat = f_nchw.reshape(N, C, H * W)

    # TODO(synk): replace with an in-kernel DMA gather (scalar-prefetched indices).
    def gather(yi, xi):
        idx = (yi * W + xi).reshape(N, 1, Hp * Wp)
        idx = jnp.broadcast_to(idx, (N, C, Hp * Wp))
        return jnp.take_along_axis(flat, idx, axis=2)          # (N, C, Hp*Wp)

    g = jnp.stack([gather(y0, x0), gather(y0, x1),
                   gather(y1, x0), gather(y1, x1)], axis=0)    # (4, N, C, HpWp)
    corners = jnp.transpose(g, (0, 2, 1, 3)).reshape(4 * C, N, Hp * Wp)
    corners = jnp.pad(corners, ((0, 0), (0, 0), (0, S - Hp * Wp)))
    corners = corners.reshape(4 * C, N * S)
    return corners.astype(store_dtype), wts.astype(store_dtype)


def _w9_of(layer, cin_pad=0):
    """OIHW (Cout, Cin, 3, 3) -> tap-major (9, Cout, Cin [+pad])."""
    w = layer['w']
    w9 = jnp.transpose(w, (2, 3, 0, 1)).reshape(9, w.shape[0], w.shape[1])
    if cin_pad:
        w9 = jnp.pad(w9, ((0, 0), (0, 0), (0, cin_pad)))
    return w9


def _deconv_as_conv3x3(w_iohw, b):
    """Embed the 4 sub-pixel phases of ConvTranspose2d(4,2,1) into one 3x3 conv
    with 4*Cout output channels (tap-major weights)."""
    Cin, Cout = w_iohw.shape[0], w_iohw.shape[1]
    wflip = w_iohw[:, :, ::-1, ::-1]
    w9 = jnp.zeros((9, 4 * Cout, Cin), jnp.float32)
    for py in (0, 1):
        for px in (0, 1):
            wp = wflip[:, :, py::2, px::2]                      # (Cin, Cout, 2, 2)
            p = py * 2 + px
            for i in (0, 1):
                for j in (0, 1):
                    t = (i + py) * 3 + (j + px)
                    w9 = w9.at[t, p * Cout:(p + 1) * Cout, :].set(
                        jnp.transpose(wp[:, :, i, j]))
    b9 = jnp.tile(b, (4,))
    return w9, b9


# ----------------------------------------------------------------------------
# Decoder3 forward (Pallas path)
# ----------------------------------------------------------------------------
def decoder3_forward_impl(params, ft_, f0, f1, up_flow0, up_flow1,
                          *, store_dtype=jnp.bfloat16):
    N, C, H, W = f0.shape
    Cf = ft_.shape[1]
    Hp, Wp = H + 2, W + 2
    S = _round_up(Hp * Wp, 128)
    g = _pick_group(N, S)
    gS = g * S
    offsets = tuple((dy - 1) * Wp + (dx - 1) for dy in range(3) for dx in range(3))
    mask = _valid_mask(N, H, W, S)

    # --- warp + concat (all in padded-flat layout, stored in store_dtype) ----
    ft_pf = _to_padded_flat(jnp.transpose(ft_, (1, 0, 2, 3)), S).astype(store_dtype)
    flows = jnp.transpose(jnp.concatenate([up_flow0, up_flow1], axis=1),
                          (1, 0, 2, 3))
    flows = jnp.pad(flows, ((0, 4), (0, 0), (0, 0), (0, 0)))   # 4 -> 8 rows (zeros)
    fl_pf = _to_padded_flat(flows, S).astype(store_dtype)
    f0c, w0 = _warp_gather_padded(f0, up_flow0, S, mask, store_dtype)
    f1c, w1 = _warp_gather_padded(f1, up_flow1, S, mask, store_dtype)

    # (32, N*S): [ft(8) | warp0(8) | warp1(8) | flows(4) | zeros(4)]
    x_in = warp_concat_padded_flat(ft_pf, f0c, w0, f1c, w1, fl_pf,
                                   gS=gS, out_dtype=store_dtype)

    p = params
    conv = functools.partial(conv3x3_padded_flat, mask=mask, offsets=offsets, gS=gS)

    # conv0: 28 real input channels + 4 zero-padded ones (so all blocks are 8-row aligned)
    x0 = conv(x_in, _w9_of(p['conv0'], cin_pad=4), p['conv0']['b'],
              alpha=p['conv0']['alpha'])
    # ResBlock (channel splices fused via keep=16 passthrough rows)
    h = conv(x0, _w9_of(p['res1']), p['res1']['b'], alpha=p['res1']['alpha'])
    h = conv(h, _w9_of(p['res2']), p['res2']['b'], alpha=p['res2']['alpha'], keep=16)
    h = conv(h, _w9_of(p['res3']), p['res3']['b'], alpha=p['res3']['alpha'])
    h = conv(h, _w9_of(p['res4']), p['res4']['b'], alpha=p['res4']['alpha'], keep=16)
    h = conv(h, _w9_of(p['res5']), p['res5']['b'], alpha=p['res5']['alpha'],
             residual=x0)

    # ConvTranspose2d(32, 12, 4, 2, 1): 4 phases fused into one 48-channel conv
    dw9, db = _deconv_as_conv3x3(p['deconv']['w'], p['deconv']['b'])
    y48 = conv(h, dw9, db, out_dtype=jnp.float32)               # (48, N*S)

    # Single combined phase-interleave + NCHW permutation
    Cout = p['deconv']['w'].shape[1]
    y = y48.reshape(4, Cout, N, S)[..., :Hp * Wp]
    y = y.reshape(2, 2, Cout, N, Hp, Wp)[..., 1:H + 1, 1:W + 1]
    y = jnp.transpose(y, (3, 2, 4, 0, 5, 1)).reshape(N, Cout, 2 * H, 2 * W)
    return y


decoder3_forward = jax.jit(
    functools.partial(decoder3_forward_impl, store_dtype=jnp.bfloat16))
decoder3_forward_f32 = jax.jit(
    functools.partial(decoder3_forward_impl, store_dtype=jnp.float32))


# ----------------------------------------------------------------------------
# Pure-JAX reference (for validation)
# ----------------------------------------------------------------------------
def _prelu_ref(x, a):
    return jnp.where(x >= 0, x, a * x)


def _conv_ref(x, w_oihw, b, pad=1):
    w_hwio = w_oihw.transpose(2, 3, 1, 0)
    y = lax.conv_general_dilated(x, w_hwio, (1, 1), ((pad, pad), (pad, pad)),
                                 dimension_numbers=('NHWC', 'HWIO', 'NHWC'))
    return y + b


def _warp_ref(img, flow):
    N, H, W, C = img.shape
    ys, xs = jnp.meshgrid(jnp.arange(H, dtype=jnp.float32),
                          jnp.arange(W, dtype=jnp.float32), indexing='ij')
    x = jnp.clip(xs[None] + flow[..., 0], 0.0, W - 1.0)
    y = jnp.clip(ys[None] + flow[..., 1], 0.0, H - 1.0)
    x0f, y0f = jnp.floor(x), jnp.floor(y)
    wx, wy = x - x0f, y - y0f
    x0, y0 = x0f.astype(jnp.int32), y0f.astype(jnp.int32)
    x1, y1 = jnp.minimum(x0 + 1, W - 1), jnp.minimum(y0 + 1, H - 1)
    flat = img.reshape(N, H * W, C)

    def gather(yy, xx):
        idx = (yy * W + xx).reshape(N, H * W, 1)
        return jnp.take_along_axis(flat, idx, axis=1).reshape(N, H, W, C)

    return (((1 - wy) * (1 - wx))[..., None] * gather(y0, x0)
            + ((1 - wy) * wx)[..., None] * gather(y0, x1)
            + (wy * (1 - wx))[..., None] * gather(y1, x0)
            + (wy * wx)[..., None] * gather(y1, x1))


def decoder3_reference(params, ft_, f0, f1, up_flow0, up_flow1):
    to_nhwc = lambda t: jnp.transpose(t, (0, 2, 3, 1))
    ft, f0n, f1n = to_nhwc(ft_), to_nhwc(f0), to_nhwc(f1)
    fl0, fl1 = to_nhwc(up_flow0), to_nhwc(up_flow1)
    x = jnp.concatenate([ft, _warp_ref(f0n, fl0), _warp_ref(f1n, fl1), fl0, fl1],
                        axis=-1)

    p = params
    cr = lambda t, q: _prelu_ref(_conv_ref(t, q['w'], q['b']), q['alpha'])
    x = cr(x, p['conv0'])
    out = cr(x, p['res1'])
    c2 = p['res2']['w'].shape[0]
    out = jnp.concatenate([out[..., :-c2], cr(out[..., -c2:], p['res2'])], axis=-1)
    out = cr(out, p['res3'])
    c4 = p['res4']['w'].shape[0]
    out = jnp.concatenate([out[..., :-c4], cr(out[..., -c4:], p['res4'])], axis=-1)
    out = _prelu_ref(x + _conv_ref(out, p['res5']['w'], p['res5']['b']),
                     p['res5']['alpha'])

    w_eq = jnp.flip(p['deconv']['w'], axis=(2, 3)).transpose(2, 3, 0, 1)
    y = lax.conv_general_dilated(out, w_eq, (1, 1), ((2, 2), (2, 2)),
                                 lhs_dilation=(2, 2),
                                 dimension_numbers=('NHWC', 'HWIO', 'NHWC'))
    y = y + p['deconv']['b']
    return jnp.transpose(y, (0, 3, 1, 2))


# ----------------------------------------------------------------------------
# Deterministic parameter init (synthetic; PyTorch weight layouts OIHW / IOHW)
# ----------------------------------------------------------------------------
def init_params(key):
    ks = jax.random.split(key, 8)

    def conv_p(k, cout, cin, kh=3, kw=3):
        k1, k2, k3 = jax.random.split(k, 3)
        w = jax.random.normal(k1, (cout, cin, kh, kw), jnp.float32) / jnp.sqrt(cin * kh * kw)
        b = jax.random.normal(k2, (cout,), jnp.float32) * 0.1
        a = jax.random.uniform(k3, (cout,), jnp.float32, minval=0.1, maxval=0.4)
        return dict(w=w, b=b, alpha=a)

    kd1, kd2 = jax.random.split(ks[6], 2)
    return {
        # config['decoder3.convblock.0.0'] = (28, 32)
        'conv0': conv_p(ks[0], 32, 28),
        # ResBlock channel_list = [(32,32),(16,16),(32,32),(16,16),(32,32)]
        'res1': conv_p(ks[1], 32, 32),
        'res2': conv_p(ks[2], 16, 16),
        'res3': conv_p(ks[3], 32, 32),
        'res4': conv_p(ks[4], 16, 16),
        'res5': conv_p(ks[5], 32, 32),   # alpha = ResBlock.prelu parameter
        # config['decoder3.convblock.2'] = (32, 12): ConvTranspose2d(32,12,4,2,1)
        'deconv': {
            'w': jax.random.normal(kd1, (32, 12, 4, 4), jnp.float32) / jnp.sqrt(32 * 16),
            'b': jax.random.normal(kd2, (12,), jnp.float32) * 0.1,
        },
    }


# ----------------------------------------------------------------------------
if __name__ == "__main__":
    key = jax.random.PRNGKey(0)
    kp, k1, k2, k3, k4, k5 = jax.random.split(key, 6)

    N, C, H, W = 2, 8, 16, 16
    ft_ = jax.random.normal(k1, (N, C, H, W), jnp.float32)
    f0 = jax.random.normal(k2, (N, C, H, W), jnp.float32)
    f1 = jax.random.normal(k3, (N, C, H, W), jnp.float32)
    up_flow0 = jax.random.normal(k4, (N, 2, H, W), jnp.float32) * 3.0
    up_flow1 = jax.random.normal(k5, (N, 2, H, W), jnp.float32) * 3.0

    params = init_params(kp)
    ref = decoder3_reference(params, ft_, f0, f1, up_flow0, up_flow1)

    # Exact-precision path (f32 storage + f32 MXU): strict correctness check.
    out32 = jax.block_until_ready(
        decoder3_forward_f32(params, ft_, f0, f1, up_flow0, up_flow1))
    assert out32.shape == (N, 12, 2 * H, 2 * W), out32.shape
    err32 = float(jnp.max(jnp.abs(out32 - ref)))
    assert err32 < 1e-3, f"f32 path max abs err vs reference: {err32}"

    # Fast path (bf16 activation storage, f32 in-kernel math): loose check.
    out_bf = jax.block_until_ready(
        decoder3_forward(params, ft_, f0, f1, up_flow0, up_flow1))
    assert out_bf.shape == (N, 12, 2 * H, 2 * W), out_bf.shape
    err_bf = float(jnp.max(jnp.abs(out_bf.astype(jnp.float32) - ref)))
    assert err_bf < 2.5e-1, f"bf16 path max abs err vs reference: {err_bf}"

    print("KERNEL_OK")
</pallas_src>

<mosaic_0001>
module attributes {stable_mosaic.version = 11 : i64} {
  func.func @_conv3x3_tap_kernel(%arg0: i32, %arg1: memref<32x384xf32, #tpu.memory_space<vmem>>, %arg2: memref<9x32x32xf32, #tpu.memory_space<vmem>>, %arg3: memref<32x1xf32, #tpu.memory_space<vmem>>, %arg4: memref<1x384xf32, #tpu.memory_space<vmem>>, %arg5: memref<32x1xf32, #tpu.memory_space<vmem>>, %arg6: memref<32x384xf32, #tpu.memory_space<vmem>>) attributes {dimension_semantics = [#tpu.dimension_semantics<parallel>], iteration_bounds = array<i64: 2>, scalar_prefetch = 0 : i64, scratch_operands = 0 : i64, tpu.core_type = #tpu.core_type<tc>, window_params = [{transform_indices = @transform_0, window_bounds = array<i64: 32, 384>}, {pipeline_mode = #tpu.pipeline_mode<synchronous>, transform_indices = @transform_1, window_bounds = array<i64: 9, 32, 32>}, {pipeline_mode = #tpu.pipeline_mode<synchronous>, transform_indices = @transform_2, window_bounds = array<i64: 32, 1>}, {transform_indices = @transform_3, window_bounds = array<i64: 1, 384>}, {pipeline_mode = #tpu.pipeline_mode<synchronous>, transform_indices = @transform_4, window_bounds = array<i64: 32, 1>}, {transform_indices = @transform_5, window_bounds = array<i64: 32, 384>}]} {
    %c0 = arith.constant 0 : index
    %c0_0 = arith.constant 0 : index
    %0 = vector.load %arg1[%c0, %c0_0] : memref<32x384xf32, #tpu.memory_space<vmem>>, vector<32x384xf32>
    %c19_i32 = arith.constant 19 : i32
    %1 = tpu.dynamic_rotate %0 by %c19_i32 dim 1 : vector<32x384xf32>, i32 -> vector<32x384xf32>
    %c0_1 = arith.constant 0 : index
    %c0_2 = arith.constant 0 : index
    %c0_3 = arith.constant 0 : index
    %2 = vector.load %arg2[%c0_1, %c0_2, %c0_3] : memref<9x32x32xf32, #tpu.memory_space<vmem>>, vector<1x32x32xf32>
    %3 = vector.shape_cast %2 : vector<1x32x32xf32> to vector<32x32xf32>
    %cst = arith.constant dense<0.000000e+00> : vector<32x384xf32>
    %4 = tpu.matmul %3, %1, %cst {dimension_numbers = #tpu.dot_dimension_numbers<[1], [0], [0], [1], [0, 0, 1, 1], [], []>} : vector<32x32xf32>, vector<32x384xf32>, vector<32x384xf32> -> vector<32x384xf32>
    %c18_i32 = arith.constant 18 : i32
    %5 = tpu.dynamic_rotate %0 by %c18_i32 dim 1 : vector<32x384xf32>, i32 -> vector<32x384xf32>
    %c1 = arith.constant 1 : index
    %c0_4 = arith.constant 0 : index
    %c0_5 = arith.constant 0 : index
    %6 = vector.load %arg2[%c1, %c0_4, %c0_5] : memref<9x32x32xf32, #tpu.memory_space<vmem>>, vector<1x32x32xf32>
    %7 = vector.shape_cast %6 : vector<1x32x32xf32> to vector<32x32xf32>
    %cst_6 = arith.constant dense<0.000000e+00> : vector<32x384xf32>
    %8 = tpu.matmul %7, %5, %cst_6 {dimension_numbers = #tpu.dot_dimension_numbers<[1], [0], [0], [1], [0, 0, 1, 1], [], []>} : vector<32x32xf32>, vector<32x384xf32>, vector<32x384xf32> -> vector<32x384xf32>
    %9 = arith.addf %4, %8 : vector<32x384xf32>
    %c17_i32 = arith.constant 17 : i32
    %10 = tpu.dynamic_rotate %0 by %c17_i32 dim 1 : vector<32x384xf32>, i32 -> vector<32x384xf32>
    %c2 = arith.constant 2 : index
    %c0_7 = arith.constant 0 : index
    %c0_8 = arith.constant 0 : index
    %11 = vector.load %arg2[%c2, %c0_7, %c0_8] : memref<9x32x32xf32, #tpu.memory_space<vmem>>, vector<1x32x32xf32>
    %12 = vector.shape_cast %11 : vector<1x32x32xf32> to vector<32x32xf32>
    %cst_9 = arith.constant dense<0.000000e+00> : vector<32x384xf32>
    %13 = tpu.matmul %12, %10, %cst_9 {dimension_numbers = #tpu.dot_dimension_numbers<[1], [0], [0], [1], [0, 0, 1, 1], [], []>} : vector<32x32xf32>, vector<32x384xf32>, vector<32x384xf32> -> vector<32x384xf32>
    %14 = arith.addf %9, %13 : vector<32x384xf32>
    %c1_i32 = arith.constant 1 : i32
    %15 = tpu.dynamic_rotate %0 by %c1_i32 dim 1 : vector<32x384xf32>, i32 -> vector<32x384xf32>
    %c3 = arith.constant 3 : index
    %c0_10 = arith.constant 0 : index
    %c0_11 = arith.constant 0 : index
    %16 = vector.load %arg2[%c3, %c0_10, %c0_11] : memref<9x32x32xf32, #tpu.memory_space<vmem>>, vector<1x32x32xf32>
    %17 = vector.shape_cast %16 : vector<1x32x32xf32> to vector<32x32xf32>
    %cst_12 = arith.constant dense<0.000000e+00> : vector<32x384xf32>
    %18 = tpu.matmul %17, %15, %cst_12 {dimension_numbers = #tpu.dot_dimension_numbers<[1], [0], [0], [1], [0, 0, 1, 1], [], []>} : vector<32x32xf32>, vector<32x384xf32>, vector<32x384xf32> -> vector<32x384xf32>
    %19 = arith.addf %14, %18 : vector<32x384xf32>
    %c4 = arith.constant 4 : index
    %c0_13 = arith.constant 0 : index
    %c0_14 = arith.constant 0 : index
    %20 = vector.load %arg2[%c4, %c0_13, %c0_14] : memref<9x32x32xf32, #tpu.memory_space<vmem>>, vector<1x32x32xf32>
    %21 = vector.shape_cast %20 : vector<1x32x32xf32> to vector<32x32xf32>
    %cst_15 = arith.constant dense<0.000000e+00> : vector<32x384xf32>
    %22 = tpu.matmul %21, %0, %cst_15 {dimension_numbers = #tpu.dot_dimension_numbers<[1], [0], [0], [1], [0, 0, 1, 1], [], []>} : vector<32x32xf32>, vector<32x384xf32>, vector<32x384xf32> -> vector<32x384xf32>
    %23 = arith.addf %19, %22 : vector<32x384xf32>
    %c383_i32 = arith.constant 383 : i32
    %24 = tpu.dynamic_rotate %0 by %c383_i32 dim 1 : vector<32x384xf32>, i32 -> vector<32x384xf32>
    %c5 = arith.constant 5 : index
    %c0_16 = arith.constant 0 : index
    %c0_17 = arith.constant 0 : index
    %25 = vector.load %arg2[%c5, %c0_16, %c0_17] : memref<9x32x32xf32, #tpu.memory_space<vmem>>, vector<1x32x32xf32>
    %26 = vector.shape_cast %25 : vector<1x32x32xf32> to vector<32x32xf32>
    %cst_18 = arith.constant dense<0.000000e+00> : vector<32x384xf32>
    %27 = tpu.matmul %26, %24, %cst_18 {dimension_numbers = #tpu.dot_dimension_numbers<[1], [0], [0], [1], [0, 0, 1, 1], [], []>} : vector<32x32xf32>, vector<32x384xf32>, vector<32x384xf32> -> vector<32x384xf32>
    %28 = arith.addf %23, %27 : vector<32x384xf32>
    %c367_i32 = arith.constant 367 : i32
    %29 = tpu.dynamic_rotate %0 by %c367_i32 dim 1 : vector<32x384xf32>, i32 -> vector<32x384xf32>
    %c6 = arith.constant 6 : index
    %c0_19 = arith.constant 0 : index
    %c0_20 = arith.constant 0 : index
    %30 = vector.load %arg2[%c6, %c0_19, %c0_20] : memref<9x32x32xf32, #tpu.memory_space<vmem>>, vector<1x32x32xf32>
    %31 = vector.shape_cast %30 : vector<1x32x32xf32> to vector<32x32xf32>
    %cst_21 = arith.constant dense<0.000000e+00> : vector<32x384xf32>
    %32 = tpu.matmul %31, %29, %cst_21 {dimension_numbers = #tpu.dot_dimension_numbers<[1], [0], [0], [1], [0, 0, 1, 1], [], []>} : vector<32x32xf32>, vector<32x384xf32>, vector<32x384xf32> -> vector<32x384xf32>
    %33 = arith.addf %28, %32 : vector<32x384xf32>
    %c366_i32 = arith.constant 366 : i32
    %34 = tpu.dynamic_rotate %0 by %c366_i32 dim 1 : vector<32x384xf32>, i32 -> vector<32x384xf32>
    %c7 = arith.constant 7 : index
    %c0_22 = arith.constant 0 : index
    %c0_23 = arith.constant 0 : index
    %35 = vector.load %arg2[%c7, %c0_22, %c0_23] : memref<9x32x32xf32, #tpu.memory_space<vmem>>, vector<1x32x32xf32>
    %36 = vector.shape_cast %35 : vector<1x32x32xf32> to vector<32x32xf32>
    %cst_24 = arith.constant dense<0.000000e+00> : vector<32x384xf32>
    %37 = tpu.matmul %36, %34, %cst_24 {dimension_numbers = #tpu.dot_dimension_numbers<[1], [0], [0], [1], [0, 0, 1, 1], [], []>} : vector<32x32xf32>, vector<32x384xf32>, vector<32x384xf32> -> vector<32x384xf32>
    %38 = arith.addf %33, %37 : vector<32x384xf32>
    %c365_i32 = arith.constant 365 : i32
    %39 = tpu.dynamic_rotate %0 by %c365_i32 dim 1 : vector<32x384xf32>, i32 -> vector<32x384xf32>
    %c8 = arith.constant 8 : index
    %c0_25 = arith.constant 0 : index
    %c0_26 = arith.constant 0 : index
    %40 = vector.load %arg2[%c8, %c0_25, %c0_26] : memref<9x32x32xf32, #tpu.memory_space<vmem>>, vector<1x32x32xf32>
    %41 = vector.shape_cast %40 : vector<1x32x32xf32> to vector<32x32xf32>
    %cst_27 = arith.constant dense<0.000000e+00> : vector<32x384xf32>
    %42 = tpu.matmul %41, %39, %cst_27 {dimension_numbers = #tpu.dot_dimension_numbers<[1], [0], [0], [1], [0, 0, 1, 1], [], []>} : vector<32x32xf32>, vector<32x384xf32>, vector<32x384xf32> -> vector<32x384xf32>
    %43 = arith.addf %38, %42 : vector<32x384xf32>
    %c0_28 = arith.constant 0 : index
    %c0_29 = arith.constant 0 : index
    %44 = vector.load %arg3[%c0_28, %c0_29] : memref<32x1xf32, #tpu.memory_space<vmem>>, vector<32x1xf32>
    %45 = vector.broadcast %44 : vector<32x1xf32> to vector<32x384xf32>
    %46 = arith.addf %43, %45 : vector<32x384xf32>
    %c0_30 = arith.constant 0 : index
    %c0_31 = arith.constant 0 : index
    %47 = vector.load %arg5[%c0_30, %c0_31] : memref<32x1xf32, #tpu.memory_space<vmem>>, vector<32x1xf32>
    %cst_32 = arith.constant 0.000000e+00 : f32
    %48 = vector.broadcast %cst_32 : f32 to vector<32x384xf32>
    %49 = arith.cmpf oge, %46, %48 : vector<32x384xf32>
    %50 = vector.broadcast %47 : vector<32x1xf32> to vector<32x384xf32>
    %51 = arith.mulf %50, %46 : vector<32x384xf32>
    %52 = arith.select %49, %46, %51 : vector<32x384xi1>, vector<32x384xf32>
    %c0_33 = arith.constant 0 : index
    %c0_34 = arith.constant 0 : index
    %53 = vector.load %arg4[%c0_33, %c0_34] : memref<1x384xf32, #tpu.memory_space<vmem>>, vector<1x384xf32>
    %54 = vector.broadcast %53 : vector<1x384xf32> to vector<32x384xf32>
    %55 = arith.mulf %52, %54 : vector<32x384xf32>
    %c0_35 = arith.constant 0 : index
    %c0_36 = arith.constant 0 : index
    %56 = vector.load %arg6[%c0_35, %c0_36] : memref<32x384xf32, #tpu.memory_space<vmem>>, vector<32x384xf32>
    tpu.vector_store %arg6[%c0_35, %c0_36], %55 {strides = array<i32>} : memref<32x384xf32, #tpu.memory_space<vmem>>, vector<32x384xf32>,
    return
  }
  func.func @transform_0(%arg0: i32) -> (i32, i32) {
    %c0_i32 = arith.constant 0 : i32
    %c0_i32_0 = arith.constant 0 : i32
    return %c0_i32, %arg0 : i32, i32
  }
  func.func @transform_1(%arg0: i32) -> (i32, i32, i32) {
    %c0_i32 = arith.constant 0 : i32
    %c0_i32_0 = arith.constant 0 : i32
    %c0_i32_1 = arith.constant 0 : i32
    %c0_i32_2 = arith.constant 0 : i32
    return %c0_i32, %c0_i32_0, %c0_i32_1 : i32, i32, i32
  }
  func.func @transform_2(%arg0: i32) -> (i32, i32) {
    %c0_i32 = arith.constant 0 : i32
    %c0_i32_0 = arith.constant 0 : i32
    %c0_i32_1 = arith.constant 0 : i32
    return %c0_i32, %c0_i32_0 : i32, i32
  }
  func.func @transform_3(%arg0: i32) -> (i32, i32) {
    %c0_i32 = arith.constant 0 : i32
    %c0_i32_0 = arith.constant 0 : i32
    return %c0_i32, %arg0 : i32, i32
  }
  func.func @transform_4(%arg0: i32) -> (i32, i32) {
    %c0_i32 = arith.constant 0 : i32
    %c0_i32_0 = arith.constant 0 : i32
    %c0_i32_1 = arith.constant 0 : i32
    return %c0_i32, %c0_i32_0 : i32, i32
  }
  func.func @transform_5(%arg0: i32) -> (i32, i32) {
    %c0_i32 = arith.constant 0 : i32
    %c0_i32_0 = arith.constant 0 : i32
    return %c0_i32, %arg0 : i32, i32
  }
}

module attributes {stable_mosaic.version = 11 : i64} {
  func.func @_warp_concat_kernel(%arg0: i32, %arg1: memref<8x384xf32, #tpu.memory_space<vmem>>, %arg2: memref<32x384xf32, #tpu.memory_space<vmem>>, %arg3: memref<4x384xf32, #tpu.memory_space<vmem>>, %arg4: memref<32x384xf32, #tpu.memory_space<vmem>>, %arg5: memref<4x384xf32, #tpu.memory_space<vmem>>, %arg6: memref<8x384xf32, #tpu.memory_space<vmem>>, %arg7: memref<32x384xf32, #tpu.memory_space<vmem>>) attributes {dimension_semantics = [#tpu.dimension_semantics<parallel>], iteration_bounds = array<i64: 2>, scalar_prefetch = 0 : i64, scratch_operands = 0 : i64, tpu.core_type = #tpu.core_type<tc>, window_params = [{transform_indices = @transform_0, window_bounds = array<i64: 8, 384>}, {transform_indices = @transform_1, window_bounds = array<i64: 32, 384>}, {transform_indices = @transform_2, window_bounds = array<i64: 4, 384>}, {transform_indices = @transform_3, window_bounds = array<i64: 32, 384>}, {transform_indices = @transform_4, window_bounds = array<i64: 4, 384>}, {transform_indices = @transform_5, window_bounds = array<i64: 8, 384>}, {transform_indices = @transform_6, window_bounds = array<i64: 32, 384>}]} {
    %c0 = arith.constant 0 : index
    %c0_0 = arith.constant 0 : index
    %0 = vector.load %arg1[%c0, %c0_0] : memref<8x384xf32, #tpu.memory_space<vmem>>, vector<8x384xf32>
    %c0_1 = arith.constant 0 : index
    %c0_2 = arith.constant 0 : index
    %1 = vector.load %arg7[%c0_1, %c0_2] : memref<32x384xf32, #tpu.memory_space<vmem>>, vector<8x384xf32>
    tpu.vector_store %arg7[%c0_1, %c0_2], %0 {strides = array<i32>} : memref<32x384xf32, #tpu.memory_space<vmem>>, vector<8x384xf32>,
    %c0_3 = arith.constant 0 : index
    %c0_4 = arith.constant 0 : index
    %2 = vector.load %arg3[%c0_3, %c0_4] : memref<4x384xf32, #tpu.memory_space<vmem>>, vector<1x384xf32>
    %c0_5 = arith.constant 0 : index
    %c0_6 = arith.constant 0 : index
    %3 = vector.load %arg2[%c0_5, %c0_6] : memref<32x384xf32, #tpu.memory_space<vmem>>, vector<8x384xf32>
    %4 = vector.broadcast %2 : vector<1x384xf32> to vector<8x384xf32>
    %5 = arith.mulf %4, %3 : vector<8x384xf32>
    %c1 = arith.constant 1 : index
    %c0_7 = arith.constant 0 : index
    %6 = vector.load %arg3[%c1, %c0_7] : memref<4x384xf32, #tpu.memory_space<vmem>>, vector<1x384xf32>
    %c8 = arith.constant 8 : index
    %c0_8 = arith.constant 0 : index
    %7 = vector.load %arg2[%c8, %c0_8] : memref<32x384xf32, #tpu.memory_space<vmem>>, vector<8x384xf32>
    %8 = vector.broadcast %6 : vector<1x384xf32> to vector<8x384xf32>
    %9 = arith.mulf %8, %7 : vector<8x384xf32>
    %10 = arith.addf %5, %9 : vector<8x384xf32>
    %c2 = arith.constant 2 : index
    %c0_9 = arith.constant 0 : index
    %11 = vector.load %arg3[%c2, %c0_9] : memref<4x384xf32, #tpu.memory_space<vmem>>, vector<1x384xf32>
    %c16 = arith.constant 16 : index
    %c0_10 = arith.constant 0 : index
    %12 = vector.load %arg2[%c16, %c0_10] : memref<32x384xf32, #tpu.memory_space<vmem>>, vector<8x384xf32>
    %13 = vector.broadcast %11 : vector<1x384xf32> to vector<8x384xf32>
    %14 = arith.mulf %13, %12 : vector<8x384xf32>
    %15 = arith.addf %10, %14 : vector<8x384xf32>
    %c3 = arith.constant 3 : index
    %c0_11 = arith.constant 0 : index
    %16 = vector.load %arg3[%c3, %c0_11] : memref<4x384xf32, #tpu.memory_space<vmem>>, vector<1x384xf32>
    %c24 = arith.constant 24 : index
    %c0_12 = arith.constant 0 : index
    %17 = vector.load %arg2[%c24, %c0_12] : memref<32x384xf32, #tpu.memory_space<vmem>>, vector<8x384xf32>
    %18 = vector.broadcast %16 : vector<1x384xf32> to vector<8x384xf32>
    %19 = arith.mulf %18, %17 : vector<8x384xf32>
    %20 = arith.addf %15, %19 : vector<8x384xf32>
    %c8_13 = arith.constant 8 : index
    %c0_14 = arith.constant 0 : index
    %21 = vector.load %arg7[%c8_13, %c0_14] : memref<32x384xf32, #tpu.memory_space<vmem>>, vector<8x384xf32>
    tpu.vector_store %arg7[%c8_13, %c0_14], %20 {strides = array<i32>} : memref<32x384xf32, #tpu.memory_space<vmem>>, vector<8x384xf32>,
    %c0_15 = arith.constant 0 : index
    %c0_16 = arith.constant 0 : index
    %22 = vector.load %arg5[%c0_15, %c0_16] : memref<4x384xf32, #tpu.memory_space<vmem>>, vector<1x384xf32>
    %c0_17 = arith.constant 0 : index
    %c0_18 = arith.constant 0 : index
    %23 = vector.load %arg4[%c0_17, %c0_18] : memref<32x384xf32, #tpu.memory_space<vmem>>, vector<8x384xf32>
    %24 = vector.broadcast %22 : vector<1x384xf32> to vector<8x384xf32>
    %25 = arith.mulf %24, %23 : vector<8x384xf32>
    %c1_19 = arith.constant 1 : index
    %c0_20 = arith.constant 0 : index
    %26 = vector.load %arg5[%c1_19, %c0_20] : memref<4x384xf32, #tpu.memory_space<vmem>>, vector<1x384xf32>
    %c8_21 = arith.constant 8 : index
    %c0_22 = arith.constant 0 : index
    %27 = vector.load %arg4[%c8_21, %c0_22] : memref<32x384xf32, #tpu.memory_space<vmem>>, vector<8x384xf32>
    %28 = vector.broadcast %26 : vector<1x384xf32> to vector<8x384xf32>
    %29 = arith.mulf %28, %27 : vector<8x384xf32>
    %30 = arith.addf %25, %29 : vector<8x384xf32>
    %c2_23 = arith.constant 2 : index
    %c0_24 = arith.constant 0 : index
    %31 = vector.load %arg5[%c2_23, %c0_24] : memref<4x384xf32, #tpu.memory_space<vmem>>, vector<1x384xf32>
    %c16_25 = arith.constant 16 : index
    %c0_26 = arith.constant 0 : index
    %32 = vector.load %arg4[%c16_25, %c0_26] : memref<32x384xf32, #tpu.memory_space<vmem>>, vector<8x384xf32>
    %33 = vector.broadcast %31 : vector<1x384xf32> to vector<8x384xf32>
    %34 = arith.mulf %33, %32 : vector<8x384xf32>
    %35 = arith.addf %30, %34 : vector<8x384xf32>
    %c3_27 = arith.constant 3 : index
    %c0_28 = arith.constant 0 : index
    %36 = vector.load %arg5[%c3_27, %c0_28] : memref<4x384xf32, #tpu.memory_space<vmem>>, vector<1x384xf32>
    %c24_29 = arith.constant 24 : index
    %c0_30 = arith.constant 0 : index
    %37 = vector.load %arg4[%c24_29, %c0_30] : memref<32x384xf32, #tpu.memory_space<vmem>>, vector<8x384xf32>
    %38 = vector.broadcast %36 : vector<1x384xf32> to vector<8x384xf32>
    %39 = arith.mulf %38, %37 : vector<8x384xf32>
    %40 = arith.addf %35, %39 : vector<8x384xf32>
    %c16_31 = arith.constant 16 : index
    %c0_32 = arith.constant 0 : index
    %41 = vector.load %arg7[%c16_31, %c0_32] : memref<32x384xf32, #tpu.memory_space<vmem>>, vector<8x384xf32>
    tpu.vector_store %arg7[%c16_31, %c0_32], %40 {strides = array<i32>} : memref<32x384xf32, #tpu.memory_space<vmem>>, vector<8x384xf32>,
    %c0_33 = arith.constant 0 : index
    %c0_34 = arith.constant 0 : index
    %42 = vector.load %arg6[%c0_33, %c0_34] : memref<8x384xf32, #tpu.memory_space<vmem>>, vector<8x384xf32>
    %c24_35 = arith.constant 24 : index
    %c0_36 = arith.constant 0 : index
    %43 = vector.load %arg7[%c24_35, %c0_36] : memref<32x384xf32, #tpu.memory_space<vmem>>, vector<8x384xf32>
    tpu.vector_store %arg7[%c24_35, %c0_36], %42 {strides = array<i32>} : memref<32x384xf32, #tpu.memory_space<vmem>>, vector<8x384xf32>,
    return
  }
  func.func @transform_0(%arg0: i32) -> (i32, i32) {
    %c0_i32 = arith.constant 0 : i32
    %c0_i32_0 = arith.constant 0 : i32
    return %c0_i32, %arg0 : i32, i32
  }
  func.func @transform_1(%arg0: i32) -> (i32, i32) {
    %c0_i32 = arith.constant 0 : i32
    %c0_i32_0 = arith.constant 0 : i32
    return %c0_i32, %arg0 : i32, i32
  }
  func.func @transform_2(%arg0: i32) -> (i32, i32) {
    %c0_i32 = arith.constant 0 : i32
    %c0_i32_0 = arith.constant 0 : i32
    return %c0_i32, %arg0 : i32, i32
  }
  func.func @transform_3(%arg0: i32) -> (i32, i32) {
    %c0_i32 = arith.constant 0 : i32
    %c0_i32_0 = arith.constant 0 : i32
    return %c0_i32, %arg0 : i32, i32
  }
  func.func @transform_4(%arg0: i32) -> (i32, i32) {
    %c0_i32 = arith.constant 0 : i32
    %c0_i32_0 = arith.constant 0 : i32
    return %c0_i32, %arg0 : i32, i32
  }
  func.func @transform_5(%arg0: i32) -> (i32, i32) {
    %c0_i32 = arith.constant 0 : i32
    %c0_i32_0 = arith.constant 0 : i32
    return %c0_i32, %arg0 : i32, i32
  }
  func.func @transform_6(%arg0: i32) -> (i32, i32) {
    %c0_i32 = arith.constant 0 : i32
    %c0_i32_0 = arith.constant 0 : i32
    return %c0_i32, %arg0 : i32, i32
  }
}

module attributes {stable_mosaic.version = 11 : i64} {
  func.func @_conv3x3_tap_kernel(%arg0: i32, %arg1: memref<32x384xf32, #tpu.memory_space<vmem>>, %arg2: memref<9x16x16xf32, #tpu.memory_space<vmem>>, %arg3: memref<16x1xf32, #tpu.memory_space<vmem>>, %arg4: memref<1x384xf32, #tpu.memory_space<vmem>>, %arg5: memref<16x1xf32, #tpu.memory_space<vmem>>, %arg6: memref<32x384xf32, #tpu.memory_space<vmem>>) attributes {dimension_semantics = [#tpu.dimension_semantics<parallel>], iteration_bounds = array<i64: 2>, scalar_prefetch = 0 : i64, scratch_operands = 0 : i64, tpu.core_type = #tpu.core_type<tc>, window_params = [{transform_indices = @transform_0, window_bounds = array<i64: 32, 384>}, {pipeline_mode = #tpu.pipeline_mode<synchronous>, transform_indices = @transform_1, window_bounds = array<i64: 9, 16, 16>}, {pipeline_mode = #tpu.pipeline_mode<synchronous>, transform_indices = @transform_2, window_bounds = array<i64: 16, 1>}, {transform_indices = @transform_3, window_bounds = array<i64: 1, 384>}, {pipeline_mode = #tpu.pipeline_mode<synchronous>, transform_indices = @transform_4, window_bounds = array<i64: 16, 1>}, {transform_indices = @transform_5, window_bounds = array<i64: 32, 384>}]} {
    %c0 = arith.constant 0 : index
    %c0_0 = arith.constant 0 : index
    %0 = vector.load %arg1[%c0, %c0_0] : memref<32x384xf32, #tpu.memory_space<vmem>>, vector<16x384xf32>
    %c0_1 = arith.constant 0 : index
    %c0_2 = arith.constant 0 : index
    %1 = vector.load %arg6[%c0_1, %c0_2] : memref<32x384xf32, #tpu.memory_space<vmem>>, vector<16x384xf32>
    tpu.vector_store %arg6[%c0_1, %c0_2], %0 {strides = array<i32>} : memref<32x384xf32, #tpu.memory_space<vmem>>, vector<16x384xf32>,
    %c16 = arith.constant 16 : index
    %c0_3 = arith.constant 0 : index
    %2 = vector.load %arg1[%c16, %c0_3] : memref<32x384xf32, #tpu.memory_space<vmem>>, vector<16x384xf32>
    %c19_i32 = arith.constant 19 : i32
    %3 = tpu.dynamic_rotate %2 by %c19_i32 dim 1 : vector<16x384xf32>, i32 -> vector<16x384xf32>
    %c0_4 = arith.constant 0 : index
    %c0_5 = arith.constant 0 : index
    %c0_6 = arith.constant 0 : index
    %4 = vector.load %arg2[%c0_4, %c0_5, %c0_6] : memref<9x16x16xf32, #tpu.memory_space<vmem>>, vector<1x16x16xf32>
    %5 = vector.shape_cast %4 : vector<1x16x16xf32> to vector<16x16xf32>
    %cst = arith.constant dense<0.000000e+00> : vector<16x384xf32>
    %6 = tpu.matmul %5, %3, %cst {dimension_numbers = #tpu.dot_dimension_numbers<[1], [0], [0], [1], [0, 0, 1, 1], [], []>} : vector<16x16xf32>, vector<16x384xf32>, vector<16x384xf32> -> vector<16x384xf32>
    %c18_i32 = arith.constant 18 : i32
    %7 = tpu.dynamic_rotate %2 by %c18_i32 dim 1 : vector<16x384xf32>, i32 -> vector<16x384xf32>
    %c1 = arith.constant 1 : index
    %c0_7 = arith.constant 0 : index
    %c0_8 = arith.constant 0 : index
    %8 = vector.load %arg2[%c1, %c0_7, %c0_8] : memref<9x16x16xf32, #tpu.memory_space<vmem>>, vector<1x16x16xf32>
    %9 = vector.shape_cast %8 : vector<1x16x16xf32> to vector<16x16xf32>
    %cst_9 = arith.constant dense<0.000000e+00> : vector<16x384xf32>
    %10 = tpu.matmul %9, %7, %cst_9 {dimension_numbers = #tpu.dot_dimension_numbers<[1], [0], [0], [1], [0, 0, 1, 1], [], []>} : vector<16x16xf32>, vector<16x384xf32>, vector<16x384xf32> -> vector<16x384xf32>
    %11 = arith.addf %6, %10 : vector<16x384xf32>
    %c17_i32 = arith.constant 17 : i32
    %12 = tpu.dynamic_rotate %2 by %c17_i32 dim 1 : vector<16x384xf32>, i32 -> vector<16x384xf32>
    %c2 = arith.constant 2 : index
    %c0_10 = arith.constant 0 : index
    %c0_11 = arith.constant 0 : index
    %13 = vector.load %arg2[%c2, %c0_10, %c0_11] : memref<9x16x16xf32, #tpu.memory_space<vmem>>, vector<1x16x16xf32>
    %14 = vector.shape_cast %13 : vector<1x16x16xf32> to vector<16x16xf32>
    %cst_12 = arith.constant dense<0.000000e+00> : vector<16x384xf32>
    %15 = tpu.matmul %14, %12, %cst_12 {dimension_numbers = #tpu.dot_dimension_numbers<[1], [0], [0], [1], [0, 0, 1, 1], [], []>} : vector<16x16xf32>, vector<16x384xf32>, vector<16x384xf32> -> vector<16x384xf32>
    %16 = arith.addf %11, %15 : vector<16x384xf32>
    %c1_i32 = arith.constant 1 : i32
    %17 = tpu.dynamic_rotate %2 by %c1_i32 dim 1 : vector<16x384xf32>, i32 -> vector<16x384xf32>
    %c3 = arith.constant 3 : index
    %c0_13 = arith.constant 0 : index
    %c0_14 = arith.constant 0 : index
    %18 = vector.load %arg2[%c3, %c0_13, %c0_14] : memref<9x16x16xf32, #tpu.memory_space<vmem>>, vector<1x16x16xf32>
    %19 = vector.shape_cast %18 : vector<1x16x16xf32> to vector<16x16xf32>
    %cst_15 = arith.constant dense<0.000000e+00> : vector<16x384xf32>
    %20 = tpu.matmul %19, %17, %cst_15 {dimension_numbers = #tpu.dot_dimension_numbers<[1], [0], [0], [1], [0, 0, 1, 1], [], []>} : vector<16x16xf32>, vector<16x384xf32>, vector<16x384xf32> -> vector<16x384xf32>
    %21 = arith.addf %16, %20 : vector<16x384xf32>
    %c4 = arith.constant 4 : index
    %c0_16 = arith.constant 0 : index
    %c0_17 = arith.constant 0 : index
    %22 = vector.load %arg2[%c4, %c0_16, %c0_17] : memref<9x16x16xf32, #tpu.memory_space<vmem>>, vector<1x16x16xf32>
    %23 = vector.shape_cast %22 : vector<1x16x16xf32> to vector<16x16xf32>
    %cst_18 = arith.constant dense<0.000000e+00> : vector<16x384xf32>
    %24 = tpu.matmul %23, %2, %cst_18 {dimension_numbers = #tpu.dot_dimension_numbers<[1], [0], [0], [1], [0, 0, 1, 1], [], []>} : vector<16x16xf32>, vector<16x384xf32>, vector<16x384xf32> -> vector<16x384xf32>
    %25 = arith.addf %21, %24 : vector<16x384xf32>
    %c383_i32 = arith.constant 383 : i32
    %26 = tpu.dynamic_rotate %2 by %c383_i32 dim 1 : vector<16x384xf32>, i32 -> vector<16x384xf32>
    %c5 = arith.constant 5 : index
    %c0_19 = arith.constant 0 : index
    %c0_20 = arith.constant 0 : index
    %27 = vector.load %arg2[%c5, %c0_19, %c0_20] : memref<9x16x16xf32, #tpu.memory_space<vmem>>, vector<1x16x16xf32>
    %28 = vector.shape_cast %27 : vector<1x16x16xf32> to vector<16x16xf32>
    %cst_21 = arith.constant dense<0.000000e+00> : vector<16x384xf32>
    %29 = tpu.matmul %28, %26, %cst_21 {dimension_numbers = #tpu.dot_dimension_numbers<[1], [0], [0], [1], [0, 0, 1, 1], [], []>} : vector<16x16xf32>, vector<16x384xf32>, vector<16x384xf32> -> vector<16x384xf32>
    %30 = arith.addf %25, %29 : vector<16x384xf32>
    %c367_i32 = arith.constant 367 : i32
    %31 = tpu.dynamic_rotate %2 by %c367_i32 dim 1 : vector<16x384xf32>, i32 -> vector<16x384xf32>
    %c6 = arith.constant 6 : index
    %c0_22 = arith.constant 0 : index
    %c0_23 = arith.constant 0 : index
    %32 = vector.load %arg2[%c6, %c0_22, %c0_23] : memref<9x16x16xf32, #tpu.memory_space<vmem>>, vector<1x16x16xf32>
    %33 = vector.shape_cast %32 : vector<1x16x16xf32> to vector<16x16xf32>
    %cst_24 = arith.constant dense<0.000000e+00> : vector<16x384xf32>
    %34 = tpu.matmul %33, %31, %cst_24 {dimension_numbers = #tpu.dot_dimension_numbers<[1], [0], [0], [1], [0, 0, 1, 1], [], []>} : vector<16x16xf32>, vector<16x384xf32>, vector<16x384xf32> -> vector<16x384xf32>
    %35 = arith.addf %30, %34 : vector<16x384xf32>
    %c366_i32 = arith.constant 366 : i32
    %36 = tpu.dynamic_rotate %2 by %c366_i32 dim 1 : vector<16x384xf32>, i32 -> vector<16x384xf32>
    %c7 = arith.constant 7 : index
    %c0_25 = arith.constant 0 : index
    %c0_26 = arith.constant 0 : index
    %37 = vector.load %arg2[%c7, %c0_25, %c0_26] : memref<9x16x16xf32, #tpu.memory_space<vmem>>, vector<1x16x16xf32>
    %38 = vector.shape_cast %37 : vector<1x16x16xf32> to vector<16x16xf32>
    %cst_27 = arith.constant dense<0.000000e+00> : vector<16x384xf32>
    %39 = tpu.matmul %38, %36, %cst_27 {dimension_numbers = #tpu.dot_dimension_numbers<[1], [0], [0], [1], [0, 0, 1, 1], [], []>} : vector<16x16xf32>, vector<16x384xf32>, vector<16x384xf32> -> vector<16x384xf32>
    %40 = arith.addf %35, %39 : vector<16x384xf32>
    %c365_i32 = arith.constant 365 : i32
    %41 = tpu.dynamic_rotate %2 by %c365_i32 dim 1 : vector<16x384xf32>, i32 -> vector<16x384xf32>
    %c8 = arith.constant 8 : index
    %c0_28 = arith.constant 0 : index
    %c0_29 = arith.constant 0 : index
    %42 = vector.load %arg2[%c8, %c0_28, %c0_29] : memref<9x16x16xf32, #tpu.memory_space<vmem>>, vector<1x16x16xf32>
    %43 = vector.shape_cast %42 : vector<1x16x16xf32> to vector<16x16xf32>
    %cst_30 = arith.constant dense<0.000000e+00> : vector<16x384xf32>
    %44 = tpu.matmul %43, %41, %cst_30 {dimension_numbers = #tpu.dot_dimension_numbers<[1], [0], [0], [1], [0, 0, 1, 1], [], []>} : vector<16x16xf32>, vector<16x384xf32>, vector<16x384xf32> -> vector<16x384xf32>
    %45 = arith.addf %40, %44 : vector<16x384xf32>
    %c0_31 = arith.constant 0 : index
    %c0_32 = arith.constant 0 : index
    %46 = vector.load %arg3[%c0_31, %c0_32] : memref<16x1xf32, #tpu.memory_space<vmem>>, vector<16x1xf32>
    %47 = vector.broadcast %46 : vector<16x1xf32> to vector<16x384xf32>
    %48 = arith.addf %45, %47 : vector<16x384xf32>
    %c0_33 = arith.constant 0 : index
    %c0_34 = arith.constant 0 : index
    %49 = vector.load %arg5[%c0_33, %c0_34] : memref<16x1xf32, #tpu.memory_space<vmem>>, vector<16x1xf32>
    %cst_35 = arith.constant 0.000000e+00 : f32
    %50 = vector.broadcast %cst_35 : f32 to vector<16x384xf32>
    %51 = arith.cmpf oge, %48, %50 : vector<16x384xf32>
    %52 = vector.broadcast %49 : vector<16x1xf32> to vector<16x384xf32>
    %53 = arith.mulf %52, %48 : vector<16x384xf32>
    %54 = arith.select %51, %48, %53 : vector<16x384xi1>, vector<16x384xf32>
    %c0_36 = arith.constant 0 : index
    %c0_37 = arith.constant 0 : index
    %55 = vector.load %arg4[%c0_36, %c0_37] : memref<1x384xf32, #tpu.memory_space<vmem>>, vector<1x384xf32>
    %56 = vector.broadcast %55 : vector<1x384xf32> to vector<16x384xf32>
    %57 = arith.mulf %54, %56 : vector<16x384xf32>
    %c16_38 = arith.constant 16 : index
    %c0_39 = arith.constant 0 : index
    %58 = vector.load %arg6[%c16_38, %c0_39] : memref<32x384xf32, #tpu.memory_space<vmem>>, vector<16x384xf32>
    tpu.vector_store %arg6[%c16_38, %c0_39], %57 {strides = array<i32>} : memref<32x384xf32, #tpu.memory_space<vmem>>, vector<16x384xf32>,
    return
  }
  func.func @transform_0(%arg0: i32) -> (i32, i32) {
    %c0_i32 = arith.constant 0 : i32
    %c0_i32_0 = arith.constant 0 : i32
    return %c0_i32, %arg0 : i32, i32
  }
  func.func @transform_1(%arg0: i32) -> (i32, i32, i32) {
    %c0_i32 = arith.constant 0 : i32
    %c0_i32_0 = arith.constant 0 : i32
    %c0_i32_1 = arith.constant 0 : i32
    %c0_i32_2 = arith.constant 0 : i32
    return %c0_i32, %c0_i32_0, %c0_i32_1 : i32, i32, i32
  }
  func.func @transform_2(%arg0: i32) -> (i32, i32) {
    %c0_i32 = arith.constant 0 : i32
    %c0_i32_0 = arith.constant 0 : i32
    %c0_i32_1 = arith.constant 0 : i32
    return %c0_i32, %c0_i32_0 : i32, i32
  }
  func.func @transform_3(%arg0: i32) -> (i32, i32) {
    %c0_i32 = arith.constant 0 : i32
    %c0_i32_0 = arith.constant 0 : i32
    return %c0_i32, %arg0 : i32, i32
  }
  func.func @transform_4(%arg0: i32) -> (i32, i32) {
    %c0_i32 = arith.constant 0 : i32
    %c0_i32_0 = arith.constant 0 : i32
    %c0_i32_1 = arith.constant 0 : i32
    return %c0_i32, %c0_i32_0 : i32, i32
  }
  func.func @transform_5(%arg0: i32) -> (i32, i32) {
    %c0_i32 = arith.constant 0 : i32
    %c0_i32_0 = arith.constant 0 : i32
    return %c0_i32, %arg0 : i32, i32
  }
}

module attributes {stable_mosaic.version = 11 : i64} {
  func.func @_conv3x3_tap_kernel(%arg0: i32, %arg1: memref<32x384xf32, #tpu.memory_space<vmem>>, %arg2: memref<9x32x32xf32, #tpu.memory_space<vmem>>, %arg3: memref<32x1xf32, #tpu.memory_space<vmem>>, %arg4: memref<1x384xf32, #tpu.memory_space<vmem>>, %arg5: memref<32x1xf32, #tpu.memory_space<vmem>>, %arg6: memref<32x384xf32, #tpu.memory_space<vmem>>, %arg7: memref<32x384xf32, #tpu.memory_space<vmem>>) attributes {dimension_semantics = [#tpu.dimension_semantics<parallel>], iteration_bounds = array<i64: 2>, scalar_prefetch = 0 : i64, scratch_operands = 0 : i64, tpu.core_type = #tpu.core_type<tc>, window_params = [{transform_indices = @transform_0, window_bounds = array<i64: 32, 384>}, {pipeline_mode = #tpu.pipeline_mode<synchronous>, transform_indices = @transform_1, window_bounds = array<i64: 9, 32, 32>}, {pipeline_mode = #tpu.pipeline_mode<synchronous>, transform_indices = @transform_2, window_bounds = array<i64: 32, 1>}, {transform_indices = @transform_3, window_bounds = array<i64: 1, 384>}, {pipeline_mode = #tpu.pipeline_mode<synchronous>, transform_indices = @transform_4, window_bounds = array<i64: 32, 1>}, {transform_indices = @transform_5, window_bounds = array<i64: 32, 384>}, {transform_indices = @transform_6, window_bounds = array<i64: 32, 384>}]} {
    %c0 = arith.constant 0 : index
    %c0_0 = arith.constant 0 : index
    %0 = vector.load %arg1[%c0, %c0_0] : memref<32x384xf32, #tpu.memory_space<vmem>>, vector<32x384xf32>
    %c19_i32 = arith.constant 19 : i32
    %1 = tpu.dynamic_rotate %0 by %c19_i32 dim 1 : vector<32x384xf32>, i32 -> vector<32x384xf32>
    %c0_1 = arith.constant 0 : index
    %c0_2 = arith.constant 0 : index
    %c0_3 = arith.constant 0 : index
    %2 = vector.load %arg2[%c0_1, %c0_2, %c0_3] : memref<9x32x32xf32, #tpu.memory_space<vmem>>, vector<1x32x32xf32>
    %3 = vector.shape_cast %2 : vector<1x32x32xf32> to vector<32x32xf32>
    %cst = arith.constant dense<0.000000e+00> : vector<32x384xf32>
    %4 = tpu.matmul %3, %1, %cst {dimension_numbers = #tpu.dot_dimension_numbers<[1], [0], [0], [1], [0, 0, 1, 1], [], []>} : vector<32x32xf32>, vector<32x384xf32>, vector<32x384xf32> -> vector<32x384xf32>
    %c18_i32 = arith.constant 18 : i32
    %5 = tpu.dynamic_rotate %0 by %c18_i32 dim 1 : vector<32x384xf32>, i32 -> vector<32x384xf32>
    %c1 = arith.constant 1 : index
    %c0_4 = arith.constant 0 : index
    %c0_5 = arith.constant 0 : index
    %6 = vector.load %arg2[%c1, %c0_4, %c0_5] : memref<9x32x32xf32, #tpu.memory_space<vmem>>, vector<1x32x32xf32>
    %7 = vector.shape_cast %6 : vector<1x32x32xf32> to vector<32x32xf32>
    %cst_6 = arith.constant dense<0.000000e+00> : vector<32x384xf32>
    %8 = tpu.matmul %7, %5, %cst_6 {dimension_numbers = #tpu.dot_dimension_numbers<[1], [0], [0], [1], [0, 0, 1, 1], [], []>} : vector<32x32xf32>, vector<32x384xf32>, vector<32x384xf32> -> vector<32x384xf32>
    %9 = arith.addf %4, %8 : vector<32x384xf32>
    %c17_i32 = arith.constant 17 : i32
    %10 = tpu.dynamic_rotate %0 by %c17_i32 dim 1 : vector<32x384xf32>, i32 -> vector<32x384xf32>
    %c2 = arith.constant 2 : index
    %c0_7 = arith.constant 0 : index
    %c0_8 = arith.constant 0 : index
    %11 = vector.load %arg2[%c2, %c0_7, %c0_8] : memref<9x32x32xf32, #tpu.memory_space<vmem>>, vector<1x32x32xf32>
    %12 = vector.shape_cast %11 : vector<1x32x32xf32> to vector<32x32xf32>
    %cst_9 = arith.constant dense<0.000000e+00> : vector<32x384xf32>
    %13 = tpu.matmul %12, %10, %cst_9 {dimension_numbers = #tpu.dot_dimension_numbers<[1], [0], [0], [1], [0, 0, 1, 1], [], []>} : vector<32x32xf32>, vector<32x384xf32>, vector<32x384xf32> -> vector<32x384xf32>
    %14 = arith.addf %9, %13 : vector<32x384xf32>
    %c1_i32 = arith.constant 1 : i32
    %15 = tpu.dynamic_rotate %0 by %c1_i32 dim 1 : vector<32x384xf32>, i32 -> vector<32x384xf32>
    %c3 = arith.constant 3 : index
    %c0_10 = arith.constant 0 : index
    %c0_11 = arith.constant 0 : index
    %16 = vector.load %arg2[%c3, %c0_10, %c0_11] : memref<9x32x32xf32, #tpu.memory_space<vmem>>, vector<1x32x32xf32>
    %17 = vector.shape_cast %16 : vector<1x32x32xf32> to vector<32x32xf32>
    %cst_12 = arith.constant dense<0.000000e+00> : vector<32x384xf32>
    %18 = tpu.matmul %17, %15, %cst_12 {dimension_numbers = #tpu.dot_dimension_numbers<[1], [0], [0], [1], [0, 0, 1, 1], [], []>} : vector<32x32xf32>, vector<32x384xf32>, vector<32x384xf32> -> vector<32x384xf32>
    %19 = arith.addf %14, %18 : vector<32x384xf32>
    %c4 = arith.constant 4 : index
    %c0_13 = arith.constant 0 : index
    %c0_14 = arith.constant 0 : index
    %20 = vector.load %arg2[%c4, %c0_13, %c0_14] : memref<9x32x32xf32, #tpu.memory_space<vmem>>, vector<1x32x32xf32>
    %21 = vector.shape_cast %20 : vector<1x32x32xf32> to vector<32x32xf32>
    %cst_15 = arith.constant dense<0.000000e+00> : vector<32x384xf32>
    %22 = tpu.matmul %21, %0, %cst_15 {dimension_numbers = #tpu.dot_dimension_numbers<[1], [0], [0], [1], [0, 0, 1, 1], [], []>} : vector<32x32xf32>, vector<32x384xf32>, vector<32x384xf32> -> vector<32x384xf32>
    %23 = arith.addf %19, %22 : vector<32x384xf32>
    %c383_i32 = arith.constant 383 : i32
    %24 = tpu.dynamic_rotate %0 by %c383_i32 dim 1 : vector<32x384xf32>, i32 -> vector<32x384xf32>
    %c5 = arith.constant 5 : index
    %c0_16 = arith.constant 0 : index
    %c0_17 = arith.constant 0 : index
    %25 = vector.load %arg2[%c5, %c0_16, %c0_17] : memref<9x32x32xf32, #tpu.memory_space<vmem>>, vector<1x32x32xf32>
    %26 = vector.shape_cast %25 : vector<1x32x32xf32> to vector<32x32xf32>
    %cst_18 = arith.constant dense<0.000000e+00> : vector<32x384xf32>
    %27 = tpu.matmul %26, %24, %cst_18 {dimension_numbers = #tpu.dot_dimension_numbers<[1], [0], [0], [1], [0, 0, 1, 1], [], []>} : vector<32x32xf32>, vector<32x384xf32>, vector<32x384xf32> -> vector<32x384xf32>
    %28 = arith.addf %23, %27 : vector<32x384xf32>
    %c367_i32 = arith.constant 367 : i32
    %29 = tpu.dynamic_rotate %0 by %c367_i32 dim 1 : vector<32x384xf32>, i32 -> vector<32x384xf32>
    %c6 = arith.constant 6 : index
    %c0_19 = arith.constant 0 : index
    %c0_20 = arith.constant 0 : index
    %30 = vector.load %arg2[%c6, %c0_19, %c0_20] : memref<9x32x32xf32, #tpu.memory_space<vmem>>, vector<1x32x32xf32>
    %31 = vector.shape_cast %30 : vector<1x32x32xf32> to vector<32x32xf32>
    %cst_21 = arith.constant dense<0.000000e+00> : vector<32x384xf32>
    %32 = tpu.matmul %31, %29, %cst_21 {dimension_numbers = #tpu.dot_dimension_numbers<[1], [0], [0], [1], [0, 0, 1, 1], [], []>} : vector<32x32xf32>, vector<32x384xf32>, vector<32x384xf32> -> vector<32x384xf32>
    %33 = arith.addf %28, %32 : vector<32x384xf32>
    %c366_i32 = arith.constant 366 : i32
    %34 = tpu.dynamic_rotate %0 by %c366_i32 dim 1 : vector<32x384xf32>, i32 -> vector<32x384xf32>
    %c7 = arith.constant 7 : index
    %c0_22 = arith.constant 0 : index
    %c0_23 = arith.constant 0 : index
    %35 = vector.load %arg2[%c7, %c0_22, %c0_23] : memref<9x32x32xf32, #tpu.memory_space<vmem>>, vector<1x32x32xf32>
    %36 = vector.shape_cast %35 : vector<1x32x32xf32> to vector<32x32xf32>
    %cst_24 = arith.constant dense<0.000000e+00> : vector<32x384xf32>
    %37 = tpu.matmul %36, %34, %cst_24 {dimension_numbers = #tpu.dot_dimension_numbers<[1], [0], [0], [1], [0, 0, 1, 1], [], []>} : vector<32x32xf32>, vector<32x384xf32>, vector<32x384xf32> -> vector<32x384xf32>
    %38 = arith.addf %33, %37 : vector<32x384xf32>
    %c365_i32 = arith.constant 365 : i32
    %39 = tpu.dynamic_rotate %0 by %c365_i32 dim 1 : vector<32x384xf32>, i32 -> vector<32x384xf32>
    %c8 = arith.constant 8 : index
    %c0_25 = arith.constant 0 : index
    %c0_26 = arith.constant 0 : index
    %40 = vector.load %arg2[%c8, %c0_25, %c0_26] : memref<9x32x32xf32, #tpu.memory_space<vmem>>, vector<1x32x32xf32>
    %41 = vector.shape_cast %40 : vector<1x32x32xf32> to vector<32x32xf32>
    %cst_27 = arith.constant dense<0.000000e+00> : vector<32x384xf32>
    %42 = tpu.matmul %41, %39, %cst_27 {dimension_numbers = #tpu.dot_dimension_numbers<[1], [0], [0], [1], [0, 0, 1, 1], [], []>} : vector<32x32xf32>, vector<32x384xf32>, vector<32x384xf32> -> vector<32x384xf32>
    %43 = arith.addf %38, %42 : vector<32x384xf32>
    %c0_28 = arith.constant 0 : index
    %c0_29 = arith.constant 0 : index
    %44 = vector.load %arg3[%c0_28, %c0_29] : memref<32x1xf32, #tpu.memory_space<vmem>>, vector<32x1xf32>
    %45 = vector.broadcast %44 : vector<32x1xf32> to vector<32x384xf32>
    %46 = arith.addf %43, %45 : vector<32x384xf32>
    %c0_30 = arith.constant 0 : index
    %c0_31 = arith.constant 0 : index
    %47 = vector.load %arg6[%c0_30, %c0_31] : memref<32x384xf32, #tpu.memory_space<vmem>>, vector<32x384xf32>
    %48 = arith.addf %46, %47 : vector<32x384xf32>
    %c0_32 = arith.constant 0 : index
    %c0_33 = arith.constant 0 : index
    %49 = vector.load %arg5[%c0_32, %c0_33] : memref<32x1xf32, #tpu.memory_space<vmem>>, vector<32x1xf32>
    %cst_34 = arith.constant 0.000000e+00 : f32
    %50 = vector.broadcast %cst_34 : f32 to vector<32x384xf32>
    %51 = arith.cmpf oge, %48, %50 : vector<32x384xf32>
    %52 = vector.broadcast %49 : vector<32x1xf32> to vector<32x384xf32>
    %53 = arith.mulf %52, %48 : vector<32x384xf32>
    %54 = arith.select %51, %48, %53 : vector<32x384xi1>, vector<32x384xf32>
    %c0_35 = arith.constant 0 : index
    %c0_36 = arith.constant 0 : index
    %55 = vector.load %arg4[%c0_35, %c0_36] : memref<1x384xf32, #tpu.memory_space<vmem>>, vector<1x384xf32>
    %56 = vector.broadcast %55 : vector<1x384xf32> to vector<32x384xf32>
    %57 = arith.mulf %54, %56 : vector<32x384xf32>
    %c0_37 = arith.constant 0 : index
    %c0_38 = arith.constant 0 : index
    %58 = vector.load %arg7[%c0_37, %c0_38] : memref<32x384xf32, #tpu.memory_space<vmem>>, vector<32x384xf32>
    tpu.vector_store %arg7[%c0_37, %c0_38], %57 {strides = array<i32>} : memref<32x384xf32, #tpu.memory_space<vmem>>, vector<32x384xf32>,
    return
  }
  func.func @transform_0(%arg0: i32) -> (i32, i32) {
    %c0_i32 = arith.constant 0 : i32
    %c0_i32_0 = arith.constant 0 : i32
    return %c0_i32, %arg0 : i32, i32
  }
  func.func @transform_1(%arg0: i32) -> (i32, i32, i32) {
    %c0_i32 = arith.constant 0 : i32
    %c0_i32_0 = arith.constant 0 : i32
    %c0_i32_1 = arith.constant 0 : i32
    %c0_i32_2 = arith.constant 0 : i32
    return %c0_i32, %c0_i32_0, %c0_i32_1 : i32, i32, i32
  }
  func.func @transform_2(%arg0: i32) -> (i32, i32) {
    %c0_i32 = arith.constant 0 : i32
    %c0_i32_0 = arith.constant 0 : i32
    %c0_i32_1 = arith.constant 0 : i32
    return %c0_i32, %c0_i32_0 : i32, i32
  }
  func.func @transform_3(%arg0: i32) -> (i32, i32) {
    %c0_i32 = arith.constant 0 : i32
    %c0_i32_0 = arith.constant 0 : i32
    return %c0_i32, %arg0 : i32, i32
  }
  func.func @transform_4(%arg0: i32) -> (i32, i32) {
    %c0_i32 = arith.constant 0 : i32
    %c0_i32_0 = arith.constant 0 : i32
    %c0_i32_1 = arith.constant 0 : i32
    return %c0_i32, %c0_i32_0 : i32, i32
  }
  func.func @transform_5(%arg0: i32) -> (i32, i32) {
    %c0_i32 = arith.constant 0 : i32
    %c0_i32_0 = arith.constant 0 : i32
    return %c0_i32, %arg0 : i32, i32
  }
  func.func @transform_6(%arg0: i32) -> (i32, i32) {
    %c0_i32 = arith.constant 0 : i32
    %c0_i32_0 = arith.constant 0 : i32
    return %c0_i32, %arg0 : i32, i32
  }
}

module attributes {stable_mosaic.version = 11 : i64} {
  func.func @_conv3x3_tap_kernel(%arg0: i32, %arg1: memref<32x384xf32, #tpu.memory_space<vmem>>, %arg2: memref<9x48x32xf32, #tpu.memory_space<vmem>>, %arg3: memref<48x1xf32, #tpu.memory_space<vmem>>, %arg4: memref<1x384xf32, #tpu.memory_space<vmem>>, %arg5: memref<48x384xf32, #tpu.memory_space<vmem>>) attributes {dimension_semantics = [#tpu.dimension_semantics<parallel>], iteration_bounds = array<i64: 2>, scalar_prefetch = 0 : i64, scratch_operands = 0 : i64, tpu.core_type = #tpu.core_type<tc>, window_params = [{transform_indices = @transform_0, window_bounds = array<i64: 32, 384>}, {pipeline_mode = #tpu.pipeline_mode<synchronous>, transform_indices = @transform_1, window_bounds = array<i64: 9, 48, 32>}, {pipeline_mode = #tpu.pipeline_mode<synchronous>, transform_indices = @transform_2, window_bounds = array<i64: 48, 1>}, {transform_indices = @transform_3, window_bounds = array<i64: 1, 384>}, {transform_indices = @transform_4, window_bounds = array<i64: 48, 384>}]} {
    %c0 = arith.constant 0 : index
    %c0_0 = arith.constant 0 : index
    %0 = vector.load %arg1[%c0, %c0_0] : memref<32x384xf32, #tpu.memory_space<vmem>>, vector<32x384xf32>
    %c19_i32 = arith.constant 19 : i32
    %1 = tpu.dynamic_rotate %0 by %c19_i32 dim 1 : vector<32x384xf32>, i32 -> vector<32x384xf32>
    %c0_1 = arith.constant 0 : index
    %c0_2 = arith.constant 0 : index
    %c0_3 = arith.constant 0 : index
    %2 = vector.load %arg2[%c0_1, %c0_2, %c0_3] : memref<9x48x32xf32, #tpu.memory_space<vmem>>, vector<1x48x32xf32>
    %3 = vector.shape_cast %2 : vector<1x48x32xf32> to vector<48x32xf32>
    %cst = arith.constant dense<0.000000e+00> : vector<48x384xf32>
    %4 = tpu.matmul %3, %1, %cst {dimension_numbers = #tpu.dot_dimension_numbers<[1], [0], [0], [1], [0, 0, 1, 1], [], []>} : vector<48x32xf32>, vector<32x384xf32>, vector<48x384xf32> -> vector<48x384xf32>
    %c18_i32 = arith.constant 18 : i32
    %5 = tpu.dynamic_rotate %0 by %c18_i32 dim 1 : vector<32x384xf32>, i32 -> vector<32x384xf32>
    %c1 = arith.constant 1 : index
    %c0_4 = arith.constant 0 : index
    %c0_5 = arith.constant 0 : index
    %6 = vector.load %arg2[%c1, %c0_4, %c0_5] : memref<9x48x32xf32, #tpu.memory_space<vmem>>, vector<1x48x32xf32>
    %7 = vector.shape_cast %6 : vector<1x48x32xf32> to vector<48x32xf32>
    %cst_6 = arith.constant dense<0.000000e+00> : vector<48x384xf32>
    %8 = tpu.matmul %7, %5, %cst_6 {dimension_numbers = #tpu.dot_dimension_numbers<[1], [0], [0], [1], [0, 0, 1, 1], [], []>} : vector<48x32xf32>, vector<32x384xf32>, vector<48x384xf32> -> vector<48x384xf32>
    %9 = arith.addf %4, %8 : vector<48x384xf32>
    %c17_i32 = arith.constant 17 : i32
    %10 = tpu.dynamic_rotate %0 by %c17_i32 dim 1 : vector<32x384xf32>, i32 -> vector<32x384xf32>
    %c2 = arith.constant 2 : index
    %c0_7 = arith.constant 0 : index
    %c0_8 = arith.constant 0 : index
    %11 = vector.load %arg2[%c2, %c0_7, %c0_8] : memref<9x48x32xf32, #tpu.memory_space<vmem>>, vector<1x48x32xf32>
    %12 = vector.shape_cast %11 : vector<1x48x32xf32> to vector<48x32xf32>
    %cst_9 = arith.constant dense<0.000000e+00> : vector<48x384xf32>
    %13 = tpu.matmul %12, %10, %cst_9 {dimension_numbers = #tpu.dot_dimension_numbers<[1], [0], [0], [1], [0, 0, 1, 1], [], []>} : vector<48x32xf32>, vector<32x384xf32>, vector<48x384xf32> -> vector<48x384xf32>
    %14 = arith.addf %9, %13 : vector<48x384xf32>
    %c1_i32 = arith.constant 1 : i32
    %15 = tpu.dynamic_rotate %0 by %c1_i32 dim 1 : vector<32x384xf32>, i32 -> vector<32x384xf32>
    %c3 = arith.constant 3 : index
    %c0_10 = arith.constant 0 : index
    %c0_11 = arith.constant 0 : index
    %16 = vector.load %arg2[%c3, %c0_10, %c0_11] : memref<9x48x32xf32, #tpu.memory_space<vmem>>, vector<1x48x32xf32>
    %17 = vector.shape_cast %16 : vector<1x48x32xf32> to vector<48x32xf32>
    %cst_12 = arith.constant dense<0.000000e+00> : vector<48x384xf32>
    %18 = tpu.matmul %17, %15, %cst_12 {dimension_numbers = #tpu.dot_dimension_numbers<[1], [0], [0], [1], [0, 0, 1, 1], [], []>} : vector<48x32xf32>, vector<32x384xf32>, vector<48x384xf32> -> vector<48x384xf32>
    %19 = arith.addf %14, %18 : vector<48x384xf32>
    %c4 = arith.constant 4 : index
    %c0_13 = arith.constant 0 : index
    %c0_14 = arith.constant 0 : index
    %20 = vector.load %arg2[%c4, %c0_13, %c0_14] : memref<9x48x32xf32, #tpu.memory_space<vmem>>, vector<1x48x32xf32>
    %21 = vector.shape_cast %20 : vector<1x48x32xf32> to vector<48x32xf32>
    %cst_15 = arith.constant dense<0.000000e+00> : vector<48x384xf32>
    %22 = tpu.matmul %21, %0, %cst_15 {dimension_numbers = #tpu.dot_dimension_numbers<[1], [0], [0], [1], [0, 0, 1, 1], [], []>} : vector<48x32xf32>, vector<32x384xf32>, vector<48x384xf32> -> vector<48x384xf32>
    %23 = arith.addf %19, %22 : vector<48x384xf32>
    %c383_i32 = arith.constant 383 : i32
    %24 = tpu.dynamic_rotate %0 by %c383_i32 dim 1 : vector<32x384xf32>, i32 -> vector<32x384xf32>
    %c5 = arith.constant 5 : index
    %c0_16 = arith.constant 0 : index
    %c0_17 = arith.constant 0 : index
    %25 = vector.load %arg2[%c5, %c0_16, %c0_17] : memref<9x48x32xf32, #tpu.memory_space<vmem>>, vector<1x48x32xf32>
    %26 = vector.shape_cast %25 : vector<1x48x32xf32> to vector<48x32xf32>
    %cst_18 = arith.constant dense<0.000000e+00> : vector<48x384xf32>
    %27 = tpu.matmul %26, %24, %cst_18 {dimension_numbers = #tpu.dot_dimension_numbers<[1], [0], [0], [1], [0, 0, 1, 1], [], []>} : vector<48x32xf32>, vector<32x384xf32>, vector<48x384xf32> -> vector<48x384xf32>
    %28 = arith.addf %23, %27 : vector<48x384xf32>
    %c367_i32 = arith.constant 367 : i32
    %29 = tpu.dynamic_rotate %0 by %c367_i32 dim 1 : vector<32x384xf32>, i32 -> vector<32x384xf32>
    %c6 = arith.constant 6 : index
    %c0_19 = arith.constant 0 : index
    %c0_20 = arith.constant 0 : index
    %30 = vector.load %arg2[%c6, %c0_19, %c0_20] : memref<9x48x32xf32, #tpu.memory_space<vmem>>, vector<1x48x32xf32>
    %31 = vector.shape_cast %30 : vector<1x48x32xf32> to vector<48x32xf32>
    %cst_21 = arith.constant dense<0.000000e+00> : vector<48x384xf32>
    %32 = tpu.matmul %31, %29, %cst_21 {dimension_numbers = #tpu.dot_dimension_numbers<[1], [0], [0], [1], [0, 0, 1, 1], [], []>} : vector<48x32xf32>, vector<32x384xf32>, vector<48x384xf32> -> vector<48x384xf32>
    %33 = arith.addf %28, %32 : vector<48x384xf32>
    %c366_i32 = arith.constant 366 : i32
    %34 = tpu.dynamic_rotate %0 by %c366_i32 dim 1 : vector<32x384xf32>, i32 -> vector<32x384xf32>
    %c7 = arith.constant 7 : index
    %c0_22 = arith.constant 0 : index
    %c0_23 = arith.constant 0 : index
    %35 = vector.load %arg2[%c7, %c0_22, %c0_23] : memref<9x48x32xf32, #tpu.memory_space<vmem>>, vector<1x48x32xf32>
    %36 = vector.shape_cast %35 : vector<1x48x32xf32> to vector<48x32xf32>
    %cst_24 = arith.constant dense<0.000000e+00> : vector<48x384xf32>
    %37 = tpu.matmul %36, %34, %cst_24 {dimension_numbers = #tpu.dot_dimension_numbers<[1], [0], [0], [1], [0, 0, 1, 1], [], []>} : vector<48x32xf32>, vector<32x384xf32>, vector<48x384xf32> -> vector<48x384xf32>
    %38 = arith.addf %33, %37 : vector<48x384xf32>
    %c365_i32 = arith.constant 365 : i32
    %39 = tpu.dynamic_rotate %0 by %c365_i32 dim 1 : vector<32x384xf32>, i32 -> vector<32x384xf32>
    %c8 = arith.constant 8 : index
    %c0_25 = arith.constant 0 : index
    %c0_26 = arith.constant 0 : index
    %40 = vector.load %arg2[%c8, %c0_25, %c0_26] : memref<9x48x32xf32, #tpu.memory_space<vmem>>, vector<1x48x32xf32>
    %41 = vector.shape_cast %40 : vector<1x48x32xf32> to vector<48x32xf32>
    %cst_27 = arith.constant dense<0.000000e+00> : vector<48x384xf32>
    %42 = tpu.matmul %41, %39, %cst_27 {dimension_numbers = #tpu.dot_dimension_numbers<[1], [0], [0], [1], [0, 0, 1, 1], [], []>} : vector<48x32xf32>, vector<32x384xf32>, vector<48x384xf32> -> vector<48x384xf32>
    %43 = arith.addf %38, %42 : vector<48x384xf32>
    %c0_28 = arith.constant 0 : index
    %c0_29 = arith.constant 0 : index
    %44 = vector.load %arg3[%c0_28, %c0_29] : memref<48x1xf32, #tpu.memory_space<vmem>>, vector<48x1xf32>
    %45 = vector.broadcast %44 : vector<48x1xf32> to vector<48x384xf32>
    %46 = arith.addf %43, %45 : vector<48x384xf32>
    %c0_30 = arith.constant 0 : index
    %c0_31 = arith.constant 0 : index
    %47 = vector.load %arg4[%c0_30, %c0_31] : memref<1x384xf32, #tpu.memory_space<vmem>>, vector<1x384xf32>
    %48 = vector.broadcast %47 : vector<1x384xf32> to vector<48x384xf32>
    %49 = arith.mulf %46, %48 : vector<48x384xf32>
    %c0_32 = arith.constant 0 : index
    %c0_33 = arith.constant 0 : index
    %50 = vector.load %arg5[%c0_32, %c0_33] : memref<48x384xf32, #tpu.memory_space<vmem>>, vector<48x384xf32>
    tpu.vector_store %arg5[%c0_32, %c0_33], %49 {strides = array<i32>} : memref<48x384xf32, #tpu.memory_space<vmem>>, vector<48x384xf32>,
    return
  }
  func.func @transform_0(%arg0: i32) -> (i32, i32) {
    %c0_i32 = arith.constant 0 : i32
    %c0_i32_0 = arith.constant 0 : i32
    return %c0_i32, %arg0 : i32, i32
  }
  func.func @transform_1(%arg0: i32) -> (i32, i32, i32) {
    %c0_i32 = arith.constant 0 : i32
    %c0_i32_0 = arith.constant 0 : i32
    %c0_i32_1 = arith.constant 0 : i32
    %c0_i32_2 = arith.constant 0 : i32
    return %c0_i32, %c0_i32_0, %c0_i32_1 : i32, i32, i32
  }
  func.func @transform_2(%arg0: i32) -> (i32, i32) {
    %c0_i32 = arith.constant 0 : i32
    %c0_i32_0 = arith.constant 0 : i32
    %c0_i32_1 = arith.constant 0 : i32
    return %c0_i32, %c0_i32_0 : i32, i32
  }
  func.func @transform_3(%arg0: i32) -> (i32, i32) {
    %c0_i32 = arith.constant 0 : i32
    %c0_i32_0 = arith.constant 0 : i32
    return %c0_i32, %arg0 : i32, i32
  }
  func.func @transform_4(%arg0: i32) -> (i32, i32) {
    %c0_i32 = arith.constant 0 : i32
    %c0_i32_0 = arith.constant 0 : i32
    return %c0_i32, %arg0 : i32, i32
  }
}

</mosaic_0001>

<bundles_post_ra>
// kernel: tile.18
= control target key start
LH: loop header
LB: loop body
LE: loop exit
PB: predicated region body
PF: predicated region fallthrough
CT: control target
= control target key end

     0   :  { %2 = vsyncpa [#allocation1], 0  ;;  %s42_s6 = smov [#allocation0]   ;;  %s59_s0 = inlined_call_operand.hbm [shape: f32[12], index: 0, kind: input, shape index: {}]   ;;  %s60_s1 = inlined_call_operand.vmem [shape: f32[4,12], index: 1, kind: output, shape index: {}]  }
   0x1   :  { %s9_s7 = sshll.u32 %s42_s6, 4  ;;  %s10_s7 = int_to_ptr.vmem [resolvable:$true] %s9_s7 }
   0x2   :  { %s28_s8 = scalar_lea.vmem %s10_s7, 16  ;;  %s32_s9 = scalar_lea.vmem %s10_s7, 32 }
   0x3   :  { %p29_p0 = scmp.ne.s32.totalorder %s10_s7, %s28_s8  ;;  %p33_p1 = scmp.lt.s32.totalorder %s10_s7, %s10_s7 }
   0x4   :  { %p34_p2 = scmp.lt.s32.totalorder %s32_s9, %s28_s8 }
   0x6   :  { %p35_p3 = por %p34_p2, %p33_p1 }
   0x8   :  { %p36_p4 = pnand %p35_p3, %p29_p0 }
   0xa   :  { %39 = shalt.err (!%p36_p4)
}
   0xb   :  { %12 = dma.hbm_to_vmem [thread:$0]  %s59_s0, 16, %s10_s7, [#allocation1]  }
   0xc   :  { %40 = dma.done.wait [#allocation1], 16  }
   0xd   :  { %41 = vsyncadd [#allocation1], 4294967280  ;;  %v16_v0 = vld [vmem:[#allocation0] ss:$0 sm:$0xff] }
   0xe   :  { %17 = vst [vmem:[%s60_s1] sm:$0xf] %v16_v0 }
   0xf   :  { %18 = vsyncpa [#allocation1], 1 }

// kernel: tile.13
= control target key start
LH: loop header
LB: loop body
LE: loop exit
PB: predicated region body
PF: predicated region fallthrough
CT: control target
= control target key end

     0   :  { %s46_s0 = inlined_call_operand.vmem [shape: f32[384], index: 0, kind: input, shape index: {}]   ;;  %s47_s1 = inlined_call_operand.vmem [shape: f32[2,384], index: 1, kind: output, shape index: {}]  }
   0x1   :  { %v4_v0 = vld [vmem:[%s46_s0] ss:$0 sm:$0xff]  ;;  %v14_v1 = vld [vmem:[%s46_s0 + $0x1] ss:$0 sm:$0xff]  ;;  %v16_v2 = vld [vmem:[%s46_s0 + $0x2] ss:$0 sm:$0xff] }
   0x2   :  { %5 = vst [vmem:[%s47_s1] sm:$0x3] %v4_v0  ;;  %15 = vst [vmem:[%s47_s1 + $0x2] sm:$0x3] %v14_v1 }
   0x3   :  { %17 = vst [vmem:[%s47_s1 + $0x4] sm:$0x3] %v16_v2 }

// kernel: mul.29
= control target key start
LH: loop header
LB: loop body
LE: loop exit
PB: predicated region body
PF: predicated region fallthrough
CT: control target
= control target key end

     0   :  { %s59_s0 = inlined_call_operand.vmem [shape: f32[2,384], index: 0, kind: input, shape index: {}]   ;;  %s60_s1 = inlined_call_operand.vmem [shape: f32[768], index: 1, kind: output, shape index: {}]  }
   0x1   :  { %v27_v0 = vld [vmem:[%s59_s0 + $0x4] sm:$0x3]  ;;  %v28_v1 = vld [vmem:[%s59_s0 + $0x2] sm:$0x3]  ;;  %v14_v2 = vld [vmem:[%s59_s0] sm:$0x3] }
   0x2   :  { %9 = vst [vmem:[#allocation0] sm:$0x3] %v27_v0  ;;  %13 = vst [vmem:[#allocation0 + $0x10] sm:$0x3] %v28_v1 }
   0x3   :  { %15 = vst [vmem:[#allocation0 + $0x8] sm:$0x3] %v14_v2 }
   0x9   :  { %v19_v4 = vld [vmem:[#allocation0 + $0x10] sm:$0x3]   ;;  %v23_v5 = vld [vmem:[#allocation0] sm:$0x3]  }
   0xa   :  { %v16_v3 = vld [vmem:[#allocation0 + $0x8] sm:$0x3]   ;;  %29 = vst [vmem:[%s60_s1 + $0x1] ss:$3 sm:$0x3] %v19_v4  }
   0xb   :  { %17 = vst [vmem:[%s60_s1] ss:$3 sm:$0x3] %v16_v3   ;;  %30 = vst [vmem:[%s60_s1 + $0x2] ss:$3 sm:$0x3] %v23_v5  }

// kernel: tile.0
= control target key start
LH: loop header
LB: loop body
LE: loop exit
PB: predicated region body
PF: predicated region fallthrough
CT: control target
= control target key end

     0   :  { %s132_s8 = smov 125   ;;  %s133_s9 = smov 126   ;;  %vm8_vm0 = vcmask 7168   ;;  %s247_s0 = inlined_call_operand.vmem [shape: f32[4,12], index: 0, kind: input, shape index: {}]   ;;  %s248_s1 = inlined_call_operand.vmem [shape: f32[48,1], index: 1, kind: output, shape index: {}]  }
   0x1   :  { %v5_v0 = vld [vmem:[%s247_s0] sm:$0xf]  ;;  %s131_s0 = smov 127   ;;  %s134_s10 = smov 124  }
   0x2   :  { %6 = vst [vmem:[#allocation0] sm:$0xf] %v5_v0  ;;  %s135_s13 = smov 123   ;;  %s136_s14 = smov 122  }
   0x3   :  { %s137_s15 = smov 121   ;;  %s138_s16 = smov 120  }
   0x4   :  { %s139_s17 = smov 119   ;;  %s140_s18 = smov 118  }
   0x5   :  { %s141_s19 = smov 117  }
   0x9   :  { %v10_v1 = vld.sshfl [vmem:[#allocation0] sm:$0xff pattern:$0x22222130]  }
   0xa   :  { %11 = vrot.lane.b32.xlu0 %v10_v1, %s131_s0  ;;  %27 = vrot.lane.b32.xlu1 %v10_v1, %s132_s8  ;;  %v7_v2 = vld [vmem:[#allocation0] sm:$0xf]  }
   0xb   :  { %9 = vst.msk [vmem:[%s248_s1] ss:$12 sm:$0xf] %vm8_vm0, %v7_v2   ;;  %v66_v3 = vld.sshfl [vmem:[#allocation0] sm:$0xff pattern:$0x11111302]  }
   0xe   :  { %19 = vrot.lane.b32.xlu0 %v10_v1, %s133_s9  ;;  %35 = vrot.lane.b32.xlu1 %v10_v1, %s134_s10 }
  0x12   :  { %43 = vrot.lane.b32.xlu0 %v10_v1, %s135_s13  ;;  %51 = vrot.lane.b32.xlu1 %v10_v1, %s136_s14 }
  0x16   :  { %59 = vrot.lane.b32.xlu0 %v10_v1, %s137_s15  ;;  %67 = vrot.lane.b32.xlu1 %v66_v3, %s138_s16 }
  0x1a   :  { %75 = vrot.lane.b32.xlu0 %v66_v3, %s139_s17  ;;  %83 = vrot.lane.b32.xlu1 %v66_v3, %s140_s18 }
  0x1e   :  { %91 = vrot.lane.b32.xlu0 %v66_v3, %s141_s19 }
  0x7c   :  { %v12_v4 = vpop.permute.xlu0 %11   ;;  %v28_v5 = vpop.permute.xlu1 %27  }
  0x7d   :  { %98 = vst.msk [vmem:[%s248_s1 + $0x1] ss:$36 sm:$0x3] %vm8_vm0, %v12_v4   ;;  %99 = vst.msk [vmem:[%s248_s1 - $0xb] ss:$12 sm:$0xc] %vm8_vm0, %v12_v4  }
  0x7e   :  { %102 = vst.msk [vmem:[%s248_s1 + $0x3] ss:$36 sm:$0x3] %vm8_vm0, %v28_v5   ;;  %103 = vst.msk [vmem:[%s248_s1 - $0x9] ss:$12 sm:$0xc] %vm8_vm0, %v28_v5  }
  0x80   :  { %v20_v6 = vpop.permute.xlu0 %19   ;;  %v36_v7 = vpop.permute.xlu1 %35  }
  0x81   :  { %100 = vst.msk [vmem:[%s248_s1 + $0x2] ss:$36 sm:$0x3] %vm8_vm0, %v20_v6   ;;  %101 = vst.msk [vmem:[%s248_s1 - $0xa] ss:$12 sm:$0xc] %vm8_vm0, %v20_v6  }
  0x82   :  { %104 = vst.msk [vmem:[%s248_s1 + $0x4] ss:$36 sm:$0x3] %vm8_vm0, %v36_v7   ;;  %105 = vst.msk [vmem:[%s248_s1 - $0x8] ss:$12 sm:$0xc] %vm8_vm0, %v36_v7  }
  0x84   :  { %v44_v8 = vpop.permute.xlu0 %43   ;;  %v52_v9 = vpop.permute.xlu1 %51  }
  0x85   :  { %106 = vst.msk [vmem:[%s248_s1 + $0x5] ss:$36 sm:$0x3] %vm8_vm0, %v44_v8   ;;  %107 = vst.msk [vmem:[%s248_s1 - $0x7] ss:$12 sm:$0xc] %vm8_vm0, %v44_v8  }
  0x86   :  { %108 = vst.msk [vmem:[%s248_s1 + $0x6] ss:$36 sm:$0x3] %vm8_vm0, %v52_v9   ;;  %109 = vst.msk [vmem:[%s248_s1 - $0x6] ss:$12 sm:$0xc] %vm8_vm0, %v52_v9  }
  0x88   :  { %v60_v10 = vpop.permute.xlu0 %59   ;;  %v68_v11 = vpop.permute.xlu1 %67  }
  0x89   :  { %110 = vst.msk [vmem:[%s248_s1 + $0x7] ss:$36 sm:$0x3] %vm8_vm0, %v60_v10   ;;  %111 = vst.msk [vmem:[%s248_s1 - $0x5] ss:$12 sm:$0xc] %vm8_vm0, %v60_v10  }
  0x8a   :  { %112 = vst.msk [vmem:[%s248_s1 + $0x20] ss:$-24 sm:$0x3] %vm8_vm0, %v68_v11   ;;  %113 = vst.msk [vmem:[%s248_s1 + $0x5c] ss:$-24 sm:$0xc] %vm8_vm0, %v68_v11  }
  0x8c   :  { %v76_v12 = vpop.permute.xlu0 %75   ;;  %v84_v13 = vpop.permute.xlu1 %83  }
  0x8d   :  { %114 = vst.msk [vmem:[%s248_s1 + $0x21] ss:$-24 sm:$0x3] %vm8_vm0, %v76_v12   ;;  %115 = vst.msk [vmem:[%s248_s1 + $0x5d] ss:$-24 sm:$0xc] %vm8_vm0, %v76_v12  }
  0x8e   :  { %116 = vst.msk [vmem:[%s248_s1 + $0x22] ss:$-24 sm:$0x3] %vm8_vm0, %v84_v13   ;;  %117 = vst.msk [vmem:[%s248_s1 + $0x5e] ss:$-24 sm:$0xc] %vm8_vm0, %v84_v13  }
  0x90   :  { %v92_v14 = vpop.permute.xlu0 %91  }
  0x91   :  { %118 = vst.msk [vmem:[%s248_s1 + $0x23] ss:$-24 sm:$0x3] %vm8_vm0, %v92_v14   ;;  %119 = vst.msk [vmem:[%s248_s1 + $0x5f] ss:$-24 sm:$0xc] %vm8_vm0, %v92_v14  }

// kernel: decoder3_forward_impl.8
= control target key start
LH: loop header
LB: loop body
LE: loop exit
PB: predicated region body
PF: predicated region fallthrough
CT: control target
= control target key end

     0   :  { %s947_s21 = smov 0   ;;  %s949_s22 = smov 0   ;;  %s1146_s0 = inlined_call_operand.vmem [shape: f32[8,768], index: 0, kind: input, shape index: {}]   ;;  %s1147_s1 = inlined_call_operand.vmem [shape: f32[32,768], index: 1, kind: input, shape index: {}]   ;;  %s1148_s2 = inlined_call_operand.vmem [shape: f32[4,768], index: 2, kind: input, shape index: {}]   ;;  %s1149_s3 = inlined_call_operand.vmem [shape: f32[32,768], index: 3, kind: input, shape index: {}]   ;;  %s1150_s4 = inlined_call_operand.vmem [shape: f32[4,768], index: 4, kind: input, shape index: {}]   ;;  %s1151_s5 = inlined_call_operand.vmem [shape: f32[8,768], index: 5, kind: input, shape index: {}]   ;;  %s1152_s6 = inlined_call_operand.vmem [shape: f32[32,768], index: 6, kind: output, shape index: {}]  }
   0x1   :  { %s951_s23 = smov 0  }
   0x2 LB: > { %s963_s24 = sadd.s32 4294967295, %s910_s23   ;;  %s966_s25 = sadd.s32 1, %s910_s23   ;;  %s910_s23 = sphi %s951_s23, %s1157_s23   ;;  %s906_s22 = sphi %s949_s22, %s1156_s22   ;;  %s902_s21 = sphi %s947_s21, %s1155_s21  }
   0x3   : > { %s46_s26 = ssub.s32 %s910_s23, %s966_s25  ;;  %s49_s27 = sadd.s32 1, %s906_s22 }
   0x4   : > { %p47_p0 = scmp.eq.s32.totalorder %s46_s26, 0  ;;  %p56_p1 = scmp.ne.s32.totalorder %s906_s22, %s902_s21 }
   0x5   : > { %p57_p2 = scmp.eq.s32.totalorder %s910_s23, 0  ;;  %p190_p3 = scmp.eq.s32.totalorder %s963_s24, 1 }
   0x6   : > { %s976_s28 = scalar_select %p47_p0, %s906_s22, %s49_s27  }
   0x7   : > { %p978_p4 = por %p57_p2, %p56_p1  ;;  %p982_p5 = por %p190_p3, %p56_p1 }
   0x8   : > { %p841_p6 = scmp.ge.s32.totalorder %s910_s23, 2 }
   0xa   : > { %212 = sbr.rel (%p841_p6) target bundleno = 37 (0x25), region = 16 }
   0xf   : > { %224 = sbr.rel (!%p978_p4) target bundleno = 26 (0x1a), region = 24  ;;  %s226_s7 = sand.u32 (%p978_p4), 1, %s906_s22  }
  0x10   : > { %s858_s8 = smul.u32 (%p978_p4), 24, %s910_s23 }
  0x11   : > { %s861_s9 = smul.u32 (%p978_p4), 96, %s226_s7 }
  0x12   : > { %s231_s12 = scalar_lea.vmem (%p978_p4), %s1147_s1, %s858_s8 }
  0x13   : > { %v244_v0 = vld [vmem:[%s231_s12] sm:$0xff] (%p978_p4)  ;;  %v246_v1 = vld [vmem:[%s231_s12 + $0x8] sm:$0xff] (%p978_p4)  ;;  %v248_v2 = vld [vmem:[%s231_s12 + $0x10] sm:$0xff] (%p978_p4)  ;;  %s228_s13 = scalar_lea.vmem (%p978_p4), [#allocation2], %s861_s9 }
  0x14   : > { %245 = vst [vmem:[%s228_s13] sm:$0xff] %v244_v0  ;;  %247 = vst [vmem:[%s228_s13 + $0x8] sm:$0xff] %v246_v1  ;;  %v250_v3 = vld [vmem:[%s231_s12 + $0x30] sm:$0xff]  ;;  %v252_v4 = vld [vmem:[%s231_s12 + $0x38] sm:$0xff] }
  0x15   : > { %249 = vst [vmem:[%s228_s13 + $0x10] sm:$0xff] %v248_v2  ;;  %v254_v5 = vld [vmem:[%s231_s12 + $0x40] sm:$0xff]  ;;  %251 = vst [vmem:[%s228_s13 + $0x18] sm:$0xff] %v250_v3  ;;  %v258_v7 = vld [vmem:[%s231_s12 + $0x68] sm:$0xff] }
  0x16   : > { %253 = vst [vmem:[%s228_s13 + $0x20] sm:$0xff] %v252_v4  ;;  %255 = vst [vmem:[%s228_s13 + $0x28] sm:$0xff] %v254_v5  ;;  %v256_v6 = vld [vmem:[%s231_s12 + $0x60] sm:$0xff]  ;;  %v260_v8 = vld [vmem:[%s231_s12 + $0x70] sm:$0xff] }
  0x17   : > { %257 = vst [vmem:[%s228_s13 + $0x30] sm:$0xff] %v256_v6  ;;  %259 = vst [vmem:[%s228_s13 + $0x38] sm:$0xff] %v258_v7  ;;  %v262_v9 = vld [vmem:[%s231_s12 + $0x90] sm:$0xff]  ;;  %v264_v10 = vld [vmem:[%s231_s12 + $0x98] sm:$0xff] }
  0x18   : > { %261 = vst [vmem:[%s228_s13 + $0x40] sm:$0xff] %v260_v8  ;;  %v266_v11 = vld [vmem:[%s231_s12 + $0xa0] sm:$0xff]  ;;  %263 = vst [vmem:[%s228_s13 + $0x48] sm:$0xff] %v262_v9 }
  0x19   : > { %265 = vst [vmem:[%s228_s13 + $0x50] sm:$0xff] %v264_v10  ;;  %267 = vst [vmem:[%s228_s13 + $0x58] sm:$0xff] %v266_v11 }
  0x1a PF: > { %282 = sbr.rel (!%p978_p4) target bundleno = 37 (0x25), region = 51  ;;  %s284_s14 = sand.u32 (%p978_p4), 1, %s906_s22  }
  0x1b   : > { %s859_s15 = smul.u32 (%p978_p4), 24, %s910_s23 }
  0x1c   : > { %s862_s16 = smul.u32 (%p978_p4), 96, %s284_s14 }
  0x1d   : > { %s289_s19 = scalar_lea.vmem (%p978_p4), %s1149_s3, %s859_s15 }
  0x1e   : > { %v302_v12 = vld [vmem:[%s289_s19] sm:$0xff] (%p978_p4)  ;;  %v304_v13 = vld [vmem:[%s289_s19 + $0x8] sm:$0xff] (%p978_p4)  ;;  %v306_v14 = vld [vmem:[%s289_s19 + $0x10] sm:$0xff] (%p978_p4)  ;;  %s286_s20 = scalar_lea.vmem (%p978_p4), [#allocation3], %s862_s16 }
  0x1f   : > { %303 = vst [vmem:[%s286_s20] sm:$0xff] %v302_v12  ;;  %305 = vst [vmem:[%s286_s20 + $0x8] sm:$0xff] %v304_v13  ;;  %v308_v15 = vld [vmem:[%s289_s19 + $0x30] sm:$0xff]  ;;  %v310_v16 = vld [vmem:[%s289_s19 + $0x38] sm:$0xff] }
  0x20   : > { %307 = vst [vmem:[%s286_s20 + $0x10] sm:$0xff] %v306_v14  ;;  %v312_v17 = vld [vmem:[%s289_s19 + $0x40] sm:$0xff]  ;;  %309 = vst [vmem:[%s286_s20 + $0x18] sm:$0xff] %v308_v15  ;;  %v316_v19 = vld [vmem:[%s289_s19 + $0x68] sm:$0xff] }
  0x21   : > { %311 = vst [vmem:[%s286_s20 + $0x20] sm:$0xff] %v310_v16  ;;  %313 = vst [vmem:[%s286_s20 + $0x28] sm:$0xff] %v312_v17  ;;  %v314_v18 = vld [vmem:[%s289_s19 + $0x60] sm:$0xff]  ;;  %v318_v20 = vld [vmem:[%s289_s19 + $0x70] sm:$0xff] }
  0x22   : > { %315 = vst [vmem:[%s286_s20 + $0x30] sm:$0xff] %v314_v18  ;;  %317 = vst [vmem:[%s286_s20 + $0x38] sm:$0xff] %v316_v19  ;;  %v320_v21 = vld [vmem:[%s289_s19 + $0x90] sm:$0xff]  ;;  %v322_v22 = vld [vmem:[%s289_s19 + $0x98] sm:$0xff] }
  0x23   : > { %319 = vst [vmem:[%s286_s20 + $0x40] sm:$0xff] %v318_v20  ;;  %v324_v23 = vld [vmem:[%s289_s19 + $0xa0] sm:$0xff]  ;;  %321 = vst [vmem:[%s286_s20 + $0x48] sm:$0xff] %v320_v21 }
  0x24   : > { %323 = vst [vmem:[%s286_s20 + $0x50] sm:$0xff] %v322_v22  ;;  %325 = vst [vmem:[%s286_s20 + $0x58] sm:$0xff] %v324_v23 }
  0x25 PF: > { %p844_p7 = scmp.ge.s32.totalorder %s910_s23, 1  ;;  %p348_p8 = scmp.lt.s32.totalorder %s910_s23, 3 }
  0x27   : > { %p349_p9 = pnand %p844_p7, %p348_p8 }
  0x28   : > { %s355_s26 = sand.u32 (!%p349_p9), 1, %s902_s21   ;;  %s414_s27 = smul.u32 (!%p349_p9), 3, %s963_s24 }
  0x29   : > { %352 = sbr.rel (%p349_p9) target bundleno = 84 (0x54), region = 82 }
  0x2a   : > { %s1005_s29 = smul.u32 (!%p349_p9), 96, %s355_s26  ;;  %p415_p10 = scmp.lt.s32.totalorder (!%p349_p9), %s414_s27, 5 }
  0x2c   : > { %s1024_s13 = scalar_lea.vmem (!%p349_p9), [#allocation2], %s1005_s29  ;;  %s1042_s17 = scalar_lea.vmem (!%p349_p9), [#allocation4], %s1005_s29 }
  0x2d   : > { %s1073_s26 = scalar_lea.vmem (!%p349_p9), [#allocation3], %s1005_s29 }
  0x2e   : > { %v452_v24 = vlaneseq  ;;  %s1159_s27 = smov (!%p415_p10, %s414_s27), 5  ;;  %v448_v28 = vld [vmem:[%s1024_s13] sm:$0xff]  ;;  %v472_v29 = vld [vmem:[%s1024_s13 + $0x18] sm:$0xff]  ;;  %v449_v30 = vld [vmem:[%s1024_s13 + $0x8] sm:$0xff] }
  0x2f   : > { %s845_s7 = sshll.u32 %s1159_s27, 3  ;;  %s846_s8 = sshll.u32 %s1159_s27, 2  ;;  %v473_v31 = vld [vmem:[%s1024_s13 + $0x20] sm:$0xff]  ;;  %v499_v35 = vld [vmem:[%s1024_s13 + $0x30] sm:$0xff]  ;;  %v526_v36 = vld [vmem:[%s1024_s13 + $0x48] sm:$0xff] }
  0x30   : > { %v453_v25 = vshrl.u32 %v452_v24, 7  ;;  %s418_s9 = scalar_lea.vmem %s1146_s0, %s845_s7  ;;  %s425_s12 = scalar_lea.vmem %s1148_s2, %s846_s8  ;;  %v500_v37 = vld [vmem:[%s1024_s13 + $0x38] sm:$0xff]  ;;  %v527_v38 = vld [vmem:[%s1024_s13 + $0x50] sm:$0xff]  ;;  %v474_v63 = vld [vmem:[%s1024_s13 + $0x28] sm:$0xff] }
  0x31   : > { %v441_v32 = vld [vmem:[%s418_s9] sm:$0xff]  ;;  %v442_v33 = vld [vmem:[%s418_s9 + $0x8] sm:$0xff]  ;;  %v443_v34 = vld [vmem:[%s418_s9 + $0x10] sm:$0xff]  ;;  %s1039_s16 = scalar_lea.vmem %s1150_s4, %s846_s8  ;;  %s438_s20 = scalar_lea.vmem %s1151_s5, %s845_s7 }
  0x32   : > { %v1011_v26 = vsub.s32 0, %v453_v25  ;;  %v1013_v27 = vsub.s32 1, %v453_v25  ;;  %v1034_v39 = vsub.s32 2, %v453_v25  ;;  %444 = vst [vmem:[%s1042_s17] sm:$0xff] %v441_v32  ;;  %445 = vst [vmem:[%s1042_s17 + $0x8] sm:$0xff] %v442_v33  ;;  %v450_v62 = vld [vmem:[%s1024_s13 + $0x10] sm:$0xff]  ;;  %v501_v0 = vld [vmem:[%s1024_s13 + $0x40] sm:$0xff] }
  0x33   : > { %446 = vst [vmem:[%s1042_s17 + $0x10] sm:$0xff] %v443_v34  ;;  %v447_v40 = vld [vmem:[%s425_s12] ss:$4 sm:$0x7]  ;;  %v528_v5 = vld [vmem:[%s1024_s13 + $0x58] sm:$0xff]  ;;  %v606_v23 = vld [vmem:[%s1073_s26 + $0x30] sm:$0xff] }
  0x34   : > { %v849_v41 = vld [vmem:[%s425_s12 + $0x1] ss:$4 sm:$0x7]  ;;  %v455_v42 = vrot.slane %v447_v40, %v1011_v26  ;;  %v850_v44 = vld [vmem:[%s425_s12 + $0x2] ss:$4 sm:$0x7]  ;;  %v459_v46 = vrot.slane %v447_v40, %v1013_v27  ;;  %v463_v3 = vrot.slane %v447_v40, %v1034_v39 }
  0x35   : > { %v479_v43 = vrot.slane %v849_v41, %v1011_v26  ;;  %v851_v45 = vld [vmem:[%s425_s12 + $0x3] ss:$4 sm:$0x7]  ;;  %v483_v47 = vrot.slane %v849_v41, %v1013_v27  ;;  %v506_v48 = vrot.slane %v850_v44, %v1011_v26  ;;  %v510_v50 = vrot.slane %v850_v44, %v1013_v27  ;;  %v1056_v56 = vld [vmem:[%s1039_s16] ss:$4 sm:$0x7] }
  0x36   : > { %v533_v49 = vrot.slane %v851_v45, %v1011_v26  ;;  %v537_v51 = vrot.slane %v851_v45, %v1013_v27  ;;  %v467_v52 = vmul.f32 %v455_v42, %v448_v28  ;;  %v468_v54 = vmul.f32 %v459_v46, %v449_v30  ;;  %v1059_v57 = vld [vmem:[%s1039_s16 + $0x1] ss:$4 sm:$0x7]  ;;  %v579_v7 = vld [vmem:[%s1073_s26 + $0x18] sm:$0xff]  ;;  %v663_v25 = vld [vmem:[%s438_s20 + $0x10] sm:$0xff]  ;;  %s860_s27 = smul.u32 (%p982_p5), 24, %s963_s24 }
  0x37   : > { %v491_v53 = vmul.f32 %v479_v43, %v472_v29  ;;  %v492_v55 = vmul.f32 %v483_v47, %v473_v31  ;;  %v518_v58 = vmul.f32 %v506_v48, %v499_v35  ;;  %v519_v60 = vmul.f32 %v510_v50, %v500_v37  ;;  %v555_v6 = vld [vmem:[%s1073_s26] sm:$0xff]  ;;  %v662_v24 = vld [vmem:[%s438_s20 + $0x8] sm:$0xff]  ;;  %666 = vst [vmem:[%s1042_s17 + $0x58] sm:$0xff] %v663_v25  ;;  %v607_v40 = vld [vmem:[%s1073_s26 + $0x38] sm:$0xff] }
  0x38   : > { %v545_v59 = vmul.f32 %v533_v49, %v526_v36  ;;  %v546_v61 = vmul.f32 %v537_v51, %v527_v38  ;;  %v487_v4 = vrot.slane %v849_v41, %v1034_v39  ;;  %v514_v8 = vrot.slane %v850_v44, %v1034_v39  ;;  %v853_v12 = vld [vmem:[%s1039_s16 + $0x2] ss:$4 sm:$0x7]  ;;  %v854_v17 = vld [vmem:[%s1039_s16 + $0x3] ss:$4 sm:$0x7]  ;;  %s676_s7 = scalar_lea.vmem (%p982_p5), %s1152_s6, %s860_s27 }
  0x39   : > { %v494_v1 = vadd.f32 %v491_v53, %v467_v52  ;;  %v495_v2 = vadd.f32 %v492_v55, %v468_v54  ;;  %v541_v9 = vrot.slane %v851_v45, %v1034_v39  ;;  %v562_v10 = vrot.slane %v1056_v56, %v1011_v26  ;;  %v661_v18 = vld [vmem:[%s438_s20] sm:$0xff]  ;;  %v633_v32 = vld [vmem:[%s1073_s26 + $0x48] sm:$0xff]  ;;  %665 = vst [vmem:[%s1042_s17 + $0x50] sm:$0xff] %v662_v24  ;;  %v634_v41 = vld [vmem:[%s1073_s26 + $0x50] sm:$0xff] }
  0x3a   : > { %v586_v11 = vrot.slane %v1059_v57, %v1011_v26  ;;  %v469_v15 = vmul.f32 %v463_v3, %v450_v62  ;;  %v493_v16 = vmul.f32 %v487_v4, %v474_v63  ;;  %v520_v19 = vmul.f32 %v514_v8, %v501_v0  ;;  %664 = vst [vmem:[%s1042_s17 + $0x48] sm:$0xff] %v661_v18  ;;  %v556_v33 = vld [vmem:[%s1073_s26 + $0x8] sm:$0xff]  ;;  %v580_v34 = vld [vmem:[%s1073_s26 + $0x20] sm:$0xff]  ;;  %v635_v62 = vld [vmem:[%s1073_s26 + $0x58] sm:$0xff] }
  0x3b   : > { %v521_v13 = vadd.f32 %v518_v58, %v494_v1  ;;  %v522_v14 = vadd.f32 %v519_v60, %v495_v2  ;;  %v547_v20 = vmul.f32 %v541_v9, %v528_v5  ;;  %v574_v21 = vmul.f32 %v562_v10, %v555_v6  ;;  %v581_v54 = vld [vmem:[%s1073_s26 + $0x28] sm:$0xff]  ;;  %v608_v55 = vld [vmem:[%s1073_s26 + $0x40] sm:$0xff] }
  0x3c   : > { %v598_v22 = vmul.f32 %v586_v11, %v579_v7  ;;  %v496_v30 = vadd.f32 %v493_v16, %v469_v15  ;;  %v613_v31 = vrot.slane %v853_v12, %v1011_v26  ;;  %v640_v36 = vrot.slane %v854_v17, %v1011_v26  ;;  %v557_v26 = vld [vmem:[%s1073_s26 + $0x10] sm:$0xff] }
  0x3d   : > { %v548_v28 = vadd.f32 %v545_v59, %v521_v13  ;;  %v549_v29 = vadd.f32 %v546_v61, %v522_v14  ;;  %v566_v37 = vrot.slane %v1056_v56, %v1013_v27  ;;  %v590_v38 = vrot.slane %v1059_v57, %v1013_v27  ;;  %v693_v7 = vld [vmem:[%s1042_s17 + $0x10] sm:$0xff] (%p982_p5) }
  0x3e   : > { %v601_v35 = vadd.f32 %v598_v22, %v574_v21  ;;  %v523_v42 = vadd.f32 %v520_v19, %v496_v30  ;;  %v625_v43 = vmul.f32 %v613_v31, %v606_v23  ;;  %v617_v44 = vrot.slane %v853_v12, %v1013_v27  ;;  %694 = vst [vmem:[%s676_s7 + $0x10] sm:$0xff] (%p982_p5), %v693_v7  ;;  %v711_v16 = vld [vmem:[%s1042_s17 + $0x58] sm:$0xff] (%p982_p5) }
  0x3f   : > { %551 = vst [vmem:[%s1042_s17 + $0x18] sm:$0xff] %v548_v28  ;;  %552 = vst [vmem:[%s1042_s17 + $0x20] sm:$0xff] %v549_v29  ;;  %v644_v45 = vrot.slane %v854_v17, %v1013_v27  ;;  %v652_v46 = vmul.f32 %v640_v36, %v633_v32  ;;  %v575_v47 = vmul.f32 %v566_v37, %v556_v33 }
  0x40   : > { %v599_v48 = vmul.f32 %v590_v38, %v580_v34  ;;  %v570_v49 = vrot.slane %v1056_v56, %v1034_v39  ;;  %v550_v50 = vadd.f32 %v547_v20, %v523_v42  ;;  %v628_v51 = vadd.f32 %v625_v43, %v601_v35  ;;  %v709_v15 = vld [vmem:[%s1042_s17 + $0x50] sm:$0xff] (%p982_p5)  ;;  %712 = vst [vmem:[%s676_s7 + $0xa0] sm:$0xff] (%p982_p5), %v711_v16 }
  0x41   : > { %v626_v52 = vmul.f32 %v617_v44, %v607_v40  ;;  %v653_v53 = vmul.f32 %v644_v45, %v634_v41  ;;  %v594_v27 = vrot.slane %v1059_v57, %v1034_v39  ;;  %v621_v60 = vrot.slane %v853_v12, %v1034_v39  ;;  %v691_v57 = vld [vmem:[%s1042_s17 + $0x8] sm:$0xff] (%p982_p5)  ;;  %710 = vst [vmem:[%s676_s7 + $0x98] sm:$0xff] (%p982_p5), %v709_v15 }
  0x42   : > { %v602_v58 = vadd.f32 %v599_v48, %v575_v47  ;;  %v576_v59 = vmul.f32 %v570_v49, %v557_v26  ;;  %553 = vst [vmem:[%s1042_s17 + $0x28] sm:$0xff] %v550_v50  ;;  %v655_v61 = vadd.f32 %v652_v46, %v628_v51  ;;  %v648_v56 = vrot.slane %v854_v17, %v1034_v39  ;;  %v689_v39 = vld [vmem:[%s1042_s17] sm:$0xff] (%p982_p5)  ;;  %v707_v14 = vld [vmem:[%s1042_s17 + $0x48] sm:$0xff] (%p982_p5) }
  0x43   : > { %v600_v0 = vmul.f32 %v594_v27, %v581_v54  ;;  %v627_v1 = vmul.f32 %v621_v60, %v608_v55  ;;  %690 = vst [vmem:[%s676_s7] sm:$0xff] (%p982_p5), %v689_v39  ;;  %692 = vst [vmem:[%s676_s7 + $0x8] sm:$0xff] (%p982_p5), %v691_v57 }
  0x44   : > { %v629_v63 = vadd.f32 %v626_v52, %v602_v58  ;;  %658 = vst [vmem:[%s1042_s17 + $0x30] sm:$0xff] %v655_v61  ;;  %v654_v4 = vmul.f32 %v648_v56, %v635_v62  ;;  %708 = vst [vmem:[%s676_s7 + $0x90] sm:$0xff] (%p982_p5), %v707_v14 }
  0x45   : > { %v603_v3 = vadd.f32 %v600_v0, %v576_v59 }
  0x46   : > { %v656_v2 = vadd.f32 %v653_v53, %v629_v63  ;;  %v695_v8 = vld [vmem:[%s1042_s17 + $0x18] sm:$0xff] (%p982_p5)  ;;  %v697_v9 = vld [vmem:[%s1042_s17 + $0x20] sm:$0xff] (%p982_p5) }
  0x47   : > { %v630_v5 = vadd.f32 %v627_v1, %v603_v3  ;;  %673 = sbr.rel (!%p982_p5) target bundleno = 84 (0x54), region = 94  ;;  %696 = vst [vmem:[%s676_s7 + $0x30] sm:$0xff] (%p982_p5), %v695_v8  ;;  %698 = vst [vmem:[%s676_s7 + $0x38] sm:$0xff] (%p982_p5), %v697_v9 }
  0x48   : > { %659 = vst [vmem:[%s1042_s17 + $0x38] sm:$0xff] %v656_v2 }
  0x49   : > { %v657_v6 = vadd.f32 %v654_v4, %v630_v5  ;;  %v699_v10 = vld [vmem:[%s1042_s17 + $0x28] sm:$0xff] (%p982_p5) }
  0x4a   : > { %700 = vst [vmem:[%s676_s7 + $0x40] sm:$0xff] (%p982_p5), %v699_v10 }
  0x4b   : > { %660 = vst [vmem:[%s1042_s17 + $0x40] sm:$0xff] %v657_v6  ;;  %v701_v11 = vld [vmem:[%s1042_s17 + $0x30] sm:$0xff] (%p982_p5) }
  0x4c   : > { %702 = vst [vmem:[%s676_s7 + $0x60] sm:$0xff] %v701_v11 }
  0x4f   : > { %v703_v12 = vld [vmem:[%s1042_s17 + $0x38] sm:$0xff] }
  0x50   : > { %704 = vst [vmem:[%s676_s7 + $0x68] sm:$0xff] %v703_v12 }
  0x52   : > { %v705_v13 = vld [vmem:[%s1042_s17 + $0x40] sm:$0xff] }
  0x53   : > { %706 = vst [vmem:[%s676_s7 + $0x70] sm:$0xff] %v705_v13 }
  0x54 PF: > { %p13_p11 = scmp.ge.s32.totalorder %s966_s25, 4   ;;  %s1155_s21 = smov %s906_s22 }
  0x55   : > { %s1156_s22 = smov %s976_s28  ;;  %s1157_s23 = smov %s966_s25 }
  0x56   :  { %15 = sbr.rel (!%p13_p11) target bundleno = 2 (0x2), region = 174 }

// kernel: decoder3_forward_impl.11
= control target key start
LH: loop header
LB: loop body
LE: loop exit
PB: predicated region body
PF: predicated region fallthrough
CT: control target
= control target key end

     0   :  { %s2400_s18 = smov 0   ;;  %s2402_s19 = smov 0   ;;  %s2804_s0 = inlined_call_operand.vmem [shape: f32[32,768], index: 0, kind: input, shape index: {}]   ;;  %s2805_s1 = inlined_call_operand.vmem [shape: f32[9,16,16], index: 1, kind: input, shape index: {}]   ;;  %s2806_s2 = inlined_call_operand.vmem [shape: f32[16,1], index: 2, kind: input, shape index: {}]   ;;  %s2807_s3 = inlined_call_operand.vmem [shape: f32[1,768], index: 3, kind: input, shape index: {}]   ;;  %s2808_s4 = inlined_call_operand.vmem [shape: f32[16,1], index: 4, kind: input, shape index: {}]   ;;  %s2809_s5 = inlined_call_operand.vmem [shape: f32[32,768], index: 5, kind: output, shape index: {}]  }
   0x1   :  { %s2404_s20 = smov 0  }
   0x2 LB: > { %s2416_s21 = sadd.s32 4294967295, %s2358_s20   ;;  %s2419_s22 = sadd.s32 1, %s2358_s20   ;;  %s2358_s20 = sphi %s2404_s20, %s2813_s20   ;;  %s2354_s19 = sphi %s2402_s19, %s2812_s19   ;;  %s2350_s18 = sphi %s2400_s18, %s2811_s18  }
   0x3   : > { %s19_s23 = ssub.s32 %s2358_s20, %s2419_s22  ;;  %s22_s24 = sadd.s32 1, %s2354_s19 }
   0x4   : > { %p20_p0 = scmp.eq.s32.totalorder %s19_s23, 0  ;;  %p29_p1 = scmp.ne.s32.totalorder %s2354_s19, %s2350_s18 }
   0x5   : > { %p30_p2 = scmp.eq.s32.totalorder %s2358_s20, 0  ;;  %p148_p3 = scmp.eq.s32.totalorder %s2416_s21, 1 }
   0x6   : > { %s2429_s25 = scalar_select %p20_p0, %s2354_s19, %s22_s24  }
   0x7   : > { %p31_p4 = por %p30_p2, %p29_p1  ;;  %p2431_p5 = por %p148_p3, %p29_p1 }
   0x8   : > { %p2139_p6 = scmp.ge.s32.totalorder %s2358_s20, 2 }
   0xa   : > { %179 = sbr.rel (%p2139_p6) target bundleno = 26 (0x1a), region = 28 }
   0xf   : > { %182 = sbr.rel (!%p31_p4) target bundleno = 26 (0x1a), region = 32  ;;  %s184_s27 = sand.u32 (%p31_p4), 1, %s2354_s19  }
  0x10   : > { %s2197_s28 = smul.u32 (%p31_p4), 24, %s2358_s20 }
  0x11   : > { %s2298_s29 = smul.u32 (%p31_p4), 96, %s184_s27 }
  0x12   : > { %s189_s7 = scalar_lea.vmem (%p31_p4), %s2804_s0, %s2197_s28 }
  0x13   : > { %v202_v0 = vld [vmem:[%s189_s7] sm:$0xff] (%p31_p4)  ;;  %v204_v1 = vld [vmem:[%s189_s7 + $0x8] sm:$0xff] (%p31_p4)  ;;  %v206_v2 = vld [vmem:[%s189_s7 + $0x10] sm:$0xff] (%p31_p4)  ;;  %s186_s8 = scalar_lea.vmem (%p31_p4), [#allocation2], %s2298_s29 }
  0x14   : > { %203 = vst [vmem:[%s186_s8] sm:$0xff] %v202_v0  ;;  %205 = vst [vmem:[%s186_s8 + $0x8] sm:$0xff] %v204_v1  ;;  %v208_v3 = vld [vmem:[%s189_s7 + $0x30] sm:$0xff]  ;;  %v210_v4 = vld [vmem:[%s189_s7 + $0x38] sm:$0xff] }
  0x15   : > { %207 = vst [vmem:[%s186_s8 + $0x10] sm:$0xff] %v206_v2  ;;  %v212_v5 = vld [vmem:[%s189_s7 + $0x40] sm:$0xff]  ;;  %209 = vst [vmem:[%s186_s8 + $0x18] sm:$0xff] %v208_v3  ;;  %v216_v7 = vld [vmem:[%s189_s7 + $0x68] sm:$0xff] }
  0x16   : > { %211 = vst [vmem:[%s186_s8 + $0x20] sm:$0xff] %v210_v4  ;;  %213 = vst [vmem:[%s186_s8 + $0x28] sm:$0xff] %v212_v5  ;;  %v214_v6 = vld [vmem:[%s189_s7 + $0x60] sm:$0xff]  ;;  %v218_v8 = vld [vmem:[%s189_s7 + $0x70] sm:$0xff] }
  0x17   : > { %215 = vst [vmem:[%s186_s8 + $0x30] sm:$0xff] %v214_v6  ;;  %217 = vst [vmem:[%s186_s8 + $0x38] sm:$0xff] %v216_v7  ;;  %v220_v9 = vld [vmem:[%s189_s7 + $0x90] sm:$0xff]  ;;  %v222_v10 = vld [vmem:[%s189_s7 + $0x98] sm:$0xff] }
  0x18   : > { %219 = vst [vmem:[%s186_s8 + $0x40] sm:$0xff] %v218_v8  ;;  %v224_v11 = vld [vmem:[%s189_s7 + $0xa0] sm:$0xff]  ;;  %221 = vst [vmem:[%s186_s8 + $0x48] sm:$0xff] %v220_v9 }
  0x19   : > { %223 = vst [vmem:[%s186_s8 + $0x50] sm:$0xff] %v222_v10  ;;  %225 = vst [vmem:[%s186_s8 + $0x58] sm:$0xff] %v224_v11 }
  0x1a PF: > { %p2141_p7 = scmp.ge.s32.totalorder %s2358_s20, 1  ;;  %p238_p8 = scmp.lt.s32.totalorder %s2358_s20, 3 }
  0x1c   : > { %p239_p9 = pnand %p2141_p7, %p238_p8 }
  0x1d   : > { %s245_s9 = sand.u32 (!%p239_p9), 1, %s2350_s18   ;;  %s2360_s12 = smov (!%p239_p9), 18  }
  0x1e   : > { %242 = sbr.rel (%p239_p9) target bundleno = 465 (0x1d1), region = 59  ;;  %s2362_s15 = smov (!%p239_p9), 19  }
  0x1f   : > { %s2444_s10 = smul.u32 (!%p239_p9), 96, %s245_s9  ;;  %s2363_s16 = smov (!%p239_p9), 17  }
  0x20   : > { %s2364_s17 = smov (!%p239_p9), 1   ;;  %s2365_s18 = smov (!%p239_p9), 127  }
  0x21   : > { %s2447_s11 = scalar_lea.vmem (!%p239_p9), [#allocation2], %s2444_s10  ;;  %s2366_s20 = smov (!%p239_p9), 111  }
  0x22   : > { %s2367_s23 = smov (!%p239_p9), 110   ;;  %s2368_s24 = smov (!%p239_p9), 109  }
  0x23   : > { %v2450_v12 = vld [vmem:[%s2447_s11 + $0x58] sm:$0xff]  ;;  %v2453_v13 = vld [vmem:[%s2447_s11 + $0x48] sm:$0xff]  ;;  %v2458_v14 = vld [vmem:[%s2447_s11 + $0x50] sm:$0xff]  ;;  %vm345_vm0 = vcmask 130048   ;;  %v2361_v19 = vmov 0.0   ;;  %v2369_v20 = vmov 0   ;;  %v312_v25 = vlaneseq }
  0x24   : > { %333 = vrot.lane.b32.xlu1 %v2450_v12, %s2360_s12  ;;  %325 = vrot.lane.b32.xlu0 %v2453_v13, %s2360_s12  ;;  %v2461_v15 = vld [vmem:[%s2447_s11 + $0x30] sm:$0xff]  ;;  %v2473_v17 = vld [vmem:[%s2447_s11 + $0x38] sm:$0xff]  ;;  %s2748_s8 = scalar_lea.vmem [#allocation3], %s2444_s10  ;;  %s276_s10 = smul.u32 3, %s2416_s21 }
  0x25   : > { %v2466_v16 = vld [vmem:[%s2805_s1 + $0x10] sm:$0xff]  ;;  %v2476_v18 = vld [vmem:[%s2447_s11 + $0x40] sm:$0xff]  ;;  %416 = vmatprep.mubr.f32.mxu0 %v2361_v19  ;;  %2335 = vset.pattern.permute.xlu1 %v2369_v20  ;;  %v1946_v22 = vld [vmem:[%s2806_s2 + $0x8] sm:$0xff]  ;;  %v2536_v26 = vand.u32 127, %v312_v25  ;;  %s2198_s13 = smul.u32 (%p2431_p5), 24, %s2416_s21 }
  0x26   : > { %2239 = vmatprep.mubr.msk.f32.mxu1 %vm345_vm0, %v2466_v16  ;;  %2334 = vset.pattern.permute.xlu0 %v2369_v20  ;;  %v1945_v21 = vld [vmem:[%s2806_s2] sm:$0xff]  ;;  %v1964_v23 = vld [vmem:[%s2808_s4 + $0x8] sm:$0xff]  ;;  %v2143_v39 = vld [vmem:[%s2805_s1 + $0x18] sm:$0xff]  ;;  %p277_p10 = scmp.lt.s32.totalorder %s276_s10, 5 }
  0x27   : > { %v1963_v24 = vld [vmem:[%s2808_s4] sm:$0xff]  ;;  %vm335_vm1 = vcmp.lt.s32.totalorder %v2536_v26, 18  ;;  %vm314_vm2 = vcmp.lt.s32.totalorder %v2536_v26, 19  ;;  %v322_v53 = vld [vmem:[%s2805_s1 + $0x8] sm:$0xff]  ;;  %vm674_vm3 = vcmp.lt.s32.totalorder %v2536_v26, 17  ;;  %vm860_vm4 = vcmp.lt.s32.totalorder %v2536_v26, 1 }
  0x28   : > { %329 = vrot.lane.b32.xlu0 %v2458_v14, %s2360_s12  ;;  %323 = vrot.lane.b32.xlu1 %v2461_v15, %s2360_s12  ;;  %v321_v43 = vld [vmem:[%s2805_s1] sm:$0xff]  ;;  %v2153_v3 = vld [vmem:[%s2805_s1 + $0x28] sm:$0xff]  ;;  %vm1213_vm5 = vcmp.lt.s32.totalorder %v2536_v26, 127  ;;  %vm1399_vm6 = vcmp.lt.s32.totalorder %v2536_v26, 111  ;;  %vm1585_vm7 = vcmp.lt.s32.totalorder %v2536_v26, 110  ;;  %vm1771_vm8 = vcmp.lt.s32.totalorder %v2536_v26, 109 }
  0x29   : > { %v2152_v57 = vld [vmem:[%s2805_s1 + $0x20] sm:$0xff]  ;;  %v2158_v7 = vld [vmem:[%s2805_s1 + $0x30] sm:$0xff]  ;;  %s2815_s10 = smov (!%p277_p10, %s276_s10), 5 }
  0x2a   : > { %v282_v26 = vld [vmem:[%s2447_s11] sm:$0xff] }
  0x2b   : > { %288 = vst [vmem:[%s2748_s8] sm:$0xff] %v282_v26 }
  0x2c   : > { %327 = vrot.lane.b32.xlu0 %v2473_v17, %s2360_s12  ;;  %331 = vrot.lane.b32.xlu1 %v2476_v18, %s2360_s12  ;;  %s279_s12 = scalar_lea.vmem %s2807_s3, %s2815_s10 }
  0x30   : > { %302 = vrot.lane.b32.xlu0 %v2453_v13, %s2362_s15  ;;  %306 = vrot.lane.b32.xlu1 %v2458_v14, %s2362_s15 }
  0x34   : > { %310 = vrot.lane.b32.xlu0 %v2450_v12, %s2362_s15  ;;  %300 = vrot.lane.b32.xlu1 %v2461_v15, %s2362_s15 }
  0x38   : > { %304 = vrot.lane.b32.xlu0 %v2473_v17, %s2362_s15  ;;  %308 = vrot.lane.b32.xlu1 %v2476_v18, %s2362_s15  ;;  %s2031_s15 = scalar_lea.vmem (%p2431_p5), %s2809_s5, %s2198_s13 }
  0x3c   : > { %664 = vrot.lane.b32.xlu0 %v2453_v13, %s2363_s16  ;;  %668 = vrot.lane.b32.xlu1 %v2458_v14, %s2363_s16 }
  0x40   : > { %672 = vrot.lane.b32.xlu0 %v2450_v12, %s2363_s16  ;;  %662 = vrot.lane.b32.xlu1 %v2461_v15, %s2363_s16 }
  0x44   : > { %666 = vrot.lane.b32.xlu0 %v2473_v17, %s2363_s16  ;;  %670 = vrot.lane.b32.xlu1 %v2476_v18, %s2363_s16 }
  0x48   : > { %850 = vrot.lane.b32.xlu0 %v2453_v13, %s2364_s17  ;;  %854 = vrot.lane.b32.xlu1 %v2458_v14, %s2364_s17 }
  0x4c   : > { %858 = vrot.lane.b32.xlu0 %v2450_v12, %s2364_s17  ;;  %848 = vrot.lane.b32.xlu1 %v2461_v15, %s2364_s17 }
  0x50   : > { %852 = vrot.lane.b32.xlu0 %v2473_v17, %s2364_s17  ;;  %856 = vrot.lane.b32.xlu1 %v2476_v18, %s2364_s17 }
  0x54   : > { %1203 = vrot.lane.b32.xlu0 %v2453_v13, %s2365_s18  ;;  %1207 = vrot.lane.b32.xlu1 %v2458_v14, %s2365_s18 }
  0x58   : > { %1211 = vrot.lane.b32.xlu0 %v2450_v12, %s2365_s18  ;;  %1201 = vrot.lane.b32.xlu1 %v2461_v15, %s2365_s18 }
  0x5c   : > { %1205 = vrot.lane.b32.xlu0 %v2473_v17, %s2365_s18  ;;  %1209 = vrot.lane.b32.xlu1 %v2476_v18, %s2365_s18 }
  0x60   : > { %1393 = vrot.lane.b32.xlu0 %v2458_v14, %s2366_s20  ;;  %1397 = vrot.lane.b32.xlu1 %v2450_v12, %s2366_s20 }
  0x64   : > { %1389 = vrot.lane.b32.xlu0 %v2453_v13, %s2366_s20  ;;  %1391 = vrot.lane.b32.xlu1 %v2473_v17, %s2366_s20 }
  0x68   : > { %1395 = vrot.lane.b32.xlu0 %v2476_v18, %s2366_s20  ;;  %1387 = vrot.lane.b32.xlu1 %v2461_v15, %s2366_s20 }
  0x6c   : > { %1575 = vrot.lane.b32.xlu0 %v2453_v13, %s2367_s23  ;;  %1579 = vrot.lane.b32.xlu1 %v2458_v14, %s2367_s23 }
  0x70   : > { %1583 = vrot.lane.b32.xlu0 %v2450_v12, %s2367_s23  ;;  %1573 = vrot.lane.b32.xlu1 %v2461_v15, %s2367_s23 }
  0x74   : > { %1577 = vrot.lane.b32.xlu0 %v2473_v17, %s2367_s23  ;;  %1581 = vrot.lane.b32.xlu1 %v2476_v18, %s2367_s23 }
  0x78   : > { %1765 = vrot.lane.b32.xlu0 %v2458_v14, %s2368_s24  ;;  %1769 = vrot.lane.b32.xlu1 %v2450_v12, %s2368_s24 }
  0x7c   : > { %1761 = vrot.lane.b32.xlu0 %v2453_v13, %s2368_s24  ;;  %1763 = vrot.lane.b32.xlu1 %v2473_v17, %s2368_s24 }
  0x80   : > { %1767 = vrot.lane.b32.xlu0 %v2476_v18, %s2368_s24  ;;  %1759 = vrot.lane.b32.xlu1 %v2461_v15, %s2368_s24 }
  0x84   : > { %1949 = vperm.xlu0 %2334, %v1945_v21   ;;  %1954 = vperm.xlu1 %2335, %v1946_v22  }
  0x88   : > { %1978 = vperm.xlu0 %2334, %v1964_v23   ;;  %1973 = vperm.xlu1 %2335, %v1963_v24   ;;  %v2159_v24 = vld [vmem:[%s2805_s1 + $0x38] sm:$0xff] }
  0x96   : > { %v334_v27 = vpop.permute.xlu1 %333  ;;  %v326_v28 = vpop.permute.xlu0 %325 }
  0x97   : > { %v341_v33 = vsel %vm335_vm1, %v334_v27, %v326_v28 }
  0x9a   : > { %v330_v29 = vpop.permute.xlu0 %329  ;;  %v324_v30 = vpop.permute.xlu1 %323 }
  0x9b   : > { %v339_v31 = vsel %vm335_vm1, %v326_v28, %v330_v29  ;;  %v337_v32 = vsel %vm335_vm1, %v330_v29, %v334_v27  ;;  %v2164_v29 = vld [vmem:[%s2805_s1 + $0x40] sm:$0xff] }
  0x9c   : > { %380 = vmatprep.subr.mxu0 %v339_v31  ;;  %2235 = vmatprep.subr.mxu1 %v337_v32 }
  0x9d   : > { %381 = vmatpush1.msra.mxu0 %v341_v33  ;;  %2236 = vmatpush3.msra.mxu1 %v337_v32 }
  0x9e   : > { %v328_v34 = vpop.permute.xlu0 %327  ;;  %v332_v35 = vpop.permute.xlu1 %331 }
  0x9f   : > { %v338_v36 = vsel %vm335_vm1, %v324_v30, %v328_v34  ;;  %v336_v37 = vsel %vm335_vm1, %v328_v34, %v332_v35  ;;  %v340_v38 = vsel %vm335_vm1, %v332_v35, %v324_v30  ;;  %v2170_v35 = vld [vmem:[%s2805_s1 + $0x50] sm:$0xff] }
  0xa0   : > { %382 = vmatprep.subr.mxu0 %v338_v36  ;;  %2237 = vmatprep.subr.mxu1 %v336_v37  ;;  %v2171_v36 = vld [vmem:[%s2805_s1 + $0x58] sm:$0xff] }
  0xa1   : > { %383 = vmatpush1.msra.mxu0 %v340_v38  ;;  %2238 = vmatpush3.msra.mxu1 %v336_v37 }
  0xa2   : > { %v303_v40 = vpop.permute.xlu0 %302  ;;  %v307_v41 = vpop.permute.xlu1 %306  ;;  %2240 = vmatmul.mubr.msk.f32.vlgmr.msra.gmra.mxu1 %vm345_vm0, %v2143_v39  ;;  %2144 = vmatmul.mubr.msk.f32.vlgmr.msra.gmra.mxu0 %vm345_vm0, %v2466_v16 }
  0xa3   : > { %v318_v42 = vsel %vm314_vm2, %v303_v40, %v307_v41  ;;  %422 = vmatprep.mubr.f32.mxu0 %v2361_v19  ;;  %574 = vmatprep.mubr.f32.mxu1 %v2361_v19 }
  0xa4   : > { %538 = vmatprep.subr.mxu1 %v318_v42  ;;  %v2176_v42 = vld [vmem:[%s2805_s1 + $0x60] sm:$0xff] }
  0xa6   : > { %v311_v44 = vpop.permute.xlu0 %310  ;;  %v301_v45 = vpop.permute.xlu1 %300  ;;  %2145 = vmatmul.mubr.msk.f32.gmra.mxu0 %vm345_vm0, %v2143_v39 }
  0xa7   : > { %v320_v46 = vsel %vm314_vm2, %v311_v44, %v303_v40  ;;  %v316_v47 = vsel %vm314_vm2, %v307_v41, %v311_v44  ;;  %2246 = vmatprep.mubr.msk.f32.mxu0 %vm345_vm0, %v321_v43 }
  0xa8   : > { %539 = vmatpush1.msra.mxu1 %v320_v46  ;;  %2242 = vmatprep.subr.mxu0 %v316_v47 }
  0xa9   : > { %2243 = vmatpush3.msra.mxu0 %v316_v47 }
  0xaa   : > { %v305_v48 = vpop.permute.xlu0 %304  ;;  %v309_v49 = vpop.permute.xlu1 %308 }
  0xab   : > { %v319_v50 = vsel %vm314_vm2, %v309_v49, %v301_v45  ;;  %v317_v51 = vsel %vm314_vm2, %v301_v45, %v305_v48  ;;  %v315_v52 = vsel %vm314_vm2, %v305_v48, %v309_v49 }
  0xac   : > { %540 = vmatprep.subr.mxu1 %v317_v51  ;;  %2244 = vmatprep.subr.mxu0 %v315_v52 }
  0xad   : > { %541 = vmatpush1.msra.mxu1 %v319_v50  ;;  %2245 = vmatpush3.msra.mxu0 %v315_v52  ;;  %v2177_v50 = vld [vmem:[%s2805_s1 + $0x68] sm:$0xff] }
  0xae   : > { %v665_v54 = vpop.permute.xlu0 %664  ;;  %v669_v55 = vpop.permute.xlu1 %668  ;;  %2247 = vmatmul.mubr.msk.f32.vlgmr.msra.gmra.mxu0 %vm345_vm0, %v322_v53  ;;  %2148 = vmatmul.mubr.msk.f32.vlgmr.msra.gmra.mxu1 %vm345_vm0, %v321_v43 }
  0xaf   : > { %v678_v56 = vsel %vm674_vm3, %v665_v54, %v669_v55  ;;  %580 = vmatprep.mubr.f32.mxu1 %v2361_v19  ;;  %754 = vmatprep.mubr.f32.mxu0 %v2361_v19 }
  0xb0   : > { %718 = vmatprep.subr.mxu0 %v678_v56 }
  0xb2   : > { %v673_v58 = vpop.permute.xlu0 %672  ;;  %v663_v59 = vpop.permute.xlu1 %662  ;;  %2149 = vmatmul.mubr.msk.f32.gmra.mxu1 %vm345_vm0, %v322_v53  ;;  %v2182_v53 = vld [vmem:[%s2805_s1 + $0x70] sm:$0xff] }
  0xb3   : > { %v680_v60 = vsel %vm674_vm3, %v673_v58, %v665_v54  ;;  %v676_v61 = vsel %vm674_vm3, %v669_v55, %v673_v58  ;;  %2253 = vmatprep.mubr.msk.f32.mxu1 %vm345_vm0, %v2152_v57 }
  0xb4   : > { %719 = vmatpush1.msra.mxu0 %v680_v60  ;;  %2249 = vmatprep.subr.mxu1 %v676_v61 }
  0xb5   : > { %2250 = vmatpush3.msra.mxu1 %v676_v61 }
  0xb6   : > { %v667_v62 = vpop.permute.xlu0 %666  ;;  %v671_v63 = vpop.permute.xlu1 %670 }
  0xb7   : > { %v679_v0 = vsel %vm674_vm3, %v671_v63, %v663_v59  ;;  %v677_v1 = vsel %vm674_vm3, %v663_v59, %v667_v62  ;;  %v675_v2 = vsel %vm674_vm3, %v667_v62, %v671_v63 }
  0xb8   : > { %720 = vmatprep.subr.mxu0 %v677_v1  ;;  %2251 = vmatprep.subr.mxu1 %v675_v2 }
  0xb9   : > { %721 = vmatpush1.msra.mxu0 %v679_v0  ;;  %2252 = vmatpush3.msra.mxu1 %v675_v2  ;;  %v2183_v0 = vld [vmem:[%s2805_s1 + $0x78] sm:$0xff] }
  0xba   : > { %v851_v4 = vpop.permute.xlu0 %850  ;;  %v855_v5 = vpop.permute.xlu1 %854  ;;  %2154 = vmatmul.mubr.msk.f32.vlgmr.msra.gmra.mxu0 %vm345_vm0, %v2152_v57  ;;  %2254 = vmatmul.mubr.msk.f32.vlgmr.msra.gmra.mxu1 %vm345_vm0, %v2153_v3 }
  0xbb   : > { %v864_v6 = vsel %vm860_vm4, %v851_v4, %v855_v5  ;;  %760 = vmatprep.mubr.f32.mxu0 %v2361_v19  ;;  %940 = vmatprep.mubr.f32.mxu1 %v2361_v19 }
  0xbc   : > { %904 = vmatprep.subr.mxu1 %v864_v6 }
  0xbe   : > { %v859_v8 = vpop.permute.xlu0 %858  ;;  %v849_v9 = vpop.permute.xlu1 %848  ;;  %2155 = vmatmul.mubr.msk.f32.gmra.mxu0 %vm345_vm0, %v2153_v3 }
  0xbf   : > { %v866_v10 = vsel %vm860_vm4, %v859_v8, %v851_v4  ;;  %v862_v11 = vsel %vm860_vm4, %v855_v5, %v859_v8  ;;  %2260 = vmatprep.mubr.msk.f32.mxu0 %vm345_vm0, %v2158_v7  ;;  %v2188_v4 = vld [vmem:[%s2805_s1 + $0x80] sm:$0xff] }
  0xc0   : > { %905 = vmatpush1.msra.mxu1 %v866_v10  ;;  %2256 = vmatprep.subr.mxu0 %v862_v11 }
  0xc1   : > { %2257 = vmatpush3.msra.mxu0 %v862_v11 }
  0xc2   : > { %v853_v16 = vpop.permute.xlu0 %852  ;;  %v857_v20 = vpop.permute.xlu1 %856 }
  0xc3   : > { %v865_v21 = vsel %vm860_vm4, %v857_v20, %v849_v9  ;;  %v863_v22 = vsel %vm860_vm4, %v849_v9, %v853_v16  ;;  %v861_v23 = vsel %vm860_vm4, %v853_v16, %v857_v20 }
  0xc4   : > { %906 = vmatprep.subr.mxu1 %v863_v22  ;;  %2258 = vmatprep.subr.mxu0 %v861_v23  ;;  %v283_v22 = vld [vmem:[%s2447_s11 + $0x8] sm:$0xff] }
  0xc5   : > { %907 = vmatpush1.msra.mxu1 %v865_v21  ;;  %2259 = vmatpush3.msra.mxu0 %v861_v23  ;;  %v2189_v21 = vld [vmem:[%s2805_s1 + $0x88] sm:$0xff]  ;;  %v284_v23 = vld [vmem:[%s2447_s11 + $0x10] sm:$0xff]  ;;  %289 = vst [vmem:[%s2748_s8 + $0x8] sm:$0xff] %v283_v22 }
  0xc6   : > { %v1204_v27 = vpop.permute.xlu0 %1203  ;;  %2160 = vmatmul.mubr.msk.f32.vlgmr.msra.gmra.mxu1 %vm345_vm0, %v2158_v7  ;;  %2261 = vmatmul.mubr.msk.f32.vlgmr.msra.gmra.mxu0 %vm345_vm0, %v2159_v24  ;;  %v1208_v28 = vpop.permute.xlu1 %1207  ;;  %290 = vst [vmem:[%s2748_s8 + $0x10] sm:$0xff] %v284_v23 }
  0xc7   : > { %1071 = vmatprep.subr.mxu0 %v2458_v14  ;;  %2263 = vmatprep.subr.mxu1 %v2450_v12 }
  0xc8   : > { %1072 = vmatpush1.msra.mxu0 %v2453_v13  ;;  %946 = vmatprep.mubr.f32.mxu1 %v2361_v19 }
  0xc9   : > { %1073 = vmatprep.subr.mxu0 %v2473_v17  ;;  %1107 = vmatprep.mubr.f32.mxu0 %v2361_v19 }
  0xca   : > { %1074 = vmatpush1.msra.mxu0 %v2461_v15  ;;  %2264 = vmatpush3.msra.mxu1 %v2450_v12  ;;  %v1212_v14 = vpop.permute.xlu0 %1211  ;;  %v1202_v30 = vpop.permute.xlu1 %1201  ;;  %v2165_v15 = vld [vmem:[%s2805_s1 + $0x48] sm:$0xff]  ;;  %v1217_v12 = vsel %vm1213_vm5, %v1204_v27, %v1208_v28 }
  0xcb   : > { %2161 = vmatmul.mubr.msk.f32.gmra.mxu1 %vm345_vm0, %v2159_v24  ;;  %2166 = vmatmul.mubr.msk.f32.vlgmr.msra.gmra.mxu0 %vm345_vm0, %v2164_v29  ;;  %v1215_v13 = vsel %vm1213_vm5, %v1208_v28, %v1212_v14  ;;  %v1219_v17 = vsel %vm1213_vm5, %v1212_v14, %v1204_v27  ;;  %v285_v24 = vld [vmem:[%s2447_s11 + $0x18] sm:$0xff]  ;;  %v286_v27 = vld [vmem:[%s2447_s11 + $0x20] sm:$0xff]  ;;  %v287_v28 = vld [vmem:[%s2447_s11 + $0x28] sm:$0xff] }
  0xcc   : > { %2265 = vmatprep.subr.mxu1 %v2476_v18  ;;  %2270 = vmatprep.subr.mxu0 %v1219_v17  ;;  %291 = vst [vmem:[%s2748_s8 + $0x18] sm:$0xff] %v285_v24  ;;  %292 = vst [vmem:[%s2748_s8 + $0x20] sm:$0xff] %v286_v27 }
  0xcd   : > { %2266 = vmatpush3.msra.mxu1 %v2476_v18  ;;  %1113 = vmatprep.mubr.f32.mxu0 %v2361_v19  ;;  %293 = vst [vmem:[%s2748_s8 + $0x28] sm:$0xff] %v287_v28 }
  0xce   : > { %1257 = vmatprep.subr.mxu1 %v1215_v13  ;;  %2267 = vmatprep.mubr.msk.f32.mxu1 %vm345_vm0, %v2164_v29  ;;  %v1206_v31 = vpop.permute.xlu0 %1205  ;;  %v1210_v32 = vpop.permute.xlu1 %1209 }
  0xcf   : > { %2271 = vmatpush3.msra.mxu0 %v1219_v17  ;;  %v1216_v33 = vsel %vm1213_vm5, %v1202_v30, %v1206_v31  ;;  %2268 = vmatmul.mubr.msk.f32.vlgmr.msra.gmra.mxu1 %vm345_vm0, %v2165_v15  ;;  %v1214_v34 = vsel %vm1213_vm5, %v1206_v31, %v1210_v32  ;;  %v1218_v18 = vsel %vm1213_vm5, %v1210_v32, %v1202_v30 }
  0xd0   : > { %2167 = vmatmul.mubr.msk.f32.gmra.mxu0 %vm345_vm0, %v2165_v15  ;;  %1258 = vmatpush1.msra.mxu1 %v1217_v12 }
  0xd1   : > { %1259 = vmatprep.subr.mxu1 %v1214_v34  ;;  %2272 = vmatprep.subr.mxu0 %v1218_v18 }
  0xd2   : > { %1260 = vmatpush1.msra.mxu1 %v1216_v33  ;;  %1293 = vmatprep.mubr.f32.mxu1 %v2361_v19  ;;  %v1394_v37 = vpop.permute.xlu0 %1393  ;;  %v1398_v38 = vpop.permute.xlu1 %1397 }
  0xd3   : > { %2273 = vmatpush3.msra.mxu0 %v1218_v18  ;;  %2274 = vmatprep.mubr.msk.f32.mxu0 %vm345_vm0, %v2170_v35  ;;  %v1401_v39 = vsel %vm1399_vm6, %v1394_v37, %v1398_v38 }
  0xd4   : > { %2172 = vmatmul.mubr.msk.f32.vlgmr.msra.gmra.mxu1 %vm345_vm0, %v2170_v35  ;;  %2275 = vmatmul.mubr.msk.f32.vlgmr.msra.gmra.mxu0 %vm345_vm0, %v2171_v36 }
  0xd5   : > { %1443 = vmatprep.subr.mxu0 %v1401_v39  ;;  %1299 = vmatprep.mubr.f32.mxu1 %v2361_v19 }
  0xd6   : > { %v1390_v40 = vpop.permute.xlu0 %1389  ;;  %v1392_v41 = vpop.permute.xlu1 %1391  ;;  %1479 = vmatprep.mubr.f32.mxu0 %v2361_v19 }
  0xd7   : > { %v1403_v43 = vsel %vm1399_vm6, %v1390_v40, %v1394_v37  ;;  %v1405_v44 = vsel %vm1399_vm6, %v1398_v38, %v1390_v40 }
  0xd8   : > { %2173 = vmatmul.mubr.msk.f32.gmra.mxu1 %vm345_vm0, %v2171_v36  ;;  %1444 = vmatpush1.msra.mxu0 %v1403_v43 }
  0xd9   : > { %2277 = vmatprep.subr.mxu1 %v1405_v44  ;;  %2281 = vmatprep.mubr.msk.f32.mxu1 %vm345_vm0, %v2176_v42 }
  0xda   : > { %2278 = vmatpush3.msra.mxu1 %v1405_v44  ;;  %v1396_v45 = vpop.permute.xlu0 %1395  ;;  %v1388_v46 = vpop.permute.xlu1 %1387 }
  0xdb   : > { %v1402_v47 = vsel %vm1399_vm6, %v1388_v46, %v1392_v41  ;;  %v1400_v48 = vsel %vm1399_vm6, %v1392_v41, %v1396_v45  ;;  %v1404_v49 = vsel %vm1399_vm6, %v1396_v45, %v1388_v46 }
  0xdc   : > { %1445 = vmatprep.subr.mxu0 %v1400_v48  ;;  %2279 = vmatprep.subr.mxu1 %v1404_v49 }
  0xdd   : > { %1446 = vmatpush1.msra.mxu0 %v1402_v47  ;;  %2280 = vmatpush3.msra.mxu1 %v1404_v49 }
  0xde   : > { %v1576_v51 = vpop.permute.xlu0 %1575  ;;  %2178 = vmatmul.mubr.msk.f32.vlgmr.msra.gmra.mxu0 %vm345_vm0, %v2176_v42  ;;  %2282 = vmatmul.mubr.msk.f32.vlgmr.msra.gmra.mxu1 %vm345_vm0, %v2177_v50  ;;  %v1580_v52 = vpop.permute.xlu1 %1579 }
  0xdf   : > { %1485 = vmatprep.mubr.f32.mxu0 %v2361_v19  ;;  %1665 = vmatprep.mubr.f32.mxu1 %v2361_v19  ;;  %v1589_v58 = vsel %vm1585_vm7, %v1576_v51, %v1580_v52 }
  0xe2   : > { %v1584_v54 = vpop.permute.xlu0 %1583  ;;  %2179 = vmatmul.mubr.msk.f32.gmra.mxu0 %vm345_vm0, %v2177_v50  ;;  %v1574_v55 = vpop.permute.xlu1 %1573 }
  0xe3   : > { %v1587_v56 = vsel %vm1585_vm7, %v1580_v52, %v1584_v54  ;;  %v1591_v57 = vsel %vm1585_vm7, %v1584_v54, %v1576_v51  ;;  %2288 = vmatprep.mubr.msk.f32.mxu0 %vm345_vm0, %v2182_v53 }
  0xe4   : > { %1629 = vmatprep.subr.mxu1 %v1587_v56  ;;  %2284 = vmatprep.subr.mxu0 %v1591_v57 }
  0xe5   : > { %1630 = vmatpush1.msra.mxu1 %v1589_v58  ;;  %2285 = vmatpush3.msra.mxu0 %v1591_v57 }
  0xe6   : > { %v1578_v59 = vpop.permute.xlu0 %1577  ;;  %v1582_v60 = vpop.permute.xlu1 %1581 }
  0xe7   : > { %v1588_v61 = vsel %vm1585_vm7, %v1574_v55, %v1578_v59  ;;  %v1586_v62 = vsel %vm1585_vm7, %v1578_v59, %v1582_v60  ;;  %v1590_v63 = vsel %vm1585_vm7, %v1582_v60, %v1574_v55 }
  0xe8   : > { %1631 = vmatprep.subr.mxu1 %v1586_v62  ;;  %2286 = vmatprep.subr.mxu0 %v1590_v63 }
  0xe9   : > { %1632 = vmatpush1.msra.mxu1 %v1588_v61  ;;  %2287 = vmatpush3.msra.mxu0 %v1590_v63 }
  0xea   : > { %v1766_v1 = vpop.permute.xlu0 %1765  ;;  %2184 = vmatmul.mubr.msk.f32.vlgmr.msra.gmra.mxu1 %vm345_vm0, %v2182_v53  ;;  %2289 = vmatmul.mubr.msk.f32.vlgmr.msra.gmra.mxu0 %vm345_vm0, %v2183_v0  ;;  %v1770_v2 = vpop.permute.xlu1 %1769 }
  0xeb   : > { %v1773_v3 = vsel %vm1771_vm8, %v1766_v1, %v1770_v2  ;;  %1671 = vmatprep.mubr.f32.mxu1 %v2361_v19  ;;  %1851 = vmatprep.mubr.f32.mxu0 %v2361_v19 }
  0xec   : > { %1815 = vmatprep.subr.mxu0 %v1773_v3 }
  0xee   : > { %v1762_v5 = vpop.permute.xlu0 %1761  ;;  %2185 = vmatmul.mubr.msk.f32.gmra.mxu1 %vm345_vm0, %v2183_v0  ;;  %v1764_v6 = vpop.permute.xlu1 %1763 }
  0xef   : > { %v1775_v7 = vsel %vm1771_vm8, %v1762_v5, %v1766_v1  ;;  %v1777_v8 = vsel %vm1771_vm8, %v1770_v2, %v1762_v5  ;;  %2295 = vmatprep.mubr.msk.f32.mxu1 %vm345_vm0, %v2188_v4 }
  0xf0   : > { %1816 = vmatpush1.msra.mxu0 %v1775_v7  ;;  %2291 = vmatprep.subr.mxu1 %v1777_v8 }
  0xf1   : > { %2292 = vmatpush3.msra.mxu1 %v1777_v8 }
  0xf2   : > { %v1768_v9 = vpop.permute.xlu0 %1767  ;;  %v1760_v10 = vpop.permute.xlu1 %1759 }
  0xf3   : > { %v1774_v11 = vsel %vm1771_vm8, %v1760_v10, %v1764_v6  ;;  %v1772_v16 = vsel %vm1771_vm8, %v1764_v6, %v1768_v9  ;;  %v1776_v20 = vsel %vm1771_vm8, %v1768_v9, %v1760_v10 }
  0xf4   : > { %1817 = vmatprep.subr.mxu0 %v1772_v16  ;;  %2293 = vmatprep.subr.mxu1 %v1776_v20 }
  0xf5   : > { %1818 = vmatpush1.msra.mxu0 %v1774_v11  ;;  %2294 = vmatpush3.msra.mxu1 %v1776_v20 }
  0xf6   : > { %2190 = vmatmul.mubr.msk.f32.vlgmr.msra.gmra.mxu0 %vm345_vm0, %v2188_v4  ;;  %2296 = vmatmul.mubr.msk.f32.vlgmr.msra.gmra.mxu1 %vm345_vm0, %v2189_v21 }
  0xf7   : > { %1857 = vmatprep.mubr.f32.mxu0 %v2361_v19 }
  0xfa   : > { %2191 = vmatmul.mubr.msk.f32.gmra.mxu0 %vm345_vm0, %v2189_v21 }
 0x162   : > { %v418_v19 = vpop.f32.mrf.mxu0  ;;  %v2241_v14 = vpop.f32.mrf.mxu1 }
 0x164   : > { %v420_v29 = vpop.f32.mrf.mxu0  ;;  %v495_v13 = vpop.f32.mrf.mxu1 }
 0x166   : > { %v424_v30 = vpop.f32.mrf.mxu0 }
 0x168   : > { %v426_v17 = vpop.f32.mrf.mxu0 }
 0x16e   : > { %v576_v15 = vpop.f32.mrf.mxu1  ;;  %v2248_v12 = vpop.f32.mrf.mxu0 }
 0x16f   : > { %v659_v57 = vadd.f32 %v2248_v12, %v2241_v14  ;;  %v577_v60 = vadd.f32 %v576_v15, %v418_v19  ;;  %v1996_v14 = vshrl.u32 %v312_v25, 7 }
 0x170   : > { %v578_v31 = vpop.f32.mrf.mxu1  ;;  %v653_v32 = vpop.f32.mrf.mxu0 }
 0x171   : > { %v579_v62 = vadd.f32 %v578_v31, %v420_v29  ;;  %v654_v63 = vadd.f32 %v653_v32, %v495_v13  ;;  %v2005_v25 = vsub.s32 2, %v1996_v14 }
 0x172   : > { %v582_v33 = vpop.f32.mrf.mxu1 }
 0x173   : > { %v583_v3 = vadd.f32 %v582_v33, %v424_v30 }
 0x174   : > { %v584_v18 = vpop.f32.mrf.mxu1 }
 0x175   : > { %v585_v8 = vadd.f32 %v584_v18, %v426_v17  ;;  %v1950_v18 = vpop.permute.xlu0 %1949 }
 0x17a   : > { %v756_v34 = vpop.f32.mrf.mxu0  ;;  %v2255_v37 = vpop.f32.mrf.mxu1 }
 0x17b   : > { %v847_v0 = vadd.f32 %v2255_v37, %v659_v57  ;;  %v842_v2 = vadd.f32 %v756_v34, %v577_v60 }
 0x17c   : > { %v758_v35 = vpop.f32.mrf.mxu0  ;;  %v833_v39 = vpop.f32.mrf.mxu1 }
 0x17d   : > { %v843_v5 = vadd.f32 %v758_v35, %v579_v62  ;;  %v844_v6 = vadd.f32 %v833_v39, %v654_v63  ;;  %v2764_v35 = vpop.permute.xlu1 %1954 }
 0x17e   : > { %v762_v36 = vpop.f32.mrf.mxu0 }
 0x17f   : > { %v845_v16 = vadd.f32 %v762_v36, %v583_v3 }
 0x180   : > { %v764_v38 = vpop.f32.mrf.mxu0 }
 0x181   : > { %v846_v23 = vadd.f32 %v764_v38, %v585_v8 }
 0x186   : > { %v942_v40 = vpop.f32.mrf.mxu1  ;;  %v2262_v41 = vpop.f32.mrf.mxu0 }
 0x187   : > { %v1033_v7 = vadd.f32 %v2262_v41, %v847_v0  ;;  %v1028_v11 = vadd.f32 %v942_v40, %v842_v2 }
 0x188   : > { %v944_v42 = vpop.f32.mrf.mxu1  ;;  %v1019_v43 = vpop.f32.mrf.mxu0 }
 0x189   : > { %v1029_v21 = vadd.f32 %v944_v42, %v843_v5  ;;  %v1030_v26 = vadd.f32 %v1019_v43, %v844_v6  ;;  %v1993_v43 = vld [vmem:[%s279_s12] sm:$0x7] }
 0x18b   : > { %v948_v44 = vpop.f32.mrf.mxu1  ;;  %v1109_v45 = vpop.f32.mrf.mxu0 }
 0x18c   : > { %v1195_v27 = vadd.f32 %v1109_v45, %v1028_v11  ;;  %v1031_v28 = vadd.f32 %v948_v44, %v845_v16 }
 0x18d   : > { %v950_v46 = vpop.f32.mrf.mxu1  ;;  %v1111_v48 = vpop.f32.mrf.mxu0 }
 0x18e   : > { %v1196_v30 = vadd.f32 %v1111_v48, %v1029_v21  ;;  %v1032_v12 = vadd.f32 %v950_v46, %v846_v23  ;;  %v1997_v48 = vsub.s32 0, %v1996_v14 }
 0x18f   : > { %v2269_v47 = vpop.f32.mrf.mxu1 }
 0x190   : > { %v1115_v50 = vpop.f32.mrf.mxu0  ;;  %v1200_v22 = vadd.f32 %v2269_v47, %v1033_v7  ;;  %v1998_v5 = vrot.slane %v1993_v43, %v1997_v48 }
 0x191   : > { %v1186_v49 = vpop.f32.mrf.mxu1  ;;  %v1198_v36 = vadd.f32 %v1115_v50, %v1031_v28 }
 0x192   : > { %v1117_v52 = vpop.f32.mrf.mxu0  ;;  %v1197_v13 = vadd.f32 %v1186_v49, %v1030_v26  ;;  %v2001_v49 = vsub.s32 1, %v1996_v14 }
 0x193   : > { %v1199_v44 = vadd.f32 %v1117_v52, %v1032_v12 }
 0x194   : > { %v1295_v51 = vpop.f32.mrf.mxu1  ;;  %v2276_v54 = vpop.f32.mrf.mxu0  ;;  %v2002_v6 = vrot.slane %v1993_v43, %v2001_v49 }
 0x195   : > { %v1381_v17 = vadd.f32 %v1295_v51, %v1195_v27  ;;  %v1386_v15 = vadd.f32 %v2276_v54, %v1200_v22 }
 0x196   : > { %v1297_v53 = vpop.f32.mrf.mxu1  ;;  %v1372_v56 = vpop.f32.mrf.mxu0 }
 0x197   : > { %v1382_v31 = vadd.f32 %v1297_v53, %v1196_v30  ;;  %v1383_v32 = vadd.f32 %v1372_v56, %v1197_v13 }
 0x198   : > { %v1301_v55 = vpop.f32.mrf.mxu1 }
 0x199   : > { %v1384_v45 = vadd.f32 %v1301_v55, %v1198_v36  ;;  %v1979_v55 = vpop.permute.xlu0 %1978  ;;  %v2050_v36 = vld [vmem:[%s2748_s8 + $0x18] sm:$0xff] (%p2431_p5) }
 0x19a   : > { %v2757_v58 = vpop.f32.mrf.mxu1  ;;  %2051 = vst [vmem:[%s2031_s15 + $0x30] sm:$0xff] (%p2431_p5), %v2050_v36 }
 0x19b   : > { %v1385_v50 = vadd.f32 %v2757_v58, %v1199_v44 }
 0x19e   : > { %v1481_v59 = vpop.f32.mrf.mxu0  ;;  %v2283_v61 = vpop.f32.mrf.mxu1 }
 0x19f   : > { %v1567_v33 = vadd.f32 %v1481_v59, %v1381_v17  ;;  %v1572_v34 = vadd.f32 %v2283_v61, %v1386_v15  ;;  %v2006_v61 = vrot.slane %v1993_v43, %v2005_v25 }
 0x1a0   : > { %v1483_v1 = vpop.f32.mrf.mxu0  ;;  %v1558_v4 = vpop.f32.mrf.mxu1 }
 0x1a1   : > { %v1568_v39 = vadd.f32 %v1483_v1, %v1382_v31  ;;  %v1569_v40 = vadd.f32 %v1558_v4, %v1383_v32  ;;  %v1974_v1 = vpop.permute.xlu1 %1973 }
 0x1a2   : > { %v1487_v9 = vpop.f32.mrf.mxu0 }
 0x1a3   : > { %v1570_v57 = vadd.f32 %v1487_v9, %v1384_v45 }
 0x1a4   : > { %v1489_v24 = vpop.f32.mrf.mxu0 }
 0x1a5   : > { %v1571_v2 = vadd.f32 %v1489_v24, %v1385_v50 }
 0x1aa   : > { %v1667_v10 = vpop.f32.mrf.mxu1  ;;  %v2290_v19 = vpop.f32.mrf.mxu0 }
 0x1ab   : > { %v1753_v41 = vadd.f32 %v1667_v10, %v1567_v33  ;;  %v1758_v42 = vadd.f32 %v2290_v19, %v1572_v34  ;;  %v2044_v34 = vld [vmem:[%s2748_s8] sm:$0xff] (%p2431_p5) }
 0x1ac   : > { %v1669_v20 = vpop.f32.mrf.mxu1  ;;  %v1744_v37 = vpop.f32.mrf.mxu0  ;;  %2045 = vst [vmem:[%s2031_s15] sm:$0xff] (%p2431_p5), %v2044_v34 }
 0x1ad   : > { %v1754_v51 = vadd.f32 %v1669_v20, %v1568_v39  ;;  %v1755_v53 = vadd.f32 %v1744_v37, %v1569_v40  ;;  %v2052_v37 = vld [vmem:[%s2748_s8 + $0x20] sm:$0xff] (%p2431_p5) }
 0x1ae   : > { %v1673_v29 = vpop.f32.mrf.mxu1  ;;  %2053 = vst [vmem:[%s2031_s15 + $0x38] sm:$0xff] (%p2431_p5), %v2052_v37 }
 0x1af   : > { %v1756_v3 = vadd.f32 %v1673_v29, %v1570_v57 }
 0x1b0   : > { %v1675_v38 = vpop.f32.mrf.mxu1 }
 0x1b1   : > { %v1757_v8 = vadd.f32 %v1675_v38, %v1571_v2  ;;  %v2054_v38 = vld [vmem:[%s2748_s8 + $0x28] sm:$0xff] (%p2431_p5) }
 0x1b2   : > { %2055 = vst [vmem:[%s2031_s15 + $0x40] sm:$0xff] (%p2431_p5), %v2054_v38 }
 0x1b6   : > { %v1853_v46 = vpop.f32.mrf.mxu0  ;;  %v2297_v47 = vpop.f32.mrf.mxu1 }
 0x1b7   : > { %v1939_v54 = vadd.f32 %v1853_v46, %v1753_v41  ;;  %v1944_v56 = vadd.f32 %v2297_v47, %v1758_v42 }
 0x1b8   : > { %v1855_v59 = vpop.f32.mrf.mxu0  ;;  %v1930_v60 = vpop.f32.mrf.mxu1 }
 0x1b9   : > { %v1957_v62 = vadd.f32 %v1950_v18, %v1939_v54  ;;  %v1962_v63 = vadd.f32 %v2764_v35, %v1944_v56  ;;  %v1940_v0 = vadd.f32 %v1855_v59, %v1754_v51  ;;  %v1941_v52 = vadd.f32 %v1930_v60, %v1755_v53 }
 0x1ba   : > { %v1859_v4 = vpop.f32.mrf.mxu0 }
 0x1bb   : > { %vm1965_vm9 = vcmp.ge.f32.partialorder %v1957_v62, 0.0  ;;  %vm1970_vm10 = vcmp.ge.f32.partialorder %v1962_v63, 0.0  ;;  %v1958_v7 = vadd.f32 %v1950_v18, %v1940_v0  ;;  %v1959_v58 = vadd.f32 %v1950_v18, %v1941_v52  ;;  %v2046_v18 = vld [vmem:[%s2748_s8 + $0x8] sm:$0xff] (%p2431_p5) }
 0x1bc   : > { %v1986_v9 = vmul.f32 %v1979_v55, %v1962_v63  ;;  %v1942_v10 = vadd.f32 %v1859_v4, %v1756_v3  ;;  %v1981_v11 = vmul.f32 %v1974_v1, %v1957_v62  ;;  %v1861_v16 = vpop.f32.mrf.mxu0  ;;  %2047 = vst [vmem:[%s2031_s15 + $0x8] sm:$0xff] (%p2431_p5), %v2046_v18 }
 0x1bd   : > { %vm1966_vm11 = vcmp.ge.f32.partialorder %v1958_v7, 0.0  ;;  %vm1967_vm12 = vcmp.ge.f32.partialorder %v1959_v58, 0.0  ;;  %v1982_v20 = vmul.f32 %v1974_v1, %v1958_v7  ;;  %v1983_v21 = vmul.f32 %v1974_v1, %v1959_v58 }
 0x1be   : > { %v1992_v26 = vsel %vm1970_vm10, %v1962_v63, %v1986_v9  ;;  %v1960_v22 = vadd.f32 %v2764_v35, %v1942_v10  ;;  %v1987_v23 = vsel %vm1965_vm9, %v1957_v62, %v1981_v11  ;;  %v1943_v24 = vadd.f32 %v1861_v16, %v1757_v8 }
 0x1bf   : > { %v2015_v27 = vmul.f32 %v2006_v61, %v1992_v26  ;;  %v1988_v28 = vsel %vm1966_vm11, %v1958_v7, %v1982_v20  ;;  %v1989_v19 = vsel %vm1967_vm12, %v1959_v58, %v1983_v21  ;;  %v2010_v29 = vmul.f32 %v1998_v5, %v1987_v23 }
 0x1c0   : > { %vm1968_vm13 = vcmp.ge.f32.partialorder %v1960_v22, 0.0  ;;  %v1984_v14 = vmul.f32 %v1979_v55, %v1960_v22  ;;  %v2011_v30 = vmul.f32 %v2002_v6, %v1988_v28  ;;  %v2012_v13 = vmul.f32 %v2006_v61, %v1989_v19 }
 0x1c1   : > { %2021 = vst [vmem:[%s2748_s8 + $0x58] sm:$0xff] %v2015_v27  ;;  %2016 = vst [vmem:[%s2748_s8 + $0x30] sm:$0xff] %v2010_v29  ;;  %v1961_v17 = vadd.f32 %v2764_v35, %v1943_v24  ;;  %v2048_v35 = vld [vmem:[%s2748_s8 + $0x10] sm:$0xff] (%p2431_p5) }
 0x1c2   : > { %v1990_v15 = vsel %vm1968_vm13, %v1960_v22, %v1984_v14  ;;  %2017 = vst [vmem:[%s2748_s8 + $0x38] sm:$0xff] %v2011_v30  ;;  %2018 = vst [vmem:[%s2748_s8 + $0x40] sm:$0xff] %v2012_v13 }
 0x1c3   : > { %v2013_v12 = vmul.f32 %v1998_v5, %v1990_v15  ;;  %vm1969_vm14 = vcmp.ge.f32.partialorder %v1961_v17, 0.0  ;;  %v1985_v31 = vmul.f32 %v1979_v55, %v1961_v17  ;;  %2049 = vst [vmem:[%s2031_s15 + $0x10] sm:$0xff] (%p2431_p5), %v2048_v35 }
 0x1c4   : > { %2028 = sbr.rel (!%p2431_p5) target bundleno = 465 (0x1d1), region = 67 }
 0x1c5   : > { %2019 = vst [vmem:[%s2748_s8 + $0x48] sm:$0xff] %v2013_v12  ;;  %v1991_v32 = vsel %vm1969_vm14, %v1961_v17, %v1985_v31 }
 0x1c6   : > { %v2014_v33 = vmul.f32 %v2002_v6, %v1991_v32 }
 0x1c8   : > { %2020 = vst [vmem:[%s2748_s8 + $0x50] sm:$0xff] %v2014_v33  ;;  %v2056_v25 = vld [vmem:[%s2748_s8 + $0x30] sm:$0xff] (%p2431_p5)  ;;  %v2066_v43 = vld [vmem:[%s2748_s8 + $0x58] sm:$0xff] (%p2431_p5) }
 0x1c9   : > { %v2058_v39 = vld [vmem:[%s2748_s8 + $0x38] sm:$0xff]  ;;  %v2060_v40 = vld [vmem:[%s2748_s8 + $0x40] sm:$0xff]  ;;  %2057 = vst [vmem:[%s2031_s15 + $0x60] sm:$0xff] %v2056_v25  ;;  %2067 = vst [vmem:[%s2031_s15 + $0xa0] sm:$0xff] %v2066_v43 }
 0x1ca   : > { %2059 = vst [vmem:[%s2031_s15 + $0x68] sm:$0xff] %v2058_v39  ;;  %2061 = vst [vmem:[%s2031_s15 + $0x70] sm:$0xff] %v2060_v40 }
 0x1cc   : > { %v2062_v41 = vld [vmem:[%s2748_s8 + $0x48] sm:$0xff] }
 0x1cd   : > { %2063 = vst [vmem:[%s2031_s15 + $0x90] sm:$0xff] %v2062_v41 }
 0x1cf   : > { %v2064_v42 = vld [vmem:[%s2748_s8 + $0x50] sm:$0xff] }
 0x1d0   : > { %2065 = vst [vmem:[%s2031_s15 + $0x98] sm:$0xff] %v2064_v42 }
 0x1d1 PF: > { %p12_p11 = scmp.ge.s32.totalorder %s2419_s22, 4   ;;  %s2811_s18 = smov %s2354_s19 }
 0x1d2   : > { %s2812_s19 = smov %s2429_s25  ;;  %s2813_s20 = smov %s2419_s22 }
 0x1d3   :  { %14 = sbr.rel (!%p12_p11) target bundleno = 2 (0x2), region = 132 }

// kernel: decoder3_forward_impl.9
= control target key start
LH: loop header
LB: loop body
LE: loop exit
PB: predicated region body
PF: predicated region fallthrough
CT: control target
= control target key end

     0   :  { %s3061_s18 = smov 0   ;;  %s3063_s19 = smov 0   ;;  %s4049_s0 = inlined_call_operand.vmem [shape: f32[32,768], index: 0, kind: input, shape index: {}]   ;;  %s4050_s1 = inlined_call_operand.vmem [shape: f32[9,32,32], index: 1, kind: input, shape index: {}]   ;;  %s4051_s2 = inlined_call_operand.vmem [shape: f32[32,1], index: 2, kind: input, shape index: {}]   ;;  %s4052_s3 = inlined_call_operand.vmem [shape: f32[1,768], index: 3, kind: input, shape index: {}]   ;;  %s4053_s4 = inlined_call_operand.vmem [shape: f32[32,1], index: 4, kind: input, shape index: {}]   ;;  %s4054_s5 = inlined_call_operand.vmem [shape: f32[32,768], index: 5, kind: output, shape index: {}]  }
   0x1   :  { %s3065_s20 = smov 0  }
   0x2 LB: > { %s3077_s21 = sadd.s32 4294967295, %s3019_s20   ;;  %s3080_s22 = sadd.s32 1, %s3019_s20   ;;  %s3019_s20 = sphi %s3065_s20, %s4102_s20   ;;  %s3015_s19 = sphi %s3063_s19, %s4101_s19   ;;  %s3011_s18 = sphi %s3061_s18, %s4100_s18  }
   0x3   : > { %s19_s23 = ssub.s32 %s3019_s20, %s3080_s22  ;;  %s22_s24 = sadd.s32 1, %s3015_s19 }
   0x4   : > { %p20_p0 = scmp.eq.s32.totalorder %s19_s23, 0  ;;  %p29_p1 = scmp.ne.s32.totalorder %s3015_s19, %s3011_s18 }
   0x5   : > { %p30_p2 = scmp.eq.s32.totalorder %s3019_s20, 0  ;;  %p148_p3 = scmp.eq.s32.totalorder %s3077_s21, 1 }
   0x6   : > { %s3090_s25 = scalar_select %p20_p0, %s3015_s19, %s22_s24  }
   0x7   : > { %p31_p4 = por %p30_p2, %p29_p1  ;;  %p3092_p5 = por %p148_p3, %p29_p1 }
   0x8   : > { %p2649_p6 = scmp.ge.s32.totalorder %s3019_s20, 2 }
   0xa   : > { %179 = sbr.rel (%p2649_p6) target bundleno = 26 (0x1a), region = 28 }
   0xf   : > { %182 = sbr.rel (!%p31_p4) target bundleno = 26 (0x1a), region = 32  ;;  %s184_s27 = sand.u32 (%p31_p4), 1, %s3015_s19  }
  0x10   : > { %s2759_s28 = smul.u32 (%p31_p4), 24, %s3019_s20 }
  0x11   : > { %s2959_s29 = smul.u32 (%p31_p4), 96, %s184_s27 }
  0x12   : > { %s189_s7 = scalar_lea.vmem (%p31_p4), %s4049_s0, %s2759_s28 }
  0x13   : > { %v202_v0 = vld [vmem:[%s189_s7] sm:$0xff] (%p31_p4)  ;;  %v204_v1 = vld [vmem:[%s189_s7 + $0x8] sm:$0xff] (%p31_p4)  ;;  %v206_v2 = vld [vmem:[%s189_s7 + $0x10] sm:$0xff] (%p31_p4)  ;;  %s186_s8 = scalar_lea.vmem (%p31_p4), [#allocation2], %s2959_s29 }
  0x14   : > { %203 = vst [vmem:[%s186_s8] sm:$0xff] %v202_v0  ;;  %205 = vst [vmem:[%s186_s8 + $0x8] sm:$0xff] %v204_v1  ;;  %v208_v3 = vld [vmem:[%s189_s7 + $0x30] sm:$0xff]  ;;  %v210_v4 = vld [vmem:[%s189_s7 + $0x38] sm:$0xff] }
  0x15   : > { %207 = vst [vmem:[%s186_s8 + $0x10] sm:$0xff] %v206_v2  ;;  %v212_v5 = vld [vmem:[%s189_s7 + $0x40] sm:$0xff]  ;;  %209 = vst [vmem:[%s186_s8 + $0x18] sm:$0xff] %v208_v3  ;;  %v216_v7 = vld [vmem:[%s189_s7 + $0x68] sm:$0xff] }
  0x16   : > { %211 = vst [vmem:[%s186_s8 + $0x20] sm:$0xff] %v210_v4  ;;  %213 = vst [vmem:[%s186_s8 + $0x28] sm:$0xff] %v212_v5  ;;  %v214_v6 = vld [vmem:[%s189_s7 + $0x60] sm:$0xff]  ;;  %v218_v8 = vld [vmem:[%s189_s7 + $0x70] sm:$0xff] }
  0x17   : > { %215 = vst [vmem:[%s186_s8 + $0x30] sm:$0xff] %v214_v6  ;;  %217 = vst [vmem:[%s186_s8 + $0x38] sm:$0xff] %v216_v7  ;;  %v220_v9 = vld [vmem:[%s189_s7 + $0x90] sm:$0xff]  ;;  %v222_v10 = vld [vmem:[%s189_s7 + $0x98] sm:$0xff] }
  0x18   : > { %219 = vst [vmem:[%s186_s8 + $0x40] sm:$0xff] %v218_v8  ;;  %v224_v11 = vld [vmem:[%s189_s7 + $0xa0] sm:$0xff]  ;;  %221 = vst [vmem:[%s186_s8 + $0x48] sm:$0xff] %v220_v9 }
  0x19   : > { %223 = vst [vmem:[%s186_s8 + $0x50] sm:$0xff] %v222_v10  ;;  %225 = vst [vmem:[%s186_s8 + $0x58] sm:$0xff] %v224_v11 }
  0x1a PF: > { %p2651_p7 = scmp.ge.s32.totalorder %s3019_s20, 1  ;;  %p238_p8 = scmp.lt.s32.totalorder %s3019_s20, 3 }
  0x1c   : > { %p239_p9 = pnand %p2651_p7, %p238_p8 }
  0x1e   : > { %242 = sbr.rel (%p239_p9) target bundleno = 575 (0x23f), region = 59 }
  0x23   : > { %s245_s9 = sand.u32 1, %s3011_s18   ;;  %s3021_s12 = smov 18   ;;  %v3139_v22 = vld [vmem:[%s4050_s1 + $0x20] sm:$0xff]  ;;  %vm379_vm0 = vcmask 261120   ;;  %v3022_v25 = vmov 0.0   ;;  %v4055_v26 = vlaneseq  ;;  %v2653_v52 = vld [vmem:[%s4050_s1 + $0x28] sm:$0xff] }
  0x24   : > { %s3105_s10 = smul.u32 96, %s245_s9  ;;  %2841 = vmatprep.mubr.msk.f32.mxu1 %vm379_vm0, %v3139_v22  ;;  %456 = vmatprep.mubr.f32.mxu0 %v3022_v25  ;;  %s3023_s15 = smov 19   ;;  %v2655_v56 = vld [vmem:[%s4050_s1 + $0x38] sm:$0xff]  ;;  %v2654_v57 = vld [vmem:[%s4050_s1 + $0x30] sm:$0xff]  ;;  %v333_v6 = vld [vmem:[%s4050_s1] sm:$0xff] }
  0x25   : > { %s3024_s16 = smov 17   ;;  %s3025_s17 = smov 1   ;;  %v3199_v29 = vand.u32 127, %v4055_v26 }
  0x26   : > { %s247_s11 = scalar_lea.vmem [#allocation2], %s3105_s10  ;;  %s3026_s18 = smov 127  }
  0x27   : > { %v3108_v12 = vld [vmem:[%s247_s11 + $0x58] sm:$0xff]  ;;  %v3110_v13 = vld [vmem:[%s247_s11 + $0x48] sm:$0xff]  ;;  %v3114_v14 = vld [vmem:[%s247_s11 + $0x50] sm:$0xff]  ;;  %vm361_vm1 = vcmp.lt.s32.totalorder %v3199_v29, 18  ;;  %s3027_s20 = smov 111   ;;  %vm320_vm2 = vcmp.lt.s32.totalorder %v3199_v29, 19 }
  0x28   : > { %359 = vrot.lane.b32.xlu1 %v3108_v12, %s3021_s12  ;;  %343 = vrot.lane.b32.xlu0 %v3110_v13, %s3021_s12  ;;  %v3116_v15 = vld [vmem:[%s247_s11 + $0x30] sm:$0xff]  ;;  %v3120_v16 = vld [vmem:[%s247_s11 + $0x38] sm:$0xff]  ;;  %s3028_s6 = smov 110   ;;  %vm776_vm3 = vcmp.lt.s32.totalorder %v3199_v29, 17  ;;  %vm1016_vm4 = vcmp.lt.s32.totalorder %v3199_v29, 1  ;;  %vm1459_vm5 = vcmp.lt.s32.totalorder %v3199_v29, 127 }
  0x29   : > { %v3122_v17 = vld [vmem:[%s247_s11 + $0x40] sm:$0xff]  ;;  %v3128_v19 = vld [vmem:[%s247_s11 + $0x18] sm:$0xff]  ;;  %v3132_v20 = vld [vmem:[%s247_s11 + $0x28] sm:$0xff]  ;;  %vm1699_vm6 = vcmp.lt.s32.totalorder %v3199_v29, 111  ;;  %vm1939_vm7 = vcmp.lt.s32.totalorder %v3199_v29, 110  ;;  %vm2179_vm8 = vcmp.lt.s32.totalorder %v3199_v29, 109 }
  0x2a   : > { %v3126_v18 = vld [vmem:[%s247_s11 + $0x20] sm:$0xff]  ;;  %v3143_v23 = vld [vmem:[%s247_s11 + $0x8] sm:$0xff]  ;;  %v3145_v24 = vld [vmem:[%s247_s11 + $0x10] sm:$0xff]  ;;  %s276_s13 = smul.u32 3, %s3077_s21 }
  0x2b   : > { %v3134_v21 = vld [vmem:[%s247_s11] sm:$0xff]  ;;  %v2747_v29 = vld [vmem:[%s4050_s1 + $0x118] sm:$0xff] }
  0x2c   : > { %351 = vrot.lane.b32.xlu0 %v3114_v14, %s3021_s12  ;;  %341 = vrot.lane.b32.xlu1 %v3116_v15, %s3021_s12  ;;  %p277_p10 = scmp.lt.s32.totalorder %s276_s13, 5 }
  0x2e   : > { %s4104_s13 = smov (!%p277_p10, %s276_s13), 5 }
  0x30   : > { %349 = vrot.lane.b32.xlu0 %v3120_v16, %s3021_s12  ;;  %357 = vrot.lane.b32.xlu1 %v3122_v17, %s3021_s12 }
  0x34   : > { %347 = vrot.lane.b32.xlu1 %v3126_v18, %s3021_s12  ;;  %339 = vrot.lane.b32.xlu0 %v3128_v19, %s3021_s12 }
  0x38   : > { %355 = vrot.lane.b32.xlu0 %v3132_v20, %s3021_s12  ;;  %337 = vrot.lane.b32.xlu1 %v3134_v21, %s3021_s12 }
  0x3c   : > { %345 = vrot.lane.b32.xlu0 %v3143_v23, %s3021_s12  ;;  %353 = vrot.lane.b32.xlu1 %v3145_v24, %s3021_s12 }
  0x40   : > { %300 = vrot.lane.b32.xlu0 %v3110_v13, %s3023_s15  ;;  %308 = vrot.lane.b32.xlu1 %v3114_v14, %s3023_s15 }
  0x44   : > { %316 = vrot.lane.b32.xlu0 %v3108_v12, %s3023_s15  ;;  %298 = vrot.lane.b32.xlu1 %v3116_v15, %s3023_s15 }
  0x48   : > { %306 = vrot.lane.b32.xlu0 %v3120_v16, %s3023_s15  ;;  %314 = vrot.lane.b32.xlu1 %v3122_v17, %s3023_s15 }
  0x4c   : > { %296 = vrot.lane.b32.xlu0 %v3128_v19, %s3023_s15  ;;  %304 = vrot.lane.b32.xlu1 %v3126_v18, %s3023_s15 }
  0x50   : > { %312 = vrot.lane.b32.xlu0 %v3132_v20, %s3023_s15  ;;  %294 = vrot.lane.b32.xlu1 %v3134_v21, %s3023_s15 }
  0x54   : > { %302 = vrot.lane.b32.xlu0 %v3143_v23, %s3023_s15  ;;  %310 = vrot.lane.b32.xlu1 %v3145_v24, %s3023_s15 }
  0x58   : > { %758 = vrot.lane.b32.xlu0 %v3110_v13, %s3024_s16  ;;  %766 = vrot.lane.b32.xlu1 %v3114_v14, %s3024_s16 }
  0x5c   : > { %774 = vrot.lane.b32.xlu0 %v3108_v12, %s3024_s16  ;;  %756 = vrot.lane.b32.xlu1 %v3116_v15, %s3024_s16 }
  0x60   : > { %764 = vrot.lane.b32.xlu0 %v3120_v16, %s3024_s16  ;;  %772 = vrot.lane.b32.xlu1 %v3122_v17, %s3024_s16 }
  0x64   : > { %754 = vrot.lane.b32.xlu0 %v3128_v19, %s3024_s16  ;;  %762 = vrot.lane.b32.xlu1 %v3126_v18, %s3024_s16 }
  0x68   : > { %770 = vrot.lane.b32.xlu0 %v3132_v20, %s3024_s16  ;;  %752 = vrot.lane.b32.xlu1 %v3134_v21, %s3024_s16 }
  0x6c   : > { %760 = vrot.lane.b32.xlu0 %v3143_v23, %s3024_s16  ;;  %768 = vrot.lane.b32.xlu1 %v3145_v24, %s3024_s16  ;;  %s3029_s16 = smov 109  }
  0x70   : > { %998 = vrot.lane.b32.xlu0 %v3110_v13, %s3025_s17  ;;  %1006 = vrot.lane.b32.xlu1 %v3114_v14, %s3025_s17 }
  0x74   : > { %1014 = vrot.lane.b32.xlu0 %v3108_v12, %s3025_s17  ;;  %996 = vrot.lane.b32.xlu1 %v3116_v15, %s3025_s17 }
  0x78   : > { %1004 = vrot.lane.b32.xlu0 %v3120_v16, %s3025_s17  ;;  %1012 = vrot.lane.b32.xlu1 %v3122_v17, %s3025_s17 }
  0x7c   : > { %994 = vrot.lane.b32.xlu0 %v3128_v19, %s3025_s17  ;;  %1002 = vrot.lane.b32.xlu1 %v3126_v18, %s3025_s17 }
  0x80   : > { %1010 = vrot.lane.b32.xlu0 %v3132_v20, %s3025_s17  ;;  %992 = vrot.lane.b32.xlu1 %v3134_v21, %s3025_s17 }
  0x84   : > { %1000 = vrot.lane.b32.xlu0 %v3143_v23, %s3025_s17  ;;  %1008 = vrot.lane.b32.xlu1 %v3145_v24, %s3025_s17  ;;  %s3991_s17 = scalar_lea.vmem [#allocation3], %s3105_s10  ;;  %s2760_s10 = smul.u32 (%p3092_p5), 24, %s3077_s21 }
  0x88   : > { %1441 = vrot.lane.b32.xlu0 %v3110_v13, %s3026_s18  ;;  %1449 = vrot.lane.b32.xlu1 %v3114_v14, %s3026_s18 }
  0x8c   : > { %1457 = vrot.lane.b32.xlu0 %v3108_v12, %s3026_s18  ;;  %1439 = vrot.lane.b32.xlu1 %v3116_v15, %s3026_s18 }
  0x90   : > { %1447 = vrot.lane.b32.xlu0 %v3120_v16, %s3026_s18  ;;  %1455 = vrot.lane.b32.xlu1 %v3122_v17, %s3026_s18 }
  0x94   : > { %1437 = vrot.lane.b32.xlu0 %v3128_v19, %s3026_s18  ;;  %1445 = vrot.lane.b32.xlu1 %v3126_v18, %s3026_s18 }
  0x98   : > { %1453 = vrot.lane.b32.xlu0 %v3132_v20, %s3026_s18  ;;  %1435 = vrot.lane.b32.xlu1 %v3134_v21, %s3026_s18 }
  0x9a   : > { %v360_v27 = vpop.permute.xlu1 %359  ;;  %v344_v28 = vpop.permute.xlu0 %343 }
  0x9b   : > { %v373_v34 = vsel %vm361_vm1, %v360_v27, %v344_v28 }
  0x9c   : > { %1443 = vrot.lane.b32.xlu0 %v3143_v23, %s3026_s18  ;;  %1451 = vrot.lane.b32.xlu1 %v3145_v24, %s3026_s18 }
  0x9e   : > { %v352_v30 = vpop.permute.xlu0 %351  ;;  %v342_v31 = vpop.permute.xlu1 %341 }
  0x9f   : > { %v369_v32 = vsel %vm361_vm1, %v344_v28, %v352_v30  ;;  %v365_v33 = vsel %vm361_vm1, %v352_v30, %v360_v27 }
  0xa0   : > { %416 = vmatprep.subr.mxu0 %v369_v32  ;;  %2833 = vmatprep.subr.mxu1 %v365_v33 }
  0xa1   : > { %1689 = vrot.lane.b32.xlu0 %v3114_v14, %s3027_s20  ;;  %1697 = vrot.lane.b32.xlu1 %v3108_v12, %s3027_s20 }
  0xa2   : > { %417 = vmatpush1.msra.mxu0 %v373_v34  ;;  %2834 = vmatpush3.msra.mxu1 %v365_v33  ;;  %v350_v35 = vpop.permute.xlu0 %349  ;;  %v358_v36 = vpop.permute.xlu1 %357 }
  0xa3   : > { %v368_v37 = vsel %vm361_vm1, %v342_v31, %v350_v35  ;;  %v364_v38 = vsel %vm361_vm1, %v350_v35, %v358_v36  ;;  %v372_v39 = vsel %vm361_vm1, %v358_v36, %v342_v31  ;;  %v334_v31 = vld [vmem:[%s4050_s1 + $0x8] sm:$0xff]  ;;  %v336_v35 = vld [vmem:[%s4050_s1 + $0x18] sm:$0xff]  ;;  %v335_v36 = vld [vmem:[%s4050_s1 + $0x10] sm:$0xff] }
  0xa4   : > { %418 = vmatprep.subr.mxu0 %v368_v37  ;;  %2835 = vmatprep.subr.mxu1 %v364_v38 }
  0xa5   : > { %1681 = vrot.lane.b32.xlu0 %v3110_v13, %s3027_s20  ;;  %1687 = vrot.lane.b32.xlu1 %v3120_v16, %s3027_s20 }
  0xa6   : > { %419 = vmatpush1.msra.mxu0 %v372_v39  ;;  %2836 = vmatpush3.msra.mxu1 %v364_v38  ;;  %v348_v40 = vpop.permute.xlu1 %347  ;;  %v340_v41 = vpop.permute.xlu0 %339 }
  0xa7   : > { %v367_v42 = vsel %vm361_vm1, %v340_v41, %v348_v40 }
  0xa8   : > { %420 = vmatprep.subr.mxu0 %v367_v42 }
  0xa9   : > { %1695 = vrot.lane.b32.xlu0 %v3122_v17, %s3027_s20  ;;  %1679 = vrot.lane.b32.xlu1 %v3116_v15, %s3027_s20 }
  0xaa   : > { %v356_v43 = vpop.permute.xlu0 %355  ;;  %v338_v44 = vpop.permute.xlu1 %337 }
  0xab   : > { %v371_v45 = vsel %vm361_vm1, %v356_v43, %v340_v41  ;;  %v363_v46 = vsel %vm361_vm1, %v348_v40, %v356_v43 }
  0xac   : > { %421 = vmatpush1.msra.mxu0 %v371_v45  ;;  %2837 = vmatprep.subr.mxu1 %v363_v46 }
  0xad   : > { %1685 = vrot.lane.b32.xlu0 %v3126_v18, %s3027_s20  ;;  %1693 = vrot.lane.b32.xlu1 %v3132_v20, %s3027_s20 }
  0xae   : > { %2838 = vmatpush3.msra.mxu1 %v363_v46  ;;  %v346_v47 = vpop.permute.xlu0 %345  ;;  %v354_v48 = vpop.permute.xlu1 %353 }
  0xaf   : > { %v366_v49 = vsel %vm361_vm1, %v338_v44, %v346_v47  ;;  %v362_v50 = vsel %vm361_vm1, %v346_v47, %v354_v48  ;;  %v370_v51 = vsel %vm361_vm1, %v354_v48, %v338_v44 }
  0xb0   : > { %422 = vmatprep.subr.mxu0 %v366_v49  ;;  %2839 = vmatprep.subr.mxu1 %v362_v50  ;;  %v2672_v49 = vld [vmem:[%s4050_s1 + $0x40] sm:$0xff] }
  0xb1   : > { %1677 = vrot.lane.b32.xlu0 %v3128_v19, %s3027_s20  ;;  %1683 = vrot.lane.b32.xlu1 %v3143_v23, %s3027_s20 }
  0xb2   : > { %423 = vmatpush1.msra.mxu0 %v370_v51  ;;  %2840 = vmatpush3.msra.mxu1 %v362_v50  ;;  %v301_v53 = vpop.permute.xlu0 %300  ;;  %v309_v54 = vpop.permute.xlu1 %308 }
  0xb3   : > { %v328_v55 = vsel %vm320_vm2, %v301_v53, %v309_v54  ;;  %2842 = vmatmul.mubr.msk.f32.vlgmr.msra.gmra.mxu1 %vm379_vm0, %v2653_v52  ;;  %2656 = vmatmul.mubr.msk.f32.vlgmr.msra.gmra.mxu0 %vm379_vm0, %v3139_v22 }
  0xb4   : > { %602 = vmatprep.subr.mxu1 %v328_v55  ;;  %462 = vmatprep.mubr.f32.mxu0 %v3022_v25 }
  0xb5   : > { %1691 = vrot.lane.b32.xlu0 %v3145_v24, %s3027_s20  ;;  %1675 = vrot.lane.b32.xlu1 %v3134_v21, %s3027_s20  ;;  %s2541_s20 = scalar_lea.vmem (%p3092_p5), %s4054_s5, %s2760_s10 }
  0xb6   : > { %v317_v58 = vpop.permute.xlu0 %316  ;;  %v299_v59 = vpop.permute.xlu1 %298  ;;  %2844 = vmatprep.mubr.msk.f32.mxu1 %vm379_vm0, %v2654_v57 }
  0xb7   : > { %v332_v60 = vsel %vm320_vm2, %v317_v58, %v301_v53  ;;  %v324_v61 = vsel %vm320_vm2, %v309_v54, %v317_v58  ;;  %2657 = vmatmul.mubr.msk.f32.gmra.mxu0 %vm379_vm0, %v2653_v52  ;;  %2845 = vmatmul.mubr.msk.f32.gmra.mxu1 %vm379_vm0, %v2655_v56 }
  0xb8   : > { %603 = vmatpush1.msra.mxu1 %v332_v60  ;;  %2847 = vmatprep.subr.mxu0 %v324_v61 }
  0xb9   : > { %1921 = vrot.lane.b32.xlu0 %v3110_v13, %s3028_s6  ;;  %1929 = vrot.lane.b32.xlu1 %v3114_v14, %s3028_s6 }
  0xba   : > { %2848 = vmatpush3.msra.mxu0 %v324_v61  ;;  %v307_v62 = vpop.permute.xlu0 %306  ;;  %v315_v63 = vpop.permute.xlu1 %314  ;;  %468 = vmatprep.mubr.f32.mxu0 %v3022_v25 }
  0xbb   : > { %v331_v0 = vsel %vm320_vm2, %v315_v63, %v299_v59  ;;  %v327_v1 = vsel %vm320_vm2, %v299_v59, %v307_v62  ;;  %v323_v2 = vsel %vm320_vm2, %v307_v62, %v315_v63  ;;  %2658 = vmatmul.mubr.msk.f32.gmra.mxu0 %vm379_vm0, %v2654_v57  ;;  %642 = vmatprep.mubr.f32.mxu1 %v3022_v25  ;;  %v2673_v59 = vld [vmem:[%s4050_s1 + $0x48] sm:$0xff]  ;;  %v2675_v63 = vld [vmem:[%s4050_s1 + $0x58] sm:$0xff] }
  0xbc   : > { %604 = vmatprep.subr.mxu1 %v327_v1  ;;  %2849 = vmatprep.subr.mxu0 %v323_v2 }
  0xbd   : > { %1937 = vrot.lane.b32.xlu0 %v3108_v12, %s3028_s6  ;;  %1919 = vrot.lane.b32.xlu1 %v3116_v15, %s3028_s6 }
  0xbe   : > { %605 = vmatpush1.msra.mxu1 %v331_v0  ;;  %2850 = vmatpush3.msra.mxu0 %v323_v2  ;;  %v297_v3 = vpop.permute.xlu0 %296  ;;  %v305_v4 = vpop.permute.xlu1 %304  ;;  %v2674_v0 = vld [vmem:[%s4050_s1 + $0x50] sm:$0xff] }
  0xbf   : > { %v326_v5 = vsel %vm320_vm2, %v297_v3, %v305_v4  ;;  %474 = vmatprep.mubr.f32.mxu0 %v3022_v25 }
  0xc0   : > { %606 = vmatprep.subr.mxu1 %v326_v5  ;;  %2659 = vmatmul.mubr.msk.f32.gmra.mxu0 %vm379_vm0, %v2655_v56 }
  0xc1   : > { %1927 = vrot.lane.b32.xlu0 %v3120_v16, %s3028_s6  ;;  %1935 = vrot.lane.b32.xlu1 %v3122_v17, %s3028_s6 }
  0xc2   : > { %v313_v7 = vpop.permute.xlu0 %312  ;;  %v295_v8 = vpop.permute.xlu1 %294  ;;  %2855 = vmatprep.mubr.msk.f32.mxu0 %vm379_vm0, %v333_v6 }
  0xc3   : > { %v330_v9 = vsel %vm320_vm2, %v313_v7, %v297_v3  ;;  %v322_v10 = vsel %vm320_vm2, %v305_v4, %v313_v7 }
  0xc4   : > { %607 = vmatpush1.msra.mxu1 %v330_v9  ;;  %2851 = vmatprep.subr.mxu0 %v322_v10 }
  0xc5   : > { %1917 = vrot.lane.b32.xlu0 %v3128_v19, %s3028_s6  ;;  %1925 = vrot.lane.b32.xlu1 %v3126_v18, %s3028_s6 }
  0xc6   : > { %2852 = vmatpush3.msra.mxu0 %v322_v10  ;;  %v303_v11 = vpop.permute.xlu0 %302  ;;  %v311_v22 = vpop.permute.xlu1 %310  ;;  %v2684_v10 = vld [vmem:[%s4050_s1 + $0x60] sm:$0xff] }
  0xc7   : > { %v329_v27 = vsel %vm320_vm2, %v311_v22, %v295_v8  ;;  %v325_v28 = vsel %vm320_vm2, %v295_v8, %v303_v11  ;;  %v321_v30 = vsel %vm320_vm2, %v303_v11, %v311_v22 }
  0xc8   : > { %608 = vmatprep.subr.mxu1 %v325_v28  ;;  %2853 = vmatprep.subr.mxu0 %v321_v30 }
  0xc9   : > { %1933 = vrot.lane.b32.xlu0 %v3132_v20, %s3028_s6  ;;  %1915 = vrot.lane.b32.xlu1 %v3134_v21, %s3028_s6 }
  0xca   : > { %609 = vmatpush1.msra.mxu1 %v329_v27  ;;  %2854 = vmatpush3.msra.mxu0 %v321_v30  ;;  %v759_v32 = vpop.permute.xlu0 %758  ;;  %v767_v33 = vpop.permute.xlu1 %766 }
  0xcb   : > { %v784_v34 = vsel %vm776_vm3, %v759_v32, %v767_v33  ;;  %2856 = vmatmul.mubr.msk.f32.vlgmr.msra.gmra.mxu0 %vm379_vm0, %v334_v31  ;;  %2664 = vmatmul.mubr.msk.f32.vlgmr.msra.gmra.mxu1 %vm379_vm0, %v333_v6 }
  0xcc   : > { %830 = vmatprep.subr.mxu0 %v784_v34  ;;  %648 = vmatprep.mubr.f32.mxu1 %v3022_v25 }
  0xcd   : > { %1923 = vrot.lane.b32.xlu0 %v3143_v23, %s3028_s6  ;;  %1931 = vrot.lane.b32.xlu1 %v3145_v24, %s3028_s6 }
  0xce   : > { %v775_v37 = vpop.permute.xlu0 %774  ;;  %v757_v38 = vpop.permute.xlu1 %756  ;;  %2858 = vmatprep.mubr.msk.f32.mxu0 %vm379_vm0, %v335_v36 }
  0xcf   : > { %v788_v39 = vsel %vm776_vm3, %v775_v37, %v759_v32  ;;  %v780_v40 = vsel %vm776_vm3, %v767_v33, %v775_v37  ;;  %2665 = vmatmul.mubr.msk.f32.gmra.mxu1 %vm379_vm0, %v334_v31  ;;  %2859 = vmatmul.mubr.msk.f32.gmra.mxu0 %vm379_vm0, %v336_v35 }
  0xd0   : > { %831 = vmatpush1.msra.mxu0 %v788_v39  ;;  %2861 = vmatprep.subr.mxu1 %v780_v40 }
  0xd1   : > { %2169 = vrot.lane.b32.xlu0 %v3114_v14, %s3029_s16  ;;  %2177 = vrot.lane.b32.xlu1 %v3108_v12, %s3029_s16 }
  0xd2   : > { %2862 = vmatpush3.msra.mxu1 %v780_v40  ;;  %v765_v41 = vpop.permute.xlu0 %764  ;;  %v773_v42 = vpop.permute.xlu1 %772  ;;  %654 = vmatprep.mubr.f32.mxu1 %v3022_v25 }
  0xd3   : > { %v787_v43 = vsel %vm776_vm3, %v773_v42, %v757_v38  ;;  %v783_v44 = vsel %vm776_vm3, %v757_v38, %v765_v41  ;;  %v779_v45 = vsel %vm776_vm3, %v765_v41, %v773_v42  ;;  %2666 = vmatmul.mubr.msk.f32.gmra.mxu1 %vm379_vm0, %v335_v36  ;;  %870 = vmatprep.mubr.f32.mxu0 %v3022_v25  ;;  %v2685_v38 = vld [vmem:[%s4050_s1 + $0x68] sm:$0xff]  ;;  %v2686_v41 = vld [vmem:[%s4050_s1 + $0x70] sm:$0xff]  ;;  %v2687_v42 = vld [vmem:[%s4050_s1 + $0x78] sm:$0xff] }
  0xd4   : > { %832 = vmatprep.subr.mxu0 %v783_v44  ;;  %2863 = vmatprep.subr.mxu1 %v779_v45 }
  0xd5   : > { %2161 = vrot.lane.b32.xlu0 %v3110_v13, %s3029_s16  ;;  %2167 = vrot.lane.b32.xlu1 %v3120_v16, %s3029_s16 }
  0xd6   : > { %833 = vmatpush1.msra.mxu0 %v787_v43  ;;  %2864 = vmatpush3.msra.mxu1 %v779_v45  ;;  %v755_v46 = vpop.permute.xlu0 %754  ;;  %v763_v47 = vpop.permute.xlu1 %762  ;;  %v2698_v45 = vld [vmem:[%s4050_s1 + $0x90] sm:$0xff] }
  0xd7   : > { %v782_v48 = vsel %vm776_vm3, %v755_v46, %v763_v47  ;;  %660 = vmatprep.mubr.f32.mxu1 %v3022_v25 }
  0xd8   : > { %834 = vmatprep.subr.mxu0 %v782_v48  ;;  %2667 = vmatmul.mubr.msk.f32.gmra.mxu1 %vm379_vm0, %v336_v35 }
  0xd9   : > { %2175 = vrot.lane.b32.xlu0 %v3122_v17, %s3029_s16  ;;  %2159 = vrot.lane.b32.xlu1 %v3116_v15, %s3029_s16 }
  0xda   : > { %v771_v50 = vpop.permute.xlu0 %770  ;;  %v753_v51 = vpop.permute.xlu1 %752  ;;  %2869 = vmatprep.mubr.msk.f32.mxu1 %vm379_vm0, %v2672_v49 }
  0xdb   : > { %v786_v52 = vsel %vm776_vm3, %v771_v50, %v755_v46  ;;  %v778_v53 = vsel %vm776_vm3, %v763_v47, %v771_v50  ;;  %v3030_v46 = vmov 0  }
  0xdc   : > { %835 = vmatpush1.msra.mxu0 %v786_v52  ;;  %2865 = vmatprep.subr.mxu1 %v778_v53  ;;  %v2699_v52 = vld [vmem:[%s4050_s1 + $0x98] sm:$0xff] }
  0xdd   : > { %2165 = vrot.lane.b32.xlu0 %v3126_v18, %s3029_s16  ;;  %2173 = vrot.lane.b32.xlu1 %v3132_v20, %s3029_s16 }
  0xde   : > { %2866 = vmatpush3.msra.mxu1 %v778_v53  ;;  %v761_v54 = vpop.permute.xlu0 %760  ;;  %v769_v55 = vpop.permute.xlu1 %768  ;;  %2996 = vset.pattern.permute.xlu1 %v3030_v46 }
  0xdf   : > { %v785_v56 = vsel %vm776_vm3, %v769_v55, %v753_v51  ;;  %v781_v57 = vsel %vm776_vm3, %v753_v51, %v761_v54  ;;  %v777_v58 = vsel %vm776_vm3, %v761_v54, %v769_v55  ;;  %2995 = vset.pattern.permute.xlu0 %v3030_v46 }
  0xe0   : > { %836 = vmatprep.subr.mxu0 %v781_v57  ;;  %2867 = vmatprep.subr.mxu1 %v777_v58 }
  0xe1   : > { %2157 = vrot.lane.b32.xlu0 %v3128_v19, %s3029_s16  ;;  %2163 = vrot.lane.b32.xlu1 %v3143_v23, %s3029_s16 }
  0xe2   : > { %837 = vmatpush1.msra.mxu0 %v785_v56  ;;  %2868 = vmatpush3.msra.mxu1 %v777_v58  ;;  %v999_v60 = vpop.permute.xlu0 %998  ;;  %v1007_v61 = vpop.permute.xlu1 %1006  ;;  %v2708_v58 = vld [vmem:[%s4050_s1 + $0xa0] sm:$0xff] }
  0xe3   : > { %v1024_v62 = vsel %vm1016_vm4, %v999_v60, %v1007_v61  ;;  %2870 = vmatmul.mubr.msk.f32.vlgmr.msra.gmra.mxu1 %vm379_vm0, %v2673_v59  ;;  %2676 = vmatmul.mubr.msk.f32.vlgmr.msra.gmra.mxu0 %vm379_vm0, %v2672_v49 }
  0xe4   : > { %1070 = vmatprep.subr.mxu1 %v1024_v62  ;;  %876 = vmatprep.mubr.f32.mxu0 %v3022_v25 }
  0xe5   : > { %2171 = vrot.lane.b32.xlu0 %v3145_v24, %s3029_s16  ;;  %2155 = vrot.lane.b32.xlu1 %v3134_v21, %s3029_s16  ;;  %s279_s16 = scalar_lea.vmem %s4052_s3, %s4104_s13 }
  0xe6   : > { %v1015_v1 = vpop.permute.xlu0 %1014  ;;  %v997_v2 = vpop.permute.xlu1 %996  ;;  %2872 = vmatprep.mubr.msk.f32.mxu1 %vm379_vm0, %v2674_v0 }
  0xe7   : > { %v1028_v3 = vsel %vm1016_vm4, %v1015_v1, %v999_v60  ;;  %v1020_v4 = vsel %vm1016_vm4, %v1007_v61, %v1015_v1  ;;  %2677 = vmatmul.mubr.msk.f32.gmra.mxu0 %vm379_vm0, %v2673_v59  ;;  %2873 = vmatmul.mubr.msk.f32.gmra.mxu1 %vm379_vm0, %v2675_v63  ;;  %v2709_v61 = vld [vmem:[%s4050_s1 + $0xa8] sm:$0xff] }
  0xe8   : > { %1071 = vmatpush1.msra.mxu1 %v1028_v3  ;;  %2875 = vmatprep.subr.mxu0 %v1020_v4 }
  0xe9   : > { %2876 = vmatpush3.msra.mxu0 %v1020_v4  ;;  %882 = vmatprep.mubr.f32.mxu0 %v3022_v25  ;;  %v2711_v4 = vld [vmem:[%s4050_s1 + $0xb8] sm:$0xff] }
  0xea   : > { %v1005_v5 = vpop.permute.xlu0 %1004  ;;  %v1013_v6 = vpop.permute.xlu1 %1012  ;;  %1110 = vmatprep.mubr.f32.mxu1 %v3022_v25 }
  0xeb   : > { %v1027_v7 = vsel %vm1016_vm4, %v1013_v6, %v997_v2  ;;  %v1023_v8 = vsel %vm1016_vm4, %v997_v2, %v1005_v5  ;;  %v1019_v9 = vsel %vm1016_vm4, %v1005_v5, %v1013_v6  ;;  %2678 = vmatmul.mubr.msk.f32.gmra.mxu0 %vm379_vm0, %v2674_v0  ;;  %v2395_v2 = vld [vmem:[%s4051_s2] sm:$0xff] }
  0xec   : > { %1072 = vmatprep.subr.mxu1 %v1023_v8  ;;  %2877 = vmatprep.subr.mxu0 %v1019_v9 }
  0xed   : > { %1073 = vmatpush1.msra.mxu1 %v1027_v7  ;;  %2878 = vmatpush3.msra.mxu0 %v1019_v9 }
  0xee   : > { %v995_v11 = vpop.permute.xlu0 %994  ;;  %v1003_v22 = vpop.permute.xlu1 %1002  ;;  %888 = vmatprep.mubr.f32.mxu0 %v3022_v25  ;;  %2401 = vperm.xlu0 %2995, %v2395_v2  }
  0xef   : > { %v1022_v27 = vsel %vm1016_vm4, %v995_v11, %v1003_v22  ;;  %2679 = vmatmul.mubr.msk.f32.gmra.mxu0 %vm379_vm0, %v2675_v63  ;;  %v2710_v63 = vld [vmem:[%s4050_s1 + $0xb0] sm:$0xff] }
  0xf0   : > { %1074 = vmatprep.subr.mxu1 %v1022_v27  ;;  %2883 = vmatprep.mubr.msk.f32.mxu0 %vm379_vm0, %v2684_v10 }
  0xf2   : > { %v1011_v28 = vpop.permute.xlu0 %1010  ;;  %v993_v30 = vpop.permute.xlu1 %992 }
  0xf3   : > { %v1026_v31 = vsel %vm1016_vm4, %v1011_v28, %v995_v11  ;;  %v1018_v32 = vsel %vm1016_vm4, %v1003_v22, %v1011_v28  ;;  %v2396_v11 = vld [vmem:[%s4051_s2 + $0x8] sm:$0xff]  ;;  %v2398_v22 = vld [vmem:[%s4051_s2 + $0x18] sm:$0xff] }
  0xf4   : > { %1075 = vmatpush1.msra.mxu1 %v1026_v31  ;;  %2879 = vmatprep.subr.mxu0 %v1018_v32  ;;  %v2720_v31 = vld [vmem:[%s4050_s1 + $0xc0] sm:$0xff] }
  0xf5   : > { %2880 = vmatpush3.msra.mxu0 %v1018_v32  ;;  %2406 = vperm.xlu1 %2996, %v2396_v11   ;;  %v2397_v32 = vld [vmem:[%s4051_s2 + $0x10] sm:$0xff] }
  0xf6   : > { %v1001_v33 = vpop.permute.xlu0 %1000  ;;  %v1009_v34 = vpop.permute.xlu1 %1008  ;;  %2416 = vperm.xlu0 %2995, %v2398_v22  }
  0xf7   : > { %v1025_v35 = vsel %vm1016_vm4, %v1009_v34, %v993_v30  ;;  %v1021_v36 = vsel %vm1016_vm4, %v993_v30, %v1001_v33  ;;  %v1017_v37 = vsel %vm1016_vm4, %v1001_v33, %v1009_v34 }
  0xf8   : > { %1076 = vmatprep.subr.mxu1 %v1021_v36  ;;  %2881 = vmatprep.subr.mxu0 %v1017_v37 }
  0xf9   : > { %1077 = vmatpush1.msra.mxu1 %v1025_v35  ;;  %2882 = vmatpush3.msra.mxu0 %v1017_v37  ;;  %v2432_v35 = vld [vmem:[%s4053_s4 + $0x8] sm:$0xff] }
  0xfa   : > { %v1442_v39 = vpop.permute.xlu0 %1441  ;;  %2688 = vmatmul.mubr.msk.f32.vlgmr.msra.gmra.mxu1 %vm379_vm0, %v2684_v10  ;;  %2884 = vmatmul.mubr.msk.f32.vlgmr.msra.gmra.mxu0 %vm379_vm0, %v2685_v38  ;;  %v1450_v40 = vpop.permute.xlu1 %1449 }
  0xfb   : > { %1273 = vmatprep.subr.mxu0 %v3114_v14  ;;  %2889 = vmatprep.subr.mxu1 %v3108_v12  ;;  %v1467_v47 = vsel %vm1459_vm5, %v1442_v39, %v1450_v40 }
  0xfc   : > { %1274 = vmatpush1.msra.mxu0 %v3110_v13  ;;  %2890 = vmatpush3.msra.mxu1 %v3108_v12 }
  0xfd   : > { %1275 = vmatprep.subr.mxu0 %v3120_v16  ;;  %2891 = vmatprep.subr.mxu1 %v3122_v17 }
  0xfe   : > { %1116 = vmatprep.mubr.f32.mxu1 %v3022_v25  ;;  %2886 = vmatprep.mubr.msk.f32.mxu0 %vm379_vm0, %v2686_v41  ;;  %v1458_v14 = vpop.permute.xlu0 %1457  ;;  %v1440_v43 = vpop.permute.xlu1 %1439 }
  0xff   : > { %1276 = vmatpush1.msra.mxu0 %v3116_v15  ;;  %2892 = vmatpush3.msra.mxu1 %v3122_v17  ;;  %v2696_v15 = vld [vmem:[%s4050_s1 + $0x80] sm:$0xff]  ;;  %v1463_v16 = vsel %vm1459_vm5, %v1450_v40, %v1458_v14  ;;  %v1471_v17 = vsel %vm1459_vm5, %v1458_v14, %v1442_v39 }
 0x100   : > { %2689 = vmatmul.mubr.msk.f32.gmra.mxu1 %vm379_vm0, %v2685_v38  ;;  %2887 = vmatmul.mubr.msk.f32.gmra.mxu0 %vm379_vm0, %v2687_v42  ;;  %v2431_v38 = vld [vmem:[%s4053_s4] sm:$0xff] }
 0x101   : > { %1277 = vmatprep.subr.mxu0 %v3126_v18  ;;  %2893 = vmatprep.subr.mxu1 %v3132_v20 }
 0x102   : > { %1278 = vmatpush1.msra.mxu0 %v3128_v19  ;;  %2894 = vmatpush3.msra.mxu1 %v3132_v20  ;;  %v1448_v12 = vpop.permute.xlu0 %1447  ;;  %v1456_v13 = vpop.permute.xlu1 %1455 }
 0x103   : > { %1279 = vmatprep.subr.mxu0 %v3143_v23  ;;  %2895 = vmatprep.subr.mxu1 %v3145_v24  ;;  %v1470_v18 = vsel %vm1459_vm5, %v1456_v13, %v1440_v43  ;;  %v1462_v50 = vsel %vm1459_vm5, %v1448_v12, %v1456_v13  ;;  %v1466_v53 = vsel %vm1459_vm5, %v1440_v43, %v1448_v12  ;;  %v2721_v43 = vld [vmem:[%s4050_s1 + $0xc8] sm:$0xff]  ;;  %v2722_v12 = vld [vmem:[%s4050_s1 + $0xd0] sm:$0xff]  ;;  %v2434_v13 = vld [vmem:[%s4053_s4 + $0x18] sm:$0xff] }
 0x104   : > { %1122 = vmatprep.mubr.f32.mxu1 %v3022_v25  ;;  %1280 = vmatpush1.msra.mxu0 %v3134_v21  ;;  %v2697_v21 = vld [vmem:[%s4050_s1 + $0x88] sm:$0xff] }
 0x105   : > { %1313 = vmatprep.mubr.f32.mxu0 %v3022_v25  ;;  %2896 = vmatpush3.msra.mxu1 %v3145_v24 }
 0x106   : > { %2690 = vmatmul.mubr.msk.f32.gmra.mxu1 %vm379_vm0, %v2686_v41  ;;  %2700 = vmatmul.mubr.msk.f32.vlgmr.msra.gmra.mxu0 %vm379_vm0, %v2696_v15  ;;  %v1438_v19 = vpop.permute.xlu0 %1437  ;;  %v1446_v20 = vpop.permute.xlu1 %1445 }
 0x107   : > { %1513 = vmatprep.subr.mxu1 %v1463_v16  ;;  %2903 = vmatprep.subr.mxu0 %v1471_v17  ;;  %v1465_v56 = vsel %vm1459_vm5, %v1438_v19, %v1446_v20 }
 0x108   : > { %2904 = vmatpush3.msra.mxu0 %v1471_v17  ;;  %1128 = vmatprep.mubr.f32.mxu1 %v3022_v25 }
 0x109   : > { %2905 = vmatprep.subr.mxu0 %v1470_v18  ;;  %1319 = vmatprep.mubr.f32.mxu0 %v3022_v25 }
 0x10a   : > { %2906 = vmatpush3.msra.mxu0 %v1470_v18  ;;  %2691 = vmatmul.mubr.msk.f32.gmra.mxu1 %vm379_vm0, %v2687_v42  ;;  %v1454_v23 = vpop.permute.xlu0 %1453  ;;  %v1436_v24 = vpop.permute.xlu1 %1435  ;;  %v2723_v18 = vld [vmem:[%s4050_s1 + $0xd8] sm:$0xff] }
 0x10b   : > { %2701 = vmatmul.mubr.msk.f32.gmra.mxu0 %vm379_vm0, %v2697_v21  ;;  %2897 = vmatprep.mubr.msk.f32.mxu1 %vm379_vm0, %v2696_v15  ;;  %v1469_v44 = vsel %vm1459_vm5, %v1454_v23, %v1438_v19  ;;  %v1461_v51 = vsel %vm1459_vm5, %v1446_v20, %v1454_v23  ;;  %v2433_v15 = vld [vmem:[%s4053_s4 + $0x10] sm:$0xff] }
 0x10c   : > { %1325 = vmatprep.mubr.f32.mxu0 %v3022_v25  ;;  %2907 = vmatprep.subr.mxu0 %v1469_v44 }
 0x10d   : > { %2908 = vmatpush3.msra.mxu0 %v1469_v44  ;;  %2411 = vperm.xlu1 %2996, %v2397_v32  }
 0x10e   : > { %2898 = vmatmul.mubr.msk.f32.vlgmr.msra.gmra.mxu1 %vm379_vm0, %v2697_v21  ;;  %v1444_v48 = vpop.permute.xlu0 %1443  ;;  %v1452_v49 = vpop.permute.xlu1 %1451  ;;  %2454 = vperm.xlu0 %2995, %v2432_v35  }
 0x10f   : > { %2702 = vmatmul.mubr.msk.f32.gmra.mxu0 %vm379_vm0, %v2698_v45  ;;  %1514 = vmatpush1.msra.mxu1 %v1467_v47  ;;  %v1460_v54 = vsel %vm1459_vm5, %v1444_v48, %v1452_v49  ;;  %v1468_v55 = vsel %vm1459_vm5, %v1452_v49, %v1436_v24  ;;  %v1464_v57 = vsel %vm1459_vm5, %v1436_v24, %v1444_v48  ;;  %v2732_v49 = vld [vmem:[%s4050_s1 + $0xe0] sm:$0xff] }
 0x110   : > { %1515 = vmatprep.subr.mxu1 %v1462_v50  ;;  %1331 = vmatprep.mubr.f32.mxu0 %v3022_v25 }
 0x111   : > { %1516 = vmatpush1.msra.mxu1 %v1466_v53  ;;  %2900 = vmatprep.mubr.msk.f32.mxu1 %vm379_vm0, %v2698_v45 }
 0x112   : > { %1517 = vmatprep.subr.mxu1 %v1461_v51  ;;  %2901 = vmatmul.mubr.msk.f32.gmra.mxu1 %vm379_vm0, %v2699_v52 }
 0x113   : > { %2703 = vmatmul.mubr.msk.f32.gmra.mxu0 %vm379_vm0, %v2699_v52  ;;  %1518 = vmatpush1.msra.mxu1 %v1465_v56  ;;  %v1690_v59 = vpop.permute.xlu0 %1689  ;;  %v1698_v60 = vpop.permute.xlu1 %1697 }
 0x114   : > { %1519 = vmatprep.subr.mxu1 %v1460_v54  ;;  %2909 = vmatprep.subr.mxu0 %v1468_v55  ;;  %v1703_v62 = vsel %vm1699_vm6, %v1690_v59, %v1698_v60 }
 0x115   : > { %1520 = vmatpush1.msra.mxu1 %v1464_v57  ;;  %1553 = vmatprep.mubr.f32.mxu1 %v3022_v25 }
 0x116   : > { %2910 = vmatpush3.msra.mxu0 %v1468_v55  ;;  %2911 = vmatprep.mubr.msk.f32.mxu0 %vm379_vm0, %v2708_v58 }
 0x117   : > { %2712 = vmatmul.mubr.msk.f32.vlgmr.msra.gmra.mxu1 %vm379_vm0, %v2708_v58  ;;  %2912 = vmatmul.mubr.msk.f32.vlgmr.msra.gmra.mxu0 %vm379_vm0, %v2709_v61  ;;  %v1682_v0 = vpop.permute.xlu0 %1681  ;;  %v1688_v1 = vpop.permute.xlu1 %1687 }
 0x118   : > { %1753 = vmatprep.subr.mxu0 %v1703_v62  ;;  %1559 = vmatprep.mubr.f32.mxu1 %v3022_v25  ;;  %v1707_v3 = vsel %vm1699_vm6, %v1682_v0, %v1690_v59  ;;  %v1711_v5 = vsel %vm1699_vm6, %v1698_v60, %v1682_v0  ;;  %v2733_v62 = vld [vmem:[%s4050_s1 + $0xe8] sm:$0xff] }
 0x119   : > { %2914 = vmatprep.mubr.msk.f32.mxu0 %vm379_vm0, %v2710_v63  ;;  %1754 = vmatpush1.msra.mxu0 %v1707_v3  ;;  %v2735_v3 = vld [vmem:[%s4050_s1 + $0xf8] sm:$0xff] }
 0x11a   : > { %2917 = vmatprep.subr.mxu1 %v1711_v5  ;;  %2449 = vperm.xlu1 %2996, %v2431_v38  }
 0x11b   : > { %2713 = vmatmul.mubr.msk.f32.gmra.mxu1 %vm379_vm0, %v2709_v61  ;;  %2915 = vmatmul.mubr.msk.f32.gmra.mxu0 %vm379_vm0, %v2711_v4  ;;  %v1696_v6 = vpop.permute.xlu0 %1695  ;;  %v1680_v7 = vpop.permute.xlu1 %1679 }
 0x11c   : > { %1565 = vmatprep.mubr.f32.mxu1 %v3022_v25  ;;  %2918 = vmatpush3.msra.mxu1 %v1711_v5  ;;  %v1706_v8 = vsel %vm1699_vm6, %v1680_v7, %v1688_v1  ;;  %v1702_v9 = vsel %vm1699_vm6, %v1688_v1, %v1696_v6  ;;  %v1710_v10 = vsel %vm1699_vm6, %v1696_v6, %v1680_v7 }
 0x11d   : > { %1755 = vmatprep.subr.mxu0 %v1702_v9  ;;  %2919 = vmatprep.subr.mxu1 %v1710_v10 }
 0x11e   : > { %1756 = vmatpush1.msra.mxu0 %v1706_v8  ;;  %2920 = vmatpush3.msra.mxu1 %v1710_v10 }
 0x11f   : > { %2714 = vmatmul.mubr.msk.f32.gmra.mxu1 %vm379_vm0, %v2710_v63  ;;  %v1686_v27 = vpop.permute.xlu0 %1685  ;;  %v1694_v28 = vpop.permute.xlu1 %1693  ;;  %1793 = vmatprep.mubr.f32.mxu0 %v3022_v25  ;;  %v2734_v63 = vld [vmem:[%s4050_s1 + $0xf0] sm:$0xff] }
 0x120   : > { %1571 = vmatprep.mubr.f32.mxu1 %v3022_v25  ;;  %v1701_v30 = vsel %vm1699_vm6, %v1686_v27, %v1694_v28  ;;  %2464 = vperm.xlu0 %2995, %v2434_v13  }
 0x121   : > { %1757 = vmatprep.subr.mxu0 %v1701_v30  ;;  %2459 = vperm.xlu1 %2996, %v2433_v15  }
 0x123   : > { %2715 = vmatmul.mubr.msk.f32.gmra.mxu1 %vm379_vm0, %v2711_v4  ;;  %v1678_v33 = vpop.permute.xlu0 %1677  ;;  %v1684_v34 = vpop.permute.xlu1 %1683 }
 0x124   : > { %v1705_v36 = vsel %vm1699_vm6, %v1678_v33, %v1686_v27  ;;  %v1709_v37 = vsel %vm1699_vm6, %v1694_v28, %v1678_v33  ;;  %2925 = vmatprep.mubr.msk.f32.mxu1 %vm379_vm0, %v2720_v31  ;;  %v2744_v27 = vld [vmem:[%s4050_s1 + $0x100] sm:$0xff] }
 0x125   : > { %1758 = vmatpush1.msra.mxu0 %v1705_v36  ;;  %2921 = vmatprep.subr.mxu1 %v1709_v37 }
 0x126   : > { %2922 = vmatpush3.msra.mxu1 %v1709_v37 }
 0x127   : > { %v1692_v39 = vpop.permute.xlu0 %1691  ;;  %v1676_v40 = vpop.permute.xlu1 %1675 }
 0x128   : > { %v1704_v41 = vsel %vm1699_vm6, %v1676_v40, %v1684_v34  ;;  %v1700_v42 = vsel %vm1699_vm6, %v1684_v34, %v1692_v39  ;;  %v1708_v14 = vsel %vm1699_vm6, %v1692_v39, %v1676_v40 }
 0x129   : > { %1759 = vmatprep.subr.mxu0 %v1700_v42  ;;  %2923 = vmatprep.subr.mxu1 %v1708_v14  ;;  %v2746_v42 = vld [vmem:[%s4050_s1 + $0x110] sm:$0xff] }
 0x12a   : > { %1760 = vmatpush1.msra.mxu0 %v1704_v41  ;;  %2924 = vmatpush3.msra.mxu1 %v1708_v14  ;;  %v2745_v41 = vld [vmem:[%s4050_s1 + $0x108] sm:$0xff] }
 0x12b   : > { %v1922_v16 = vpop.permute.xlu0 %1921  ;;  %2724 = vmatmul.mubr.msk.f32.vlgmr.msra.gmra.mxu0 %vm379_vm0, %v2720_v31  ;;  %2926 = vmatmul.mubr.msk.f32.vlgmr.msra.gmra.mxu1 %vm379_vm0, %v2721_v43  ;;  %v1930_v17 = vpop.permute.xlu1 %1929 }
 0x12c   : > { %1799 = vmatprep.mubr.f32.mxu0 %v3022_v25  ;;  %2928 = vmatprep.mubr.msk.f32.mxu1 %vm379_vm0, %v2722_v12  ;;  %v1947_v24 = vsel %vm1939_vm7, %v1922_v16, %v1930_v17 }
 0x12f   : > { %v1938_v19 = vpop.permute.xlu0 %1937  ;;  %2725 = vmatmul.mubr.msk.f32.gmra.mxu0 %vm379_vm0, %v2721_v43  ;;  %2929 = vmatmul.mubr.msk.f32.gmra.mxu1 %vm379_vm0, %v2723_v18  ;;  %v1920_v20 = vpop.permute.xlu1 %1919 }
 0x130   : > { %v1943_v21 = vsel %vm1939_vm7, %v1930_v17, %v1938_v19  ;;  %v1951_v23 = vsel %vm1939_vm7, %v1938_v19, %v1922_v16  ;;  %1805 = vmatprep.mubr.f32.mxu0 %v3022_v25  ;;  %2033 = vmatprep.mubr.f32.mxu1 %v3022_v25 }
 0x131   : > { %1993 = vmatprep.subr.mxu1 %v1943_v21  ;;  %2931 = vmatprep.subr.mxu0 %v1951_v23 }
 0x132   : > { %1994 = vmatpush1.msra.mxu1 %v1947_v24  ;;  %2932 = vmatpush3.msra.mxu0 %v1951_v23 }
 0x133   : > { %v1928_v44 = vpop.permute.xlu0 %1927  ;;  %2726 = vmatmul.mubr.msk.f32.gmra.mxu0 %vm379_vm0, %v2722_v12  ;;  %v1936_v45 = vpop.permute.xlu1 %1935 }
 0x134   : > { %v1946_v46 = vsel %vm1939_vm7, %v1920_v20, %v1928_v44  ;;  %v1942_v47 = vsel %vm1939_vm7, %v1928_v44, %v1936_v45  ;;  %v1950_v48 = vsel %vm1939_vm7, %v1936_v45, %v1920_v20  ;;  %1811 = vmatprep.mubr.f32.mxu0 %v3022_v25 }
 0x135   : > { %1995 = vmatprep.subr.mxu1 %v1942_v47  ;;  %2933 = vmatprep.subr.mxu0 %v1950_v48 }
 0x136   : > { %1996 = vmatpush1.msra.mxu1 %v1946_v46  ;;  %2934 = vmatpush3.msra.mxu0 %v1950_v48 }
 0x137   : > { %v1918_v50 = vpop.permute.xlu0 %1917  ;;  %2727 = vmatmul.mubr.msk.f32.gmra.mxu0 %vm379_vm0, %v2723_v18  ;;  %v1926_v51 = vpop.permute.xlu1 %1925 }
 0x138   : > { %2939 = vmatprep.mubr.msk.f32.mxu0 %vm379_vm0, %v2732_v49  ;;  %v1945_v56 = vsel %vm1939_vm7, %v1918_v50, %v1926_v51 }
 0x13b   : > { %v1934_v52 = vpop.permute.xlu0 %1933  ;;  %v1916_v53 = vpop.permute.xlu1 %1915 }
 0x13c   : > { %v1941_v54 = vsel %vm1939_vm7, %v1926_v51, %v1934_v52  ;;  %v1949_v55 = vsel %vm1939_vm7, %v1934_v52, %v1918_v50 }
 0x13d   : > { %1997 = vmatprep.subr.mxu1 %v1941_v54  ;;  %2935 = vmatprep.subr.mxu0 %v1949_v55 }
 0x13e   : > { %1998 = vmatpush1.msra.mxu1 %v1945_v56  ;;  %2936 = vmatpush3.msra.mxu0 %v1949_v55 }
 0x13f   : > { %v1924_v57 = vpop.permute.xlu0 %1923  ;;  %v1932_v58 = vpop.permute.xlu1 %1931 }
 0x140   : > { %v1944_v59 = vsel %vm1939_vm7, %v1916_v53, %v1924_v57  ;;  %v1940_v60 = vsel %vm1939_vm7, %v1924_v57, %v1932_v58  ;;  %v1948_v61 = vsel %vm1939_vm7, %v1932_v58, %v1916_v53 }
 0x141   : > { %1999 = vmatprep.subr.mxu1 %v1940_v60  ;;  %2937 = vmatprep.subr.mxu0 %v1948_v61 }
 0x142   : > { %2000 = vmatpush1.msra.mxu1 %v1944_v59  ;;  %2938 = vmatpush3.msra.mxu0 %v1948_v61 }
 0x143   : > { %v2170_v0 = vpop.permute.xlu0 %2169  ;;  %2736 = vmatmul.mubr.msk.f32.vlgmr.msra.gmra.mxu1 %vm379_vm0, %v2732_v49  ;;  %2940 = vmatmul.mubr.msk.f32.vlgmr.msra.gmra.mxu0 %vm379_vm0, %v2733_v62  ;;  %v2178_v1 = vpop.permute.xlu1 %2177 }
 0x144   : > { %v2183_v2 = vsel %vm2179_vm8, %v2170_v0, %v2178_v1  ;;  %2039 = vmatprep.mubr.f32.mxu1 %v3022_v25  ;;  %2942 = vmatprep.mubr.msk.f32.mxu0 %vm379_vm0, %v2734_v63 }
 0x145   : > { %2233 = vmatprep.subr.mxu0 %v2183_v2 }
 0x147   : > { %v2162_v4 = vpop.permute.xlu0 %2161  ;;  %2737 = vmatmul.mubr.msk.f32.gmra.mxu1 %vm379_vm0, %v2733_v62  ;;  %2943 = vmatmul.mubr.msk.f32.gmra.mxu0 %vm379_vm0, %v2735_v3  ;;  %v2168_v5 = vpop.permute.xlu1 %2167 }
 0x148   : > { %v2187_v6 = vsel %vm2179_vm8, %v2162_v4, %v2170_v0  ;;  %v2191_v7 = vsel %vm2179_vm8, %v2178_v1, %v2162_v4  ;;  %2045 = vmatprep.mubr.f32.mxu1 %v3022_v25  ;;  %2273 = vmatprep.mubr.f32.mxu0 %v3022_v25 }
 0x149   : > { %2234 = vmatpush1.msra.mxu0 %v2187_v6  ;;  %2945 = vmatprep.subr.mxu1 %v2191_v7 }
 0x14a   : > { %2946 = vmatpush3.msra.mxu1 %v2191_v7 }
 0x14b   : > { %v2176_v8 = vpop.permute.xlu0 %2175  ;;  %2738 = vmatmul.mubr.msk.f32.gmra.mxu1 %vm379_vm0, %v2734_v63  ;;  %v2160_v9 = vpop.permute.xlu1 %2159 }
 0x14c   : > { %v2186_v10 = vsel %vm2179_vm8, %v2160_v9, %v2168_v5  ;;  %v2182_v11 = vsel %vm2179_vm8, %v2168_v5, %v2176_v8  ;;  %v2190_v22 = vsel %vm2179_vm8, %v2176_v8, %v2160_v9  ;;  %2051 = vmatprep.mubr.f32.mxu1 %v3022_v25 }
 0x14d   : > { %2235 = vmatprep.subr.mxu0 %v2182_v11  ;;  %2947 = vmatprep.subr.mxu1 %v2190_v22 }
 0x14e   : > { %2236 = vmatpush1.msra.mxu0 %v2186_v10  ;;  %2948 = vmatpush3.msra.mxu1 %v2190_v22 }
 0x14f   : > { %v2166_v28 = vpop.permute.xlu0 %2165  ;;  %2739 = vmatmul.mubr.msk.f32.gmra.mxu1 %vm379_vm0, %v2735_v3  ;;  %v2174_v30 = vpop.permute.xlu1 %2173 }
 0x150   : > { %v2181_v31 = vsel %vm2179_vm8, %v2166_v28, %v2174_v30  ;;  %2953 = vmatprep.mubr.msk.f32.mxu1 %vm379_vm0, %v2744_v27 }
 0x151   : > { %2237 = vmatprep.subr.mxu0 %v2181_v31 }
 0x153   : > { %v2158_v32 = vpop.permute.xlu0 %2157  ;;  %v2164_v33 = vpop.permute.xlu1 %2163 }
 0x154   : > { %v2185_v34 = vsel %vm2179_vm8, %v2158_v32, %v2166_v28  ;;  %v2189_v35 = vsel %vm2179_vm8, %v2174_v30, %v2158_v32 }
 0x155   : > { %2238 = vmatpush1.msra.mxu0 %v2185_v34  ;;  %2949 = vmatprep.subr.mxu1 %v2189_v35 }
 0x156   : > { %2950 = vmatpush3.msra.mxu1 %v2189_v35 }
 0x157   : > { %v2172_v36 = vpop.permute.xlu0 %2171  ;;  %v2156_v37 = vpop.permute.xlu1 %2155 }
 0x158   : > { %v2184_v38 = vsel %vm2179_vm8, %v2156_v37, %v2164_v33  ;;  %v2180_v39 = vsel %vm2179_vm8, %v2164_v33, %v2172_v36  ;;  %v2188_v40 = vsel %vm2179_vm8, %v2172_v36, %v2156_v37 }
 0x159   : > { %2239 = vmatprep.subr.mxu0 %v2180_v39  ;;  %2951 = vmatprep.subr.mxu1 %v2188_v40 }
 0x15a   : > { %2240 = vmatpush1.msra.mxu0 %v2184_v38  ;;  %2952 = vmatpush3.msra.mxu1 %v2188_v40 }
 0x15b   : > { %2748 = vmatmul.mubr.msk.f32.vlgmr.msra.gmra.mxu0 %vm379_vm0, %v2744_v27  ;;  %2954 = vmatmul.mubr.msk.f32.vlgmr.msra.gmra.mxu1 %vm379_vm0, %v2745_v41 }
 0x15c   : > { %2279 = vmatprep.mubr.f32.mxu0 %v3022_v25  ;;  %2956 = vmatprep.mubr.msk.f32.mxu1 %vm379_vm0, %v2746_v42 }
 0x15f   : > { %2749 = vmatmul.mubr.msk.f32.gmra.mxu0 %vm379_vm0, %v2745_v41  ;;  %2957 = vmatmul.mubr.msk.f32.gmra.mxu1 %vm379_vm0, %v2747_v29 }
 0x160   : > { %2285 = vmatprep.mubr.f32.mxu0 %v3022_v25 }
 0x163   : > { %2750 = vmatmul.mubr.msk.f32.gmra.mxu0 %vm379_vm0, %v2746_v42 }
 0x164   : > { %2291 = vmatprep.mubr.f32.mxu0 %v3022_v25 }
 0x167   : > { %2751 = vmatmul.mubr.msk.f32.gmra.mxu0 %vm379_vm0, %v2747_v29 }
 0x173   : > { %v458_v14 = vpop.f32.mrf.mxu0  ;;  %v2843_v16 = vpop.f32.mrf.mxu1 }
 0x175   : > { %v460_v43 = vpop.f32.mrf.mxu0  ;;  %v547_v18 = vpop.f32.mrf.mxu1 }
 0x177   : > { %v464_v12 = vpop.f32.mrf.mxu0  ;;  %v2846_v20 = vpop.f32.mrf.mxu1 }
 0x179   : > { %v466_v13 = vpop.f32.mrf.mxu0  ;;  %v557_v23 = vpop.f32.mrf.mxu1 }
 0x17b   : > { %v470_v15 = vpop.f32.mrf.mxu0 }
 0x17d   : > { %v472_v17 = vpop.f32.mrf.mxu0 }
 0x180   : > { %v476_v19 = vpop.f32.mrf.mxu0 }
 0x182   : > { %v478_v21 = vpop.f32.mrf.mxu0 }
 0x18b   : > { %v644_v24 = vpop.f32.mrf.mxu1  ;;  %v2857_v44 = vpop.f32.mrf.mxu0 }
 0x18c   : > { %v3727_v45 = vadd.f32 %v644_v24, %v458_v14  ;;  %v3729_v46 = vadd.f32 %v2857_v44, %v2843_v16 }
 0x18d   : > { %v646_v25 = vpop.f32.mrf.mxu1  ;;  %v733_v47 = vpop.f32.mrf.mxu0 }
 0x18e   : > { %v3731_v48 = vadd.f32 %v646_v25, %v460_v43  ;;  %v3733_v49 = vadd.f32 %v733_v47, %v547_v18 }
 0x18f   : > { %v650_v50 = vpop.f32.mrf.mxu1  ;;  %v2860_v51 = vpop.f32.mrf.mxu0 }
 0x190   : > { %v3735_v52 = vadd.f32 %v650_v50, %v464_v12  ;;  %v3737_v53 = vadd.f32 %v2860_v51, %v2846_v20 }
 0x191   : > { %v652_v54 = vpop.f32.mrf.mxu1  ;;  %v743_v55 = vpop.f32.mrf.mxu0 }
 0x192   : > { %v653_v56 = vadd.f32 %v652_v54, %v466_v13  ;;  %v744_v57 = vadd.f32 %v743_v55, %v557_v23 }
 0x193   : > { %v656_v58 = vpop.f32.mrf.mxu1 }
 0x194   : > { %v3739_v59 = vadd.f32 %v656_v58, %v470_v15 }
 0x195   : > { %v658_v60 = vpop.f32.mrf.mxu1 }
 0x196   : > { %v3741_v61 = vadd.f32 %v658_v60, %v472_v17 }
 0x198   : > { %v662_v62 = vpop.f32.mrf.mxu1 }
 0x199   : > { %v3743_v63 = vadd.f32 %v662_v62, %v476_v19 }
 0x19a   : > { %v664_v0 = vpop.f32.mrf.mxu1 }
 0x19b   : > { %v3745_v1 = vadd.f32 %v664_v0, %v478_v21 }
 0x1a3   : > { %v3747_v2 = vpop.f32.mrf.mxu0  ;;  %v3749_v3 = vpop.f32.mrf.mxu1 }
 0x1a5   : > { %v3751_v4 = vpop.f32.mrf.mxu0  ;;  %v3753_v5 = vpop.f32.mrf.mxu1 }
 0x1a7   : > { %v3755_v6 = vpop.f32.mrf.mxu0  ;;  %v3757_v7 = vpop.f32.mrf.mxu1 }
 0x1a9   : > { %v880_v8 = vpop.f32.mrf.mxu0  ;;  %v971_v9 = vpop.f32.mrf.mxu1 }
 0x1aa   : > { %v3759_v10 = vadd.f32 %v880_v8, %v653_v56  ;;  %v3761_v11 = vadd.f32 %v971_v9, %v744_v57 }
 0x1ab   : > { %v3763_v22 = vpop.f32.mrf.mxu0 }
 0x1ad   : > { %v3765_v27 = vpop.f32.mrf.mxu0 }
 0x1af   : > { %v3767_v28 = vpop.f32.mrf.mxu0 }
 0x1b1   : > { %v3769_v30 = vpop.f32.mrf.mxu0 }
 0x1ba   : > { %v3771_v31 = vpop.f32.mrf.mxu1  ;;  %v3773_v32 = vpop.f32.mrf.mxu0 }
 0x1bc   : > { %v3775_v33 = vpop.f32.mrf.mxu1  ;;  %v3777_v34 = vpop.f32.mrf.mxu0 }
 0x1c0   : > { %v3779_v35 = vpop.f32.mrf.mxu1  ;;  %v3781_v36 = vpop.f32.mrf.mxu0 }
 0x1c2   : > { %v3783_v37 = vpop.f32.mrf.mxu1  ;;  %v3785_v38 = vpop.f32.mrf.mxu0 }
 0x1c6   : > { %v3787_v39 = vpop.f32.mrf.mxu1  ;;  %v3789_v40 = vpop.f32.mrf.mxu0 }
 0x1c8   : > { %v3791_v41 = vpop.f32.mrf.mxu1  ;;  %v3793_v42 = vpop.f32.mrf.mxu0 }
 0x1ca   : > { %v3795_v29 = vpop.f32.mrf.mxu1 }
 0x1cb   : > { %v3797_v14 = vpop.f32.mrf.mxu0 }
 0x1cc   : > { %v3799_v43 = vpop.f32.mrf.mxu1 }
 0x1cd   : > { %v3801_v12 = vpop.f32.mrf.mxu0 }
 0x1ce   : > { %v3803_v13 = vpop.f32.mrf.mxu1 }
 0x1cf   : > { %v3807_v16 = vpop.f32.mrf.mxu0 }
 0x1d0   : > { %v3805_v15 = vpop.f32.mrf.mxu1 }
 0x1d1   : > { %v3813_v19 = vpop.f32.mrf.mxu0 }
 0x1d2   : > { %v3809_v17 = vpop.f32.mrf.mxu1 }
 0x1d3   : > { %v3817_v21 = vpop.f32.mrf.mxu0 }
 0x1d4   : > { %v3811_v18 = vpop.f32.mrf.mxu1 }
 0x1d5   : > { %v3821_v24 = vpop.f32.mrf.mxu0 }
 0x1d7   : > { %v3815_v20 = vpop.f32.mrf.mxu1  ;;  %v3825_v25 = vpop.f32.mrf.mxu0 }
 0x1d9   : > { %v3819_v23 = vpop.f32.mrf.mxu1  ;;  %v3829_v50 = vpop.f32.mrf.mxu0 }
 0x1db   : > { %v3823_v44 = vpop.f32.mrf.mxu1  ;;  %v3833_v54 = vpop.f32.mrf.mxu0 }
 0x1dd   : > { %v3827_v47 = vpop.f32.mrf.mxu1  ;;  %v3837_v56 = vpop.f32.mrf.mxu0 }
 0x1de   : > { %4059 = vst [vmem:[#allocation6_spill] sm:$0xff] %v3837_v56 }
 0x1df   : > { %v3831_v51 = vpop.f32.mrf.mxu1 }
 0x1e0   : > { %4057 = vst [vmem:[#allocation4_spill] sm:$0xff] %v3831_v51 }
 0x1e1   : > { %v3835_v55 = vpop.f32.mrf.mxu1 }
 0x1e2   : > { %4058 = vst [vmem:[#allocation5_spill] sm:$0xff] %v3835_v55 }
 0x1e3   : > { %v3839_v57 = vpop.f32.mrf.mxu1 }
 0x1e4   : > { %4060 = vst [vmem:[#allocation7_spill] sm:$0xff] %v3839_v57 }
 0x1e5   : > { %v3843_v60 = vpop.f32.mrf.mxu1 }
 0x1e6   : > { %4062 = vst [vmem:[#allocation9_spill] sm:$0xff] %v3843_v60 }
 0x1eb   : > { %v3841_v58 = vpop.f32.mrf.mxu0  ;;  %v3847_v0 = vpop.f32.mrf.mxu1 }
 0x1ec   : > { %4061 = vst [vmem:[#allocation8_spill] sm:$0xff] %v3841_v58  ;;  %4064 = vst [vmem:[#allocation11_spill] sm:$0xff] %v3847_v0 }
 0x1ed   : > { %v3845_v62 = vpop.f32.mrf.mxu0  ;;  %v3851_v9 = vpop.f32.mrf.mxu1 }
 0x1ee   : > { %4063 = vst [vmem:[#allocation10_spill] sm:$0xff] %v3845_v62  ;;  %4066 = vst [vmem:[#allocation13_spill] sm:$0xff] %v3851_v9 }
 0x1ef   : > { %v3849_v8 = vpop.f32.mrf.mxu0  ;;  %v3856_v55 = vpop.f32.mrf.mxu1 }
 0x1f0   : > { %4065 = vst [vmem:[#allocation12_spill] sm:$0xff] %v3849_v8  ;;  %4068 = vst [vmem:[#allocation15_spill] sm:$0xff] %v3856_v55  ;;  %v4074_v8 = vlaneseq  ;;  %v2491_v55 = vld [vmem:[%s279_s16] sm:$0x7] }
 0x1f1   : > { %v3853_v26 = vpop.f32.mrf.mxu0  ;;  %v3860_v57 = vpop.f32.mrf.mxu1 }
 0x1f2   : > { %4067 = vst [vmem:[#allocation14_spill] sm:$0xff] %v3853_v26  ;;  %4070 = vst [vmem:[#allocation17_spill] sm:$0xff] %v3860_v57  ;;  %v2494_v0 = vshrl.u32 %v4074_v8, 7  ;;  %v981_v8 = vadd.f32 %v3751_v4, %v3731_v48  ;;  %v987_v48 = vadd.f32 %v3765_v27, %v3741_v61 }
 0x1f3   : > { %v3858_v51 = vpop.f32.mrf.mxu0 }
 0x1f4   : > { %4069 = vst [vmem:[#allocation16_spill] sm:$0xff] %v3858_v51  ;;  %v2503_v57 = vsub.s32 2, %v2494_v0  ;;  %v2499_v56 = vsub.s32 1, %v2494_v0 }
 0x1f5   : > { %v3862_v58 = vpop.f32.mrf.mxu0 }
 0x1f6   : > { %4071 = vst [vmem:[#allocation18_spill] sm:$0xff] %v3862_v58  ;;  %v980_v58 = vadd.f32 %v3747_v2, %v3727_v45  ;;  %v986_v45 = vadd.f32 %v3763_v22, %v3739_v59  ;;  %v991_v2 = vadd.f32 %v3757_v7, %v3737_v53  ;;  %v3900_v4 = vrot.slane %v2491_v55, %v2503_v57  ;;  %v4082_v57 = vld [vmem:[#allocation7_spill] sm:$0xff] }
 0x1f7   : > { %v3869_v9 = vpop.f32.mrf.mxu0  ;;  %v1224_v7 = vadd.f32 %v3783_v37, %v3759_v10 }
 0x1f8   : > { %4075 = vst [vmem:[#allocation21_spill] sm:$0xff] %v3869_v9  ;;  %v985_v9 = vadd.f32 %v3749_v3, %v3729_v46  ;;  %v990_v46 = vadd.f32 %v3769_v30, %v3745_v1  ;;  %v3907_v3 = vrot.slane %v2491_v55, %v2499_v56  ;;  %v1228_v1 = vadd.f32 %v3785_v38, %v3761_v11  ;;  %v4081_v56 = vld [vmem:[#allocation5_spill] sm:$0xff] }
 0x1f9   : > { %v1226_v22 = vadd.f32 %v3787_v39, %v986_v45  ;;  %v1427_v11 = vadd.f32 %v3801_v12, %v1224_v7  ;;  %v4086_v45 = vld [vmem:[#allocation10_spill] sm:$0xff] }
 0x1fa   : > { %v1225_v53 = vadd.f32 %v3773_v32, %v985_v9  ;;  %v4084_v9 = vld [vmem:[#allocation11_spill] sm:$0xff] }
 0x203   : > { %v3864_v60 = vpop.f32.mrf.mxu1 }
 0x204   : > { %4072 = vst [vmem:[#allocation19_spill] sm:$0xff] %v3864_v60  ;;  %v3880_v60 = vpop.f32.mrf.mxu0 }
 0x205   : > { %v3866_v62 = vpop.f32.mrf.mxu1  ;;  %4078 = vst [vmem:[#allocation24_spill] sm:$0xff] %v3880_v60 }
 0x206   : > { %4073 = vst [vmem:[#allocation20_spill] sm:$0xff] %v3866_v62  ;;  %v2495_v62 = vsub.s32 0, %v2494_v0  ;;  %v2941_v60 = vpop.f32.mrf.mxu0 }
 0x207   : > { %v3871_v26 = vpop.f32.mrf.mxu1 }
 0x208   : > { %4076 = vst [vmem:[#allocation22_spill] sm:$0xff] %v3871_v26  ;;  %v983_v26 = vadd.f32 %v3755_v6, %v3735_v52  ;;  %v989_v52 = vadd.f32 %v3767_v28, %v3743_v63  ;;  %v3905_v59 = vrot.slane %v2491_v55, %v2495_v62  ;;  %v1231_v63 = vadd.f32 %v3781_v36, %v991_v2  ;;  %v2124_v27 = vpop.f32.mrf.mxu0  ;;  %v4080_v55 = vld [vmem:[#allocation4_spill] sm:$0xff]  ;;  %v4087_v2 = vld [vmem:[#allocation13_spill] sm:$0xff] }
 0x209   : > { %v3876_v51 = vpop.f32.mrf.mxu1  ;;  %v1429_v36 = vadd.f32 %v3807_v16, %v1226_v22  ;;  %v4083_v62 = vld [vmem:[#allocation8_spill] sm:$0xff] }
 0x20a   : > { %4077 = vst [vmem:[#allocation23_spill] sm:$0xff] %v3876_v51  ;;  %v982_v51 = vadd.f32 %v3753_v5, %v3733_v49  ;;  %v1220_v49 = vadd.f32 %v3771_v31, %v980_v58  ;;  %v1221_v5 = vadd.f32 %v3775_v33, %v981_v8  ;;  %v1223_v6 = vadd.f32 %v3779_v35, %v983_v26  ;;  %v3925_v33 = vpop.permute.xlu0 %2401 }
 0x20b   : > { %v3894_v0 = vpop.f32.mrf.mxu1  ;;  %v1227_v31 = vadd.f32 %v3791_v41, %v987_v48  ;;  %v1229_v26 = vadd.f32 %v3795_v29, %v989_v52  ;;  %v1428_v35 = vadd.f32 %v3803_v13, %v1225_v53  ;;  %v1434_v39 = vadd.f32 %v3809_v17, %v1231_v63  ;;  %v4088_v48 = vld [vmem:[#allocation12_spill] sm:$0xff]  ;;  %v4089_v53 = vld [vmem:[#allocation15_spill] sm:$0xff] }
 0x20c   : > { %v1222_v61 = vadd.f32 %v3777_v34, %v982_v51  ;;  %v1423_v30 = vadd.f32 %v3789_v40, %v1220_v49  ;;  %v1424_v32 = vadd.f32 %v3793_v42, %v1221_v5  ;;  %v1426_v10 = vadd.f32 %v3797_v14, %v1223_v6  ;;  %v3935_v40 = vpop.permute.xlu1 %2406  ;;  %v4079_v51 = vld [vmem:[#allocation6_spill] sm:$0xff]  ;;  %v4091_v63 = vld [vmem:[#allocation19_spill] sm:$0xff] }
 0x20d   : > { %v3919_v28 = vpop.f32.mrf.mxu1  ;;  %v1230_v34 = vadd.f32 %v3799_v43, %v990_v46  ;;  %v1430_v37 = vadd.f32 %v3813_v19, %v1227_v31  ;;  %v1432_v41 = vadd.f32 %v3817_v21, %v1229_v26  ;;  %v1431_v29 = vadd.f32 %v3811_v18, %v1228_v1  ;;  %v2944_v43 = vpop.f32.mrf.mxu0 }
 0x20e   : > { %v1425_v38 = vadd.f32 %v3805_v15, %v1222_v61  ;;  %v1663_v14 = vadd.f32 %v3815_v20, %v1423_v30  ;;  %v1668_v13 = vadd.f32 %v3825_v25, %v1428_v35  ;;  %v1664_v16 = vadd.f32 %v3819_v23, %v1424_v32  ;;  %v3953_v8 = vpop.permute.xlu0 %2416  ;;  %v4090_v61 = vld [vmem:[#allocation14_spill] sm:$0xff]  ;;  %v4092_v30 = vld [vmem:[#allocation17_spill] sm:$0xff]  ;;  %v4093_v32 = vld [vmem:[#allocation16_spill] sm:$0xff] }
 0x20f   : > { %v1433_v42 = vadd.f32 %v3821_v24, %v1230_v34  ;;  %v2053_v12 = vpop.f32.mrf.mxu1  ;;  %v1666_v17 = vadd.f32 %v3823_v44, %v1426_v10  ;;  %v1674_v19 = vadd.f32 %v3833_v54, %v1434_v39  ;;  %v1667_v21 = vadd.f32 %v3827_v47, %v1427_v11  ;;  %v2134_v46 = vpop.f32.mrf.mxu0  ;;  %v4094_v10 = vld [vmem:[#allocation18_spill] sm:$0xff]  ;;  %v4095_v11 = vld [vmem:[#allocation21_spill] sm:$0xff] }
 0x210   : > { %v1665_v15 = vadd.f32 %v3829_v50, %v1425_v38  ;;  %v1671_v24 = vadd.f32 %v4079_v51, %v1431_v29  ;;  %v1669_v18 = vadd.f32 %v4080_v55, %v1429_v36  ;;  %v1670_v20 = vadd.f32 %v4081_v56, %v1430_v37  ;;  %v4085_v50 = vld [vmem:[#allocation9_spill] sm:$0xff]  ;;  %v3964_v22 = vpop.permute.xlu1 %2411  ;;  %v4096_v38 = vld [vmem:[#allocation20_spill] sm:$0xff] }
 0x211   : > { %v1672_v58 = vadd.f32 %v4082_v57, %v1432_v41  ;;  %v1903_v25 = vadd.f32 %v4083_v62, %v1663_v14  ;;  %v1908_v23 = vadd.f32 %v4084_v9, %v1668_v13  ;;  %v1673_v44 = vadd.f32 %v4085_v50, %v1433_v42  ;;  %v3959_v49 = vpop.f32.mrf.mxu1  ;;  %v4097_v14 = vld [vmem:[#allocation24_spill] sm:$0xff] }
 0x212   : > { %v1904_v54 = vadd.f32 %v4086_v45, %v1664_v16  ;;  %v1905_v47 = vadd.f32 %v4087_v2, %v1665_v15  ;;  %v1906_v52 = vadd.f32 %v4088_v48, %v1666_v17  ;;  %v1914_v5 = vadd.f32 %v4089_v53, %v1674_v19  ;;  %v4099_v17 = vld [vmem:[#allocation23_spill] sm:$0xff] }
 0x213   : > { %v1907_v6 = vadd.f32 %v4090_v61, %v1667_v21  ;;  %v2143_v7 = vadd.f32 %v4091_v63, %v1903_v25  ;;  %v2148_v1 = vadd.f32 %v2941_v60, %v1908_v23  ;;  %v1911_v31 = vadd.f32 %v4092_v30, %v1671_v24  ;;  %v4098_v60 = vld [vmem:[#allocation22_spill] sm:$0xff] }
 0x214   : > { %v1909_v26 = vadd.f32 %v4093_v32, %v1669_v18  ;;  %v1910_v34 = vadd.f32 %v4094_v10, %v1670_v20  ;;  %v1912_v35 = vadd.f32 %v4095_v11, %v1672_v58  ;;  %v2144_v39 = vadd.f32 %v4096_v38, %v1904_v54  ;;  %v3976_v20 = vpop.permute.xlu0 %2454  ;;  %v2450_v50 = vpop.permute.xlu1 %2449 }
 0x215   : > { %v2145_v41 = vadd.f32 %v2124_v27, %v1905_v47  ;;  %v1913_v13 = vadd.f32 %v4097_v14, %v1673_v44  ;;  %v2146_v16 = vadd.f32 %v4098_v60, %v1906_v52  ;;  %v2154_v15 = vadd.f32 %v2944_v43, %v1914_v5 }
 0x216   : > { %v2147_v19 = vadd.f32 %v4099_v17, %v1907_v6  ;;  %v2151_v27 = vadd.f32 %v2134_v46, %v1911_v31  ;;  %v2149_v57 = vadd.f32 %v3894_v0, %v1909_v26  ;;  %v2150_v58 = vadd.f32 %v3919_v28, %v1910_v34 }
 0x217   : > { %v2152_v62 = vadd.f32 %v2053_v12, %v1912_v35  ;;  %v2153_v11 = vadd.f32 %v3959_v49, %v1913_v13 }
 0x218   : > { %v2465_v31 = vpop.permute.xlu0 %2464  ;;  %v2460_v60 = vpop.permute.xlu1 %2459 }
 0x21b   : > { %v2275_v36 = vpop.f32.mrf.mxu0  ;;  %v2955_v37 = vpop.f32.mrf.mxu1 }
 0x21c   : > { %v2383_v42 = vadd.f32 %v2275_v36, %v2143_v7  ;;  %v2388_v29 = vadd.f32 %v2955_v37, %v2148_v1 }
 0x21d   : > { %v2277_v21 = vpop.f32.mrf.mxu0  ;;  %v2364_v51 = vpop.f32.mrf.mxu1 }
 0x21e   : > { %v2419_v24 = vadd.f32 %v3925_v33, %v2383_v42  ;;  %v2424_v55 = vadd.f32 %v3935_v40, %v2388_v29  ;;  %v2384_v18 = vadd.f32 %v2277_v21, %v2144_v39  ;;  %v2385_v56 = vadd.f32 %v2364_v51, %v2145_v41 }
 0x21f   : > { %v2281_v25 = vpop.f32.mrf.mxu0  ;;  %v2958_v43 = vpop.f32.mrf.mxu1 }
 0x220   : > { %vm2435_vm9 = vcmp.ge.f32.partialorder %v2419_v24, 0.0  ;;  %vm2440_vm10 = vcmp.ge.f32.partialorder %v2424_v55, 0.0  ;;  %v2420_v9 = vadd.f32 %v3925_v33, %v2384_v18  ;;  %v2421_v23 = vadd.f32 %v3925_v33, %v2385_v56 }
 0x221   : > { %v2472_v44 = vmul.f32 %v3976_v20, %v2424_v55  ;;  %v2467_v45 = vmul.f32 %v2450_v50, %v2419_v24  ;;  %v2386_v54 = vadd.f32 %v2281_v25, %v2146_v16  ;;  %v2394_v2 = vadd.f32 %v2958_v43, %v2154_v15  ;;  %v2283_v47 = vpop.f32.mrf.mxu0  ;;  %v2374_v53 = vpop.f32.mrf.mxu1 }
 0x222   : > { %vm2436_vm11 = vcmp.ge.f32.partialorder %v2420_v9, 0.0  ;;  %vm2437_vm12 = vcmp.ge.f32.partialorder %v2421_v23, 0.0  ;;  %v2468_v0 = vmul.f32 %v2450_v50, %v2420_v9  ;;  %v2469_v28 = vmul.f32 %v2450_v50, %v2421_v23 }
 0x223   : > { %v2484_v12 = vsel %vm2440_vm10, %v2424_v55, %v2472_v44  ;;  %v2479_v48 = vsel %vm2435_vm9, %v2419_v24, %v2467_v45  ;;  %v2422_v52 = vadd.f32 %v3935_v40, %v2386_v54  ;;  %v2430_v46 = vadd.f32 %v3953_v8, %v2394_v2  ;;  %v2287_v33 = vpop.f32.mrf.mxu0 }
 0x224   : > { %v2513_v5 = vmul.f32 %v3900_v4, %v2484_v12  ;;  %v2480_v61 = vsel %vm2436_vm11, %v2420_v9, %v2468_v0  ;;  %v2481_v6 = vsel %vm2437_vm12, %v2421_v23, %v2469_v28  ;;  %v2508_v63 = vmul.f32 %v3905_v59, %v2479_v48 }
 0x225   : > { %v2509_v7 = vmul.f32 %v3907_v3, %v2480_v61  ;;  %v2510_v1 = vmul.f32 %v3900_v4, %v2481_v6  ;;  %vm2438_vm13 = vcmp.ge.f32.partialorder %v2422_v52, 0.0  ;;  %v2470_v30 = vmul.f32 %v3976_v20, %v2422_v52  ;;  %v2289_v32 = vpop.f32.mrf.mxu0 }
 0x226   : > { %2525 = vst [vmem:[%s3991_s17 + $0x28] sm:$0xff] %v2513_v5  ;;  %2520 = vst [vmem:[%s3991_s17] sm:$0xff] %v2508_v63  ;;  %vm2446_vm14 = vcmp.ge.f32.partialorder %v2430_v46, 0.0  ;;  %v2387_v26 = vadd.f32 %v2283_v47, %v2147_v19  ;;  %v2391_v10 = vadd.f32 %v2374_v53, %v2151_v27  ;;  %v2478_v34 = vmul.f32 %v2465_v31, %v2430_v46 }
 0x227   : > { %2521 = vst [vmem:[%s3991_s17 + $0x8] sm:$0xff] %v2509_v7  ;;  %2522 = vst [vmem:[%s3991_s17 + $0x10] sm:$0xff] %v2510_v1  ;;  %v2482_v35 = vsel %vm2438_vm13, %v2422_v52, %v2470_v30  ;;  %v2389_v36 = vadd.f32 %v2287_v33, %v2149_v57  ;;  %v2390_v37 = vadd.f32 %v2289_v32, %v2150_v58  ;;  %v2293_v38 = vpop.f32.mrf.mxu0 }
 0x228   : > { %v2511_v39 = vmul.f32 %v3905_v59, %v2482_v35  ;;  %v2423_v41 = vadd.f32 %v3935_v40, %v2387_v26  ;;  %v2427_v42 = vadd.f32 %v3964_v22, %v2391_v10  ;;  %v2490_v29 = vsel %vm2446_vm14, %v2430_v46, %v2478_v34 }
 0x229   : > { %v2519_v14 = vmul.f32 %v3900_v4, %v2490_v29  ;;  %v2425_v49 = vadd.f32 %v3964_v22, %v2389_v36  ;;  %v2426_v13 = vadd.f32 %v3964_v22, %v2390_v37  ;;  %v2392_v16 = vadd.f32 %v2293_v38, %v2152_v62  ;;  %v2295_v15 = vpop.f32.mrf.mxu0 }
 0x22a   : > { %2523 = vst [vmem:[%s3991_s17 + $0x18] sm:$0xff] %v2511_v39  ;;  %vm2439_vm15 = vcmp.ge.f32.partialorder %v2423_v41, 0.0  ;;  %v2471_v17 = vmul.f32 %v3976_v20, %v2423_v41  ;;  %vm2443_vm0 = vcmp.ge.f32.partialorder %v2427_v42, 0.0  ;;  %v2475_v19 = vmul.f32 %v2460_v60, %v2427_v42 }
 0x22b   : > { %2531 = vst [vmem:[%s3991_s17 + $0x58] sm:$0xff] %v2519_v14  ;;  %vm2441_vm1 = vcmp.ge.f32.partialorder %v2425_v49, 0.0  ;;  %v2473_v40 = vmul.f32 %v2460_v60, %v2425_v49  ;;  %vm2442_vm2 = vcmp.ge.f32.partialorder %v2426_v13, 0.0  ;;  %v2474_v21 = vmul.f32 %v2460_v60, %v2426_v13 }
 0x22c   : > { %v2483_v51 = vsel %vm2439_vm15, %v2423_v41, %v2471_v17  ;;  %v2487_v24 = vsel %vm2443_vm0, %v2427_v42, %v2475_v19  ;;  %v2428_v22 = vadd.f32 %v3953_v8, %v2392_v16  ;;  %v2393_v55 = vadd.f32 %v2295_v15, %v2153_v11 }
 0x22d   : > { %v2512_v18 = vmul.f32 %v3907_v3, %v2483_v51  ;;  %v2516_v56 = vmul.f32 %v3900_v4, %v2487_v24  ;;  %v2485_v20 = vsel %vm2441_vm1, %v2425_v49, %v2473_v40  ;;  %v2486_v27 = vsel %vm2442_vm2, %v2426_v13, %v2474_v21  ;;  %v2564_v54 = vld [vmem:[%s3991_s17 + $0x28] sm:$0xff] (%p3092_p5) }
 0x22e   : > { %v2514_v57 = vmul.f32 %v3905_v59, %v2485_v20  ;;  %v2515_v58 = vmul.f32 %v3907_v3, %v2486_v27  ;;  %vm2444_vm3 = vcmp.ge.f32.partialorder %v2428_v22, 0.0  ;;  %v2476_v62 = vmul.f32 %v2465_v31, %v2428_v22  ;;  %v2558_v44 = vld [vmem:[%s3991_s17 + $0x10] sm:$0xff] (%p3092_p5)  ;;  %2565 = vst [vmem:[%s2541_s20 + $0x40] sm:$0xff] (%p3092_p5), %v2564_v54 }
 0x22f   : > { %2524 = vst [vmem:[%s3991_s17 + $0x20] sm:$0xff] %v2512_v18  ;;  %2528 = vst [vmem:[%s3991_s17 + $0x40] sm:$0xff] %v2516_v56  ;;  %v2429_v25 = vadd.f32 %v3953_v8, %v2393_v55  ;;  %v2556_v8 = vld [vmem:[%s3991_s17 + $0x8] sm:$0xff] (%p3092_p5) }
 0x230   : > { %2526 = vst [vmem:[%s3991_s17 + $0x30] sm:$0xff] %v2514_v57  ;;  %2527 = vst [vmem:[%s3991_s17 + $0x38] sm:$0xff] %v2515_v58  ;;  %v2488_v43 = vsel %vm2444_vm3, %v2428_v22, %v2476_v62 }
 0x231   : > { %v2517_v9 = vmul.f32 %v3905_v59, %v2488_v43  ;;  %vm2445_vm4 = vcmp.ge.f32.partialorder %v2429_v25, 0.0  ;;  %v2477_v4 = vmul.f32 %v2465_v31, %v2429_v25  ;;  %v2554_v59 = vld [vmem:[%s3991_s17] sm:$0xff] (%p3092_p5)  ;;  %v2560_v45 = vld [vmem:[%s3991_s17 + $0x18] sm:$0xff] (%p3092_p5)  ;;  %2557 = vst [vmem:[%s2541_s20 + $0x8] sm:$0xff] (%p3092_p5), %v2556_v8  ;;  %2559 = vst [vmem:[%s2541_s20 + $0x10] sm:$0xff] (%p3092_p5), %v2558_v44 }
 0x232   : > { %2538 = sbr.rel (!%p3092_p5) target bundleno = 575 (0x23f), region = 67  ;;  %2555 = vst [vmem:[%s2541_s20] sm:$0xff] (%p3092_p5), %v2554_v59  ;;  %2561 = vst [vmem:[%s2541_s20 + $0x30] sm:$0xff] (%p3092_p5), %v2560_v45  ;;  %v2576_v48 = vld [vmem:[%s3991_s17 + $0x58] sm:$0xff] (%p3092_p5) }
 0x233   : > { %2529 = vst [vmem:[%s3991_s17 + $0x48] sm:$0xff] %v2517_v9  ;;  %v2489_v23 = vsel %vm2445_vm4, %v2429_v25, %v2477_v4  ;;  %2577 = vst [vmem:[%s2541_s20 + $0xa0] sm:$0xff] (%p3092_p5), %v2576_v48 }
 0x234   : > { %v2518_v50 = vmul.f32 %v3907_v3, %v2489_v23 }
 0x236   : > { %2530 = vst [vmem:[%s3991_s17 + $0x50] sm:$0xff] %v2518_v50  ;;  %v2562_v3 = vld [vmem:[%s3991_s17 + $0x20] sm:$0xff] (%p3092_p5) }
 0x237   : > { %v2566_v2 = vld [vmem:[%s3991_s17 + $0x30] sm:$0xff]  ;;  %v2568_v47 = vld [vmem:[%s3991_s17 + $0x38] sm:$0xff]  ;;  %v2570_v0 = vld [vmem:[%s3991_s17 + $0x40] sm:$0xff]  ;;  %2563 = vst [vmem:[%s2541_s20 + $0x38] sm:$0xff] %v2562_v3 }
 0x238   : > { %2567 = vst [vmem:[%s2541_s20 + $0x60] sm:$0xff] %v2566_v2  ;;  %2569 = vst [vmem:[%s2541_s20 + $0x68] sm:$0xff] %v2568_v47 }
 0x239   : > { %2571 = vst [vmem:[%s2541_s20 + $0x70] sm:$0xff] %v2570_v0 }
 0x23a   : > { %v2572_v28 = vld [vmem:[%s3991_s17 + $0x48] sm:$0xff] }
 0x23b   : > { %2573 = vst [vmem:[%s2541_s20 + $0x90] sm:$0xff] %v2572_v28 }
 0x23d   : > { %v2574_v12 = vld [vmem:[%s3991_s17 + $0x50] sm:$0xff] }
 0x23e   : > { %2575 = vst [vmem:[%s2541_s20 + $0x98] sm:$0xff] %v2574_v12 }
 0x23f PF: > { %p12_p11 = scmp.ge.s32.totalorder %s3080_s22, 4   ;;  %s4100_s18 = smov %s3015_s19 }
 0x240   : > { %s4101_s19 = smov %s3090_s25  ;;  %s4102_s20 = smov %s3080_s22 }
 0x241   :  { %14 = sbr.rel (!%p12_p11) target bundleno = 2 (0x2), region = 132 }

// kernel: decoder3_forward_impl.14
= control target key start
LH: loop header
LB: loop body
LE: loop exit
PB: predicated region body
PF: predicated region fallthrough
CT: control target
= control target key end

     0   :  { %s3201_s21 = smov 0   ;;  %s3203_s22 = smov 0   ;;  %s4212_s0 = inlined_call_operand.vmem [shape: f32[32,768], index: 0, kind: input, shape index: {}]   ;;  %s4213_s1 = inlined_call_operand.vmem [shape: f32[9,32,32], index: 1, kind: input, shape index: {}]   ;;  %s4214_s2 = inlined_call_operand.vmem [shape: f32[32,1], index: 2, kind: input, shape index: {}]   ;;  %s4215_s3 = inlined_call_operand.vmem [shape: f32[1,768], index: 3, kind: input, shape index: {}]   ;;  %s4216_s4 = inlined_call_operand.vmem [shape: f32[32,1], index: 4, kind: input, shape index: {}]   ;;  %s4217_s5 = inlined_call_operand.vmem [shape: f32[32,768], index: 5, kind: input, shape index: {}]   ;;  %s4218_s6 = inlined_call_operand.vmem [shape: f32[32,768], index: 6, kind: output, shape index: {}]  }
   0x1   :  { %s3205_s23 = smov 0  }
   0x2 LB: > { %s3217_s24 = sadd.s32 4294967295, %s3154_s23   ;;  %s3220_s25 = sadd.s32 1, %s3154_s23   ;;  %s3154_s23 = sphi %s3205_s23, %s4267_s23   ;;  %s3150_s22 = sphi %s3203_s22, %s4266_s22   ;;  %s3146_s21 = sphi %s3201_s21, %s4265_s21  }
   0x3   : > { %s20_s26 = ssub.s32 %s3154_s23, %s3220_s25  ;;  %s23_s27 = sadd.s32 1, %s3150_s22 }
   0x4   : > { %p21_p0 = scmp.eq.s32.totalorder %s20_s26, 0  ;;  %p30_p1 = scmp.ne.s32.totalorder %s3150_s22, %s3146_s21 }
   0x5   : > { %p31_p2 = scmp.eq.s32.totalorder %s3154_s23, 0  ;;  %p175_p3 = scmp.eq.s32.totalorder %s3217_s24, 1 }
   0x6   : > { %s3230_s28 = scalar_select %p21_p0, %s3150_s22, %s23_s27  }
   0x7   : > { %p3232_p4 = por %p31_p2, %p30_p1  ;;  %p3236_p5 = por %p175_p3, %p30_p1 }
   0x8   : > { %p2781_p6 = scmp.ge.s32.totalorder %s3154_s23, 2 }
   0xa   : > { %206 = sbr.rel (%p2781_p6) target bundleno = 37 (0x25), region = 28 }
   0xf   : > { %209 = sbr.rel (!%p3232_p4) target bundleno = 26 (0x1a), region = 32  ;;  %s211_s7 = sand.u32 (%p3232_p4), 1, %s3150_s22  }
  0x10   : > { %s2892_s8 = smul.u32 (%p3232_p4), 24, %s3154_s23 }
  0x11   : > { %s3093_s9 = smul.u32 (%p3232_p4), 96, %s211_s7 }
  0x12   : > { %s216_s12 = scalar_lea.vmem (%p3232_p4), %s4212_s0, %s2892_s8 }
  0x13   : > { %v229_v0 = vld [vmem:[%s216_s12] sm:$0xff] (%p3232_p4)  ;;  %v231_v1 = vld [vmem:[%s216_s12 + $0x8] sm:$0xff] (%p3232_p4)  ;;  %v233_v2 = vld [vmem:[%s216_s12 + $0x10] sm:$0xff] (%p3232_p4)  ;;  %s213_s13 = scalar_lea.vmem (%p3232_p4), [#allocation2], %s3093_s9 }
  0x14   : > { %230 = vst [vmem:[%s213_s13] sm:$0xff] %v229_v0  ;;  %232 = vst [vmem:[%s213_s13 + $0x8] sm:$0xff] %v231_v1  ;;  %v235_v3 = vld [vmem:[%s216_s12 + $0x30] sm:$0xff]  ;;  %v237_v4 = vld [vmem:[%s216_s12 + $0x38] sm:$0xff] }
  0x15   : > { %234 = vst [vmem:[%s213_s13 + $0x10] sm:$0xff] %v233_v2  ;;  %v239_v5 = vld [vmem:[%s216_s12 + $0x40] sm:$0xff]  ;;  %236 = vst [vmem:[%s213_s13 + $0x18] sm:$0xff] %v235_v3  ;;  %v243_v7 = vld [vmem:[%s216_s12 + $0x68] sm:$0xff] }
  0x16   : > { %238 = vst [vmem:[%s213_s13 + $0x20] sm:$0xff] %v237_v4  ;;  %240 = vst [vmem:[%s213_s13 + $0x28] sm:$0xff] %v239_v5  ;;  %v241_v6 = vld [vmem:[%s216_s12 + $0x60] sm:$0xff]  ;;  %v245_v8 = vld [vmem:[%s216_s12 + $0x70] sm:$0xff] }
  0x17   : > { %242 = vst [vmem:[%s213_s13 + $0x30] sm:$0xff] %v241_v6  ;;  %244 = vst [vmem:[%s213_s13 + $0x38] sm:$0xff] %v243_v7  ;;  %v247_v9 = vld [vmem:[%s216_s12 + $0x90] sm:$0xff]  ;;  %v249_v10 = vld [vmem:[%s216_s12 + $0x98] sm:$0xff] }
  0x18   : > { %246 = vst [vmem:[%s213_s13 + $0x40] sm:$0xff] %v245_v8  ;;  %v251_v11 = vld [vmem:[%s216_s12 + $0xa0] sm:$0xff]  ;;  %248 = vst [vmem:[%s213_s13 + $0x48] sm:$0xff] %v247_v9 }
  0x19   : > { %250 = vst [vmem:[%s213_s13 + $0x50] sm:$0xff] %v249_v10  ;;  %252 = vst [vmem:[%s213_s13 + $0x58] sm:$0xff] %v251_v11 }
  0x1a PF: > { %266 = sbr.rel (!%p3232_p4) target bundleno = 37 (0x25), region = 59  ;;  %s268_s14 = sand.u32 (%p3232_p4), 1, %s3150_s22  }
  0x1b   : > { %s2893_s15 = smul.u32 (%p3232_p4), 24, %s3154_s23 }
  0x1c   : > { %s3094_s16 = smul.u32 (%p3232_p4), 96, %s268_s14 }
  0x1d   : > { %s273_s19 = scalar_lea.vmem (%p3232_p4), %s4217_s5, %s2893_s15 }
  0x1e   : > { %v286_v12 = vld [vmem:[%s273_s19] sm:$0xff] (%p3232_p4)  ;;  %v288_v13 = vld [vmem:[%s273_s19 + $0x8] sm:$0xff] (%p3232_p4)  ;;  %v290_v14 = vld [vmem:[%s273_s19 + $0x10] sm:$0xff] (%p3232_p4)  ;;  %s270_s20 = scalar_lea.vmem (%p3232_p4), [#allocation3], %s3094_s16 }
  0x1f   : > { %287 = vst [vmem:[%s270_s20] sm:$0xff] %v286_v12  ;;  %289 = vst [vmem:[%s270_s20 + $0x8] sm:$0xff] %v288_v13  ;;  %v292_v15 = vld [vmem:[%s273_s19 + $0x30] sm:$0xff]  ;;  %v294_v16 = vld [vmem:[%s273_s19 + $0x38] sm:$0xff] }
  0x20   : > { %291 = vst [vmem:[%s270_s20 + $0x10] sm:$0xff] %v290_v14  ;;  %v296_v17 = vld [vmem:[%s273_s19 + $0x40] sm:$0xff]  ;;  %293 = vst [vmem:[%s270_s20 + $0x18] sm:$0xff] %v292_v15  ;;  %v300_v19 = vld [vmem:[%s273_s19 + $0x68] sm:$0xff] }
  0x21   : > { %295 = vst [vmem:[%s270_s20 + $0x20] sm:$0xff] %v294_v16  ;;  %297 = vst [vmem:[%s270_s20 + $0x28] sm:$0xff] %v296_v17  ;;  %v298_v18 = vld [vmem:[%s273_s19 + $0x60] sm:$0xff]  ;;  %v302_v20 = vld [vmem:[%s273_s19 + $0x70] sm:$0xff] }
  0x22   : > { %299 = vst [vmem:[%s270_s20 + $0x30] sm:$0xff] %v298_v18  ;;  %301 = vst [vmem:[%s270_s20 + $0x38] sm:$0xff] %v300_v19  ;;  %v304_v21 = vld [vmem:[%s273_s19 + $0x90] sm:$0xff]  ;;  %v306_v22 = vld [vmem:[%s273_s19 + $0x98] sm:$0xff] }
  0x23   : > { %303 = vst [vmem:[%s270_s20 + $0x40] sm:$0xff] %v302_v20  ;;  %v308_v23 = vld [vmem:[%s273_s19 + $0xa0] sm:$0xff]  ;;  %305 = vst [vmem:[%s270_s20 + $0x48] sm:$0xff] %v304_v21 }
  0x24   : > { %307 = vst [vmem:[%s270_s20 + $0x50] sm:$0xff] %v306_v22  ;;  %309 = vst [vmem:[%s270_s20 + $0x58] sm:$0xff] %v308_v23 }
  0x25 PF: > { %p2784_p7 = scmp.ge.s32.totalorder %s3154_s23, 1  ;;  %p314_p8 = scmp.lt.s32.totalorder %s3154_s23, 3 }
  0x27   : > { %p315_p9 = pnand %p2784_p7, %p314_p8 }
  0x29   : > { %318 = sbr.rel (%p315_p9) target bundleno = 588 (0x24c), region = 82 }
  0x2e   : > { %s321_s26 = sand.u32 1, %s3146_s21   ;;  %s3156_s7 = smov 18   ;;  %v3292_v34 = vld [vmem:[%s4213_s1 + $0x20] sm:$0xff]  ;;  %vm469_vm0 = vcmask 261120   ;;  %v3157_v37 = vmov 0.0   ;;  %v4219_v38 = vlaneseq  ;;  %v2786_v0 = vld [vmem:[%s4213_s1 + $0x28] sm:$0xff] }
  0x2f   : > { %s3258_s27 = smul.u32 96, %s321_s26  ;;  %2975 = vmatprep.mubr.msk.f32.mxu1 %vm469_vm0, %v3292_v34  ;;  %546 = vmatprep.mubr.f32.mxu0 %v3157_v37  ;;  %s3158_s8 = smov 19   ;;  %v2788_v4 = vld [vmem:[%s4213_s1 + $0x38] sm:$0xff]  ;;  %v2787_v5 = vld [vmem:[%s4213_s1 + $0x30] sm:$0xff]  ;;  %v423_v18 = vld [vmem:[%s4213_s1] sm:$0xff] }
  0x30   : > { %s3159_s9 = smov 17   ;;  %s3160_s10 = smov 1   ;;  %v3352_v41 = vand.u32 127, %v4219_v38 }
  0x31   : > { %s323_s29 = scalar_lea.vmem [#allocation2], %s3258_s27  ;;  %s3161_s11 = smov 127  }
  0x32   : > { %v3261_v24 = vld [vmem:[%s323_s29 + $0x58] sm:$0xff]  ;;  %v3263_v25 = vld [vmem:[%s323_s29 + $0x48] sm:$0xff]  ;;  %v3267_v26 = vld [vmem:[%s323_s29 + $0x50] sm:$0xff]  ;;  %vm451_vm1 = vcmp.lt.s32.totalorder %v3352_v41, 18  ;;  %s3162_s12 = smov 111   ;;  %vm410_vm2 = vcmp.lt.s32.totalorder %v3352_v41, 19 }
  0x33   : > { %449 = vrot.lane.b32.xlu1 %v3261_v24, %s3156_s7  ;;  %433 = vrot.lane.b32.xlu0 %v3263_v25, %s3156_s7  ;;  %v3269_v27 = vld [vmem:[%s323_s29 + $0x30] sm:$0xff]  ;;  %v3273_v28 = vld [vmem:[%s323_s29 + $0x38] sm:$0xff]  ;;  %s3163_s19 = smov 110   ;;  %vm866_vm3 = vcmp.lt.s32.totalorder %v3352_v41, 17  ;;  %vm1106_vm4 = vcmp.lt.s32.totalorder %v3352_v41, 1  ;;  %vm1549_vm5 = vcmp.lt.s32.totalorder %v3352_v41, 127 }
  0x34   : > { %v3275_v29 = vld [vmem:[%s323_s29 + $0x40] sm:$0xff]  ;;  %v3281_v31 = vld [vmem:[%s323_s29 + $0x18] sm:$0xff]  ;;  %v3285_v32 = vld [vmem:[%s323_s29 + $0x28] sm:$0xff]  ;;  %vm1789_vm6 = vcmp.lt.s32.totalorder %v3352_v41, 111  ;;  %vm2029_vm7 = vcmp.lt.s32.totalorder %v3352_v41, 110  ;;  %vm2269_vm8 = vcmp.lt.s32.totalorder %v3352_v41, 109 }
  0x35   : > { %v3279_v30 = vld [vmem:[%s323_s29 + $0x20] sm:$0xff]  ;;  %v3296_v35 = vld [vmem:[%s323_s29 + $0x8] sm:$0xff]  ;;  %v3298_v36 = vld [vmem:[%s323_s29 + $0x10] sm:$0xff]  ;;  %s4120_s15 = scalar_lea.vmem [#allocation3], %s3258_s27  ;;  %s4147_s16 = scalar_lea.vmem [#allocation4], %s3258_s27 }
  0x36   : > { %v3287_v33 = vld [vmem:[%s323_s29] sm:$0xff]  ;;  %v2880_v41 = vld [vmem:[%s4213_s1 + $0x118] sm:$0xff]  ;;  %s2894_s27 = smul.u32 (%p3236_p5), 24, %s3217_s24 }
  0x37   : > { %441 = vrot.lane.b32.xlu0 %v3267_v26, %s3156_s7  ;;  %431 = vrot.lane.b32.xlu1 %v3269_v27, %s3156_s7 }
  0x38   : > { %s2655_s18 = scalar_lea.vmem (%p3236_p5), %s4218_s6, %s2894_s27 }
  0x3b   : > { %439 = vrot.lane.b32.xlu0 %v3273_v28, %s3156_s7  ;;  %447 = vrot.lane.b32.xlu1 %v3275_v29, %s3156_s7 }
  0x3f   : > { %437 = vrot.lane.b32.xlu1 %v3279_v30, %s3156_s7  ;;  %429 = vrot.lane.b32.xlu0 %v3281_v31, %s3156_s7 }
  0x43   : > { %445 = vrot.lane.b32.xlu0 %v3285_v32, %s3156_s7  ;;  %427 = vrot.lane.b32.xlu1 %v3287_v33, %s3156_s7 }
  0x47   : > { %435 = vrot.lane.b32.xlu0 %v3296_v35, %s3156_s7  ;;  %443 = vrot.lane.b32.xlu1 %v3298_v36, %s3156_s7 }
  0x4b   : > { %390 = vrot.lane.b32.xlu0 %v3263_v25, %s3158_s8  ;;  %398 = vrot.lane.b32.xlu1 %v3267_v26, %s3158_s8 }
  0x4f   : > { %406 = vrot.lane.b32.xlu0 %v3261_v24, %s3158_s8  ;;  %388 = vrot.lane.b32.xlu1 %v3269_v27, %s3158_s8 }
  0x53   : > { %396 = vrot.lane.b32.xlu0 %v3273_v28, %s3158_s8  ;;  %404 = vrot.lane.b32.xlu1 %v3275_v29, %s3158_s8 }
  0x57   : > { %386 = vrot.lane.b32.xlu0 %v3281_v31, %s3158_s8  ;;  %394 = vrot.lane.b32.xlu1 %v3279_v30, %s3158_s8 }
  0x5b   : > { %402 = vrot.lane.b32.xlu0 %v3285_v32, %s3158_s8  ;;  %384 = vrot.lane.b32.xlu1 %v3287_v33, %s3158_s8 }
  0x5f   : > { %392 = vrot.lane.b32.xlu0 %v3296_v35, %s3158_s8  ;;  %400 = vrot.lane.b32.xlu1 %v3298_v36, %s3158_s8 }
  0x63   : > { %848 = vrot.lane.b32.xlu0 %v3263_v25, %s3159_s9  ;;  %856 = vrot.lane.b32.xlu1 %v3267_v26, %s3159_s9 }
  0x67   : > { %864 = vrot.lane.b32.xlu0 %v3261_v24, %s3159_s9  ;;  %846 = vrot.lane.b32.xlu1 %v3269_v27, %s3159_s9 }
  0x6b   : > { %854 = vrot.lane.b32.xlu0 %v3273_v28, %s3159_s9  ;;  %862 = vrot.lane.b32.xlu1 %v3275_v29, %s3159_s9 }
  0x6f   : > { %844 = vrot.lane.b32.xlu0 %v3281_v31, %s3159_s9  ;;  %852 = vrot.lane.b32.xlu1 %v3279_v30, %s3159_s9 }
  0x73   : > { %860 = vrot.lane.b32.xlu0 %v3285_v32, %s3159_s9  ;;  %842 = vrot.lane.b32.xlu1 %v3287_v33, %s3159_s9 }
  0x77   : > { %850 = vrot.lane.b32.xlu0 %v3296_v35, %s3159_s9  ;;  %858 = vrot.lane.b32.xlu1 %v3298_v36, %s3159_s9 }
  0x7b   : > { %1088 = vrot.lane.b32.xlu0 %v3263_v25, %s3160_s10  ;;  %1096 = vrot.lane.b32.xlu1 %v3267_v26, %s3160_s10 }
  0x7f   : > { %1104 = vrot.lane.b32.xlu0 %v3261_v24, %s3160_s10  ;;  %1086 = vrot.lane.b32.xlu1 %v3269_v27, %s3160_s10 }
  0x83   : > { %1094 = vrot.lane.b32.xlu0 %v3273_v28, %s3160_s10  ;;  %1102 = vrot.lane.b32.xlu1 %v3275_v29, %s3160_s10 }
  0x87   : > { %1084 = vrot.lane.b32.xlu0 %v3281_v31, %s3160_s10  ;;  %1092 = vrot.lane.b32.xlu1 %v3279_v30, %s3160_s10 }
  0x8b   : > { %1100 = vrot.lane.b32.xlu0 %v3285_v32, %s3160_s10  ;;  %1082 = vrot.lane.b32.xlu1 %v3287_v33, %s3160_s10 }
  0x8f   : > { %1090 = vrot.lane.b32.xlu0 %v3296_v35, %s3160_s10  ;;  %1098 = vrot.lane.b32.xlu1 %v3298_v36, %s3160_s10  ;;  %s3164_s10 = smov 109  }
  0x93   : > { %1531 = vrot.lane.b32.xlu0 %v3263_v25, %s3161_s11  ;;  %1539 = vrot.lane.b32.xlu1 %v3267_v26, %s3161_s11 }
  0x97   : > { %1547 = vrot.lane.b32.xlu0 %v3261_v24, %s3161_s11  ;;  %1529 = vrot.lane.b32.xlu1 %v3269_v27, %s3161_s11 }
  0x9b   : > { %1537 = vrot.lane.b32.xlu0 %v3273_v28, %s3161_s11  ;;  %1545 = vrot.lane.b32.xlu1 %v3275_v29, %s3161_s11 }
  0x9f   : > { %1527 = vrot.lane.b32.xlu0 %v3281_v31, %s3161_s11  ;;  %1535 = vrot.lane.b32.xlu1 %v3279_v30, %s3161_s11 }
  0xa3   : > { %1543 = vrot.lane.b32.xlu0 %v3285_v32, %s3161_s11  ;;  %1525 = vrot.lane.b32.xlu1 %v3287_v33, %s3161_s11 }
  0xa5   : > { %v450_v39 = vpop.permute.xlu1 %449  ;;  %v434_v40 = vpop.permute.xlu0 %433 }
  0xa6   : > { %v463_v46 = vsel %vm451_vm1, %v450_v39, %v434_v40 }
  0xa7   : > { %1533 = vrot.lane.b32.xlu0 %v3296_v35, %s3161_s11  ;;  %1541 = vrot.lane.b32.xlu1 %v3298_v36, %s3161_s11  ;;  %s365_s11 = smul.u32 3, %s3217_s24 }
  0xa9   : > { %v442_v42 = vpop.permute.xlu0 %441  ;;  %v432_v43 = vpop.permute.xlu1 %431  ;;  %p366_p10 = scmp.lt.s32.totalorder %s365_s11, 5 }
  0xaa   : > { %v459_v44 = vsel %vm451_vm1, %v434_v40, %v442_v42  ;;  %v455_v45 = vsel %vm451_vm1, %v442_v42, %v450_v39 }
  0xab   : > { %506 = vmatprep.subr.mxu0 %v459_v44  ;;  %2967 = vmatprep.subr.mxu1 %v455_v45  ;;  %s4269_s11 = smov (!%p366_p10, %s365_s11), 5 }
  0xac   : > { %1779 = vrot.lane.b32.xlu0 %v3267_v26, %s3162_s12  ;;  %1787 = vrot.lane.b32.xlu1 %v3261_v24, %s3162_s12  ;;  %s368_s14 = scalar_lea.vmem %s4215_s3, %s4269_s11 }
  0xad   : > { %507 = vmatpush1.msra.mxu0 %v463_v46  ;;  %2968 = vmatpush3.msra.mxu1 %v455_v45  ;;  %v440_v47 = vpop.permute.xlu0 %439  ;;  %v448_v48 = vpop.permute.xlu1 %447 }
  0xae   : > { %v458_v49 = vsel %vm451_vm1, %v432_v43, %v440_v47  ;;  %v454_v50 = vsel %vm451_vm1, %v440_v47, %v448_v48  ;;  %v462_v51 = vsel %vm451_vm1, %v448_v48, %v432_v43  ;;  %v424_v43 = vld [vmem:[%s4213_s1 + $0x8] sm:$0xff]  ;;  %v426_v47 = vld [vmem:[%s4213_s1 + $0x18] sm:$0xff]  ;;  %v425_v48 = vld [vmem:[%s4213_s1 + $0x10] sm:$0xff] }
  0xaf   : > { %508 = vmatprep.subr.mxu0 %v458_v49  ;;  %2969 = vmatprep.subr.mxu1 %v454_v50 }
  0xb0   : > { %1771 = vrot.lane.b32.xlu0 %v3263_v25, %s3162_s12  ;;  %1777 = vrot.lane.b32.xlu1 %v3273_v28, %s3162_s12 }
  0xb1   : > { %509 = vmatpush1.msra.mxu0 %v462_v51  ;;  %2970 = vmatpush3.msra.mxu1 %v454_v50  ;;  %v438_v52 = vpop.permute.xlu1 %437  ;;  %v430_v53 = vpop.permute.xlu0 %429 }
  0xb2   : > { %v457_v54 = vsel %vm451_vm1, %v430_v53, %v438_v52 }
  0xb3   : > { %510 = vmatprep.subr.mxu0 %v457_v54 }
  0xb4   : > { %1785 = vrot.lane.b32.xlu0 %v3275_v29, %s3162_s12  ;;  %1769 = vrot.lane.b32.xlu1 %v3269_v27, %s3162_s12 }
  0xb5   : > { %v446_v55 = vpop.permute.xlu0 %445  ;;  %v428_v56 = vpop.permute.xlu1 %427 }
  0xb6   : > { %v461_v57 = vsel %vm451_vm1, %v446_v55, %v430_v53  ;;  %v453_v58 = vsel %vm451_vm1, %v438_v52, %v446_v55 }
  0xb7   : > { %511 = vmatpush1.msra.mxu0 %v461_v57  ;;  %2971 = vmatprep.subr.mxu1 %v453_v58 }
  0xb8   : > { %1775 = vrot.lane.b32.xlu0 %v3279_v30, %s3162_s12  ;;  %1783 = vrot.lane.b32.xlu1 %v3285_v32, %s3162_s12 }
  0xb9   : > { %2972 = vmatpush3.msra.mxu1 %v453_v58  ;;  %v436_v59 = vpop.permute.xlu0 %435  ;;  %v444_v60 = vpop.permute.xlu1 %443 }
  0xba   : > { %v456_v61 = vsel %vm451_vm1, %v428_v56, %v436_v59  ;;  %v452_v62 = vsel %vm451_vm1, %v436_v59, %v444_v60  ;;  %v460_v63 = vsel %vm451_vm1, %v444_v60, %v428_v56 }
  0xbb   : > { %512 = vmatprep.subr.mxu0 %v456_v61  ;;  %2973 = vmatprep.subr.mxu1 %v452_v62  ;;  %v2805_v61 = vld [vmem:[%s4213_s1 + $0x40] sm:$0xff] }
  0xbc   : > { %1767 = vrot.lane.b32.xlu0 %v3281_v31, %s3162_s12  ;;  %1773 = vrot.lane.b32.xlu1 %v3296_v35, %s3162_s12 }
  0xbd   : > { %513 = vmatpush1.msra.mxu0 %v460_v63  ;;  %2974 = vmatpush3.msra.mxu1 %v452_v62  ;;  %v391_v1 = vpop.permute.xlu0 %390  ;;  %v399_v2 = vpop.permute.xlu1 %398 }
  0xbe   : > { %v418_v3 = vsel %vm410_vm2, %v391_v1, %v399_v2  ;;  %2976 = vmatmul.mubr.msk.f32.vlgmr.msra.gmra.mxu1 %vm469_vm0, %v2786_v0  ;;  %2789 = vmatmul.mubr.msk.f32.vlgmr.msra.gmra.mxu0 %vm469_vm0, %v3292_v34 }
  0xbf   : > { %692 = vmatprep.subr.mxu1 %v418_v3  ;;  %552 = vmatprep.mubr.f32.mxu0 %v3157_v37 }
  0xc0   : > { %1781 = vrot.lane.b32.xlu0 %v3298_v36, %s3162_s12  ;;  %1765 = vrot.lane.b32.xlu1 %v3287_v33, %s3162_s12 }
  0xc1   : > { %v407_v6 = vpop.permute.xlu0 %406  ;;  %v389_v7 = vpop.permute.xlu1 %388  ;;  %2978 = vmatprep.mubr.msk.f32.mxu1 %vm469_vm0, %v2787_v5 }
  0xc2   : > { %v422_v8 = vsel %vm410_vm2, %v407_v6, %v391_v1  ;;  %v414_v9 = vsel %vm410_vm2, %v399_v2, %v407_v6  ;;  %2790 = vmatmul.mubr.msk.f32.gmra.mxu0 %vm469_vm0, %v2786_v0  ;;  %2979 = vmatmul.mubr.msk.f32.gmra.mxu1 %vm469_vm0, %v2788_v4 }
  0xc3   : > { %693 = vmatpush1.msra.mxu1 %v422_v8  ;;  %2981 = vmatprep.subr.mxu0 %v414_v9 }
  0xc4   : > { %2011 = vrot.lane.b32.xlu0 %v3263_v25, %s3163_s19  ;;  %2019 = vrot.lane.b32.xlu1 %v3267_v26, %s3163_s19 }
  0xc5   : > { %2982 = vmatpush3.msra.mxu0 %v414_v9  ;;  %v397_v10 = vpop.permute.xlu0 %396  ;;  %v405_v11 = vpop.permute.xlu1 %404  ;;  %558 = vmatprep.mubr.f32.mxu0 %v3157_v37 }
  0xc6   : > { %v421_v12 = vsel %vm410_vm2, %v405_v11, %v389_v7  ;;  %v417_v13 = vsel %vm410_vm2, %v389_v7, %v397_v10  ;;  %v413_v14 = vsel %vm410_vm2, %v397_v10, %v405_v11  ;;  %2791 = vmatmul.mubr.msk.f32.gmra.mxu0 %vm469_vm0, %v2787_v5  ;;  %732 = vmatprep.mubr.f32.mxu1 %v3157_v37  ;;  %v2806_v7 = vld [vmem:[%s4213_s1 + $0x48] sm:$0xff]  ;;  %v2808_v11 = vld [vmem:[%s4213_s1 + $0x58] sm:$0xff] }
  0xc7   : > { %694 = vmatprep.subr.mxu1 %v417_v13  ;;  %2983 = vmatprep.subr.mxu0 %v413_v14 }
  0xc8   : > { %2027 = vrot.lane.b32.xlu0 %v3261_v24, %s3163_s19  ;;  %2009 = vrot.lane.b32.xlu1 %v3269_v27, %s3163_s19 }
  0xc9   : > { %695 = vmatpush1.msra.mxu1 %v421_v12  ;;  %2984 = vmatpush3.msra.mxu0 %v413_v14  ;;  %v387_v15 = vpop.permute.xlu0 %386  ;;  %v395_v16 = vpop.permute.xlu1 %394  ;;  %v2807_v12 = vld [vmem:[%s4213_s1 + $0x50] sm:$0xff] }
  0xca   : > { %v416_v17 = vsel %vm410_vm2, %v387_v15, %v395_v16  ;;  %564 = vmatprep.mubr.f32.mxu0 %v3157_v37 }
  0xcb   : > { %696 = vmatprep.subr.mxu1 %v416_v17  ;;  %2792 = vmatmul.mubr.msk.f32.gmra.mxu0 %vm469_vm0, %v2788_v4 }
  0xcc   : > { %2017 = vrot.lane.b32.xlu0 %v3273_v28, %s3163_s19  ;;  %2025 = vrot.lane.b32.xlu1 %v3275_v29, %s3163_s19 }
  0xcd   : > { %v403_v19 = vpop.permute.xlu0 %402  ;;  %v385_v20 = vpop.permute.xlu1 %384  ;;  %2989 = vmatprep.mubr.msk.f32.mxu0 %vm469_vm0, %v423_v18 }
  0xce   : > { %v420_v21 = vsel %vm410_vm2, %v403_v19, %v387_v15  ;;  %v412_v22 = vsel %vm410_vm2, %v395_v16, %v403_v19 }
  0xcf   : > { %697 = vmatpush1.msra.mxu1 %v420_v21  ;;  %2985 = vmatprep.subr.mxu0 %v412_v22 }
  0xd0   : > { %2007 = vrot.lane.b32.xlu0 %v3281_v31, %s3163_s19  ;;  %2015 = vrot.lane.b32.xlu1 %v3279_v30, %s3163_s19 }
  0xd1   : > { %2986 = vmatpush3.msra.mxu0 %v412_v22  ;;  %v393_v23 = vpop.permute.xlu0 %392  ;;  %v401_v34 = vpop.permute.xlu1 %400  ;;  %v2817_v22 = vld [vmem:[%s4213_s1 + $0x60] sm:$0xff] }
  0xd2   : > { %v419_v39 = vsel %vm410_vm2, %v401_v34, %v385_v20  ;;  %v415_v40 = vsel %vm410_vm2, %v385_v20, %v393_v23  ;;  %v411_v42 = vsel %vm410_vm2, %v393_v23, %v401_v34 }
  0xd3   : > { %698 = vmatprep.subr.mxu1 %v415_v40  ;;  %2987 = vmatprep.subr.mxu0 %v411_v42 }
  0xd4   : > { %2023 = vrot.lane.b32.xlu0 %v3285_v32, %s3163_s19  ;;  %2005 = vrot.lane.b32.xlu1 %v3287_v33, %s3163_s19 }
  0xd5   : > { %699 = vmatpush1.msra.mxu1 %v419_v39  ;;  %2988 = vmatpush3.msra.mxu0 %v411_v42  ;;  %v849_v44 = vpop.permute.xlu0 %848  ;;  %v857_v45 = vpop.permute.xlu1 %856 }
  0xd6   : > { %v874_v46 = vsel %vm866_vm3, %v849_v44, %v857_v45  ;;  %2990 = vmatmul.mubr.msk.f32.vlgmr.msra.gmra.mxu0 %vm469_vm0, %v424_v43  ;;  %2797 = vmatmul.mubr.msk.f32.vlgmr.msra.gmra.mxu1 %vm469_vm0, %v423_v18 }
  0xd7   : > { %920 = vmatprep.subr.mxu0 %v874_v46  ;;  %738 = vmatprep.mubr.f32.mxu1 %v3157_v37 }
  0xd8   : > { %2013 = vrot.lane.b32.xlu0 %v3296_v35, %s3163_s19  ;;  %2021 = vrot.lane.b32.xlu1 %v3298_v36, %s3163_s19 }
  0xd9   : > { %v865_v49 = vpop.permute.xlu0 %864  ;;  %v847_v50 = vpop.permute.xlu1 %846  ;;  %2992 = vmatprep.mubr.msk.f32.mxu0 %vm469_vm0, %v425_v48 }
  0xda   : > { %v878_v51 = vsel %vm866_vm3, %v865_v49, %v849_v44  ;;  %v870_v52 = vsel %vm866_vm3, %v857_v45, %v865_v49  ;;  %2798 = vmatmul.mubr.msk.f32.gmra.mxu1 %vm469_vm0, %v424_v43  ;;  %2993 = vmatmul.mubr.msk.f32.gmra.mxu0 %vm469_vm0, %v426_v47 }
  0xdb   : > { %921 = vmatpush1.msra.mxu0 %v878_v51  ;;  %2995 = vmatprep.subr.mxu1 %v870_v52 }
  0xdc   : > { %2259 = vrot.lane.b32.xlu0 %v3267_v26, %s3164_s10  ;;  %2267 = vrot.lane.b32.xlu1 %v3261_v24, %s3164_s10 }
  0xdd   : > { %2996 = vmatpush3.msra.mxu1 %v870_v52  ;;  %v855_v53 = vpop.permute.xlu0 %854  ;;  %v863_v54 = vpop.permute.xlu1 %862  ;;  %744 = vmatprep.mubr.f32.mxu1 %v3157_v37 }
  0xde   : > { %v877_v55 = vsel %vm866_vm3, %v863_v54, %v847_v50  ;;  %v873_v56 = vsel %vm866_vm3, %v847_v50, %v855_v53  ;;  %v869_v57 = vsel %vm866_vm3, %v855_v53, %v863_v54  ;;  %2799 = vmatmul.mubr.msk.f32.gmra.mxu1 %vm469_vm0, %v425_v48  ;;  %960 = vmatprep.mubr.f32.mxu0 %v3157_v37  ;;  %v2818_v50 = vld [vmem:[%s4213_s1 + $0x68] sm:$0xff]  ;;  %v2819_v53 = vld [vmem:[%s4213_s1 + $0x70] sm:$0xff]  ;;  %v2820_v54 = vld [vmem:[%s4213_s1 + $0x78] sm:$0xff] }
  0xdf   : > { %922 = vmatprep.subr.mxu0 %v873_v56  ;;  %2997 = vmatprep.subr.mxu1 %v869_v57 }
  0xe0   : > { %2251 = vrot.lane.b32.xlu0 %v3263_v25, %s3164_s10  ;;  %2257 = vrot.lane.b32.xlu1 %v3273_v28, %s3164_s10 }
  0xe1   : > { %923 = vmatpush1.msra.mxu0 %v877_v55  ;;  %2998 = vmatpush3.msra.mxu1 %v869_v57  ;;  %v845_v58 = vpop.permute.xlu0 %844  ;;  %v853_v59 = vpop.permute.xlu1 %852  ;;  %v2831_v57 = vld [vmem:[%s4213_s1 + $0x90] sm:$0xff] }
  0xe2   : > { %v872_v60 = vsel %vm866_vm3, %v845_v58, %v853_v59  ;;  %750 = vmatprep.mubr.f32.mxu1 %v3157_v37 }
  0xe3   : > { %924 = vmatprep.subr.mxu0 %v872_v60  ;;  %2800 = vmatmul.mubr.msk.f32.gmra.mxu1 %vm469_vm0, %v426_v47 }
  0xe4   : > { %2265 = vrot.lane.b32.xlu0 %v3275_v29, %s3164_s10  ;;  %2249 = vrot.lane.b32.xlu1 %v3269_v27, %s3164_s10 }
  0xe5   : > { %v861_v62 = vpop.permute.xlu0 %860  ;;  %v843_v63 = vpop.permute.xlu1 %842  ;;  %3003 = vmatprep.mubr.msk.f32.mxu1 %vm469_vm0, %v2805_v61 }
  0xe6   : > { %v876_v0 = vsel %vm866_vm3, %v861_v62, %v845_v58  ;;  %v868_v1 = vsel %vm866_vm3, %v853_v59, %v861_v62  ;;  %v3165_v58 = vmov 0  }
  0xe7   : > { %925 = vmatpush1.msra.mxu0 %v876_v0  ;;  %2999 = vmatprep.subr.mxu1 %v868_v1  ;;  %v2832_v0 = vld [vmem:[%s4213_s1 + $0x98] sm:$0xff] }
  0xe8   : > { %2255 = vrot.lane.b32.xlu0 %v3279_v30, %s3164_s10  ;;  %2263 = vrot.lane.b32.xlu1 %v3285_v32, %s3164_s10 }
  0xe9   : > { %3000 = vmatpush3.msra.mxu1 %v868_v1  ;;  %v851_v2 = vpop.permute.xlu0 %850  ;;  %v859_v3 = vpop.permute.xlu1 %858  ;;  %3131 = vset.pattern.permute.xlu1 %v3165_v58 }
  0xea   : > { %v875_v4 = vsel %vm866_vm3, %v859_v3, %v843_v63  ;;  %v871_v5 = vsel %vm866_vm3, %v843_v63, %v851_v2  ;;  %v867_v6 = vsel %vm866_vm3, %v851_v2, %v859_v3  ;;  %3130 = vset.pattern.permute.xlu0 %v3165_v58 }
  0xeb   : > { %926 = vmatprep.subr.mxu0 %v871_v5  ;;  %3001 = vmatprep.subr.mxu1 %v867_v6 }
  0xec   : > { %2247 = vrot.lane.b32.xlu0 %v3281_v31, %s3164_s10  ;;  %2253 = vrot.lane.b32.xlu1 %v3296_v35, %s3164_s10 }
  0xed   : > { %927 = vmatpush1.msra.mxu0 %v875_v4  ;;  %3002 = vmatpush3.msra.mxu1 %v867_v6  ;;  %v1089_v8 = vpop.permute.xlu0 %1088  ;;  %v1097_v9 = vpop.permute.xlu1 %1096  ;;  %v2841_v6 = vld [vmem:[%s4213_s1 + $0xa0] sm:$0xff] }
  0xee   : > { %v1114_v10 = vsel %vm1106_vm4, %v1089_v8, %v1097_v9  ;;  %3004 = vmatmul.mubr.msk.f32.vlgmr.msra.gmra.mxu1 %vm469_vm0, %v2806_v7  ;;  %2809 = vmatmul.mubr.msk.f32.vlgmr.msra.gmra.mxu0 %vm469_vm0, %v2805_v61 }
  0xef   : > { %1160 = vmatprep.subr.mxu1 %v1114_v10  ;;  %966 = vmatprep.mubr.f32.mxu0 %v3157_v37 }
  0xf0   : > { %2261 = vrot.lane.b32.xlu0 %v3298_v36, %s3164_s10  ;;  %2245 = vrot.lane.b32.xlu1 %v3287_v33, %s3164_s10 }
  0xf1   : > { %v1105_v13 = vpop.permute.xlu0 %1104  ;;  %v1087_v14 = vpop.permute.xlu1 %1086  ;;  %3006 = vmatprep.mubr.msk.f32.mxu1 %vm469_vm0, %v2807_v12 }
  0xf2   : > { %v1118_v15 = vsel %vm1106_vm4, %v1105_v13, %v1089_v8  ;;  %v1110_v16 = vsel %vm1106_vm4, %v1097_v9, %v1105_v13  ;;  %2810 = vmatmul.mubr.msk.f32.gmra.mxu0 %vm469_vm0, %v2806_v7  ;;  %3007 = vmatmul.mubr.msk.f32.gmra.mxu1 %vm469_vm0, %v2808_v11  ;;  %v2842_v9 = vld [vmem:[%s4213_s1 + $0xa8] sm:$0xff] }
  0xf3   : > { %1161 = vmatpush1.msra.mxu1 %v1118_v15  ;;  %3009 = vmatprep.subr.mxu0 %v1110_v16 }
  0xf4   : > { %3010 = vmatpush3.msra.mxu0 %v1110_v16  ;;  %972 = vmatprep.mubr.f32.mxu0 %v3157_v37  ;;  %v2844_v16 = vld [vmem:[%s4213_s1 + $0xb8] sm:$0xff] }
  0xf5   : > { %v1095_v17 = vpop.permute.xlu0 %1094  ;;  %v1103_v18 = vpop.permute.xlu1 %1102  ;;  %1200 = vmatprep.mubr.f32.mxu1 %v3157_v37 }
  0xf6   : > { %v1117_v19 = vsel %vm1106_vm4, %v1103_v18, %v1087_v14  ;;  %v1113_v20 = vsel %vm1106_vm4, %v1087_v14, %v1095_v17  ;;  %v1109_v21 = vsel %vm1106_vm4, %v1095_v17, %v1103_v18  ;;  %2811 = vmatmul.mubr.msk.f32.gmra.mxu0 %vm469_vm0, %v2807_v12  ;;  %v2485_v14 = vld [vmem:[%s4214_s2] sm:$0xff] }
  0xf7   : > { %1162 = vmatprep.subr.mxu1 %v1113_v20  ;;  %3011 = vmatprep.subr.mxu0 %v1109_v21 }
  0xf8   : > { %1163 = vmatpush1.msra.mxu1 %v1117_v19  ;;  %3012 = vmatpush3.msra.mxu0 %v1109_v21 }
  0xf9   : > { %v1085_v23 = vpop.permute.xlu0 %1084  ;;  %v1093_v34 = vpop.permute.xlu1 %1092  ;;  %978 = vmatprep.mubr.f32.mxu0 %v3157_v37  ;;  %2491 = vperm.xlu0 %3130, %v2485_v14  }
  0xfa   : > { %v1112_v39 = vsel %vm1106_vm4, %v1085_v23, %v1093_v34  ;;  %2812 = vmatmul.mubr.msk.f32.gmra.mxu0 %vm469_vm0, %v2808_v11  ;;  %v2843_v11 = vld [vmem:[%s4213_s1 + $0xb0] sm:$0xff] }
  0xfb   : > { %1164 = vmatprep.subr.mxu1 %v1112_v39  ;;  %3017 = vmatprep.mubr.msk.f32.mxu0 %vm469_vm0, %v2817_v22 }
  0xfd   : > { %v1101_v40 = vpop.permute.xlu0 %1100  ;;  %v1083_v42 = vpop.permute.xlu1 %1082 }
  0xfe   : > { %v1116_v43 = vsel %vm1106_vm4, %v1101_v40, %v1085_v23  ;;  %v1108_v44 = vsel %vm1106_vm4, %v1093_v34, %v1101_v40  ;;  %v2486_v23 = vld [vmem:[%s4214_s2 + $0x8] sm:$0xff]  ;;  %v2488_v34 = vld [vmem:[%s4214_s2 + $0x18] sm:$0xff] }
  0xff   : > { %1165 = vmatpush1.msra.mxu1 %v1116_v43  ;;  %3013 = vmatprep.subr.mxu0 %v1108_v44  ;;  %v2853_v43 = vld [vmem:[%s4213_s1 + $0xc0] sm:$0xff] }
 0x100   : > { %3014 = vmatpush3.msra.mxu0 %v1108_v44  ;;  %2496 = vperm.xlu1 %3131, %v2486_v23   ;;  %v2487_v44 = vld [vmem:[%s4214_s2 + $0x10] sm:$0xff] }
 0x101   : > { %v1091_v45 = vpop.permute.xlu0 %1090  ;;  %v1099_v46 = vpop.permute.xlu1 %1098  ;;  %2506 = vperm.xlu0 %3130, %v2488_v34  }
 0x102   : > { %v1115_v47 = vsel %vm1106_vm4, %v1099_v46, %v1083_v42  ;;  %v1111_v48 = vsel %vm1106_vm4, %v1083_v42, %v1091_v45  ;;  %v1107_v49 = vsel %vm1106_vm4, %v1091_v45, %v1099_v46 }
 0x103   : > { %1166 = vmatprep.subr.mxu1 %v1111_v48  ;;  %3015 = vmatprep.subr.mxu0 %v1107_v49 }
 0x104   : > { %1167 = vmatpush1.msra.mxu1 %v1115_v47  ;;  %3016 = vmatpush3.msra.mxu0 %v1107_v49  ;;  %v2546_v47 = vld [vmem:[%s4216_s4 + $0x8] sm:$0xff] }
 0x105   : > { %v1532_v51 = vpop.permute.xlu0 %1531  ;;  %2821 = vmatmul.mubr.msk.f32.vlgmr.msra.gmra.mxu1 %vm469_vm0, %v2817_v22  ;;  %3018 = vmatmul.mubr.msk.f32.vlgmr.msra.gmra.mxu0 %vm469_vm0, %v2818_v50  ;;  %v1540_v52 = vpop.permute.xlu1 %1539 }
 0x106   : > { %1363 = vmatprep.subr.mxu0 %v3267_v26  ;;  %3023 = vmatprep.subr.mxu1 %v3261_v24  ;;  %v1557_v59 = vsel %vm1549_vm5, %v1532_v51, %v1540_v52 }
 0x107   : > { %1364 = vmatpush1.msra.mxu0 %v3263_v25  ;;  %3024 = vmatpush3.msra.mxu1 %v3261_v24 }
 0x108   : > { %1365 = vmatprep.subr.mxu0 %v3273_v28  ;;  %3025 = vmatprep.subr.mxu1 %v3275_v29 }
 0x109   : > { %1206 = vmatprep.mubr.f32.mxu1 %v3157_v37  ;;  %3020 = vmatprep.mubr.msk.f32.mxu0 %vm469_vm0, %v2819_v53  ;;  %v1548_v26 = vpop.permute.xlu0 %1547  ;;  %v1530_v55 = vpop.permute.xlu1 %1529 }
 0x10a   : > { %1366 = vmatpush1.msra.mxu0 %v3269_v27  ;;  %3026 = vmatpush3.msra.mxu1 %v3275_v29  ;;  %v2829_v27 = vld [vmem:[%s4213_s1 + $0x80] sm:$0xff]  ;;  %v1553_v28 = vsel %vm1549_vm5, %v1540_v52, %v1548_v26  ;;  %v1561_v29 = vsel %vm1549_vm5, %v1548_v26, %v1532_v51 }
 0x10b   : > { %2822 = vmatmul.mubr.msk.f32.gmra.mxu1 %vm469_vm0, %v2818_v50  ;;  %3021 = vmatmul.mubr.msk.f32.gmra.mxu0 %vm469_vm0, %v2820_v54  ;;  %v2545_v50 = vld [vmem:[%s4216_s4] sm:$0xff] }
 0x10c   : > { %1367 = vmatprep.subr.mxu0 %v3279_v30  ;;  %3027 = vmatprep.subr.mxu1 %v3285_v32 }
 0x10d   : > { %1368 = vmatpush1.msra.mxu0 %v3281_v31  ;;  %3028 = vmatpush3.msra.mxu1 %v3285_v32  ;;  %v1538_v24 = vpop.permute.xlu0 %1537  ;;  %v1546_v25 = vpop.permute.xlu1 %1545 }
 0x10e   : > { %1369 = vmatprep.subr.mxu0 %v3296_v35  ;;  %3029 = vmatprep.subr.mxu1 %v3298_v36  ;;  %v1560_v30 = vsel %vm1549_vm5, %v1546_v25, %v1530_v55  ;;  %v1552_v62 = vsel %vm1549_vm5, %v1538_v24, %v1546_v25  ;;  %v1556_v1 = vsel %vm1549_vm5, %v1530_v55, %v1538_v24  ;;  %v2854_v55 = vld [vmem:[%s4213_s1 + $0xc8] sm:$0xff]  ;;  %v2855_v24 = vld [vmem:[%s4213_s1 + $0xd0] sm:$0xff]  ;;  %v2548_v25 = vld [vmem:[%s4216_s4 + $0x18] sm:$0xff] }
 0x10f   : > { %1212 = vmatprep.mubr.f32.mxu1 %v3157_v37  ;;  %1370 = vmatpush1.msra.mxu0 %v3287_v33  ;;  %v2830_v33 = vld [vmem:[%s4213_s1 + $0x88] sm:$0xff] }
 0x110   : > { %1403 = vmatprep.mubr.f32.mxu0 %v3157_v37  ;;  %3030 = vmatpush3.msra.mxu1 %v3298_v36 }
 0x111   : > { %2823 = vmatmul.mubr.msk.f32.gmra.mxu1 %vm469_vm0, %v2819_v53  ;;  %2833 = vmatmul.mubr.msk.f32.vlgmr.msra.gmra.mxu0 %vm469_vm0, %v2829_v27  ;;  %v1528_v31 = vpop.permute.xlu0 %1527  ;;  %v1536_v32 = vpop.permute.xlu1 %1535 }
 0x112   : > { %1603 = vmatprep.subr.mxu1 %v1553_v28  ;;  %3037 = vmatprep.subr.mxu0 %v1561_v29  ;;  %v1555_v4 = vsel %vm1549_vm5, %v1528_v31, %v1536_v32 }
 0x113   : > { %3038 = vmatpush3.msra.mxu0 %v1561_v29  ;;  %1218 = vmatprep.mubr.f32.mxu1 %v3157_v37 }
 0x114   : > { %3039 = vmatprep.subr.mxu0 %v1560_v30  ;;  %1409 = vmatprep.mubr.f32.mxu0 %v3157_v37 }
 0x115   : > { %3040 = vmatpush3.msra.mxu0 %v1560_v30  ;;  %2824 = vmatmul.mubr.msk.f32.gmra.mxu1 %vm469_vm0, %v2820_v54  ;;  %v1544_v35 = vpop.permute.xlu0 %1543  ;;  %v1526_v36 = vpop.permute.xlu1 %1525  ;;  %v2856_v30 = vld [vmem:[%s4213_s1 + $0xd8] sm:$0xff] }
 0x116   : > { %2834 = vmatmul.mubr.msk.f32.gmra.mxu0 %vm469_vm0, %v2830_v33  ;;  %3031 = vmatprep.mubr.msk.f32.mxu1 %vm469_vm0, %v2829_v27  ;;  %v1559_v56 = vsel %vm1549_vm5, %v1544_v35, %v1528_v31  ;;  %v1551_v63 = vsel %vm1549_vm5, %v1536_v32, %v1544_v35  ;;  %v2547_v27 = vld [vmem:[%s4216_s4 + $0x10] sm:$0xff] }
 0x117   : > { %1415 = vmatprep.mubr.f32.mxu0 %v3157_v37  ;;  %3041 = vmatprep.subr.mxu0 %v1559_v56 }
 0x118   : > { %3042 = vmatpush3.msra.mxu0 %v1559_v56  ;;  %2501 = vperm.xlu1 %3131, %v2487_v44  }
 0x119   : > { %3032 = vmatmul.mubr.msk.f32.vlgmr.msra.gmra.mxu1 %vm469_vm0, %v2830_v33  ;;  %v1534_v60 = vpop.permute.xlu0 %1533  ;;  %v1542_v61 = vpop.permute.xlu1 %1541  ;;  %2568 = vperm.xlu0 %3130, %v2546_v47  }
 0x11a   : > { %2835 = vmatmul.mubr.msk.f32.gmra.mxu0 %vm469_vm0, %v2831_v57  ;;  %1604 = vmatpush1.msra.mxu1 %v1557_v59  ;;  %v1550_v2 = vsel %vm1549_vm5, %v1534_v60, %v1542_v61  ;;  %v1558_v3 = vsel %vm1549_vm5, %v1542_v61, %v1526_v36  ;;  %v1554_v5 = vsel %vm1549_vm5, %v1526_v36, %v1534_v60  ;;  %v2865_v61 = vld [vmem:[%s4213_s1 + $0xe0] sm:$0xff] }
 0x11b   : > { %1605 = vmatprep.subr.mxu1 %v1552_v62  ;;  %1421 = vmatprep.mubr.f32.mxu0 %v3157_v37 }
 0x11c   : > { %1606 = vmatpush1.msra.mxu1 %v1556_v1  ;;  %3034 = vmatprep.mubr.msk.f32.mxu1 %vm469_vm0, %v2831_v57 }
 0x11d   : > { %1607 = vmatprep.subr.mxu1 %v1551_v63  ;;  %3035 = vmatmul.mubr.msk.f32.gmra.mxu1 %vm469_vm0, %v2832_v0 }
 0x11e   : > { %2836 = vmatmul.mubr.msk.f32.gmra.mxu0 %vm469_vm0, %v2832_v0  ;;  %1608 = vmatpush1.msra.mxu1 %v1555_v4  ;;  %v1780_v7 = vpop.permute.xlu0 %1779  ;;  %v1788_v8 = vpop.permute.xlu1 %1787 }
 0x11f   : > { %1609 = vmatprep.subr.mxu1 %v1550_v2  ;;  %3043 = vmatprep.subr.mxu0 %v1558_v3  ;;  %v1793_v10 = vsel %vm1789_vm6, %v1780_v7, %v1788_v8 }
 0x120   : > { %1610 = vmatpush1.msra.mxu1 %v1554_v5  ;;  %1643 = vmatprep.mubr.f32.mxu1 %v3157_v37 }
 0x121   : > { %3044 = vmatpush3.msra.mxu0 %v1558_v3  ;;  %3045 = vmatprep.mubr.msk.f32.mxu0 %vm469_vm0, %v2841_v6 }
 0x122   : > { %2845 = vmatmul.mubr.msk.f32.vlgmr.msra.gmra.mxu1 %vm469_vm0, %v2841_v6  ;;  %3046 = vmatmul.mubr.msk.f32.vlgmr.msra.gmra.mxu0 %vm469_vm0, %v2842_v9  ;;  %v1772_v12 = vpop.permute.xlu0 %1771  ;;  %v1778_v13 = vpop.permute.xlu1 %1777 }
 0x123   : > { %1843 = vmatprep.subr.mxu0 %v1793_v10  ;;  %1649 = vmatprep.mubr.f32.mxu1 %v3157_v37  ;;  %v1797_v15 = vsel %vm1789_vm6, %v1772_v12, %v1780_v7  ;;  %v1801_v17 = vsel %vm1789_vm6, %v1788_v8, %v1772_v12  ;;  %v2866_v10 = vld [vmem:[%s4213_s1 + $0xe8] sm:$0xff] }
 0x124   : > { %3048 = vmatprep.mubr.msk.f32.mxu0 %vm469_vm0, %v2843_v11  ;;  %1844 = vmatpush1.msra.mxu0 %v1797_v15  ;;  %v2868_v15 = vld [vmem:[%s4213_s1 + $0xf8] sm:$0xff] }
 0x125   : > { %3051 = vmatprep.subr.mxu1 %v1801_v17  ;;  %2563 = vperm.xlu1 %3131, %v2545_v50  }
 0x126   : > { %2846 = vmatmul.mubr.msk.f32.gmra.mxu1 %vm469_vm0, %v2842_v9  ;;  %3049 = vmatmul.mubr.msk.f32.gmra.mxu0 %vm469_vm0, %v2844_v16  ;;  %v1786_v18 = vpop.permute.xlu0 %1785  ;;  %v1770_v19 = vpop.permute.xlu1 %1769 }
 0x127   : > { %1655 = vmatprep.mubr.f32.mxu1 %v3157_v37  ;;  %3052 = vmatpush3.msra.mxu1 %v1801_v17  ;;  %v1796_v20 = vsel %vm1789_vm6, %v1770_v19, %v1778_v13  ;;  %v1792_v21 = vsel %vm1789_vm6, %v1778_v13, %v1786_v18  ;;  %v1800_v22 = vsel %vm1789_vm6, %v1786_v18, %v1770_v19 }
 0x128   : > { %1845 = vmatprep.subr.mxu0 %v1792_v21  ;;  %3053 = vmatprep.subr.mxu1 %v1800_v22 }
 0x129   : > { %1846 = vmatpush1.msra.mxu0 %v1796_v20  ;;  %3054 = vmatpush3.msra.mxu1 %v1800_v22 }
 0x12a   : > { %2847 = vmatmul.mubr.msk.f32.gmra.mxu1 %vm469_vm0, %v2843_v11  ;;  %v1776_v39 = vpop.permute.xlu0 %1775  ;;  %v1784_v40 = vpop.permute.xlu1 %1783  ;;  %1883 = vmatprep.mubr.f32.mxu0 %v3157_v37  ;;  %v2867_v11 = vld [vmem:[%s4213_s1 + $0xf0] sm:$0xff] }
 0x12b   : > { %1661 = vmatprep.mubr.f32.mxu1 %v3157_v37  ;;  %v1791_v42 = vsel %vm1789_vm6, %v1776_v39, %v1784_v40  ;;  %2578 = vperm.xlu0 %3130, %v2548_v25  }
 0x12c   : > { %1847 = vmatprep.subr.mxu0 %v1791_v42  ;;  %2573 = vperm.xlu1 %3131, %v2547_v27  }
 0x12e   : > { %2848 = vmatmul.mubr.msk.f32.gmra.mxu1 %vm469_vm0, %v2844_v16  ;;  %v1768_v45 = vpop.permute.xlu0 %1767  ;;  %v1774_v46 = vpop.permute.xlu1 %1773 }
 0x12f   : > { %v1795_v48 = vsel %vm1789_vm6, %v1768_v45, %v1776_v39  ;;  %v1799_v49 = vsel %vm1789_vm6, %v1784_v40, %v1768_v45  ;;  %3059 = vmatprep.mubr.msk.f32.mxu1 %vm469_vm0, %v2853_v43  ;;  %v2877_v39 = vld [vmem:[%s4213_s1 + $0x100] sm:$0xff] }
 0x130   : > { %1848 = vmatpush1.msra.mxu0 %v1795_v48  ;;  %3055 = vmatprep.subr.mxu1 %v1799_v49 }
 0x131   : > { %3056 = vmatpush3.msra.mxu1 %v1799_v49 }
 0x132   : > { %v1782_v51 = vpop.permute.xlu0 %1781  ;;  %v1766_v52 = vpop.permute.xlu1 %1765 }
 0x133   : > { %v1794_v53 = vsel %vm1789_vm6, %v1766_v52, %v1774_v46  ;;  %v1790_v54 = vsel %vm1789_vm6, %v1774_v46, %v1782_v51  ;;  %v1798_v26 = vsel %vm1789_vm6, %v1782_v51, %v1766_v52 }
 0x134   : > { %1849 = vmatprep.subr.mxu0 %v1790_v54  ;;  %3057 = vmatprep.subr.mxu1 %v1798_v26  ;;  %v2879_v54 = vld [vmem:[%s4213_s1 + $0x110] sm:$0xff] }
 0x135   : > { %1850 = vmatpush1.msra.mxu0 %v1794_v53  ;;  %3058 = vmatpush3.msra.mxu1 %v1798_v26  ;;  %v2878_v53 = vld [vmem:[%s4213_s1 + $0x108] sm:$0xff] }
 0x136   : > { %v2012_v28 = vpop.permute.xlu0 %2011  ;;  %2857 = vmatmul.mubr.msk.f32.vlgmr.msra.gmra.mxu0 %vm469_vm0, %v2853_v43  ;;  %3060 = vmatmul.mubr.msk.f32.vlgmr.msra.gmra.mxu1 %vm469_vm0, %v2854_v55  ;;  %v2020_v29 = vpop.permute.xlu1 %2019 }
 0x137   : > { %1889 = vmatprep.mubr.f32.mxu0 %v3157_v37  ;;  %3062 = vmatprep.mubr.msk.f32.mxu1 %vm469_vm0, %v2855_v24  ;;  %v2037_v36 = vsel %vm2029_vm7, %v2012_v28, %v2020_v29 }
 0x13a   : > { %v2028_v31 = vpop.permute.xlu0 %2027  ;;  %2858 = vmatmul.mubr.msk.f32.gmra.mxu0 %vm469_vm0, %v2854_v55  ;;  %3063 = vmatmul.mubr.msk.f32.gmra.mxu1 %vm469_vm0, %v2856_v30  ;;  %v2010_v32 = vpop.permute.xlu1 %2009 }
 0x13b   : > { %v2033_v33 = vsel %vm2029_vm7, %v2020_v29, %v2028_v31  ;;  %v2041_v35 = vsel %vm2029_vm7, %v2028_v31, %v2012_v28  ;;  %1895 = vmatprep.mubr.f32.mxu0 %v3157_v37  ;;  %2123 = vmatprep.mubr.f32.mxu1 %v3157_v37 }
 0x13c   : > { %2083 = vmatprep.subr.mxu1 %v2033_v33  ;;  %3065 = vmatprep.subr.mxu0 %v2041_v35 }
 0x13d   : > { %2084 = vmatpush1.msra.mxu1 %v2037_v36  ;;  %3066 = vmatpush3.msra.mxu0 %v2041_v35 }
 0x13e   : > { %v2018_v56 = vpop.permute.xlu0 %2017  ;;  %2859 = vmatmul.mubr.msk.f32.gmra.mxu0 %vm469_vm0, %v2855_v24  ;;  %v2026_v57 = vpop.permute.xlu1 %2025 }
 0x13f   : > { %v2036_v58 = vsel %vm2029_vm7, %v2010_v32, %v2018_v56  ;;  %v2032_v59 = vsel %vm2029_vm7, %v2018_v56, %v2026_v57  ;;  %v2040_v60 = vsel %vm2029_vm7, %v2026_v57, %v2010_v32  ;;  %1901 = vmatprep.mubr.f32.mxu0 %v3157_v37 }
 0x140   : > { %2085 = vmatprep.subr.mxu1 %v2032_v59  ;;  %3067 = vmatprep.subr.mxu0 %v2040_v60 }
 0x141   : > { %2086 = vmatpush1.msra.mxu1 %v2036_v58  ;;  %3068 = vmatpush3.msra.mxu0 %v2040_v60 }
 0x142   : > { %v2008_v62 = vpop.permute.xlu0 %2007  ;;  %2860 = vmatmul.mubr.msk.f32.gmra.mxu0 %vm469_vm0, %v2856_v30  ;;  %v2016_v63 = vpop.permute.xlu1 %2015 }
 0x143   : > { %3073 = vmatprep.mubr.msk.f32.mxu0 %vm469_vm0, %v2865_v61  ;;  %v2035_v4 = vsel %vm2029_vm7, %v2008_v62, %v2016_v63 }
 0x146   : > { %v2024_v0 = vpop.permute.xlu0 %2023  ;;  %v2006_v1 = vpop.permute.xlu1 %2005 }
 0x147   : > { %v2031_v2 = vsel %vm2029_vm7, %v2016_v63, %v2024_v0  ;;  %v2039_v3 = vsel %vm2029_vm7, %v2024_v0, %v2008_v62 }
 0x148   : > { %2087 = vmatprep.subr.mxu1 %v2031_v2  ;;  %3069 = vmatprep.subr.mxu0 %v2039_v3 }
 0x149   : > { %2088 = vmatpush1.msra.mxu1 %v2035_v4  ;;  %3070 = vmatpush3.msra.mxu0 %v2039_v3 }
 0x14a   : > { %v2014_v5 = vpop.permute.xlu0 %2013  ;;  %v2022_v6 = vpop.permute.xlu1 %2021 }
 0x14b   : > { %v2034_v7 = vsel %vm2029_vm7, %v2006_v1, %v2014_v5  ;;  %v2030_v8 = vsel %vm2029_vm7, %v2014_v5, %v2022_v6  ;;  %v2038_v9 = vsel %vm2029_vm7, %v2022_v6, %v2006_v1 }
 0x14c   : > { %2089 = vmatprep.subr.mxu1 %v2030_v8  ;;  %3071 = vmatprep.subr.mxu0 %v2038_v9 }
 0x14d   : > { %2090 = vmatpush1.msra.mxu1 %v2034_v7  ;;  %3072 = vmatpush3.msra.mxu0 %v2038_v9 }
 0x14e   : > { %v2260_v12 = vpop.permute.xlu0 %2259  ;;  %2869 = vmatmul.mubr.msk.f32.vlgmr.msra.gmra.mxu1 %vm469_vm0, %v2865_v61  ;;  %3074 = vmatmul.mubr.msk.f32.vlgmr.msra.gmra.mxu0 %vm469_vm0, %v2866_v10  ;;  %v2268_v13 = vpop.permute.xlu1 %2267 }
 0x14f   : > { %v2273_v14 = vsel %vm2269_vm8, %v2260_v12, %v2268_v13  ;;  %2129 = vmatprep.mubr.f32.mxu1 %v3157_v37  ;;  %3076 = vmatprep.mubr.msk.f32.mxu0 %vm469_vm0, %v2867_v11 }
 0x150   : > { %2323 = vmatprep.subr.mxu0 %v2273_v14 }
 0x152   : > { %v2252_v16 = vpop.permute.xlu0 %2251  ;;  %2870 = vmatmul.mubr.msk.f32.gmra.mxu1 %vm469_vm0, %v2866_v10  ;;  %3077 = vmatmul.mubr.msk.f32.gmra.mxu0 %vm469_vm0, %v2868_v15  ;;  %v2258_v17 = vpop.permute.xlu1 %2257 }
 0x153   : > { %v2277_v18 = vsel %vm2269_vm8, %v2252_v16, %v2260_v12  ;;  %v2281_v19 = vsel %vm2269_vm8, %v2268_v13, %v2252_v16  ;;  %2135 = vmatprep.mubr.f32.mxu1 %v3157_v37  ;;  %2363 = vmatprep.mubr.f32.mxu0 %v3157_v37 }
 0x154   : > { %2324 = vmatpush1.msra.mxu0 %v2277_v18  ;;  %3079 = vmatprep.subr.mxu1 %v2281_v19 }
 0x155   : > { %3080 = vmatpush3.msra.mxu1 %v2281_v19 }
 0x156   : > { %v2266_v20 = vpop.permute.xlu0 %2265  ;;  %2871 = vmatmul.mubr.msk.f32.gmra.mxu1 %vm469_vm0, %v2867_v11  ;;  %v2250_v21 = vpop.permute.xlu1 %2249 }
 0x157   : > { %v2276_v22 = vsel %vm2269_vm8, %v2250_v21, %v2258_v17  ;;  %v2272_v23 = vsel %vm2269_vm8, %v2258_v17, %v2266_v20  ;;  %v2280_v34 = vsel %vm2269_vm8, %v2266_v20, %v2250_v21  ;;  %2141 = vmatprep.mubr.f32.mxu1 %v3157_v37 }
 0x158   : > { %2325 = vmatprep.subr.mxu0 %v2272_v23  ;;  %3081 = vmatprep.subr.mxu1 %v2280_v34 }
 0x159   : > { %2326 = vmatpush1.msra.mxu0 %v2276_v22  ;;  %3082 = vmatpush3.msra.mxu1 %v2280_v34 }
 0x15a   : > { %v2256_v40 = vpop.permute.xlu0 %2255  ;;  %2872 = vmatmul.mubr.msk.f32.gmra.mxu1 %vm469_vm0, %v2868_v15  ;;  %v2264_v42 = vpop.permute.xlu1 %2263 }
 0x15b   : > { %v2271_v43 = vsel %vm2269_vm8, %v2256_v40, %v2264_v42  ;;  %3087 = vmatprep.mubr.msk.f32.mxu1 %vm469_vm0, %v2877_v39 }
 0x15c   : > { %2327 = vmatprep.subr.mxu0 %v2271_v43 }
 0x15e   : > { %v2248_v44 = vpop.permute.xlu0 %2247  ;;  %v2254_v45 = vpop.permute.xlu1 %2253 }
 0x15f   : > { %v2275_v46 = vsel %vm2269_vm8, %v2248_v44, %v2256_v40  ;;  %v2279_v47 = vsel %vm2269_vm8, %v2264_v42, %v2248_v44 }
 0x160   : > { %2328 = vmatpush1.msra.mxu0 %v2275_v46  ;;  %3083 = vmatprep.subr.mxu1 %v2279_v47 }
 0x161   : > { %3084 = vmatpush3.msra.mxu1 %v2279_v47 }
 0x162   : > { %v2262_v48 = vpop.permute.xlu0 %2261  ;;  %v2246_v49 = vpop.permute.xlu1 %2245 }
 0x163   : > { %v2274_v50 = vsel %vm2269_vm8, %v2246_v49, %v2254_v45  ;;  %v2270_v51 = vsel %vm2269_vm8, %v2254_v45, %v2262_v48  ;;  %v2278_v52 = vsel %vm2269_vm8, %v2262_v48, %v2246_v49 }
 0x164   : > { %2329 = vmatprep.subr.mxu0 %v2270_v51  ;;  %3085 = vmatprep.subr.mxu1 %v2278_v52 }
 0x165   : > { %2330 = vmatpush1.msra.mxu0 %v2274_v50  ;;  %3086 = vmatpush3.msra.mxu1 %v2278_v52 }
 0x166   : > { %2881 = vmatmul.mubr.msk.f32.vlgmr.msra.gmra.mxu0 %vm469_vm0, %v2877_v39  ;;  %3088 = vmatmul.mubr.msk.f32.vlgmr.msra.gmra.mxu1 %vm469_vm0, %v2878_v53 }
 0x167   : > { %2369 = vmatprep.mubr.f32.mxu0 %v3157_v37  ;;  %3090 = vmatprep.mubr.msk.f32.mxu1 %vm469_vm0, %v2879_v54 }
 0x16a   : > { %2882 = vmatmul.mubr.msk.f32.gmra.mxu0 %vm469_vm0, %v2878_v53  ;;  %3091 = vmatmul.mubr.msk.f32.gmra.mxu1 %vm469_vm0, %v2880_v41 }
 0x16b   : > { %2375 = vmatprep.mubr.f32.mxu0 %v3157_v37 }
 0x16e   : > { %2883 = vmatmul.mubr.msk.f32.gmra.mxu0 %vm469_vm0, %v2879_v54 }
 0x16f   : > { %2381 = vmatprep.mubr.f32.mxu0 %v3157_v37 }
 0x172   : > { %2884 = vmatmul.mubr.msk.f32.gmra.mxu0 %vm469_vm0, %v2880_v41 }
 0x17e   : > { %v548_v26 = vpop.f32.mrf.mxu0  ;;  %v2977_v28 = vpop.f32.mrf.mxu1 }
 0x180   : > { %v550_v55 = vpop.f32.mrf.mxu0  ;;  %v637_v30 = vpop.f32.mrf.mxu1 }
 0x182   : > { %v554_v24 = vpop.f32.mrf.mxu0  ;;  %v2980_v32 = vpop.f32.mrf.mxu1 }
 0x184   : > { %v556_v25 = vpop.f32.mrf.mxu0  ;;  %v647_v35 = vpop.f32.mrf.mxu1 }
 0x186   : > { %v560_v27 = vpop.f32.mrf.mxu0 }
 0x188   : > { %v562_v29 = vpop.f32.mrf.mxu0 }
 0x18b   : > { %v566_v31 = vpop.f32.mrf.mxu0 }
 0x18d   : > { %v568_v33 = vpop.f32.mrf.mxu0 }
 0x196   : > { %v734_v36 = vpop.f32.mrf.mxu1  ;;  %v2991_v56 = vpop.f32.mrf.mxu0 }
 0x197   : > { %v3880_v57 = vadd.f32 %v734_v36, %v548_v26  ;;  %v3882_v58 = vadd.f32 %v2991_v56, %v2977_v28 }
 0x198   : > { %v736_v37 = vpop.f32.mrf.mxu1  ;;  %v823_v59 = vpop.f32.mrf.mxu0 }
 0x199   : > { %v3884_v60 = vadd.f32 %v736_v37, %v550_v55  ;;  %v3886_v61 = vadd.f32 %v823_v59, %v637_v30 }
 0x19a   : > { %v740_v62 = vpop.f32.mrf.mxu1  ;;  %v2994_v63 = vpop.f32.mrf.mxu0 }
 0x19b   : > { %v3888_v0 = vadd.f32 %v740_v62, %v554_v24  ;;  %v3890_v1 = vadd.f32 %v2994_v63, %v2980_v32 }
 0x19c   : > { %v742_v2 = vpop.f32.mrf.mxu1  ;;  %v833_v3 = vpop.f32.mrf.mxu0 }
 0x19d   : > { %v743_v4 = vadd.f32 %v742_v2, %v556_v25  ;;  %v834_v5 = vadd.f32 %v833_v3, %v647_v35 }
 0x19e   : > { %v746_v6 = vpop.f32.mrf.mxu1 }
 0x19f   : > { %v747_v7 = vadd.f32 %v746_v6, %v560_v27 }
 0x1a0   : > { %v748_v8 = vpop.f32.mrf.mxu1 }
 0x1a1   : > { %v3892_v9 = vadd.f32 %v748_v8, %v562_v29 }
 0x1a3   : > { %v752_v10 = vpop.f32.mrf.mxu1 }
 0x1a4   : > { %v3894_v11 = vadd.f32 %v752_v10, %v566_v31 }
 0x1a5   : > { %v754_v12 = vpop.f32.mrf.mxu1 }
 0x1a6   : > { %v3896_v13 = vadd.f32 %v754_v12, %v568_v33 }
 0x1ae   : > { %v3898_v14 = vpop.f32.mrf.mxu0  ;;  %v3900_v15 = vpop.f32.mrf.mxu1 }
 0x1b0   : > { %v3902_v16 = vpop.f32.mrf.mxu0  ;;  %v3904_v17 = vpop.f32.mrf.mxu1 }
 0x1b2   : > { %v3906_v18 = vpop.f32.mrf.mxu0  ;;  %v3908_v19 = vpop.f32.mrf.mxu1 }
 0x1b4   : > { %v970_v20 = vpop.f32.mrf.mxu0  ;;  %v1061_v21 = vpop.f32.mrf.mxu1 }
 0x1b5   : > { %v3910_v22 = vadd.f32 %v970_v20, %v743_v4  ;;  %v3912_v23 = vadd.f32 %v1061_v21, %v834_v5 }
 0x1b6   : > { %v974_v34 = vpop.f32.mrf.mxu0 }
 0x1b7   : > { %v3914_v39 = vadd.f32 %v974_v34, %v747_v7 }
 0x1b8   : > { %v3916_v40 = vpop.f32.mrf.mxu0 }
 0x1ba   : > { %v3918_v42 = vpop.f32.mrf.mxu0 }
 0x1bc   : > { %v3920_v43 = vpop.f32.mrf.mxu0 }
 0x1c5   : > { %v3922_v44 = vpop.f32.mrf.mxu1  ;;  %v3924_v45 = vpop.f32.mrf.mxu0 }
 0x1c7   : > { %v3926_v46 = vpop.f32.mrf.mxu1  ;;  %v3928_v47 = vpop.f32.mrf.mxu0 }
 0x1cb   : > { %v3930_v48 = vpop.f32.mrf.mxu1  ;;  %v3932_v49 = vpop.f32.mrf.mxu0 }
 0x1cd   : > { %v3934_v50 = vpop.f32.mrf.mxu1  ;;  %v3936_v51 = vpop.f32.mrf.mxu0 }
 0x1d1   : > { %v3938_v52 = vpop.f32.mrf.mxu1  ;;  %v3940_v53 = vpop.f32.mrf.mxu0 }
 0x1d3   : > { %v3942_v54 = vpop.f32.mrf.mxu1  ;;  %v3944_v41 = vpop.f32.mrf.mxu0 }
 0x1d5   : > { %v3946_v26 = vpop.f32.mrf.mxu1 }
 0x1d6   : > { %v3948_v55 = vpop.f32.mrf.mxu0 }
 0x1d7   : > { %v3950_v24 = vpop.f32.mrf.mxu1 }
 0x1d8   : > { %v3952_v25 = vpop.f32.mrf.mxu0 }
 0x1d9   : > { %v3954_v27 = vpop.f32.mrf.mxu1 }
 0x1da   : > { %v3958_v29 = vpop.f32.mrf.mxu0 }
 0x1db   : > { %v3956_v28 = vpop.f32.mrf.mxu1 }
 0x1dc   : > { %v3964_v32 = vpop.f32.mrf.mxu0 }
 0x1dd   : > { %v3960_v30 = vpop.f32.mrf.mxu1 }
 0x1de   : > { %v3968_v35 = vpop.f32.mrf.mxu0 }
 0x1df   : > { %v3962_v31 = vpop.f32.mrf.mxu1 }
 0x1e0   : > { %v3972_v56 = vpop.f32.mrf.mxu0 }
 0x1e2   : > { %v3966_v33 = vpop.f32.mrf.mxu1  ;;  %v3976_v59 = vpop.f32.mrf.mxu0 }
 0x1e4   : > { %v3970_v36 = vpop.f32.mrf.mxu1  ;;  %v3980_v63 = vpop.f32.mrf.mxu0 }
 0x1e6   : > { %v3974_v37 = vpop.f32.mrf.mxu1  ;;  %v3984_v3 = vpop.f32.mrf.mxu0 }
 0x1e8   : > { %v3978_v62 = vpop.f32.mrf.mxu1  ;;  %v3988_v5 = vpop.f32.mrf.mxu0 }
 0x1e9   : > { %4224 = vst [vmem:[#allocation7_spill] sm:$0xff] %v3988_v5 }
 0x1ea   : > { %v3982_v2 = vpop.f32.mrf.mxu1 }
 0x1eb   : > { %4222 = vst [vmem:[#allocation5_spill] sm:$0xff] %v3982_v2 }
 0x1ec   : > { %v3986_v4 = vpop.f32.mrf.mxu1 }
 0x1ed   : > { %4223 = vst [vmem:[#allocation6_spill] sm:$0xff] %v3986_v4 }
 0x1ee   : > { %v3990_v6 = vpop.f32.mrf.mxu1 }
 0x1ef   : > { %4225 = vst [vmem:[#allocation8_spill] sm:$0xff] %v3990_v6 }
 0x1f0   : > { %v3994_v8 = vpop.f32.mrf.mxu1 }
 0x1f1   : > { %4227 = vst [vmem:[#allocation10_spill] sm:$0xff] %v3994_v8 }
 0x1f6   : > { %v3992_v7 = vpop.f32.mrf.mxu0  ;;  %v3998_v12 = vpop.f32.mrf.mxu1 }
 0x1f7   : > { %4226 = vst [vmem:[#allocation9_spill] sm:$0xff] %v3992_v7  ;;  %4229 = vst [vmem:[#allocation12_spill] sm:$0xff] %v3998_v12 }
 0x1f8   : > { %v3996_v10 = vpop.f32.mrf.mxu0  ;;  %v4002_v21 = vpop.f32.mrf.mxu1 }
 0x1f9   : > { %4228 = vst [vmem:[#allocation11_spill] sm:$0xff] %v3996_v10  ;;  %4231 = vst [vmem:[#allocation14_spill] sm:$0xff] %v4002_v21 }
 0x1fa   : > { %v4000_v20 = vpop.f32.mrf.mxu0  ;;  %v4007_v38 = vpop.f32.mrf.mxu1 }
 0x1fb   : > { %4230 = vst [vmem:[#allocation13_spill] sm:$0xff] %v4000_v20  ;;  %4233 = vst [vmem:[#allocation16_spill] sm:$0xff] %v4007_v38  ;;  %v4239_v20 = vlaneseq }
 0x1fc   : > { %v4004_v34 = vpop.f32.mrf.mxu0  ;;  %v4011_v6 = vpop.f32.mrf.mxu1 }
 0x1fd   : > { %4232 = vst [vmem:[#allocation15_spill] sm:$0xff] %v4004_v34  ;;  %4235 = vst [vmem:[#allocation18_spill] sm:$0xff] %v4011_v6  ;;  %v2608_v12 = vshrl.u32 %v4239_v20, 7  ;;  %v1071_v20 = vadd.f32 %v3902_v16, %v3884_v60  ;;  %v1080_v60 = vadd.f32 %v3920_v43, %v3896_v13  ;;  %v1318_v13 = vadd.f32 %v3936_v51, %v3912_v23 }
 0x1fe   : > { %v4009_v4 = vpop.f32.mrf.mxu0 }
 0x1ff   : > { %4234 = vst [vmem:[#allocation17_spill] sm:$0xff] %v4009_v4  ;;  %v2609_v6 = vsub.s32 0, %v2608_v12  ;;  %v2613_v2 = vsub.s32 1, %v2608_v12  ;;  %v1311_v16 = vadd.f32 %v3926_v46, %v1071_v20 }
 0x200   : > { %v4013_v7 = vpop.f32.mrf.mxu0  ;;  %v4252_v20 = vld [vmem:[#allocation14_spill] sm:$0xff] }
 0x201   : > { %4236 = vst [vmem:[#allocation19_spill] sm:$0xff] %v4013_v7  ;;  %v2605_v7 = vld [vmem:[%s368_s14] sm:$0x7] }
 0x202   : > { %v4020_v21 = vpop.f32.mrf.mxu0 }
 0x203   : > { %4240 = vst [vmem:[#allocation22_spill] sm:$0xff] %v4020_v21  ;;  %v1072_v21 = vadd.f32 %v3904_v17, %v3886_v61 }
 0x204   : > { %v4029_v38 = vpop.f32.mrf.mxu0 }
 0x205   : > { %4243 = vst [vmem:[#allocation25_spill] sm:$0xff] %v4029_v38  ;;  %v1081_v38 = vadd.f32 %v3908_v19, %v3890_v1 }
 0x20e   : > { %v4015_v8 = vpop.f32.mrf.mxu1  ;;  %v3075_v5 = vpop.f32.mrf.mxu0 }
 0x20f   : > { %4237 = vst [vmem:[#allocation20_spill] sm:$0xff] %v4015_v8  ;;  %v2617_v8 = vsub.s32 2, %v2608_v12 }
 0x210   : > { %v4017_v10 = vpop.f32.mrf.mxu1  ;;  %v2214_v19 = vpop.f32.mrf.mxu0 }
 0x211   : > { %4238 = vst [vmem:[#allocation21_spill] sm:$0xff] %v4017_v10  ;;  %v1070_v10 = vadd.f32 %v3898_v14, %v3880_v57  ;;  %v1077_v57 = vadd.f32 %v3916_v40, %v3892_v9  ;;  %v4047_v14 = vrot.slane %v2605_v7, %v2609_v6  ;;  %v4053_v61 = vrot.slane %v2605_v7, %v2617_v8 }
 0x212   : > { %v4022_v34 = vpop.f32.mrf.mxu1  ;;  %v1312_v9 = vadd.f32 %v3928_v47, %v1072_v21 }
 0x213   : > { %4241 = vst [vmem:[#allocation23_spill] sm:$0xff] %v4022_v34  ;;  %v1075_v34 = vadd.f32 %v3900_v15, %v3882_v58  ;;  %v1079_v58 = vadd.f32 %v3918_v42, %v3894_v11  ;;  %v1310_v1 = vadd.f32 %v3922_v44, %v1070_v10  ;;  %v1314_v11 = vadd.f32 %v3934_v50, %v3910_v22  ;;  %v4250_v10 = vld [vmem:[#allocation10_spill] sm:$0xff] }
 0x214   : > { %v4027_v4 = vpop.f32.mrf.mxu1  ;;  %v1316_v42 = vadd.f32 %v3938_v52, %v3914_v39  ;;  %v1317_v44 = vadd.f32 %v3942_v54, %v1077_v57  ;;  %v1320_v22 = vadd.f32 %v3950_v24, %v1080_v60  ;;  %v3078_v54 = vpop.f32.mrf.mxu0 }
 0x215   : > { %4242 = vst [vmem:[#allocation24_spill] sm:$0xff] %v4027_v4  ;;  %v1073_v4 = vadd.f32 %v3906_v18, %v3888_v0  ;;  %v4055_v0 = vrot.slane %v2605_v7, %v2613_v2  ;;  %v1315_v15 = vadd.f32 %v3924_v45, %v1075_v34  ;;  %v1321_v18 = vadd.f32 %v3932_v49, %v1081_v38  ;;  %v4251_v34 = vld [vmem:[#allocation11_spill] sm:$0xff] }
 0x216   : > { %v4043_v12 = vpop.f32.mrf.mxu1  ;;  %v1513_v43 = vadd.f32 %v3940_v53, %v1310_v1  ;;  %v1514_v45 = vadd.f32 %v3944_v41, %v1311_v16  ;;  %v1319_v38 = vadd.f32 %v3946_v26, %v1079_v58  ;;  %v1517_v23 = vadd.f32 %v3952_v25, %v1314_v11  ;;  %v2224_v57 = vpop.f32.mrf.mxu0  ;;  %v4253_v58 = vld [vmem:[#allocation13_spill] sm:$0xff]  ;;  %v4254_v1 = vld [vmem:[#allocation16_spill] sm:$0xff] }
 0x217   : > { %v1313_v17 = vadd.f32 %v3930_v48, %v1073_v4  ;;  %v1519_v47 = vadd.f32 %v3958_v29, %v1316_v42  ;;  %v1518_v48 = vadd.f32 %v3954_v27, %v1315_v15  ;;  %v1520_v39 = vadd.f32 %v3964_v32, %v1317_v44  ;;  %v2492_v27 = vpop.permute.xlu0 %2491  ;;  %v4255_v16 = vld [vmem:[#allocation20_spill] sm:$0xff] }
 0x218   : > { %v4067_v40 = vpop.f32.mrf.mxu1  ;;  %v1515_v49 = vadd.f32 %v3956_v28, %v1312_v9  ;;  %v1522_v50 = vadd.f32 %v3968_v35, %v1319_v38  ;;  %v1524_v51 = vadd.f32 %v3960_v30, %v1321_v18  ;;  %v1523_v52 = vadd.f32 %v3972_v56, %v1320_v22  ;;  %v4090_v28 = vpop.permute.xlu1 %2496  ;;  %v4245_v56 = vld [vmem:[#allocation5_spill] sm:$0xff]  ;;  %v4256_v18 = vld [vmem:[#allocation15_spill] sm:$0xff] }
 0x219   : > { %v1516_v46 = vadd.f32 %v3948_v55, %v1313_v17  ;;  %v1521_v53 = vadd.f32 %v3962_v31, %v1318_v13  ;;  %v1753_v26 = vadd.f32 %v3966_v33, %v1513_v43  ;;  %v1758_v55 = vadd.f32 %v3976_v59, %v1518_v48  ;;  %v4244_v31 = vld [vmem:[#allocation7_spill] sm:$0xff]  ;;  %v4246_v33 = vld [vmem:[#allocation6_spill] sm:$0xff]  ;;  %v4247_v59 = vld [vmem:[#allocation9_spill] sm:$0xff] }
 0x21a   : > { %v2143_v41 = vpop.f32.mrf.mxu1  ;;  %v1754_v24 = vadd.f32 %v3970_v36, %v1514_v45  ;;  %v1755_v25 = vadd.f32 %v3980_v63, %v1515_v49  ;;  %v1764_v30 = vadd.f32 %v3984_v3, %v1524_v51  ;;  %v1757_v32 = vadd.f32 %v3978_v62, %v1517_v23  ;;  %v4248_v36 = vld [vmem:[#allocation12_spill] sm:$0xff]  ;;  %v4257_v13 = vld [vmem:[#allocation18_spill] sm:$0xff]  ;;  %v4258_v43 = vld [vmem:[#allocation17_spill] sm:$0xff] }
 0x21b   : > { %v1756_v29 = vadd.f32 %v3974_v37, %v1516_v46  ;;  %v1761_v35 = vadd.f32 %v4244_v31, %v1521_v53  ;;  %v1759_v2 = vadd.f32 %v4245_v56, %v1519_v47  ;;  %v1760_v4 = vadd.f32 %v4246_v33, %v1520_v39  ;;  %v4249_v63 = vld [vmem:[#allocation8_spill] sm:$0xff]  ;;  %v4259_v45 = vld [vmem:[#allocation19_spill] sm:$0xff]  ;;  %v4260_v23 = vld [vmem:[#allocation21_spill] sm:$0xff] }
 0x21c   : > { %v1993_v6 = vadd.f32 %v4247_v59, %v1753_v26  ;;  %v1998_v7 = vadd.f32 %v4248_v36, %v1758_v55  ;;  %v1762_v8 = vadd.f32 %v4249_v63, %v1522_v50  ;;  %v1763_v21 = vadd.f32 %v4250_v10, %v1523_v52  ;;  %v2145_v62 = vpop.f32.mrf.mxu1  ;;  %v4112_v50 = vpop.permute.xlu0 %2506  ;;  %v4262_v53 = vld [vmem:[#allocation25_spill] sm:$0xff]  ;;  %v4263_v55 = vld [vmem:[#allocation23_spill] sm:$0xff]  ;;  %v4264_v33 = vld [vmem:[#allocation24_spill] sm:$0xff] }
 0x21d   : > { %v1994_v37 = vadd.f32 %v4251_v34, %v1754_v24  ;;  %v1995_v3 = vadd.f32 %v4252_v20, %v1755_v25  ;;  %v1996_v60 = vadd.f32 %v4253_v58, %v1756_v29  ;;  %v2004_v15 = vadd.f32 %v4254_v1, %v1764_v30  ;;  %v4114_v51 = vpop.permute.xlu1 %2501  ;;  %v2526_v29 = vld [vmem:[%s4120_s15 + $0x28] sm:$0xff]  ;;  %v2524_v1 = vld [vmem:[%s4120_s15 + $0x18] sm:$0xff] }
 0x21e   : > { %v2233_v9 = vadd.f32 %v4255_v16, %v1993_v6  ;;  %v2238_v17 = vadd.f32 %v3075_v5, %v1998_v7  ;;  %v1997_v11 = vadd.f32 %v4256_v18, %v1757_v32  ;;  %v2001_v42 = vadd.f32 %v4257_v13, %v1761_v35  ;;  %v4261_v5 = vld [vmem:[#allocation22_spill] sm:$0xff]  ;;  %v2523_v7 = vld [vmem:[%s4120_s15 + $0x10] sm:$0xff] }
 0x21f   : > { %v1999_v44 = vadd.f32 %v4258_v43, %v1759_v2  ;;  %v2000_v38 = vadd.f32 %v4259_v45, %v1760_v4  ;;  %v2234_v47 = vadd.f32 %v4260_v23, %v1994_v37  ;;  %v2235_v48 = vadd.f32 %v2214_v19, %v1995_v3  ;;  %v2521_v19 = vld [vmem:[%s4120_s15] sm:$0xff]  ;;  %v2522_v36 = vld [vmem:[%s4120_s15 + $0x8] sm:$0xff] }
 0x220   : > { %v2002_v52 = vadd.f32 %v4261_v5, %v1762_v8  ;;  %v2003_v26 = vadd.f32 %v4262_v53, %v1763_v21  ;;  %v2236_v24 = vadd.f32 %v4263_v55, %v1996_v60  ;;  %v2244_v25 = vadd.f32 %v3078_v54, %v2004_v15  ;;  %v2532_v15 = vld [vmem:[%s4120_s15 + $0x58] sm:$0xff]  ;;  %v4134_v16 = vpop.permute.xlu0 %2568 }
 0x221   : > { %v2237_v4 = vadd.f32 %v4264_v33, %v1997_v11  ;;  %v2241_v59 = vadd.f32 %v2224_v57, %v2001_v42  ;;  %v2239_v54 = vadd.f32 %v4043_v12, %v1999_v44  ;;  %v2240_v6 = vadd.f32 %v4067_v40, %v2000_v38 }
 0x222   : > { %v2242_v20 = vadd.f32 %v2143_v41, %v2002_v52  ;;  %v4130_v3 = vadd.f32 %v2145_v62, %v2003_v26 }
 0x226   : > { %v2365_v46 = vpop.f32.mrf.mxu0  ;;  %v3089_v22 = vpop.f32.mrf.mxu1 }
 0x227   : > { %v2473_v39 = vadd.f32 %v2365_v46, %v2233_v9  ;;  %v2478_v49 = vadd.f32 %v3089_v22, %v2238_v17  ;;  %v2564_v9 = vpop.permute.xlu1 %2563 }
 0x228   : > { %v2367_v30 = vpop.f32.mrf.mxu0  ;;  %v2454_v32 = vpop.f32.mrf.mxu1 }
 0x229   : > { %v2509_v31 = vadd.f32 %v2492_v27, %v2473_v39  ;;  %v2514_v35 = vadd.f32 %v4090_v28, %v2478_v49  ;;  %v2474_v56 = vadd.f32 %v2367_v30, %v2234_v47  ;;  %v2475_v2 = vadd.f32 %v2454_v32, %v2235_v48  ;;  %v2527_v30 = vld [vmem:[%s4120_s15 + $0x30] sm:$0xff] }
 0x22a   : > { %v2371_v63 = vpop.f32.mrf.mxu0  ;;  %v3092_v8 = vpop.f32.mrf.mxu1 }
 0x22b   : > { %v2533_v10 = vadd.f32 %v2521_v19, %v2509_v31  ;;  %v2538_v21 = vadd.f32 %v2526_v29, %v2514_v35  ;;  %v2510_v34 = vadd.f32 %v2492_v27, %v2474_v56  ;;  %v2511_v37 = vadd.f32 %v2492_v27, %v2475_v2  ;;  %v2525_v19 = vld [vmem:[%s4120_s15 + $0x20] sm:$0xff] }
 0x22c   : > { %v2476_v58 = vadd.f32 %v2371_v63, %v2236_v24  ;;  %v2484_v60 = vadd.f32 %v3092_v8, %v2244_v25  ;;  %v2373_v57 = vpop.f32.mrf.mxu0  ;;  %v2464_v38 = vpop.f32.mrf.mxu1  ;;  %v2529_v29 = vld [vmem:[%s4120_s15 + $0x40] sm:$0xff] }
 0x22d   : > { %vm2549_vm9 = vcmp.ge.f32.partialorder %v2533_v10, 0.0  ;;  %vm2554_vm10 = vcmp.ge.f32.partialorder %v2538_v21, 0.0  ;;  %v2534_v12 = vadd.f32 %v2522_v36, %v2510_v34  ;;  %v2535_v40 = vadd.f32 %v2523_v7, %v2511_v37  ;;  %v2579_v24 = vpop.permute.xlu0 %2578  ;;  %v2530_v36 = vld [vmem:[%s4120_s15 + $0x48] sm:$0xff] }
 0x22e   : > { %v2512_v17 = vadd.f32 %v4090_v28, %v2476_v58  ;;  %v2520_v18 = vadd.f32 %v4112_v50, %v2484_v60  ;;  %v2586_v41 = vmul.f32 %v4134_v16, %v2538_v21  ;;  %v2581_v27 = vmul.f32 %v2564_v9, %v2533_v10  ;;  %v2377_v62 = vpop.f32.mrf.mxu0  ;;  %v2531_v60 = vld [vmem:[%s4120_s15 + $0x50] sm:$0xff] }
 0x22f   : > { %vm2550_vm11 = vcmp.ge.f32.partialorder %v2534_v12, 0.0  ;;  %vm2551_vm12 = vcmp.ge.f32.partialorder %v2535_v40, 0.0  ;;  %v2582_v11 = vmul.f32 %v2564_v9, %v2534_v12  ;;  %v2583_v13 = vmul.f32 %v2564_v9, %v2535_v40 }
 0x230   : > { %v2536_v42 = vadd.f32 %v2524_v1, %v2512_v17  ;;  %v2544_v43 = vadd.f32 %v2532_v15, %v2520_v18  ;;  %v2598_v44 = vsel %vm2554_vm10, %v2538_v21, %v2586_v41  ;;  %v2593_v45 = vsel %vm2549_vm9, %v2533_v10, %v2581_v27  ;;  %v2379_v46 = vpop.f32.mrf.mxu0 }
 0x231   : > { %v2627_v22 = vmul.f32 %v4053_v61, %v2598_v44  ;;  %v2594_v23 = vsel %vm2550_vm11, %v2534_v12, %v2582_v11  ;;  %v2595_v47 = vsel %vm2551_vm12, %v2535_v40, %v2583_v13  ;;  %v2622_v48 = vmul.f32 %v4047_v14, %v2593_v45 }
 0x232   : > { %vm2552_vm13 = vcmp.ge.f32.partialorder %v2536_v42, 0.0  ;;  %v2584_v39 = vmul.f32 %v4134_v16, %v2536_v42  ;;  %v2623_v49 = vmul.f32 %v4055_v0, %v2594_v23  ;;  %v2624_v5 = vmul.f32 %v4053_v61, %v2595_v47  ;;  %v2383_v52 = vpop.f32.mrf.mxu0 }
 0x233   : > { %2639 = vst [vmem:[%s4147_s16 + $0x28] sm:$0xff] %v2627_v22  ;;  %2634 = vst [vmem:[%s4147_s16] sm:$0xff] %v2622_v48  ;;  %v2477_v53 = vadd.f32 %v2373_v57, %v2237_v4  ;;  %v2481_v26 = vadd.f32 %v2464_v38, %v2241_v59  ;;  %v2479_v55 = vadd.f32 %v2377_v62, %v2239_v54  ;;  %vm2560_vm14 = vcmp.ge.f32.partialorder %v2544_v43, 0.0  ;;  %v2528_v54 = vld [vmem:[%s4120_s15 + $0x38] sm:$0xff] }
 0x234   : > { %v2596_v25 = vsel %vm2552_vm13, %v2536_v42, %v2584_v39  ;;  %2635 = vst [vmem:[%s4147_s16 + $0x8] sm:$0xff] %v2623_v49  ;;  %2636 = vst [vmem:[%s4147_s16 + $0x10] sm:$0xff] %v2624_v5  ;;  %v2592_v32 = vmul.f32 %v2579_v24, %v2544_v43  ;;  %v2480_v31 = vadd.f32 %v2379_v46, %v2240_v6  ;;  %v2385_v56 = vpop.f32.mrf.mxu0 }
 0x235   : > { %v2482_v35 = vadd.f32 %v2383_v52, %v2242_v20  ;;  %v2625_v2 = vmul.f32 %v4047_v14, %v2596_v25  ;;  %v2513_v33 = vadd.f32 %v4090_v28, %v2477_v53  ;;  %v2517_v4 = vadd.f32 %v4114_v51, %v2481_v26 }
 0x236   : > { %v2515_v59 = vadd.f32 %v4114_v51, %v2479_v55  ;;  %v2604_v7 = vsel %vm2560_vm14, %v2544_v43, %v2592_v32  ;;  %v2516_v63 = vadd.f32 %v4114_v51, %v2480_v31  ;;  %v2483_v8 = vadd.f32 %v2385_v56, %v4130_v3  ;;  %v2574_v51 = vpop.permute.xlu1 %2573 }
 0x237   : > { %v2518_v6 = vadd.f32 %v4112_v50, %v2482_v35  ;;  %2637 = vst [vmem:[%s4147_s16 + $0x18] sm:$0xff] %v2625_v2  ;;  %v2537_v10 = vadd.f32 %v2525_v19, %v2513_v33  ;;  %v2541_v21 = vadd.f32 %v2529_v29, %v2517_v4  ;;  %v2633_v34 = vmul.f32 %v4053_v61, %v2604_v7 }
 0x238   : > { %v2539_v28 = vadd.f32 %v2527_v30, %v2515_v59  ;;  %v2540_v37 = vadd.f32 %v2528_v54, %v2516_v63  ;;  %v2519_v58 = vadd.f32 %v4112_v50, %v2483_v8 }
 0x239   : > { %v2542_v20 = vadd.f32 %v2530_v36, %v2518_v6  ;;  %vm2553_vm15 = vcmp.ge.f32.partialorder %v2537_v10, 0.0  ;;  %v2585_v57 = vmul.f32 %v4134_v16, %v2537_v10  ;;  %2645 = vst [vmem:[%s4147_s16 + $0x58] sm:$0xff] %v2633_v34  ;;  %vm2557_vm1 = vcmp.ge.f32.partialorder %v2541_v21, 0.0 }
 0x23a   : > { %vm2555_vm0 = vcmp.ge.f32.partialorder %v2539_v28, 0.0  ;;  %v2587_v12 = vmul.f32 %v2574_v51, %v2539_v28  ;;  %v2589_v3 = vmul.f32 %v2574_v51, %v2541_v21  ;;  %vm2556_vm2 = vcmp.ge.f32.partialorder %v2540_v37, 0.0  ;;  %v2678_v46 = vld [vmem:[%s4147_s16 + $0x28] sm:$0xff] (%p3236_p5) }
 0x23b   : > { %v2588_v40 = vmul.f32 %v2574_v51, %v2540_v37  ;;  %v2597_v1 = vsel %vm2553_vm15, %v2537_v10, %v2585_v57  ;;  %vm2558_vm3 = vcmp.ge.f32.partialorder %v2542_v20, 0.0  ;;  %v2590_v15 = vmul.f32 %v2579_v24, %v2542_v20  ;;  %v2672_v45 = vld [vmem:[%s4147_s16 + $0x10] sm:$0xff] (%p3236_p5)  ;;  %2679 = vst [vmem:[%s2655_s18 + $0x40] sm:$0xff] (%p3236_p5), %v2678_v46 }
 0x23c   : > { %v2543_v50 = vadd.f32 %v2531_v60, %v2519_v58  ;;  %v2626_v9 = vmul.f32 %v4055_v0, %v2597_v1  ;;  %v2599_v16 = vsel %vm2555_vm0, %v2539_v28, %v2587_v12  ;;  %v2601_v17 = vsel %vm2557_vm1, %v2541_v21, %v2589_v3  ;;  %2673 = vst [vmem:[%s2655_s18 + $0x10] sm:$0xff] (%p3236_p5), %v2672_v45 }
 0x23d   : > { %v2600_v18 = vsel %vm2556_vm2, %v2540_v37, %v2588_v40  ;;  %v2628_v41 = vmul.f32 %v4047_v14, %v2599_v16  ;;  %v2630_v27 = vmul.f32 %v4053_v61, %v2601_v17  ;;  %v2602_v11 = vsel %vm2558_vm3, %v2542_v20, %v2590_v15  ;;  %v2670_v61 = vld [vmem:[%s4147_s16 + $0x8] sm:$0xff] (%p3236_p5) }
 0x23e   : > { %v2629_v62 = vmul.f32 %v4055_v0, %v2600_v18  ;;  %2638 = vst [vmem:[%s4147_s16 + $0x20] sm:$0xff] %v2626_v9  ;;  %v2631_v13 = vmul.f32 %v4047_v14, %v2602_v11  ;;  %vm2559_vm4 = vcmp.ge.f32.partialorder %v2543_v50, 0.0  ;;  %v2591_v42 = vmul.f32 %v2579_v24, %v2543_v50  ;;  %v2668_v14 = vld [vmem:[%s4147_s16] sm:$0xff] (%p3236_p5)  ;;  %v2674_v38 = vld [vmem:[%s4147_s16 + $0x18] sm:$0xff] (%p3236_p5)  ;;  %2671 = vst [vmem:[%s2655_s18 + $0x8] sm:$0xff] (%p3236_p5), %v2670_v61 }
 0x23f   : > { %2640 = vst [vmem:[%s4147_s16 + $0x30] sm:$0xff] %v2628_v41  ;;  %2642 = vst [vmem:[%s4147_s16 + $0x40] sm:$0xff] %v2630_v27  ;;  %2652 = sbr.rel (!%p3236_p5) target bundleno = 588 (0x24c), region = 94 }
 0x240   : > { %2641 = vst [vmem:[%s4147_s16 + $0x38] sm:$0xff] %v2629_v62  ;;  %2643 = vst [vmem:[%s4147_s16 + $0x48] sm:$0xff] %v2631_v13  ;;  %v2603_v43 = vsel %vm2559_vm4, %v2543_v50, %v2591_v42  ;;  %v2690_v49 = vld [vmem:[%s4147_s16 + $0x58] sm:$0xff] (%p3236_p5) }
 0x241   : > { %v2632_v44 = vmul.f32 %v4055_v0, %v2603_v43  ;;  %2669 = vst [vmem:[%s2655_s18] sm:$0xff] (%p3236_p5), %v2668_v14  ;;  %2675 = vst [vmem:[%s2655_s18 + $0x30] sm:$0xff] (%p3236_p5), %v2674_v38 }
 0x242   : > { %2691 = vst [vmem:[%s2655_s18 + $0xa0] sm:$0xff] (%p3236_p5), %v2690_v49 }
 0x243   : > { %2644 = vst [vmem:[%s4147_s16 + $0x50] sm:$0xff] %v2632_v44 }
 0x245   : > { %v2676_v0 = vld [vmem:[%s4147_s16 + $0x20] sm:$0xff] }
 0x246   : > { %v2680_v22 = vld [vmem:[%s4147_s16 + $0x30] sm:$0xff]  ;;  %v2684_v47 = vld [vmem:[%s4147_s16 + $0x40] sm:$0xff]  ;;  %2677 = vst [vmem:[%s2655_s18 + $0x38] sm:$0xff] %v2676_v0 }
 0x247   : > { %v2682_v23 = vld [vmem:[%s4147_s16 + $0x38] sm:$0xff]  ;;  %2681 = vst [vmem:[%s2655_s18 + $0x60] sm:$0xff] %v2680_v22  ;;  %2685 = vst [vmem:[%s2655_s18 + $0x70] sm:$0xff] %v2684_v47  ;;  %v2686_v48 = vld [vmem:[%s4147_s16 + $0x48] sm:$0xff] }
 0x248   : > { %2683 = vst [vmem:[%s2655_s18 + $0x68] sm:$0xff] %v2682_v23  ;;  %2687 = vst [vmem:[%s2655_s18 + $0x90] sm:$0xff] %v2686_v48 }
 0x24a   : > { %v2688_v39 = vld [vmem:[%s4147_s16 + $0x50] sm:$0xff] }
 0x24b   : > { %2689 = vst [vmem:[%s2655_s18 + $0x98] sm:$0xff] %v2688_v39 }
 0x24c PF: > { %p13_p11 = scmp.ge.s32.totalorder %s3220_s25, 4   ;;  %s4265_s21 = smov %s3150_s22 }
 0x24d   : > { %s4266_s22 = smov %s3230_s28  ;;  %s4267_s23 = smov %s3220_s25 }
 0x24e   :  { %15 = sbr.rel (!%p13_p11) target bundleno = 2 (0x2), region = 167 }

// kernel: decoder3_forward_impl.15
= control target key start
LH: loop header
LB: loop body
LE: loop exit
PB: predicated region body
PF: predicated region fallthrough
CT: control target
= control target key end

     0   :  { %s3429_s15 = smov 0   ;;  %s3431_s16 = smov 0   ;;  %s4518_s0 = inlined_call_operand.vmem [shape: f32[32,768], index: 0, kind: input, shape index: {}]   ;;  %s4519_s1 = inlined_call_operand.vmem [shape: f32[9,48,32], index: 1, kind: input, shape index: {}]   ;;  %s4520_s2 = inlined_call_operand.vmem [shape: f32[48,1], index: 2, kind: input, shape index: {}]   ;;  %s4521_s3 = inlined_call_operand.vmem [shape: f32[1,768], index: 3, kind: input, shape index: {}]   ;;  %s4522_s4 = inlined_call_operand.vmem [shape: f32[48,768], index: 4, kind: output, shape index: {}]  }
   0x1   :  { %s3433_s17 = smov 0  }
   0x2 LB: > { %s3445_s18 = sadd.s32 4294967295, %s3392_s17   ;;  %s3448_s19 = sadd.s32 1, %s3392_s17   ;;  %s3392_s17 = sphi %s3433_s17, %s4560_s17   ;;  %s3388_s16 = sphi %s3431_s16, %s4559_s16   ;;  %s3384_s15 = sphi %s3429_s15, %s4558_s15  }
   0x3   : > { %s18_s20 = ssub.s32 %s3392_s17, %s3448_s19  ;;  %s21_s21 = sadd.s32 1, %s3388_s16 }
   0x4   : > { %p19_p0 = scmp.eq.s32.totalorder %s18_s20, 0  ;;  %p28_p1 = scmp.ne.s32.totalorder %s3388_s16, %s3384_s15 }
   0x5   : > { %p29_p2 = scmp.eq.s32.totalorder %s3392_s17, 0  ;;  %p126_p3 = scmp.eq.s32.totalorder %s3445_s18, 1 }
   0x6   : > { %s3458_s22 = scalar_select %p19_p0, %s3388_s16, %s21_s21  }
   0x7   : > { %p30_p4 = por %p29_p2, %p28_p1  ;;  %p3460_p5 = por %p126_p3, %p28_p1 }
   0x8   : > { %p2916_p6 = scmp.ge.s32.totalorder %s3392_s17, 2 }
   0xa   : > { %154 = sbr.rel (%p2916_p6) target bundleno = 26 (0x1a), region = 24 }
   0xf   : > { %157 = sbr.rel (!%p30_p4) target bundleno = 26 (0x1a), region = 28  ;;  %s159_s24 = sand.u32 (%p30_p4), 1, %s3388_s16  }
  0x10   : > { %s3078_s25 = smul.u32 (%p30_p4), 24, %s3392_s17 }
  0x11   : > { %s3331_s26 = smul.u32 (%p30_p4), 96, %s159_s24 }
  0x12   : > { %s164_s29 = scalar_lea.vmem (%p30_p4), %s4518_s0, %s3078_s25 }
  0x13   : > { %v177_v0 = vld [vmem:[%s164_s29] sm:$0xff] (%p30_p4)  ;;  %v179_v1 = vld [vmem:[%s164_s29 + $0x8] sm:$0xff] (%p30_p4)  ;;  %v181_v2 = vld [vmem:[%s164_s29 + $0x10] sm:$0xff] (%p30_p4)  ;;  %s161_s30 = scalar_lea.vmem (%p30_p4), [#allocation2], %s3331_s26 }
  0x14   : > { %178 = vst [vmem:[%s161_s30] sm:$0xff] %v177_v0  ;;  %180 = vst [vmem:[%s161_s30 + $0x8] sm:$0xff] %v179_v1  ;;  %v183_v3 = vld [vmem:[%s164_s29 + $0x30] sm:$0xff]  ;;  %v185_v4 = vld [vmem:[%s164_s29 + $0x38] sm:$0xff] }
  0x15   : > { %182 = vst [vmem:[%s161_s30 + $0x10] sm:$0xff] %v181_v2  ;;  %v187_v5 = vld [vmem:[%s164_s29 + $0x40] sm:$0xff]  ;;  %184 = vst [vmem:[%s161_s30 + $0x18] sm:$0xff] %v183_v3  ;;  %v191_v7 = vld [vmem:[%s164_s29 + $0x68] sm:$0xff] }
  0x16   : > { %186 = vst [vmem:[%s161_s30 + $0x20] sm:$0xff] %v185_v4  ;;  %188 = vst [vmem:[%s161_s30 + $0x28] sm:$0xff] %v187_v5  ;;  %v189_v6 = vld [vmem:[%s164_s29 + $0x60] sm:$0xff]  ;;  %v193_v8 = vld [vmem:[%s164_s29 + $0x70] sm:$0xff] }
  0x17   : > { %190 = vst [vmem:[%s161_s30 + $0x30] sm:$0xff] %v189_v6  ;;  %192 = vst [vmem:[%s161_s30 + $0x38] sm:$0xff] %v191_v7  ;;  %v195_v9 = vld [vmem:[%s164_s29 + $0x90] sm:$0xff]  ;;  %v197_v10 = vld [vmem:[%s164_s29 + $0x98] sm:$0xff] }
  0x18   : > { %194 = vst [vmem:[%s161_s30 + $0x40] sm:$0xff] %v193_v8  ;;  %v199_v11 = vld [vmem:[%s164_s29 + $0xa0] sm:$0xff]  ;;  %196 = vst [vmem:[%s161_s30 + $0x48] sm:$0xff] %v195_v9 }
  0x19   : > { %198 = vst [vmem:[%s161_s30 + $0x50] sm:$0xff] %v197_v10  ;;  %200 = vst [vmem:[%s161_s30 + $0x58] sm:$0xff] %v199_v11 }
  0x1a PF: > { %p2918_p7 = scmp.ge.s32.totalorder %s3392_s17, 1  ;;  %p213_p8 = scmp.lt.s32.totalorder %s3392_s17, 3 }
  0x1c   : > { %p214_p9 = pnand %p2918_p7, %p213_p8 }
  0x1e   : > { %217 = sbr.rel (%p214_p9) target bundleno = 580 (0x244), region = 55 }
  0x23   : > { %s220_s5 = sand.u32 1, %s3384_s15   ;;  %s3394_s8 = smov 18   ;;  %v3395_v22 = vmov 0.0   ;;  %v3507_v23 = vld [vmem:[%s4519_s1 + $0x30] sm:$0xff]  ;;  %vm356_vm0 = vcmask 261120   ;;  %v291_v26 = vlaneseq  ;;  %v2920_v52 = vld [vmem:[%s4519_s1 + $0x38] sm:$0xff] }
  0x24   : > { %s3332_s6 = smul.u32 96, %s220_s5  ;;  %439 = vmatprep.mubr.f32.mxu0 %v3395_v22  ;;  %3178 = vmatprep.mubr.msk.f32.mxu1 %vm356_vm0, %v3507_v23  ;;  %s3396_s11 = smov 19   ;;  %v2922_v56 = vld [vmem:[%s4519_s1 + $0x48] sm:$0xff]  ;;  %v2921_v57 = vld [vmem:[%s4519_s1 + $0x40] sm:$0xff]  ;;  %v2923_v62 = vld [vmem:[%s4519_s1 + $0x50] sm:$0xff] }
  0x25   : > { %s3397_s12 = smov 17   ;;  %s3398_s13 = smov 1   ;;  %v3566_v29 = vand.u32 127, %v291_v26  ;;  %v2924_v4 = vld [vmem:[%s4519_s1 + $0x58] sm:$0xff] }
  0x26   : > { %s222_s7 = scalar_lea.vmem [#allocation2], %s3332_s6  ;;  %s3399_s14 = smov 127  }
  0x27   : > { %v3475_v12 = vld [vmem:[%s222_s7 + $0x58] sm:$0xff]  ;;  %v3477_v13 = vld [vmem:[%s222_s7 + $0x48] sm:$0xff]  ;;  %v3481_v14 = vld [vmem:[%s222_s7 + $0x50] sm:$0xff]  ;;  %vm336_vm1 = vcmp.lt.s32.totalorder %v3566_v29, 18  ;;  %s3400_s17 = smov 111   ;;  %vm293_vm2 = vcmp.lt.s32.totalorder %v3566_v29, 19 }
  0x28   : > { %334 = vrot.lane.b32.xlu1 %v3475_v12, %s3394_s8  ;;  %318 = vrot.lane.b32.xlu0 %v3477_v13, %s3394_s8  ;;  %v3483_v15 = vld [vmem:[%s222_s7 + $0x30] sm:$0xff]  ;;  %v3487_v16 = vld [vmem:[%s222_s7 + $0x38] sm:$0xff]  ;;  %s3401_s30 = smov 110   ;;  %vm809_vm3 = vcmp.lt.s32.totalorder %v3566_v29, 17  ;;  %vm1085_vm4 = vcmp.lt.s32.totalorder %v3566_v29, 1  ;;  %vm1600_vm5 = vcmp.lt.s32.totalorder %v3566_v29, 127 }
  0x29   : > { %v3489_v17 = vld [vmem:[%s222_s7 + $0x40] sm:$0xff]  ;;  %v3495_v19 = vld [vmem:[%s222_s7 + $0x18] sm:$0xff]  ;;  %v3499_v20 = vld [vmem:[%s222_s7 + $0x28] sm:$0xff]  ;;  %vm1876_vm6 = vcmp.lt.s32.totalorder %v3566_v29, 111  ;;  %vm2152_vm7 = vcmp.lt.s32.totalorder %v3566_v29, 110  ;;  %vm2428_vm8 = vcmp.lt.s32.totalorder %v3566_v29, 109 }
  0x2a   : > { %v3493_v18 = vld [vmem:[%s222_s7 + $0x20] sm:$0xff]  ;;  %v3513_v24 = vld [vmem:[%s222_s7 + $0x8] sm:$0xff]  ;;  %v3515_v25 = vld [vmem:[%s222_s7 + $0x10] sm:$0xff]  ;;  %s249_s28 = smul.u32 3, %s3445_s18 }
  0x2b   : > { %v3501_v21 = vld [vmem:[%s222_s7] sm:$0xff]  ;;  %v3059_v29 = vld [vmem:[%s4519_s1 + $0x190] sm:$0xff]  ;;  %s4383_s7 = smul.u32 144, %s220_s5 }
  0x2c   : > { %326 = vrot.lane.b32.xlu0 %v3481_v14, %s3394_s8  ;;  %316 = vrot.lane.b32.xlu1 %v3483_v15, %s3394_s8  ;;  %p250_p10 = scmp.lt.s32.totalorder %s249_s28, 5  ;;  %s3079_s5 = smul.u32 (%p3460_p5), 24, %s3445_s18 }
  0x2d   : > { %s4419_s15 = scalar_lea.vmem [#allocation3], %s4383_s7 }
  0x2e   : > { %s4562_s28 = smov (!%p250_p10, %s249_s28), 5  ;;  %s2796_s9 = scalar_lea.vmem (%p3460_p5), %s4522_s4, %s3079_s5 }
  0x2f   : > { %s252_s6 = scalar_lea.vmem %s4521_s3, %s4562_s28 }
  0x30   : > { %324 = vrot.lane.b32.xlu0 %v3487_v16, %s3394_s8  ;;  %332 = vrot.lane.b32.xlu1 %v3489_v17, %s3394_s8 }
  0x34   : > { %322 = vrot.lane.b32.xlu1 %v3493_v18, %s3394_s8  ;;  %314 = vrot.lane.b32.xlu0 %v3495_v19, %s3394_s8 }
  0x38   : > { %330 = vrot.lane.b32.xlu0 %v3499_v20, %s3394_s8  ;;  %312 = vrot.lane.b32.xlu1 %v3501_v21, %s3394_s8 }
  0x3c   : > { %320 = vrot.lane.b32.xlu0 %v3513_v24, %s3394_s8  ;;  %328 = vrot.lane.b32.xlu1 %v3515_v25, %s3394_s8 }
  0x40   : > { %273 = vrot.lane.b32.xlu0 %v3477_v13, %s3396_s11  ;;  %281 = vrot.lane.b32.xlu1 %v3481_v14, %s3396_s11 }
  0x44   : > { %289 = vrot.lane.b32.xlu0 %v3475_v12, %s3396_s11  ;;  %271 = vrot.lane.b32.xlu1 %v3483_v15, %s3396_s11 }
  0x48   : > { %279 = vrot.lane.b32.xlu0 %v3487_v16, %s3396_s11  ;;  %287 = vrot.lane.b32.xlu1 %v3489_v17, %s3396_s11 }
  0x4c   : > { %269 = vrot.lane.b32.xlu0 %v3495_v19, %s3396_s11  ;;  %277 = vrot.lane.b32.xlu1 %v3493_v18, %s3396_s11 }
  0x50   : > { %285 = vrot.lane.b32.xlu0 %v3499_v20, %s3396_s11  ;;  %267 = vrot.lane.b32.xlu1 %v3501_v21, %s3396_s11 }
  0x54   : > { %275 = vrot.lane.b32.xlu0 %v3513_v24, %s3396_s11  ;;  %283 = vrot.lane.b32.xlu1 %v3515_v25, %s3396_s11 }
  0x58   : > { %791 = vrot.lane.b32.xlu0 %v3477_v13, %s3397_s12  ;;  %799 = vrot.lane.b32.xlu1 %v3481_v14, %s3397_s12 }
  0x5c   : > { %807 = vrot.lane.b32.xlu0 %v3475_v12, %s3397_s12  ;;  %789 = vrot.lane.b32.xlu1 %v3483_v15, %s3397_s12 }
  0x60   : > { %797 = vrot.lane.b32.xlu0 %v3487_v16, %s3397_s12  ;;  %805 = vrot.lane.b32.xlu1 %v3489_v17, %s3397_s12 }
  0x64   : > { %787 = vrot.lane.b32.xlu0 %v3495_v19, %s3397_s12  ;;  %795 = vrot.lane.b32.xlu1 %v3493_v18, %s3397_s12 }
  0x68   : > { %803 = vrot.lane.b32.xlu0 %v3499_v20, %s3397_s12  ;;  %785 = vrot.lane.b32.xlu1 %v3501_v21, %s3397_s12 }
  0x6c   : > { %793 = vrot.lane.b32.xlu0 %v3513_v24, %s3397_s12  ;;  %801 = vrot.lane.b32.xlu1 %v3515_v25, %s3397_s12  ;;  %s3402_s12 = smov 109  }
  0x70   : > { %1067 = vrot.lane.b32.xlu0 %v3477_v13, %s3398_s13  ;;  %1075 = vrot.lane.b32.xlu1 %v3481_v14, %s3398_s13 }
  0x74   : > { %1083 = vrot.lane.b32.xlu0 %v3475_v12, %s3398_s13  ;;  %1065 = vrot.lane.b32.xlu1 %v3483_v15, %s3398_s13 }
  0x78   : > { %1073 = vrot.lane.b32.xlu0 %v3487_v16, %s3398_s13  ;;  %1081 = vrot.lane.b32.xlu1 %v3489_v17, %s3398_s13 }
  0x7c   : > { %1063 = vrot.lane.b32.xlu0 %v3495_v19, %s3398_s13  ;;  %1071 = vrot.lane.b32.xlu1 %v3493_v18, %s3398_s13 }
  0x80   : > { %1079 = vrot.lane.b32.xlu0 %v3499_v20, %s3398_s13  ;;  %1061 = vrot.lane.b32.xlu1 %v3501_v21, %s3398_s13 }
  0x84   : > { %1069 = vrot.lane.b32.xlu0 %v3513_v24, %s3398_s13  ;;  %1077 = vrot.lane.b32.xlu1 %v3515_v25, %s3398_s13 }
  0x88   : > { %1582 = vrot.lane.b32.xlu0 %v3477_v13, %s3399_s14  ;;  %1590 = vrot.lane.b32.xlu1 %v3481_v14, %s3399_s14 }
  0x8c   : > { %1598 = vrot.lane.b32.xlu0 %v3475_v12, %s3399_s14  ;;  %1580 = vrot.lane.b32.xlu1 %v3483_v15, %s3399_s14 }
  0x90   : > { %1588 = vrot.lane.b32.xlu0 %v3487_v16, %s3399_s14  ;;  %1596 = vrot.lane.b32.xlu1 %v3489_v17, %s3399_s14 }
  0x94   : > { %1578 = vrot.lane.b32.xlu0 %v3495_v19, %s3399_s14  ;;  %1586 = vrot.lane.b32.xlu1 %v3493_v18, %s3399_s14 }
  0x98   : > { %1594 = vrot.lane.b32.xlu0 %v3499_v20, %s3399_s14  ;;  %1576 = vrot.lane.b32.xlu1 %v3501_v21, %s3399_s14 }
  0x9a   : > { %v335_v27 = vpop.permute.xlu1 %334  ;;  %v319_v28 = vpop.permute.xlu0 %318 }
  0x9b   : > { %v348_v34 = vsel %vm336_vm1, %v335_v27, %v319_v28 }
  0x9c   : > { %1584 = vrot.lane.b32.xlu0 %v3513_v24, %s3399_s14  ;;  %1592 = vrot.lane.b32.xlu1 %v3515_v25, %s3399_s14 }
  0x9e   : > { %v327_v30 = vpop.permute.xlu0 %326  ;;  %v317_v31 = vpop.permute.xlu1 %316 }
  0x9f   : > { %v344_v32 = vsel %vm336_vm1, %v319_v28, %v327_v30  ;;  %v340_v33 = vsel %vm336_vm1, %v327_v30, %v335_v27 }
  0xa0   : > { %399 = vmatprep.subr.mxu0 %v344_v32  ;;  %3170 = vmatprep.subr.mxu1 %v340_v33  ;;  %v306_v32 = vld [vmem:[%s4519_s1] sm:$0xff] }
  0xa1   : > { %1866 = vrot.lane.b32.xlu0 %v3481_v14, %s3400_s17  ;;  %1874 = vrot.lane.b32.xlu1 %v3475_v12, %s3400_s17 }
  0xa2   : > { %400 = vmatpush1.msra.mxu0 %v348_v34  ;;  %3171 = vmatpush3.msra.mxu1 %v340_v33  ;;  %v325_v35 = vpop.permute.xlu0 %324  ;;  %v333_v36 = vpop.permute.xlu1 %332 }
  0xa3   : > { %v343_v37 = vsel %vm336_vm1, %v317_v31, %v325_v35  ;;  %v339_v38 = vsel %vm336_vm1, %v325_v35, %v333_v36  ;;  %v347_v39 = vsel %vm336_vm1, %v333_v36, %v317_v31 }
  0xa4   : > { %401 = vmatprep.subr.mxu0 %v343_v37  ;;  %3172 = vmatprep.subr.mxu1 %v339_v38  ;;  %v307_v37 = vld [vmem:[%s4519_s1 + $0x8] sm:$0xff] }
  0xa5   : > { %1858 = vrot.lane.b32.xlu0 %v3477_v13, %s3400_s17  ;;  %1864 = vrot.lane.b32.xlu1 %v3487_v16, %s3400_s17 }
  0xa6   : > { %402 = vmatpush1.msra.mxu0 %v347_v39  ;;  %3173 = vmatpush3.msra.mxu1 %v339_v38  ;;  %v323_v40 = vpop.permute.xlu1 %322  ;;  %v315_v41 = vpop.permute.xlu0 %314 }
  0xa7   : > { %v342_v42 = vsel %vm336_vm1, %v315_v41, %v323_v40 }
  0xa8   : > { %403 = vmatprep.subr.mxu0 %v342_v42  ;;  %v308_v42 = vld [vmem:[%s4519_s1 + $0x10] sm:$0xff] }
  0xa9   : > { %1872 = vrot.lane.b32.xlu0 %v3489_v17, %s3400_s17  ;;  %1856 = vrot.lane.b32.xlu1 %v3483_v15, %s3400_s17 }
  0xaa   : > { %v331_v43 = vpop.permute.xlu0 %330  ;;  %v313_v44 = vpop.permute.xlu1 %312 }
  0xab   : > { %v346_v45 = vsel %vm336_vm1, %v331_v43, %v315_v41  ;;  %v338_v46 = vsel %vm336_vm1, %v323_v40, %v331_v43  ;;  %v309_v43 = vld [vmem:[%s4519_s1 + $0x18] sm:$0xff] }
  0xac   : > { %404 = vmatpush1.msra.mxu0 %v346_v45  ;;  %3174 = vmatprep.subr.mxu1 %v338_v46 }
  0xad   : > { %1862 = vrot.lane.b32.xlu0 %v3493_v18, %s3400_s17  ;;  %1870 = vrot.lane.b32.xlu1 %v3499_v20, %s3400_s17 }
  0xae   : > { %3175 = vmatpush3.msra.mxu1 %v338_v46  ;;  %v321_v47 = vpop.permute.xlu0 %320  ;;  %v329_v48 = vpop.permute.xlu1 %328 }
  0xaf   : > { %v341_v49 = vsel %vm336_vm1, %v313_v44, %v321_v47  ;;  %v337_v50 = vsel %vm336_vm1, %v321_v47, %v329_v48  ;;  %v345_v51 = vsel %vm336_vm1, %v329_v48, %v313_v44 }
  0xb0   : > { %405 = vmatprep.subr.mxu0 %v341_v49  ;;  %3176 = vmatprep.subr.mxu1 %v337_v50 }
  0xb1   : > { %1854 = vrot.lane.b32.xlu0 %v3495_v19, %s3400_s17  ;;  %1860 = vrot.lane.b32.xlu1 %v3513_v24, %s3400_s17 }
  0xb2   : > { %406 = vmatpush1.msra.mxu0 %v345_v51  ;;  %3177 = vmatpush3.msra.mxu1 %v337_v50  ;;  %v274_v53 = vpop.permute.xlu0 %273  ;;  %v282_v54 = vpop.permute.xlu1 %281 }
  0xb3   : > { %v301_v55 = vsel %vm293_vm2, %v274_v53, %v282_v54  ;;  %2925 = vmatmul.mubr.msk.f32.vlgmr.msra.gmra.mxu0 %vm356_vm0, %v3507_v23  ;;  %3179 = vmatmul.mubr.msk.f32.vlgmr.msra.gmra.mxu1 %vm356_vm0, %v2920_v52 }
  0xb4   : > { %613 = vmatprep.subr.mxu1 %v301_v55  ;;  %445 = vmatprep.mubr.f32.mxu0 %v3395_v22 }
  0xb5   : > { %1868 = vrot.lane.b32.xlu0 %v3515_v25, %s3400_s17  ;;  %1852 = vrot.lane.b32.xlu1 %v3501_v21, %s3400_s17 }
  0xb6   : > { %v290_v58 = vpop.permute.xlu0 %289  ;;  %v272_v59 = vpop.permute.xlu1 %271  ;;  %3181 = vmatprep.mubr.msk.f32.mxu1 %vm356_vm0, %v2921_v57 }
  0xb7   : > { %v3638_v60 = vsel %vm293_vm2, %v282_v54, %v290_v58  ;;  %v305_v61 = vsel %vm293_vm2, %v290_v58, %v274_v53  ;;  %2926 = vmatmul.mubr.msk.f32.gmra.mxu0 %vm356_vm0, %v2920_v52  ;;  %3182 = vmatmul.mubr.msk.f32.gmra.mxu1 %vm356_vm0, %v2922_v56  ;;  %v310_v53 = vld [vmem:[%s4519_s1 + $0x20] sm:$0xff] }
  0xb8   : > { %614 = vmatpush1.msra.mxu1 %v305_v61  ;;  %3187 = vmatprep.subr.mxu0 %v3638_v60 }
  0xb9   : > { %2134 = vrot.lane.b32.xlu0 %v3477_v13, %s3401_s30  ;;  %2142 = vrot.lane.b32.xlu1 %v3481_v14, %s3401_s30 }
  0xba   : > { %3188 = vmatpush3.msra.mxu0 %v3638_v60  ;;  %v280_v63 = vpop.permute.xlu0 %279  ;;  %v288_v0 = vpop.permute.xlu1 %287  ;;  %451 = vmatprep.mubr.f32.mxu0 %v3395_v22 }
  0xbb   : > { %v296_v1 = vsel %vm293_vm2, %v280_v63, %v288_v0  ;;  %v304_v2 = vsel %vm293_vm2, %v288_v0, %v272_v59  ;;  %v300_v3 = vsel %vm293_vm2, %v272_v59, %v280_v63  ;;  %2927 = vmatmul.mubr.msk.f32.gmra.mxu0 %vm356_vm0, %v2921_v57  ;;  %3184 = vmatprep.mubr.msk.f32.mxu1 %vm356_vm0, %v2923_v62  ;;  %v2949_v59 = vld [vmem:[%s4519_s1 + $0x60] sm:$0xff] }
  0xbc   : > { %615 = vmatprep.subr.mxu1 %v300_v3  ;;  %3189 = vmatprep.subr.mxu0 %v296_v1 }
  0xbd   : > { %2150 = vrot.lane.b32.xlu0 %v3475_v12, %s3401_s30  ;;  %2132 = vrot.lane.b32.xlu1 %v3483_v15, %s3401_s30 }
  0xbe   : > { %616 = vmatpush1.msra.mxu1 %v304_v2  ;;  %3190 = vmatpush3.msra.mxu0 %v296_v1  ;;  %v270_v5 = vpop.permute.xlu0 %269  ;;  %v278_v6 = vpop.permute.xlu1 %277 }
  0xbf   : > { %v299_v7 = vsel %vm293_vm2, %v270_v5, %v278_v6  ;;  %457 = vmatprep.mubr.f32.mxu0 %v3395_v22  ;;  %3185 = vmatmul.mubr.msk.f32.gmra.mxu1 %vm356_vm0, %v2924_v4 }
  0xc0   : > { %617 = vmatprep.subr.mxu1 %v299_v7  ;;  %2928 = vmatmul.mubr.msk.f32.gmra.mxu0 %vm356_vm0, %v2922_v56  ;;  %v311_v56 = vld [vmem:[%s4519_s1 + $0x28] sm:$0xff]  ;;  %v2951_v7 = vld [vmem:[%s4519_s1 + $0x70] sm:$0xff] }
  0xc1   : > { %2140 = vrot.lane.b32.xlu0 %v3487_v16, %s3401_s30  ;;  %2148 = vrot.lane.b32.xlu1 %v3489_v17, %s3401_s30 }
  0xc2   : > { %v286_v8 = vpop.permute.xlu0 %285  ;;  %v268_v9 = vpop.permute.xlu1 %267  ;;  %463 = vmatprep.mubr.f32.mxu0 %v3395_v22  ;;  %653 = vmatprep.mubr.f32.mxu1 %v3395_v22 }
  0xc3   : > { %v295_v10 = vsel %vm293_vm2, %v278_v6, %v286_v8  ;;  %v303_v11 = vsel %vm293_vm2, %v286_v8, %v270_v5 }
  0xc4   : > { %618 = vmatpush1.msra.mxu1 %v303_v11  ;;  %3191 = vmatprep.subr.mxu0 %v295_v10 }
  0xc5   : > { %2130 = vrot.lane.b32.xlu0 %v3495_v19, %s3401_s30  ;;  %2138 = vrot.lane.b32.xlu1 %v3493_v18, %s3401_s30 }
  0xc6   : > { %3192 = vmatpush3.msra.mxu0 %v295_v10  ;;  %v276_v23 = vpop.permute.xlu0 %275  ;;  %v284_v27 = vpop.permute.xlu1 %283 }
  0xc7   : > { %2929 = vmatmul.mubr.msk.f32.gmra.mxu0 %vm356_vm0, %v2923_v62  ;;  %v294_v28 = vsel %vm293_vm2, %v276_v23, %v284_v27  ;;  %v302_v30 = vsel %vm293_vm2, %v284_v27, %v268_v9  ;;  %v298_v31 = vsel %vm293_vm2, %v268_v9, %v276_v23  ;;  %v2950_v62 = vld [vmem:[%s4519_s1 + $0x68] sm:$0xff] }
  0xc8   : > { %619 = vmatprep.subr.mxu1 %v298_v31  ;;  %3193 = vmatprep.subr.mxu0 %v294_v28  ;;  %v2953_v31 = vld [vmem:[%s4519_s1 + $0x80] sm:$0xff] }
  0xc9   : > { %2146 = vrot.lane.b32.xlu0 %v3499_v20, %s3401_s30  ;;  %2128 = vrot.lane.b32.xlu1 %v3501_v21, %s3401_s30 }
  0xca   : > { %469 = vmatprep.mubr.f32.mxu0 %v3395_v22  ;;  %620 = vmatpush1.msra.mxu1 %v302_v30  ;;  %v792_v33 = vpop.permute.xlu0 %791  ;;  %v800_v34 = vpop.permute.xlu1 %799 }
  0xcb   : > { %3194 = vmatpush3.msra.mxu0 %v294_v28  ;;  %2937 = vmatmul.mubr.msk.f32.vlgmr.msra.gmra.mxu1 %vm356_vm0, %v306_v32  ;;  %v817_v35 = vsel %vm809_vm3, %v792_v33, %v800_v34 }
  0xcc   : > { %2930 = vmatmul.mubr.msk.f32.gmra.mxu0 %vm356_vm0, %v2924_v4  ;;  %3323 = vmatprep.subr.mxu1 %v3638_v60 }
  0xcd   : > { %3327 = vmatpush3.msra.mxu1 %v3638_v60  ;;  %2136 = vrot.lane.b32.xlu0 %v3513_v24, %s3401_s30 }
  0xce   : > { %2144 = vrot.lane.b32.xlu1 %v3515_v25, %s3401_s30  ;;  %3324 = vmatprep.subr.mxu1 %v296_v1  ;;  %v808_v36 = vpop.permute.xlu0 %807  ;;  %v790_v38 = vpop.permute.xlu1 %789 }
  0xcf   : > { %871 = vmatprep.subr.mxu0 %v817_v35  ;;  %659 = vmatprep.mubr.f32.mxu1 %v3395_v22  ;;  %v821_v39 = vsel %vm809_vm3, %v808_v36, %v792_v33  ;;  %v813_v44 = vsel %vm809_vm3, %v800_v34, %v808_v36  ;;  %v2954_v35 = vld [vmem:[%s4519_s1 + $0x88] sm:$0xff] }
  0xd0   : > { %3328 = vmatpush3.msra.mxu1 %v296_v1  ;;  %3195 = vmatprep.mubr.msk.f32.mxu0 %vm356_vm0, %v306_v32 }
  0xd1   : > { %2938 = vmatmul.mubr.msk.f32.gmra.mxu1 %vm356_vm0, %v307_v37  ;;  %3325 = vmatprep.subr.mxu1 %v295_v10 }
  0xd2   : > { %3196 = vmatmul.mubr.msk.f32.vlgmr.msra.gmra.mxu0 %vm356_vm0, %v307_v37  ;;  %3329 = vmatpush3.msra.mxu1 %v295_v10  ;;  %v3723_v40 = vpop.permute.xlu0 %797  ;;  %v806_v41 = vpop.permute.xlu1 %805 }
  0xd3   : > { %2418 = vrot.lane.b32.xlu0 %v3481_v14, %s3402_s12  ;;  %2426 = vrot.lane.b32.xlu1 %v3475_v12, %s3402_s12  ;;  %v816_v45 = vsel %vm809_vm3, %v790_v38, %v3723_v40  ;;  %v820_v48 = vsel %vm809_vm3, %v806_v41, %v790_v38  ;;  %v812_v1 = vsel %vm809_vm3, %v3723_v40, %v806_v41 }
  0xd4   : > { %3326 = vmatprep.subr.mxu1 %v294_v28  ;;  %872 = vmatpush1.msra.mxu0 %v821_v39 }
  0xd5   : > { %665 = vmatprep.mubr.f32.mxu1 %v3395_v22  ;;  %3330 = vmatpush3.msra.mxu1 %v294_v28  ;;  %v2952_v28 = vld [vmem:[%s4519_s1 + $0x78] sm:$0xff] }
  0xd6   : > { %3198 = vmatprep.mubr.msk.f32.mxu0 %vm356_vm0, %v308_v42  ;;  %2939 = vmatmul.mubr.msk.f32.gmra.mxu1 %vm356_vm0, %v308_v42  ;;  %v788_v46 = vpop.permute.xlu0 %787  ;;  %v796_v47 = vpop.permute.xlu1 %795 }
  0xd7   : > { %3199 = vmatmul.mubr.msk.f32.gmra.mxu0 %vm356_vm0, %v309_v43  ;;  %3204 = vmatprep.subr.mxu1 %v813_v44  ;;  %v815_v49 = vsel %vm809_vm3, %v788_v46, %v796_v47 }
  0xd8   : > { %2410 = vrot.lane.b32.xlu0 %v3477_v13, %s3402_s12  ;;  %2416 = vrot.lane.b32.xlu1 %v3487_v16, %s3402_s12 }
  0xd9   : > { %873 = vmatprep.subr.mxu0 %v816_v45  ;;  %671 = vmatprep.mubr.f32.mxu1 %v3395_v22 }
  0xda   : > { %874 = vmatpush1.msra.mxu0 %v820_v48  ;;  %2940 = vmatmul.mubr.msk.f32.gmra.mxu1 %vm356_vm0, %v309_v43  ;;  %v804_v50 = vpop.permute.xlu0 %803  ;;  %v786_v51 = vpop.permute.xlu1 %785  ;;  %v2967_v43 = vld [vmem:[%s4519_s1 + $0x90] sm:$0xff] }
  0xdb   : > { %875 = vmatprep.subr.mxu0 %v815_v49  ;;  %677 = vmatprep.mubr.f32.mxu1 %v3395_v22  ;;  %v819_v52 = vsel %vm809_vm3, %v804_v50, %v788_v46  ;;  %v811_v3 = vsel %vm809_vm3, %v796_v47, %v804_v50  ;;  %v2968_v46 = vld [vmem:[%s4519_s1 + $0x98] sm:$0xff]  ;;  %v2969_v47 = vld [vmem:[%s4519_s1 + $0xa0] sm:$0xff] }
  0xdc   : > { %2424 = vrot.lane.b32.xlu0 %v3489_v17, %s3402_s12  ;;  %2408 = vrot.lane.b32.xlu1 %v3483_v15, %s3402_s12 }
  0xdd   : > { %876 = vmatpush1.msra.mxu0 %v819_v52  ;;  %911 = vmatprep.mubr.f32.mxu0 %v3395_v22 }
  0xde   : > { %2941 = vmatmul.mubr.msk.f32.gmra.mxu1 %vm356_vm0, %v310_v53  ;;  %v794_v54 = vpop.permute.xlu0 %793  ;;  %v802_v55 = vpop.permute.xlu1 %801 }
  0xdf   : > { %683 = vmatprep.mubr.f32.mxu1 %v3395_v22  ;;  %v818_v57 = vsel %vm809_vm3, %v802_v55, %v786_v51  ;;  %v814_v58 = vsel %vm809_vm3, %v786_v51, %v794_v54  ;;  %v810_v6 = vsel %vm809_vm3, %v794_v54, %v802_v55  ;;  %v2986_v51 = vld [vmem:[%s4519_s1 + $0xc8] sm:$0xff] }
  0xe0   : > { %2414 = vrot.lane.b32.xlu0 %v3493_v18, %s3402_s12  ;;  %2422 = vrot.lane.b32.xlu1 %v3499_v20, %s3402_s12 }
  0xe1   : > { %877 = vmatprep.subr.mxu0 %v814_v58 }
  0xe2   : > { %2942 = vmatmul.mubr.msk.f32.gmra.mxu1 %vm356_vm0, %v311_v56  ;;  %878 = vmatpush1.msra.mxu0 %v818_v57  ;;  %v1068_v60 = vpop.permute.xlu0 %1067  ;;  %v1076_v61 = vpop.permute.xlu1 %1075 }
  0xe3   : > { %3201 = vmatprep.mubr.msk.f32.mxu1 %vm356_vm0, %v310_v53  ;;  %2955 = vmatmul.mubr.msk.f32.vlgmr.msra.gmra.mxu0 %vm356_vm0, %v2949_v59  ;;  %v1093_v8 = vsel %vm1085_vm4, %v1068_v60, %v1076_v61 }
  0xe4   : > { %2406 = vrot.lane.b32.xlu0 %v3495_v19, %s3402_s12  ;;  %2412 = vrot.lane.b32.xlu1 %v3513_v24, %s3402_s12 }
  0xe5   : > { %917 = vmatprep.mubr.f32.mxu0 %v3395_v22 }
  0xe6   : > { %3202 = vmatmul.mubr.msk.f32.vlgmr.msra.gmra.mxu1 %vm356_vm0, %v311_v56  ;;  %v1084_v63 = vpop.permute.xlu0 %1083  ;;  %v1066_v0 = vpop.permute.xlu1 %1065  ;;  %v2987_v56 = vld [vmem:[%s4519_s1 + $0xd0] sm:$0xff] }
  0xe7   : > { %3205 = vmatpush3.msra.mxu1 %v813_v44  ;;  %2956 = vmatmul.mubr.msk.f32.gmra.mxu0 %vm356_vm0, %v2950_v62  ;;  %v1089_v2 = vsel %vm1085_vm4, %v1076_v61, %v1084_v63  ;;  %v1097_v10 = vsel %vm1085_vm4, %v1084_v63, %v1068_v60  ;;  %v2988_v60 = vld [vmem:[%s4519_s1 + $0xd8] sm:$0xff] }
  0xe8   : > { %3206 = vmatprep.subr.mxu1 %v812_v1  ;;  %2420 = vrot.lane.b32.xlu0 %v3515_v25, %s3402_s12 }
  0xe9   : > { %2404 = vrot.lane.b32.xlu1 %v3501_v21, %s3402_s12  ;;  %3207 = vmatpush3.msra.mxu1 %v812_v1 }
  0xea   : > { %3208 = vmatprep.subr.mxu1 %v811_v3  ;;  %3212 = vmatprep.mubr.msk.f32.mxu1 %vm356_vm0, %v2949_v59  ;;  %v1074_v4 = vpop.permute.xlu0 %1073  ;;  %v1082_v5 = vpop.permute.xlu1 %1081 }
  0xeb   : > { %3209 = vmatpush3.msra.mxu1 %v811_v3  ;;  %3221 = vmatprep.subr.mxu0 %v1089_v2  ;;  %v1092_v9 = vsel %vm1085_vm4, %v1066_v0, %v1074_v4  ;;  %v1088_v11 = vsel %vm1085_vm4, %v1074_v4, %v1082_v5  ;;  %v1096_v30 = vsel %vm1085_vm4, %v1082_v5, %v1066_v0  ;;  %v2989_v0 = vld [vmem:[%s4519_s1 + $0xe0] sm:$0xff] }
  0xec   : > { %3210 = vmatprep.subr.mxu1 %v810_v6  ;;  %923 = vmatprep.mubr.f32.mxu0 %v3395_v22 }
  0xed   : > { %3211 = vmatpush3.msra.mxu1 %v810_v6  ;;  %3222 = vmatpush3.msra.mxu0 %v1089_v2 }
  0xee   : > { %3213 = vmatmul.mubr.msk.f32.vlgmr.msra.gmra.mxu1 %vm356_vm0, %v2950_v62  ;;  %1147 = vmatprep.subr.mxu1 %v1093_v8  ;;  %v1064_v23 = vpop.permute.xlu0 %1063  ;;  %v1072_v27 = vpop.permute.xlu1 %1071 }
  0xef   : > { %2957 = vmatmul.mubr.msk.f32.gmra.mxu0 %vm356_vm0, %v2951_v7  ;;  %1148 = vmatpush1.msra.mxu1 %v1097_v10  ;;  %v1091_v32 = vsel %vm1085_vm4, %v1064_v23, %v1072_v27 }
  0xf0   : > { %3215 = vmatprep.mubr.msk.f32.mxu1 %vm356_vm0, %v2951_v7  ;;  %1149 = vmatprep.subr.mxu1 %v1092_v9  ;;  %v2990_v7 = vld [vmem:[%s4519_s1 + $0xe8] sm:$0xff] }
  0xf1   : > { %3223 = vmatprep.subr.mxu0 %v1088_v11  ;;  %929 = vmatprep.mubr.f32.mxu0 %v3395_v22 }
  0xf2   : > { %3216 = vmatmul.mubr.msk.f32.gmra.mxu1 %vm356_vm0, %v2952_v28  ;;  %3224 = vmatpush3.msra.mxu0 %v1088_v11  ;;  %v1080_v33 = vpop.permute.xlu0 %1079  ;;  %v1062_v34 = vpop.permute.xlu1 %1061  ;;  %v3003_v11 = vld [vmem:[%s4519_s1 + $0xf0] sm:$0xff] }
  0xf3   : > { %1150 = vmatpush1.msra.mxu1 %v1096_v30  ;;  %2958 = vmatmul.mubr.msk.f32.gmra.mxu0 %vm356_vm0, %v2952_v28  ;;  %v1095_v36 = vsel %vm1085_vm4, %v1080_v33, %v1064_v23  ;;  %v1087_v37 = vsel %vm1085_vm4, %v1072_v27, %v1080_v33  ;;  %v3004_v28 = vld [vmem:[%s4519_s1 + $0xf8] sm:$0xff]  ;;  %v3403_v33 = vmov 0  }
  0xf4   : > { %3218 = vmatprep.mubr.msk.f32.mxu1 %vm356_vm0, %v2953_v31  ;;  %1151 = vmatprep.subr.mxu1 %v1091_v32 }
  0xf5   : > { %935 = vmatprep.mubr.f32.mxu0 %v3395_v22  ;;  %1152 = vmatpush1.msra.mxu1 %v1095_v36 }
  0xf6   : > { %3219 = vmatmul.mubr.msk.f32.gmra.mxu1 %vm356_vm0, %v2954_v35  ;;  %3225 = vmatprep.subr.mxu0 %v1087_v37  ;;  %v1070_v38 = vpop.permute.xlu0 %1069  ;;  %v1078_v39 = vpop.permute.xlu1 %1077 }
  0xf7   : > { %2959 = vmatmul.mubr.msk.f32.gmra.mxu0 %vm356_vm0, %v2953_v31  ;;  %v1094_v40 = vsel %vm1085_vm4, %v1078_v39, %v1062_v34  ;;  %v1090_v41 = vsel %vm1085_vm4, %v1062_v34, %v1070_v38  ;;  %v1086_v42 = vsel %vm1085_vm4, %v1070_v38, %v1078_v39  ;;  %1187 = vmatprep.mubr.f32.mxu1 %v3395_v22  ;;  %v3006_v39 = vld [vmem:[%s4519_s1 + $0x108] sm:$0xff] }
  0xf8   : > { %941 = vmatprep.mubr.f32.mxu0 %v3395_v22  ;;  %3226 = vmatpush3.msra.mxu0 %v1087_v37  ;;  %v3005_v37 = vld [vmem:[%s4519_s1 + $0x100] sm:$0xff] }
  0xf9   : > { %1153 = vmatprep.subr.mxu1 %v1090_v41  ;;  %3227 = vmatprep.subr.mxu0 %v1086_v42 }
  0xfa   : > { %1154 = vmatpush1.msra.mxu1 %v1094_v40  ;;  %3228 = vmatpush3.msra.mxu0 %v1086_v42  ;;  %v3859_v44 = vpop.permute.xlu0 %1582  ;;  %v3861_v45 = vpop.permute.xlu1 %1590 }
  0xfb   : > { %2960 = vmatmul.mubr.msk.f32.gmra.mxu0 %vm356_vm0, %v2954_v35  ;;  %2973 = vmatmul.mubr.msk.f32.vlgmr.msra.gmra.mxu1 %vm356_vm0, %v2967_v43  ;;  %v1608_v63 = vsel %vm1600_vm5, %v3859_v44, %v3861_v45 }
  0xfc   : > { %3229 = vmatprep.mubr.msk.f32.mxu0 %vm356_vm0, %v2967_v43  ;;  %1386 = vmatprep.subr.mxu0 %v3481_v14  ;;  %v2970_v14 = vld [vmem:[%s4519_s1 + $0xa8] sm:$0xff] }
  0xfd   : > { %3238 = vmatprep.subr.mxu1 %v3475_v12  ;;  %1193 = vmatprep.mubr.f32.mxu1 %v3395_v22 }
  0xfe   : > { %3239 = vmatpush3.msra.mxu1 %v3475_v12  ;;  %v1599_v48 = vpop.permute.xlu0 %1598  ;;  %v3876_v49 = vpop.permute.xlu1 %1580  ;;  %3369 = vset.pattern.permute.xlu1 %v3403_v33 }
  0xff   : > { %3230 = vmatmul.mubr.msk.f32.vlgmr.msra.gmra.mxu0 %vm356_vm0, %v2968_v46  ;;  %3240 = vmatprep.subr.mxu1 %v3489_v17 }
 0x100   : > { %1387 = vmatpush1.msra.mxu0 %v3477_v13  ;;  %3232 = vmatprep.mubr.msk.f32.mxu0 %vm356_vm0, %v2969_v47  ;;  %v2971_v13 = vld [vmem:[%s4519_s1 + $0xb0] sm:$0xff] }
 0x101   : > { %1388 = vmatprep.subr.mxu0 %v3487_v16  ;;  %3241 = vmatpush3.msra.mxu1 %v3489_v17 }
 0x102   : > { %1389 = vmatpush1.msra.mxu0 %v3483_v15  ;;  %2974 = vmatmul.mubr.msk.f32.gmra.mxu1 %vm356_vm0, %v2968_v46  ;;  %v3889_v12 = vpop.permute.xlu0 %1588  ;;  %v3891_v50 = vpop.permute.xlu1 %1596  ;;  %v2972_v15 = vld [vmem:[%s4519_s1 + $0xb8] sm:$0xff] }
 0x103   : > { %3233 = vmatmul.mubr.msk.f32.gmra.mxu0 %vm356_vm0, %v2970_v14  ;;  %1390 = vmatprep.subr.mxu0 %v3493_v18  ;;  %v1604_v18 = vsel %vm1600_vm5, %v3861_v45, %v1599_v48  ;;  %v1603_v1 = vsel %vm1600_vm5, %v3889_v12, %v3891_v50  ;;  %v1607_v2 = vsel %vm1600_vm5, %v3876_v49, %v3889_v12  ;;  %v3008_v46 = vld [vmem:[%s4519_s1 + $0x118] sm:$0xff]  ;;  %v3021_v12 = vld [vmem:[%s4519_s1 + $0x120] sm:$0xff] }
 0x104   : > { %3242 = vmatprep.subr.mxu1 %v3499_v20  ;;  %1391 = vmatpush1.msra.mxu0 %v3495_v19  ;;  %v1612_v19 = vsel %vm1600_vm5, %v1599_v48, %v3859_v44  ;;  %v3007_v44 = vld [vmem:[%s4519_s1 + $0x110] sm:$0xff] }
 0x105   : > { %3243 = vmatpush3.msra.mxu1 %v3499_v20  ;;  %1392 = vmatprep.subr.mxu0 %v3513_v24  ;;  %v2985_v20 = vld [vmem:[%s4519_s1 + $0xc0] sm:$0xff] }
 0x106   : > { %3244 = vmatprep.subr.mxu1 %v3515_v25  ;;  %1199 = vmatprep.mubr.f32.mxu1 %v3395_v22  ;;  %v3907_v16 = vpop.permute.xlu0 %1578  ;;  %v3909_v17 = vpop.permute.xlu1 %1586 }
 0x107   : > { %3235 = vmatprep.mubr.msk.f32.mxu0 %vm356_vm0, %v2971_v13  ;;  %1393 = vmatpush1.msra.mxu0 %v3501_v21  ;;  %v1606_v6 = vsel %vm1600_vm5, %v3907_v16, %v3909_v17 }
 0x108   : > { %3245 = vmatpush3.msra.mxu1 %v3515_v25  ;;  %3236 = vmatmul.mubr.msk.f32.gmra.mxu0 %vm356_vm0, %v2972_v15  ;;  %v1611_v25 = vsel %vm1600_vm5, %v3891_v50, %v3876_v49 }
 0x109   : > { %2975 = vmatmul.mubr.msk.f32.gmra.mxu1 %vm356_vm0, %v2969_v47  ;;  %1662 = vmatprep.subr.mxu1 %v1604_v18 }
 0x10a   : > { %3255 = vmatprep.subr.mxu0 %v1612_v19  ;;  %1205 = vmatprep.mubr.f32.mxu1 %v3395_v22  ;;  %v1595_v21 = vpop.permute.xlu0 %1594  ;;  %v1577_v24 = vpop.permute.xlu1 %1576 }
 0x10b   : > { %1426 = vmatprep.mubr.f32.mxu0 %v3395_v22  ;;  %v1610_v52 = vsel %vm1600_vm5, %v1595_v21, %v3907_v16  ;;  %v1602_v5 = vsel %vm1600_vm5, %v3909_v17, %v1595_v21  ;;  %v3022_v17 = vld [vmem:[%s4519_s1 + $0x128] sm:$0xff]  ;;  %3368 = vset.pattern.permute.xlu0 %v3403_v33  ;;  %v2680_v21 = vld [vmem:[%s4520_s2] sm:$0xff] }
 0x10c   : > { %2991 = vmatmul.mubr.msk.f32.vlgmr.msra.gmra.mxu0 %vm356_vm0, %v2985_v20  ;;  %2688 = vperm.xlu0 %3368, %v2680_v21   ;;  %v3042_v33 = vld [vmem:[%s4519_s1 + $0x168] sm:$0xff] }
 0x10d   : > { %2976 = vmatmul.mubr.msk.f32.gmra.mxu1 %vm356_vm0, %v2970_v14  ;;  %3256 = vmatpush3.msra.mxu0 %v1612_v19 }
 0x10e   : > { %3257 = vmatprep.subr.mxu0 %v1611_v25  ;;  %1211 = vmatprep.mubr.f32.mxu1 %v3395_v22  ;;  %v1585_v53 = vpop.permute.xlu0 %1584  ;;  %v1593_v54 = vpop.permute.xlu1 %1592 }
 0x10f   : > { %3258 = vmatpush3.msra.mxu0 %v1611_v25  ;;  %1432 = vmatprep.mubr.f32.mxu0 %v3395_v22  ;;  %v1609_v55 = vsel %vm1600_vm5, %v1593_v54, %v1577_v24  ;;  %v1601_v8 = vsel %vm1600_vm5, %v1585_v53, %v1593_v54  ;;  %v1605_v10 = vsel %vm1600_vm5, %v1577_v24, %v1585_v53  ;;  %v2681_v24 = vld [vmem:[%s4520_s2 + $0x8] sm:$0xff]  ;;  %v3023_v25 = vld [vmem:[%s4519_s1 + $0x130] sm:$0xff]  ;;  %v2683_v53 = vld [vmem:[%s4520_s2 + $0x18] sm:$0xff] }
 0x110   : > { %2992 = vmatmul.mubr.msk.f32.gmra.mxu0 %vm356_vm0, %v2986_v51  ;;  %3259 = vmatprep.subr.mxu0 %v1610_v52  ;;  %v2682_v54 = vld [vmem:[%s4520_s2 + $0x10] sm:$0xff] }
 0x111   : > { %2977 = vmatmul.mubr.msk.f32.gmra.mxu1 %vm356_vm0, %v2971_v13  ;;  %1438 = vmatprep.mubr.f32.mxu0 %v3395_v22 }
 0x112   : > { %1217 = vmatprep.mubr.f32.mxu1 %v3395_v22  ;;  %3260 = vmatpush3.msra.mxu0 %v1610_v52 }
 0x113   : > { %3261 = vmatprep.subr.mxu0 %v1609_v55  ;;  %v1867_v57 = vpop.permute.xlu0 %1866  ;;  %v1875_v58 = vpop.permute.xlu1 %1874  ;;  %2693 = vperm.xlu1 %3369, %v2681_v24  }
 0x114   : > { %2993 = vmatmul.mubr.msk.f32.gmra.mxu0 %vm356_vm0, %v2987_v56  ;;  %v1880_v59 = vsel %vm1876_vm6, %v1867_v57, %v1875_v58  ;;  %2703 = vperm.xlu0 %3368, %v2683_v53  }
 0x115   : > { %2978 = vmatmul.mubr.msk.f32.gmra.mxu1 %vm356_vm0, %v2972_v15  ;;  %1444 = vmatprep.mubr.f32.mxu0 %v3395_v22 }
 0x116   : > { %3246 = vmatprep.mubr.msk.f32.mxu1 %vm356_vm0, %v2985_v20  ;;  %3262 = vmatpush3.msra.mxu0 %v1609_v55  ;;  %v3024_v55 = vld [vmem:[%s4519_s1 + $0x138] sm:$0xff] }
 0x117   : > { %1938 = vmatprep.subr.mxu0 %v1880_v59  ;;  %v1859_v61 = vpop.permute.xlu0 %1858  ;;  %v1865_v62 = vpop.permute.xlu1 %1864  ;;  %2698 = vperm.xlu1 %3369, %v2682_v54  }
 0x118   : > { %2994 = vmatmul.mubr.msk.f32.gmra.mxu0 %vm356_vm0, %v2988_v60  ;;  %v1888_v9 = vsel %vm1876_vm6, %v1875_v58, %v1859_v61  ;;  %v1884_v32 = vsel %vm1876_vm6, %v1859_v61, %v1867_v57  ;;  %v3025_v61 = vld [vmem:[%s4519_s1 + $0x140] sm:$0xff] }
 0x119   : > { %3247 = vmatmul.mubr.msk.f32.vlgmr.msra.gmra.mxu1 %vm356_vm0, %v2986_v51  ;;  %1450 = vmatprep.mubr.f32.mxu0 %v3395_v22 }
 0x11a   : > { %1663 = vmatpush1.msra.mxu1 %v1608_v63  ;;  %3249 = vmatprep.mubr.msk.f32.mxu1 %vm356_vm0, %v2987_v56 }
 0x11b   : > { %1664 = vmatprep.subr.mxu1 %v1603_v1  ;;  %v1873_v3 = vpop.permute.xlu0 %1872  ;;  %v1857_v4 = vpop.permute.xlu1 %1856 }
 0x11c   : > { %1665 = vmatpush1.msra.mxu1 %v1607_v2  ;;  %2995 = vmatmul.mubr.msk.f32.gmra.mxu0 %vm356_vm0, %v2989_v0  ;;  %v1879_v34 = vsel %vm1876_vm6, %v1865_v62, %v1873_v3  ;;  %v1883_v35 = vsel %vm1876_vm6, %v1857_v4, %v1865_v62  ;;  %v1887_v36 = vsel %vm1876_vm6, %v1873_v3, %v1857_v4 }
 0x11d   : > { %1666 = vmatprep.subr.mxu1 %v1602_v5  ;;  %3250 = vmatmul.mubr.msk.f32.gmra.mxu1 %vm356_vm0, %v2988_v60  ;;  %v3026_v5 = vld [vmem:[%s4519_s1 + $0x148] sm:$0xff] }
 0x11e   : > { %1667 = vmatpush1.msra.mxu1 %v1606_v6  ;;  %1456 = vmatprep.mubr.f32.mxu0 %v3395_v22 }
 0x11f   : > { %1668 = vmatprep.subr.mxu1 %v1601_v8  ;;  %3252 = vmatprep.mubr.msk.f32.mxu1 %vm356_vm0, %v2989_v0  ;;  %v1863_v23 = vpop.permute.xlu0 %1862  ;;  %v1871_v27 = vpop.permute.xlu1 %1870 }
 0x120   : > { %1669 = vmatpush1.msra.mxu1 %v1605_v10  ;;  %2996 = vmatmul.mubr.msk.f32.gmra.mxu0 %vm356_vm0, %v2990_v7  ;;  %v1878_v38 = vsel %vm1876_vm6, %v1863_v23, %v1871_v27 }
 0x121   : > { %3272 = vmatprep.subr.mxu1 %v1888_v9  ;;  %3253 = vmatmul.mubr.msk.f32.gmra.mxu1 %vm356_vm0, %v2990_v7  ;;  %v3039_v7 = vld [vmem:[%s4519_s1 + $0x150] sm:$0xff] }
 0x122   : > { %1702 = vmatprep.mubr.f32.mxu1 %v3395_v22  ;;  %3263 = vmatprep.mubr.msk.f32.mxu0 %vm356_vm0, %v3003_v11 }
 0x123   : > { %v1855_v30 = vpop.permute.xlu0 %1854  ;;  %v1861_v31 = vpop.permute.xlu1 %1860 }
 0x124   : > { %3264 = vmatmul.mubr.msk.f32.vlgmr.msra.gmra.mxu0 %vm356_vm0, %v3004_v28  ;;  %v1882_v42 = vsel %vm1876_vm6, %v1855_v30, %v1863_v23  ;;  %v1886_v43 = vsel %vm1876_vm6, %v1871_v27, %v1855_v30  ;;  %v3040_v23 = vld [vmem:[%s4519_s1 + $0x158] sm:$0xff]  ;;  %v3041_v27 = vld [vmem:[%s4519_s1 + $0x160] sm:$0xff] }
 0x125   : > { %3009 = vmatmul.mubr.msk.f32.vlgmr.msra.gmra.mxu1 %vm356_vm0, %v3003_v11  ;;  %1939 = vmatpush1.msra.mxu0 %v1884_v32  ;;  %v2685_v11 = vld [vmem:[%s4520_s2 + $0x28] sm:$0xff] }
 0x126   : > { %3273 = vmatpush3.msra.mxu1 %v1888_v9  ;;  %1940 = vmatprep.subr.mxu0 %v1879_v34 }
 0x127   : > { %3274 = vmatprep.subr.mxu1 %v1887_v36  ;;  %1941 = vmatpush1.msra.mxu0 %v1883_v35  ;;  %v1869_v40 = vpop.permute.xlu0 %1868  ;;  %v1853_v41 = vpop.permute.xlu1 %1852  ;;  %v3043_v35 = vld [vmem:[%s4519_s1 + $0x170] sm:$0xff] }
 0x128   : > { %3275 = vmatpush3.msra.mxu1 %v1887_v36  ;;  %1708 = vmatprep.mubr.f32.mxu1 %v3395_v22  ;;  %v1877_v45 = vsel %vm1876_vm6, %v1861_v31, %v1869_v40  ;;  %v1885_v49 = vsel %vm1876_vm6, %v1869_v40, %v1853_v41  ;;  %v1881_v14 = vsel %vm1876_vm6, %v1853_v41, %v1861_v31  ;;  %v2684_v31 = vld [vmem:[%s4520_s2 + $0x20] sm:$0xff] }
 0x129   : > { %3266 = vmatprep.mubr.msk.f32.mxu0 %vm356_vm0, %v3005_v37  ;;  %1942 = vmatprep.subr.mxu0 %v1878_v38  ;;  %v3044_v38 = vld [vmem:[%s4519_s1 + $0x178] sm:$0xff] }
 0x12a   : > { %3010 = vmatmul.mubr.msk.f32.gmra.mxu1 %vm356_vm0, %v3004_v28  ;;  %3267 = vmatmul.mubr.msk.f32.gmra.mxu0 %vm356_vm0, %v3006_v39 }
 0x12b   : > { %1943 = vmatpush1.msra.mxu0 %v1882_v42  ;;  %3276 = vmatprep.subr.mxu1 %v1886_v43  ;;  %v2135_v47 = vpop.permute.xlu0 %2134  ;;  %v2143_v48 = vpop.permute.xlu1 %2142 }
 0x12c   : > { %1714 = vmatprep.mubr.f32.mxu1 %v3395_v22  ;;  %3269 = vmatprep.mubr.msk.f32.mxu0 %vm356_vm0, %v3007_v44  ;;  %v2160_v59 = vsel %vm2152_vm7, %v2135_v47, %v2143_v48 }
 0x12d   : > { %3277 = vmatpush3.msra.mxu1 %v1886_v43  ;;  %1944 = vmatprep.subr.mxu0 %v1877_v45 }
 0x12e   : > { %3011 = vmatmul.mubr.msk.f32.gmra.mxu1 %vm356_vm0, %v3005_v37  ;;  %3270 = vmatmul.mubr.msk.f32.gmra.mxu0 %vm356_vm0, %v3008_v46 }
 0x12f   : > { %3278 = vmatprep.subr.mxu1 %v1885_v49  ;;  %1720 = vmatprep.mubr.f32.mxu1 %v3395_v22  ;;  %v2151_v50 = vpop.permute.xlu0 %2150  ;;  %v2133_v13 = vpop.permute.xlu1 %2132 }
 0x130   : > { %1945 = vmatpush1.msra.mxu0 %v1881_v14  ;;  %1978 = vmatprep.mubr.f32.mxu0 %v3395_v22  ;;  %v2164_v15 = vsel %vm2152_vm7, %v2151_v50, %v2135_v47  ;;  %v2156_v16 = vsel %vm2152_vm7, %v2143_v48, %v2151_v50  ;;  %v3057_v50 = vld [vmem:[%s4519_s1 + $0x180] sm:$0xff] }
 0x131   : > { %3279 = vmatpush3.msra.mxu1 %v1885_v49  ;;  %3289 = vmatprep.subr.mxu0 %v2164_v15 }
 0x132   : > { %3012 = vmatmul.mubr.msk.f32.gmra.mxu1 %vm356_vm0, %v3006_v39  ;;  %3027 = vmatmul.mubr.msk.f32.vlgmr.msra.gmra.mxu0 %vm356_vm0, %v3021_v12 }
 0x133   : > { %1726 = vmatprep.mubr.f32.mxu1 %v3395_v22  ;;  %1984 = vmatprep.mubr.f32.mxu0 %v3395_v22  ;;  %v2141_v18 = vpop.permute.xlu0 %2140  ;;  %v2149_v19 = vpop.permute.xlu1 %2148 }
 0x134   : > { %2214 = vmatprep.subr.mxu1 %v2156_v16  ;;  %3290 = vmatpush3.msra.mxu0 %v2164_v15  ;;  %v2163_v20 = vsel %vm2152_vm7, %v2149_v19, %v2133_v13  ;;  %v2155_v60 = vsel %vm2152_vm7, %v2141_v18, %v2149_v19  ;;  %v2159_v63 = vsel %vm2152_vm7, %v2133_v13, %v2141_v18  ;;  %v3058_v16 = vld [vmem:[%s4519_s1 + $0x188] sm:$0xff]  ;;  %v3061_v18 = vld [vmem:[%s4519_s1 + $0x1a0] sm:$0xff] }
 0x135   : > { %3291 = vmatprep.subr.mxu0 %v2163_v20  ;;  %2713 = vperm.xlu0 %3368, %v2685_v11   ;;  %v3062_v19 = vld [vmem:[%s4519_s1 + $0x1a8] sm:$0xff] }
 0x136   : > { %3013 = vmatmul.mubr.msk.f32.gmra.mxu1 %vm356_vm0, %v3007_v44  ;;  %3028 = vmatmul.mubr.msk.f32.gmra.mxu0 %vm356_vm0, %v3022_v17 }
 0x137   : > { %1732 = vmatprep.mubr.f32.mxu1 %v3395_v22  ;;  %1990 = vmatprep.mubr.f32.mxu0 %v3395_v22  ;;  %v2131_v51 = vpop.permute.xlu0 %2130  ;;  %v2139_v52 = vpop.permute.xlu1 %2138 }
 0x138   : > { %3292 = vmatpush3.msra.mxu0 %v2163_v20  ;;  %v2158_v4 = vsel %vm2152_vm7, %v2131_v51, %v2139_v52  ;;  %2708 = vperm.xlu1 %3369, %v2684_v31  }
 0x13a   : > { %3014 = vmatmul.mubr.msk.f32.gmra.mxu1 %vm356_vm0, %v3008_v46  ;;  %3029 = vmatmul.mubr.msk.f32.gmra.mxu0 %vm356_vm0, %v3023_v25 }
 0x13b   : > { %1996 = vmatprep.mubr.f32.mxu0 %v3395_v22  ;;  %3280 = vmatprep.mubr.msk.f32.mxu1 %vm356_vm0, %v3021_v12  ;;  %v2147_v56 = vpop.permute.xlu0 %2146  ;;  %v2129_v57 = vpop.permute.xlu1 %2128 }
 0x13c   : > { %v2162_v58 = vsel %vm2152_vm7, %v2147_v56, %v2131_v51  ;;  %v2154_v0 = vsel %vm2152_vm7, %v2139_v52, %v2147_v56 }
 0x13d   : > { %3293 = vmatprep.subr.mxu0 %v2162_v58 }
 0x13e   : > { %3030 = vmatmul.mubr.msk.f32.gmra.mxu0 %vm356_vm0, %v3024_v55  ;;  %3281 = vmatmul.mubr.msk.f32.vlgmr.msra.gmra.mxu1 %vm356_vm0, %v3022_v17  ;;  %v3060_v17 = vld [vmem:[%s4519_s1 + $0x198] sm:$0xff] }
 0x13f   : > { %2215 = vmatpush1.msra.mxu1 %v2160_v59  ;;  %2002 = vmatprep.mubr.f32.mxu0 %v3395_v22  ;;  %v2137_v62 = vpop.permute.xlu0 %2136 }
 0x140   : > { %2216 = vmatprep.subr.mxu1 %v2155_v60  ;;  %3283 = vmatprep.mubr.msk.f32.mxu1 %vm356_vm0, %v3023_v25  ;;  %v2145_v1 = vpop.permute.xlu1 %2144  ;;  %v2157_v6 = vsel %vm2152_vm7, %v2129_v57, %v2137_v62 }
 0x141   : > { %2217 = vmatpush1.msra.mxu1 %v2159_v63  ;;  %3294 = vmatpush3.msra.mxu0 %v2162_v58  ;;  %v2153_v2 = vsel %vm2152_vm7, %v2137_v62, %v2145_v1  ;;  %v2161_v3 = vsel %vm2152_vm7, %v2145_v1, %v2129_v57 }
 0x142   : > { %3031 = vmatmul.mubr.msk.f32.gmra.mxu0 %vm356_vm0, %v3025_v61  ;;  %3284 = vmatmul.mubr.msk.f32.gmra.mxu1 %vm356_vm0, %v3024_v55 }
 0x143   : > { %2218 = vmatprep.subr.mxu1 %v2154_v0  ;;  %2008 = vmatprep.mubr.f32.mxu0 %v3395_v22 }
 0x144   : > { %3286 = vmatprep.mubr.msk.f32.mxu1 %vm356_vm0, %v3025_v61  ;;  %2219 = vmatpush1.msra.mxu1 %v2158_v4 }
 0x145   : > { %2220 = vmatprep.subr.mxu1 %v2153_v2  ;;  %3295 = vmatprep.subr.mxu0 %v2161_v3  ;;  %v2419_v8 = vpop.permute.xlu0 %2418  ;;  %v2427_v9 = vpop.permute.xlu1 %2426 }
 0x146   : > { %3032 = vmatmul.mubr.msk.f32.gmra.mxu0 %vm356_vm0, %v3026_v5  ;;  %3287 = vmatmul.mubr.msk.f32.gmra.mxu1 %vm356_vm0, %v3026_v5  ;;  %v2432_v10 = vsel %vm2428_vm8, %v2419_v8, %v2427_v9 }
 0x147   : > { %2221 = vmatpush1.msra.mxu1 %v2157_v6  ;;  %2254 = vmatprep.mubr.f32.mxu1 %v3395_v22 }
 0x148   : > { %3296 = vmatpush3.msra.mxu0 %v2161_v3  ;;  %3297 = vmatprep.mubr.msk.f32.mxu0 %vm356_vm0, %v3039_v7 }
 0x149   : > { %2490 = vmatprep.subr.mxu0 %v2432_v10 }
 0x14a   : > { %3045 = vmatmul.mubr.msk.f32.vlgmr.msra.gmra.mxu1 %vm356_vm0, %v3039_v7  ;;  %3298 = vmatmul.mubr.msk.f32.vlgmr.msra.gmra.mxu0 %vm356_vm0, %v3040_v23  ;;  %v2411_v28 = vpop.permute.xlu0 %2410  ;;  %v2417_v30 = vpop.permute.xlu1 %2416 }
 0x14b   : > { %2260 = vmatprep.mubr.f32.mxu1 %v3395_v22  ;;  %3300 = vmatprep.mubr.msk.f32.mxu0 %vm356_vm0, %v3041_v27  ;;  %v2436_v32 = vsel %vm2428_vm8, %v2411_v28, %v2419_v8  ;;  %v2440_v34 = vsel %vm2428_vm8, %v2427_v9, %v2411_v28 }
 0x14c   : > { %2491 = vmatpush1.msra.mxu0 %v2436_v32  ;;  %3306 = vmatprep.subr.mxu1 %v2440_v34 }
 0x14d   : > { %3307 = vmatpush3.msra.mxu1 %v2440_v34 }
 0x14e   : > { %3046 = vmatmul.mubr.msk.f32.gmra.mxu1 %vm356_vm0, %v3040_v23  ;;  %3301 = vmatmul.mubr.msk.f32.gmra.mxu0 %vm356_vm0, %v3042_v33  ;;  %v2425_v36 = vpop.permute.xlu0 %2424  ;;  %v2409_v37 = vpop.permute.xlu1 %2408 }
 0x14f   : > { %2266 = vmatprep.mubr.f32.mxu1 %v3395_v22  ;;  %3303 = vmatprep.mubr.msk.f32.mxu0 %vm356_vm0, %v3043_v35  ;;  %v2435_v39 = vsel %vm2428_vm8, %v2409_v37, %v2417_v30  ;;  %v2431_v40 = vsel %vm2428_vm8, %v2417_v30, %v2425_v36  ;;  %v2439_v41 = vsel %vm2428_vm8, %v2425_v36, %v2409_v37 }
 0x150   : > { %2492 = vmatprep.subr.mxu0 %v2431_v40  ;;  %3308 = vmatprep.subr.mxu1 %v2439_v41 }
 0x151   : > { %2493 = vmatpush1.msra.mxu0 %v2435_v39  ;;  %3309 = vmatpush3.msra.mxu1 %v2439_v41 }
 0x152   : > { %3047 = vmatmul.mubr.msk.f32.gmra.mxu1 %vm356_vm0, %v3041_v27  ;;  %3304 = vmatmul.mubr.msk.f32.gmra.mxu0 %vm356_vm0, %v3044_v38  ;;  %v2415_v42 = vpop.permute.xlu0 %2414  ;;  %v2423_v43 = vpop.permute.xlu1 %2422 }
 0x153   : > { %2272 = vmatprep.mubr.f32.mxu1 %v3395_v22  ;;  %v2430_v44 = vsel %vm2428_vm8, %v2415_v42, %v2423_v43  ;;  %2530 = vmatprep.mubr.f32.mxu0 %v3395_v22 }
 0x154   : > { %2494 = vmatprep.subr.mxu0 %v2430_v44 }
 0x156   : > { %3048 = vmatmul.mubr.msk.f32.gmra.mxu1 %vm356_vm0, %v3042_v33  ;;  %v2407_v45 = vpop.permute.xlu0 %2406  ;;  %v2413_v46 = vpop.permute.xlu1 %2412 }
 0x157   : > { %2278 = vmatprep.mubr.f32.mxu1 %v3395_v22  ;;  %v2434_v47 = vsel %vm2428_vm8, %v2407_v45, %v2415_v42  ;;  %v2438_v48 = vsel %vm2428_vm8, %v2423_v43, %v2407_v45 }
 0x158   : > { %2495 = vmatpush1.msra.mxu0 %v2434_v47  ;;  %3310 = vmatprep.subr.mxu1 %v2438_v48 }
 0x159   : > { %3311 = vmatpush3.msra.mxu1 %v2438_v48 }
 0x15a   : > { %3049 = vmatmul.mubr.msk.f32.gmra.mxu1 %vm356_vm0, %v3043_v35  ;;  %v2421_v49 = vpop.permute.xlu0 %2420 }
 0x15b   : > { %2284 = vmatprep.mubr.f32.mxu1 %v3395_v22  ;;  %v2405_v14 = vpop.permute.xlu1 %2404  ;;  %v2429_v12 = vsel %vm2428_vm8, %v2413_v46, %v2421_v49 }
 0x15c   : > { %v2433_v13 = vsel %vm2428_vm8, %v2405_v14, %v2413_v46  ;;  %2496 = vmatprep.subr.mxu0 %v2429_v12  ;;  %v2437_v15 = vsel %vm2428_vm8, %v2421_v49, %v2405_v14 }
 0x15d   : > { %3312 = vmatprep.subr.mxu1 %v2437_v15  ;;  %2497 = vmatpush1.msra.mxu0 %v2433_v13 }
 0x15e   : > { %3050 = vmatmul.mubr.msk.f32.gmra.mxu1 %vm356_vm0, %v3044_v38  ;;  %3063 = vmatmul.mubr.msk.f32.vlgmr.msra.gmra.mxu0 %vm356_vm0, %v3057_v50 }
 0x15f   : > { %3313 = vmatpush3.msra.mxu1 %v2437_v15  ;;  %3314 = vmatprep.mubr.msk.f32.mxu1 %vm356_vm0, %v3057_v50 }
 0x160   : > { %2536 = vmatprep.mubr.f32.mxu0 %v3395_v22 }
 0x162   : > { %3315 = vmatmul.mubr.msk.f32.vlgmr.msra.gmra.mxu1 %vm356_vm0, %v3058_v16  ;;  %3064 = vmatmul.mubr.msk.f32.gmra.mxu0 %vm356_vm0, %v3058_v16 }
 0x163   : > { %3317 = vmatprep.mubr.msk.f32.mxu1 %vm356_vm0, %v3059_v29  ;;  %2542 = vmatprep.mubr.f32.mxu0 %v3395_v22 }
 0x166   : > { %3318 = vmatmul.mubr.msk.f32.gmra.mxu1 %vm356_vm0, %v3060_v17  ;;  %3065 = vmatmul.mubr.msk.f32.gmra.mxu0 %vm356_vm0, %v3059_v29 }
 0x167   : > { %3320 = vmatprep.mubr.msk.f32.mxu1 %vm356_vm0, %v3061_v18  ;;  %2548 = vmatprep.mubr.f32.mxu0 %v3395_v22 }
 0x16a   : > { %3321 = vmatmul.mubr.msk.f32.gmra.mxu1 %vm356_vm0, %v3062_v19  ;;  %3066 = vmatmul.mubr.msk.f32.gmra.mxu0 %vm356_vm0, %v3060_v17 }
 0x16b   : > { %2554 = vmatprep.mubr.f32.mxu0 %v3395_v22 }
 0x16e   : > { %3067 = vmatmul.mubr.msk.f32.gmra.mxu0 %vm356_vm0, %v3061_v18 }
 0x16f   : > { %2560 = vmatprep.mubr.f32.mxu0 %v3395_v22 }
 0x172   : > { %3068 = vmatmul.mubr.msk.f32.gmra.mxu0 %vm356_vm0, %v3062_v19 }
 0x173   : > { %v441_v20 = vpop.f32.mrf.mxu0  ;;  %v3180_v21 = vpop.f32.mrf.mxu1 }
 0x175   : > { %v443_v24 = vpop.f32.mrf.mxu0  ;;  %v542_v51 = vpop.f32.mrf.mxu1 }
 0x177   : > { %v447_v25 = vpop.f32.mrf.mxu0  ;;  %v3183_v54 = vpop.f32.mrf.mxu1 }
 0x179   : > { %v449_v52 = vpop.f32.mrf.mxu0  ;;  %v552_v56 = vpop.f32.mrf.mxu1 }
 0x17b   : > { %v453_v53 = vpop.f32.mrf.mxu0 }
 0x17d   : > { %v455_v55 = vpop.f32.mrf.mxu0 }
 0x17f   : > { %v3186_v59 = vpop.f32.mrf.mxu1 }
 0x180   : > { %v459_v57 = vpop.f32.mrf.mxu0 }
 0x181   : > { %v562_v61 = vpop.f32.mrf.mxu1 }
 0x182   : > { %v461_v58 = vpop.f32.mrf.mxu0 }
 0x187   : > { %v465_v60 = vpop.f32.mrf.mxu0 }
 0x189   : > { %v467_v62 = vpop.f32.mrf.mxu0 }
 0x18b   : > { %v655_v63 = vpop.f32.mrf.mxu1 }
 0x18c   : > { %v471_v22 = vpop.f32.mrf.mxu0  ;;  %v656_v0 = vadd.f32 %v655_v63, %v441_v20 }
 0x18d   : > { %v657_v1 = vpop.f32.mrf.mxu1 }
 0x18e   : > { %v473_v2 = vpop.f32.mrf.mxu0  ;;  %v658_v3 = vadd.f32 %v657_v1, %v443_v24 }
 0x191   : > { %v661_v4 = vpop.f32.mrf.mxu1 }
 0x192   : > { %v662_v5 = vadd.f32 %v661_v4, %v447_v25  ;;  %v3197_v6 = vpop.f32.mrf.mxu0 }
 0x193   : > { %v762_v7 = vadd.f32 %v3197_v6, %v3180_v21  ;;  %v663_v8 = vpop.f32.mrf.mxu1 }
 0x194   : > { %v664_v9 = vadd.f32 %v663_v8, %v449_v52  ;;  %v756_v10 = vpop.f32.mrf.mxu0 }
 0x195   : > { %v757_v11 = vadd.f32 %v756_v10, %v542_v51 }
 0x196   : > { %v667_v23 = vpop.f32.mrf.mxu1 }
 0x197   : > { %v668_v27 = vadd.f32 %v667_v23, %v453_v53  ;;  %v3200_v28 = vpop.f32.mrf.mxu0 }
 0x198   : > { %v772_v30 = vadd.f32 %v3200_v28, %v3183_v54  ;;  %v669_v31 = vpop.f32.mrf.mxu1 }
 0x199   : > { %v670_v32 = vadd.f32 %v669_v31, %v455_v55  ;;  %v766_v33 = vpop.f32.mrf.mxu0 }
 0x19a   : > { %v767_v34 = vadd.f32 %v766_v33, %v552_v56  ;;  %v673_v35 = vpop.f32.mrf.mxu1 }
 0x19b   : > { %v674_v36 = vadd.f32 %v673_v35, %v459_v57 }
 0x19c   : > { %v675_v37 = vpop.f32.mrf.mxu1 }
 0x19d   : > { %v676_v38 = vadd.f32 %v675_v37, %v461_v58 }
 0x19e   : > { %v679_v39 = vpop.f32.mrf.mxu1 }
 0x19f   : > { %v680_v40 = vadd.f32 %v679_v39, %v465_v60 }
 0x1a0   : > { %v681_v41 = vpop.f32.mrf.mxu1 }
 0x1a1   : > { %v682_v42 = vadd.f32 %v681_v41, %v467_v62 }
 0x1a2   : > { %v685_v43 = vpop.f32.mrf.mxu1 }
 0x1a3   : > { %v686_v44 = vadd.f32 %v685_v43, %v471_v22  ;;  %v913_v45 = vpop.f32.mrf.mxu0 }
 0x1a4   : > { %v687_v46 = vpop.f32.mrf.mxu1  ;;  %v1043_v47 = vadd.f32 %v913_v45, %v656_v0 }
 0x1a5   : > { %v688_v48 = vadd.f32 %v687_v46, %v473_v2  ;;  %v915_v49 = vpop.f32.mrf.mxu0 }
 0x1a6   : > { %v3203_v14 = vpop.f32.mrf.mxu1  ;;  %v1044_v12 = vadd.f32 %v915_v49, %v658_v3 }
 0x1a7   : > { %v782_v50 = vadd.f32 %v3203_v14, %v3186_v59  ;;  %v919_v13 = vpop.f32.mrf.mxu0 }
 0x1a8   : > { %v776_v15 = vpop.f32.mrf.mxu1  ;;  %v1046_v16 = vadd.f32 %v919_v13, %v662_v5 }
 0x1a9   : > { %v777_v29 = vadd.f32 %v776_v15, %v562_v61  ;;  %v921_v17 = vpop.f32.mrf.mxu0 }
 0x1aa   : > { %v1047_v18 = vadd.f32 %v921_v17, %v664_v9 }
 0x1ae   : > { %v3214_v19 = vpop.f32.mrf.mxu1 }
 0x1af   : > { %v1048_v20 = vadd.f32 %v3214_v19, %v762_v7  ;;  %v925_v21 = vpop.f32.mrf.mxu0 }
 0x1b0   : > { %v1049_v24 = vadd.f32 %v925_v21, %v668_v27  ;;  %v1014_v25 = vpop.f32.mrf.mxu1 }
 0x1b1   : > { %v1045_v51 = vadd.f32 %v1014_v25, %v757_v11  ;;  %v927_v52 = vpop.f32.mrf.mxu0 }
 0x1b2   : > { %v1050_v53 = vadd.f32 %v927_v52, %v670_v32  ;;  %v3217_v54 = vpop.f32.mrf.mxu1 }
 0x1b3   : > { %v1054_v55 = vadd.f32 %v3217_v54, %v772_v30  ;;  %v931_v56 = vpop.f32.mrf.mxu0 }
 0x1b4   : > { %v1052_v57 = vadd.f32 %v931_v56, %v674_v36  ;;  %v1024_v58 = vpop.f32.mrf.mxu1 }
 0x1b5   : > { %v1051_v59 = vadd.f32 %v1024_v58, %v767_v34  ;;  %v933_v60 = vpop.f32.mrf.mxu0 }
 0x1b6   : > { %v1053_v62 = vadd.f32 %v933_v60, %v676_v38  ;;  %v3220_v63 = vpop.f32.mrf.mxu1 }
 0x1b7   : > { %v1060_v61 = vadd.f32 %v3220_v63, %v782_v50  ;;  %v937_v22 = vpop.f32.mrf.mxu0 }
 0x1b8   : > { %v1055_v0 = vadd.f32 %v937_v22, %v680_v40  ;;  %v1034_v1 = vpop.f32.mrf.mxu1 }
 0x1b9   : > { %v1057_v2 = vadd.f32 %v1034_v1, %v777_v29  ;;  %v939_v3 = vpop.f32.mrf.mxu0 }
 0x1ba   : > { %v1056_v4 = vadd.f32 %v939_v3, %v682_v42 }
 0x1bb   : > { %v943_v5 = vpop.f32.mrf.mxu0  ;;  %v1189_v6 = vpop.f32.mrf.mxu1 }
 0x1bc   : > { %v1058_v7 = vadd.f32 %v943_v5, %v686_v44  ;;  %v1319_v8 = vadd.f32 %v1189_v6, %v1043_v47 }
 0x1bd   : > { %v945_v9 = vpop.f32.mrf.mxu0  ;;  %v1191_v10 = vpop.f32.mrf.mxu1 }
 0x1be   : > { %v1059_v11 = vadd.f32 %v945_v9, %v688_v48  ;;  %v1320_v23 = vadd.f32 %v1191_v10, %v1044_v12 }
 0x1bf   : > { %v3231_v27 = vpop.f32.mrf.mxu0 }
 0x1c0   : > { %v1324_v28 = vadd.f32 %v3231_v27, %v1048_v20 }
 0x1c1   : > { %v1290_v30 = vpop.f32.mrf.mxu0 }
 0x1c2   : > { %v1321_v31 = vadd.f32 %v1290_v30, %v1045_v51  ;;  %v1195_v32 = vpop.f32.mrf.mxu1 }
 0x1c3   : > { %v1322_v33 = vadd.f32 %v1195_v32, %v1046_v16  ;;  %v3234_v34 = vpop.f32.mrf.mxu0 }
 0x1c4   : > { %v1330_v35 = vadd.f32 %v3234_v34, %v1054_v55  ;;  %v1197_v36 = vpop.f32.mrf.mxu1 }
 0x1c5   : > { %v1323_v37 = vadd.f32 %v1197_v36, %v1047_v18  ;;  %v1300_v38 = vpop.f32.mrf.mxu0 }
 0x1c6   : > { %v1327_v39 = vadd.f32 %v1300_v38, %v1051_v59 }
 0x1c8   : > { %v3237_v40 = vpop.f32.mrf.mxu0 }
 0x1c9   : > { %v1201_v41 = vpop.f32.mrf.mxu1  ;;  %v1336_v42 = vadd.f32 %v3237_v40, %v1060_v61 }
 0x1ca   : > { %v1325_v43 = vadd.f32 %v1201_v41, %v1049_v24  ;;  %v1310_v44 = vpop.f32.mrf.mxu0 }
 0x1cb   : > { %v1203_v45 = vpop.f32.mrf.mxu1  ;;  %v1333_v46 = vadd.f32 %v1310_v44, %v1057_v2 }
 0x1cc   : > { %v1326_v47 = vadd.f32 %v1203_v45, %v1050_v53  ;;  %v1428_v48 = vpop.f32.mrf.mxu0 }
 0x1cd   : > { %v1207_v49 = vpop.f32.mrf.mxu1  ;;  %v4234_v14 = vadd.f32 %v1428_v48, %v1319_v8 }
 0x1ce   : > { %v1328_v12 = vadd.f32 %v1207_v49, %v1052_v57  ;;  %v1430_v50 = vpop.f32.mrf.mxu0 }
 0x1cf   : > { %v1209_v13 = vpop.f32.mrf.mxu1  ;;  %v4236_v15 = vadd.f32 %v1430_v50, %v1320_v23 }
 0x1d0   : > { %v1329_v16 = vadd.f32 %v1209_v13, %v1053_v62  ;;  %v1434_v29 = vpop.f32.mrf.mxu0 }
 0x1d1   : > { %v1213_v17 = vpop.f32.mrf.mxu1  ;;  %v4238_v18 = vadd.f32 %v1434_v29, %v1322_v33 }
 0x1d2   : > { %v1331_v19 = vadd.f32 %v1213_v17, %v1055_v0  ;;  %v1436_v20 = vpop.f32.mrf.mxu0 }
 0x1d3   : > { %v1215_v21 = vpop.f32.mrf.mxu1  ;;  %v4240_v24 = vadd.f32 %v1436_v20, %v1323_v37 }
 0x1d4   : > { %v1332_v25 = vadd.f32 %v1215_v21, %v1056_v4  ;;  %v1440_v51 = vpop.f32.mrf.mxu0 }
 0x1d5   : > { %v1219_v52 = vpop.f32.mrf.mxu1  ;;  %v4242_v53 = vadd.f32 %v1440_v51, %v1325_v43 }
 0x1d6   : > { %v1334_v54 = vadd.f32 %v1219_v52, %v1058_v7  ;;  %v1442_v55 = vpop.f32.mrf.mxu0 }
 0x1d7   : > { %v1221_v56 = vpop.f32.mrf.mxu1  ;;  %v4244_v57 = vadd.f32 %v1442_v55, %v1326_v47 }
 0x1d8   : > { %v1335_v58 = vadd.f32 %v1221_v56, %v1059_v11  ;;  %v1446_v59 = vpop.f32.mrf.mxu0 }
 0x1d9   : > { %v4246_v60 = vadd.f32 %v1446_v59, %v1328_v12  ;;  %v3248_v62 = vpop.f32.mrf.mxu1 }
 0x1da   : > { %v4248_v63 = vadd.f32 %v3248_v62, %v1324_v28  ;;  %v1448_v61 = vpop.f32.mrf.mxu0 }
 0x1db   : > { %v4250_v22 = vadd.f32 %v1448_v61, %v1329_v16  ;;  %v1529_v0 = vpop.f32.mrf.mxu1 }
 0x1dc   : > { %v4252_v1 = vadd.f32 %v1529_v0, %v1321_v31  ;;  %v1452_v2 = vpop.f32.mrf.mxu0 }
 0x1dd   : > { %v4254_v3 = vadd.f32 %v1452_v2, %v1331_v19  ;;  %v3251_v4 = vpop.f32.mrf.mxu1 }
 0x1de   : > { %v4256_v5 = vadd.f32 %v3251_v4, %v1330_v35  ;;  %v1454_v6 = vpop.f32.mrf.mxu0 }
 0x1df   : > { %v4258_v7 = vadd.f32 %v1454_v6, %v1332_v25  ;;  %v1539_v8 = vpop.f32.mrf.mxu1 }
 0x1e0   : > { %v4260_v9 = vadd.f32 %v1539_v8, %v1327_v39  ;;  %v1458_v10 = vpop.f32.mrf.mxu0 }
 0x1e1   : > { %v4262_v11 = vadd.f32 %v1458_v10, %v1334_v54  ;;  %v3254_v23 = vpop.f32.mrf.mxu1 }
 0x1e2   : > { %v4264_v27 = vadd.f32 %v3254_v23, %v1336_v42  ;;  %v1460_v28 = vpop.f32.mrf.mxu0 }
 0x1e3   : > { %v4266_v30 = vadd.f32 %v1460_v28, %v1335_v58  ;;  %v1549_v31 = vpop.f32.mrf.mxu1  ;;  %v2737_v28 = vshrl.u32 %v291_v26, 7 }
 0x1e4   : > { %v4268_v32 = vadd.f32 %v1549_v31, %v1333_v46  ;;  %v3265_v33 = vpop.f32.mrf.mxu0 }
 0x1e5   : > { %4524 = vst [vmem:[#allocation4_spill] sm:$0xff] %v4266_v30  ;;  %v1704_v34 = vpop.f32.mrf.mxu1  ;;  %v2734_v30 = vld [vmem:[%s252_s6] sm:$0x7] }
 0x1e6   : > { %v1805_v35 = vpop.f32.mrf.mxu0 }
 0x1e7   : > { %v1706_v36 = vpop.f32.mrf.mxu1 }
 0x1ea   : > { %v1710_v37 = vpop.f32.mrf.mxu1  ;;  %v3268_v38 = vpop.f32.mrf.mxu0 }
 0x1ec   : > { %v1712_v39 = vpop.f32.mrf.mxu1  ;;  %v1815_v40 = vpop.f32.mrf.mxu0 }
 0x1ee   : > { %v1716_v41 = vpop.f32.mrf.mxu1  ;;  %v4270_v43 = vpop.f32.mrf.mxu0 }
 0x1f0   : > { %v4272_v44 = vpop.f32.mrf.mxu1  ;;  %v4274_v42 = vpop.f32.mrf.mxu0 }
 0x1f2   : > { %v4276_v45 = vpop.f32.mrf.mxu1  ;;  %v1980_v47 = vpop.f32.mrf.mxu0 }
 0x1f4   : > { %v4278_v46 = vpop.f32.mrf.mxu1  ;;  %v4280_v48 = vpop.f32.mrf.mxu0 }
 0x1f6   : > { %v4282_v49 = vpop.f32.mrf.mxu1  ;;  %v4284_v12 = vpop.f32.mrf.mxu0 }
 0x1f8   : > { %v4286_v50 = vpop.f32.mrf.mxu1  ;;  %v4288_v13 = vpop.f32.mrf.mxu0 }
 0x1fa   : > { %v4290_v16 = vpop.f32.mrf.mxu1  ;;  %v4292_v29 = vpop.f32.mrf.mxu0 }
 0x1fc   : > { %v4294_v17 = vpop.f32.mrf.mxu1  ;;  %v4296_v19 = vpop.f32.mrf.mxu0 }
 0x1fd   : > { %4525 = vst [vmem:[#allocation5_spill] sm:$0xff] %v4294_v17  ;;  %v2738_v17 = vsub.s32 0, %v2737_v28 }
 0x1fe   : > { %v4298_v20 = vpop.f32.mrf.mxu0  ;;  %v4300_v21 = vpop.f32.mrf.mxu1 }
 0x1ff   : > { %v4345_v26 = vrot.slane %v2734_v30, %v2738_v17  ;;  %v1838_v17 = vadd.f32 %v1712_v39, %v4240_v24 }
 0x200   : > { %v4302_v25 = vpop.f32.mrf.mxu0  ;;  %v4304_v51 = vpop.f32.mrf.mxu1 }
 0x202   : > { %v4306_v52 = vpop.f32.mrf.mxu0  ;;  %v4308_v54 = vpop.f32.mrf.mxu1 }
 0x203   : > { %4526 = vst [vmem:[#allocation6_spill] sm:$0xff] %v4308_v54 }
 0x204   : > { %v4310_v55 = vpop.f32.mrf.mxu0  ;;  %v4312_v56 = vpop.f32.mrf.mxu1 }
 0x205   : > { %4527 = vst [vmem:[#allocation7_spill] sm:$0xff] %v4310_v55  ;;  %4528 = vst [vmem:[#allocation8_spill] sm:$0xff] %v4312_v56 }
 0x206   : > { %v4314_v58 = vpop.f32.mrf.mxu0  ;;  %v4316_v59 = vpop.f32.mrf.mxu1 }
 0x207   : > { %4529 = vst [vmem:[#allocation9_spill] sm:$0xff] %v4314_v58  ;;  %4530 = vst [vmem:[#allocation10_spill] sm:$0xff] %v4316_v59  ;;  %v2746_v59 = vsub.s32 2, %v2737_v28 }
 0x208   : > { %v4319_v62 = vpop.f32.mrf.mxu0  ;;  %v4321_v61 = vpop.f32.mrf.mxu1 }
 0x209   : > { %4531 = vst [vmem:[#allocation11_spill] sm:$0xff] %v4319_v62  ;;  %4532 = vst [vmem:[#allocation12_spill] sm:$0xff] %v4321_v61  ;;  %v2742_v61 = vsub.s32 1, %v2737_v28  ;;  %v1836_v28 = vadd.f32 %v1805_v35, %v4252_v1  ;;  %v1843_v1 = vadd.f32 %v4276_v45, %v4246_v60  ;;  %v1847_v60 = vadd.f32 %v4286_v50, %v4258_v7 }
 0x20a   : > { %v2256_v0 = vpop.f32.mrf.mxu1  ;;  %v3299_v2 = vpop.f32.mrf.mxu0  ;;  %v2114_v35 = vadd.f32 %v4288_v13, %v1838_v17  ;;  %v4541_v50 = vld [vmem:[#allocation6_spill] sm:$0xff] }
 0x20b   : > { %v4349_v55 = vrot.slane %v2734_v30, %v2742_v61 }
 0x20c   : > { %v2258_v4 = vpop.f32.mrf.mxu1  ;;  %v4323_v6 = vpop.f32.mrf.mxu0 }
 0x20d   : > { %4533 = vst [vmem:[#allocation13_spill] sm:$0xff] %v4323_v6  ;;  %v1839_v6 = vadd.f32 %v3265_v33, %v4248_v63  ;;  %v1840_v63 = vadd.f32 %v1716_v41, %v4242_v53  ;;  %v1844_v53 = vadd.f32 %v4278_v46, %v4250_v22  ;;  %v4391_v22 = vadd.f32 %v4290_v16, %v4262_v11  ;;  %v4542_v16 = vld [vmem:[#allocation7_spill] sm:$0xff] }
 0x20e   : > { %v2262_v8 = vpop.f32.mrf.mxu1  ;;  %v4325_v10 = vpop.f32.mrf.mxu0 }
 0x20f   : > { %4534 = vst [vmem:[#allocation14_spill] sm:$0xff] %v4325_v10  ;;  %v4400_v7 = vadd.f32 %v4302_v25, %v1844_v53 }
 0x210   : > { %v4327_v23 = vpop.f32.mrf.mxu1  ;;  %v4335_v62 = vpop.f32.mrf.mxu0 }
 0x211   : > { %4535 = vst [vmem:[#allocation15_spill] sm:$0xff] %v4327_v23  ;;  %4537 = vst [vmem:[#allocation17_spill] sm:$0xff] %v4335_v62  ;;  %v4351_v62 = vrot.slane %v2734_v30, %v2746_v59  ;;  %v1851_v30 = vadd.f32 %v4270_v43, %v4264_v27  ;;  %v1846_v27 = vadd.f32 %v4282_v49, %v4254_v3  ;;  %v2694_v49 = vpop.permute.xlu1 %2693 }
 0x212   : > { %v4330_v31 = vpop.f32.mrf.mxu1  ;;  %v4341_v10 = vpop.f32.mrf.mxu0  ;;  %v2116_v3 = vadd.f32 %v4292_v29, %v1840_v63  ;;  %v2119_v43 = vadd.f32 %v4298_v20, %v1843_v1  ;;  %v4408_v29 = vadd.f32 %v4542_v16, %v1847_v60 }
 0x213   : > { %4536 = vst [vmem:[#allocation16_spill] sm:$0xff] %v4330_v31  ;;  %4540 = vst [vmem:[#allocation20_spill] sm:$0xff] %v4341_v10  ;;  %v1834_v31 = vadd.f32 %v1704_v34, %v4234_v14  ;;  %v1845_v10 = vadd.f32 %v3268_v38, %v4256_v5  ;;  %v1842_v14 = vadd.f32 %v1815_v40, %v4260_v9  ;;  %v2689_v34 = vpop.permute.xlu0 %2688 }
 0x214   : > { %v4337_v58 = vpop.f32.mrf.mxu1  ;;  %v4372_v5 = vpop.f32.mrf.mxu0  ;;  %v2115_v38 = vadd.f32 %v4300_v21, %v1839_v6 }
 0x215   : > { %4538 = vst [vmem:[#allocation18_spill] sm:$0xff] %v4337_v58  ;;  %v1835_v58 = vadd.f32 %v1706_v36, %v4236_v15  ;;  %v2110_v33 = vadd.f32 %v1980_v47, %v1834_v31  ;;  %v1841_v15 = vadd.f32 %v4272_v44, %v4244_v57  ;;  %v2112_v44 = vadd.f32 %v4304_v51, %v1836_v28  ;;  %v2699_v53 = vpop.permute.xlu1 %2698 }
 0x216   : > { %v4339_v56 = vpop.f32.mrf.mxu1  ;;  %v2391_v45 = vadd.f32 %v3299_v2, %v2115_v38  ;;  %v2121_v13 = vadd.f32 %v4541_v50, %v1845_v10  ;;  %v4546_v6 = vld [vmem:[#allocation14_spill] sm:$0xff] }
 0x217   : > { %4539 = vst [vmem:[#allocation19_spill] sm:$0xff] %v4339_v56  ;;  %v1837_v56 = vadd.f32 %v1710_v37, %v4238_v18  ;;  %v4368_v18 = vadd.f32 %v4274_v42, %v4268_v32  ;;  %v2111_v9 = vadd.f32 %v4280_v48, %v1835_v58  ;;  %v2386_v57 = vadd.f32 %v2256_v0, %v2110_v33  ;;  %v4412_v61 = vpop.permute.xlu0 %2703  ;;  %v4544_v0 = vld [vmem:[#allocation8_spill] sm:$0xff] }
 0x218   : > { %v4343_v23 = vpop.f32.mrf.mxu1  ;;  %v2117_v41 = vadd.f32 %v4296_v19, %v1841_v15  ;;  %v4543_v19 = vld [vmem:[#allocation13_spill] sm:$0xff]  ;;  %v2118_v2 = vadd.f32 %v4544_v0, %v1842_v14  ;;  %v4547_v10 = vld [vmem:[#allocation15_spill] sm:$0xff] }
 0x219   : > { %v2113_v32 = vadd.f32 %v4284_v12, %v1837_v56  ;;  %v2387_v39 = vadd.f32 %v2258_v4, %v2111_v9  ;;  %v2122_v12 = vadd.f32 %v4306_v52, %v1846_v27  ;;  %v2388_v20 = vadd.f32 %v4543_v19, %v2112_v44  ;;  %v4545_v52 = vld [vmem:[#allocation10_spill] sm:$0xff]  ;;  %v4548_v14 = vld [vmem:[#allocation17_spill] sm:$0xff] }
 0x21a   : > { %v4357_v54 = vpop.f32.mrf.mxu1  ;;  %v2127_v4 = vadd.f32 %v4545_v52, %v1851_v30  ;;  %v2390_v31 = vadd.f32 %v4547_v10, %v2114_v35  ;;  %v2394_v9 = vadd.f32 %v4548_v14, %v2118_v2  ;;  %v4549_v30 = vld [vmem:[#allocation16_spill] sm:$0xff] }
 0x21b   : > { %v2389_v47 = vadd.f32 %v2262_v8, %v2113_v32  ;;  %v2397_v8 = vadd.f32 %v4546_v6, %v2121_v13  ;;  %v2392_v27 = vadd.f32 %v4549_v30, %v2116_v3  ;;  %v4436_v19 = vpop.permute.xlu0 %2713  ;;  %v2396_v6 = vadd.f32 %v4343_v23, %v4400_v7  ;;  %v4555_v23 = vld [vmem:[#allocation5_spill] sm:$0xff] }
 0x21c   : > { %v4374_v24 = vpop.f32.mrf.mxu1 }
 0x21e   : > { %v4393_v36 = vpop.f32.mrf.mxu1  ;;  %v2532_v37 = vpop.f32.mrf.mxu0 }
 0x21f   : > { %v2662_v40 = vadd.f32 %v2532_v37, %v2386_v57  ;;  %v4550_v57 = vld [vmem:[#allocation18_spill] sm:$0xff] }
 0x220   : > { %v4403_v11 = vpop.f32.mrf.mxu1  ;;  %v2534_v42 = vpop.f32.mrf.mxu0  ;;  %v2393_v32 = vadd.f32 %v4550_v57, %v2117_v41 }
 0x221   : > { %v2716_v46 = vadd.f32 %v2689_v34, %v2662_v40  ;;  %v2663_v48 = vadd.f32 %v2534_v42, %v2387_v39  ;;  %v4551_v42 = vld [vmem:[#allocation12_spill] sm:$0xff] }
 0x222   : > { %v3316_v21 = vpop.f32.mrf.mxu1  ;;  %v2538_v25 = vpop.f32.mrf.mxu0 }
 0x223   : > { %v2667_v51 = vadd.f32 %v3316_v21, %v2391_v45  ;;  %v2751_v56 = vmul.f32 %v4345_v26, %v2716_v46  ;;  %v2717_v58 = vadd.f32 %v2689_v34, %v2663_v48  ;;  %v2665_v59 = vadd.f32 %v2538_v25, %v2389_v47  ;;  %v4552_v47 = vld [vmem:[#allocation20_spill] sm:$0xff]  ;;  %v4553_v21 = vld [vmem:[#allocation19_spill] sm:$0xff] }
 0x224   : > { %v2633_v28 = vpop.f32.mrf.mxu1  ;;  %v2540_v17 = vpop.f32.mrf.mxu0  ;;  %v2124_v45 = vadd.f32 %v4551_v42, %v4368_v18  ;;  %v2403_v46 = vadd.f32 %v4552_v47, %v2127_v4  ;;  %v2395_v25 = vadd.f32 %v4553_v21, %v2119_v43 }
 0x225   : > { %2769 = vst [vmem:[%s4419_s15] sm:$0xff] %v2751_v56  ;;  %v2752_v63 = vmul.f32 %v4349_v55, %v2717_v58  ;;  %v2664_v33 = vadd.f32 %v2633_v28, %v2388_v20  ;;  %v2721_v15 = vadd.f32 %v2694_v49, %v2667_v51  ;;  %v2719_v1 = vadd.f32 %v2694_v49, %v2665_v59  ;;  %v2709_v4 = vpop.permute.xlu1 %2708 }
 0x226   : > { %v3319_v60 = vpop.f32.mrf.mxu1  ;;  %v2666_v35 = vadd.f32 %v2540_v17, %v2390_v31  ;;  %v2544_v37 = vpop.f32.mrf.mxu0  ;;  %v2400_v18 = vadd.f32 %v4372_v5, %v2124_v45  ;;  %v2398_v5 = vadd.f32 %v4357_v54, %v2122_v12  ;;  %v4556_v54 = vld [vmem:[#allocation9_spill] sm:$0xff] }
 0x227   : > { %2770 = vst [vmem:[%s4419_s15 + $0x8] sm:$0xff] %v2752_v63  ;;  %v2718_v38 = vadd.f32 %v2689_v34, %v2664_v33  ;;  %v2756_v39 = vmul.f32 %v4351_v62, %v2721_v15  ;;  %v2754_v40 = vmul.f32 %v4345_v26, %v2719_v1  ;;  %v2673_v44 = vadd.f32 %v3319_v60, %v2397_v8  ;;  %v4554_v15 = vld [vmem:[#allocation4_spill] sm:$0xff] }
 0x228   : > { %v2720_v3 = vadd.f32 %v2694_v49, %v2666_v35  ;;  %v2643_v48 = vpop.f32.mrf.mxu1  ;;  %v2668_v41 = vadd.f32 %v2544_v37, %v2392_v27  ;;  %v2546_v50 = vpop.f32.mrf.mxu0  ;;  %v1850_v7 = vadd.f32 %v4555_v23, %v4554_v15  ;;  %v2125_v12 = vadd.f32 %v4556_v54, %v4391_v22 }
 0x229   : > { %v2753_v13 = vmul.f32 %v4351_v62, %v2718_v38  ;;  %2774 = vst [vmem:[%s4419_s15 + $0x28] sm:$0xff] %v2756_v39  ;;  %2772 = vst [vmem:[%s4419_s15 + $0x18] sm:$0xff] %v2754_v40  ;;  %v2727_v34 = vadd.f32 %v4412_v61, %v2673_v44  ;;  %v2670_v16 = vadd.f32 %v2643_v48, %v2394_v9 }
 0x22a   : > { %v2669_v20 = vadd.f32 %v2546_v50, %v2393_v32  ;;  %v2755_v49 = vmul.f32 %v4349_v55, %v2720_v3  ;;  %v3322_v51 = vpop.f32.mrf.mxu1  ;;  %v2722_v56 = vadd.f32 %v2699_v53, %v2668_v41  ;;  %v2550_v58 = vpop.f32.mrf.mxu0  ;;  %v2399_v9 = vadd.f32 %v4374_v24, %v4408_v29  ;;  %v4557_v32 = vld [vmem:[#allocation11_spill] sm:$0xff] }
 0x22b   : > { %2771 = vst [vmem:[%s4419_s15 + $0x10] sm:$0xff] %v2753_v13  ;;  %v2762_v59 = vmul.f32 %v4351_v62, %v2727_v34  ;;  %v2679_v0 = vadd.f32 %v3322_v51, %v2403_v46  ;;  %v2724_v2 = vadd.f32 %v2699_v53, %v2670_v16  ;;  %v2671_v10 = vadd.f32 %v2550_v58, %v2395_v25 }
 0x22c   : > { %v2723_v52 = vadd.f32 %v2699_v53, %v2669_v20  ;;  %2773 = vst [vmem:[%s4419_s15 + $0x20] sm:$0xff] %v2755_v49  ;;  %v2757_v43 = vmul.f32 %v4345_v26, %v2722_v56  ;;  %v2653_v8 = vpop.f32.mrf.mxu1  ;;  %v2552_v31 = vpop.f32.mrf.mxu0  ;;  %v2126_v60 = vadd.f32 %v4557_v32, %v1850_v7  ;;  %v2401_v38 = vadd.f32 %v4393_v36, %v2125_v12 }
 0x22d   : > { %2780 = vst [vmem:[%s4419_s15 + $0x58] sm:$0xff] %v2762_v59  ;;  %v2759_v28 = vmul.f32 %v4351_v62, %v2724_v2  ;;  %v2733_v17 = vadd.f32 %v4436_v19, %v2679_v0  ;;  %v2676_v33 = vadd.f32 %v2653_v8, %v2400_v18  ;;  %v2725_v1 = vadd.f32 %v4412_v61, %v2671_v10 }
 0x22e   : > { %v2758_v63 = vmul.f32 %v4349_v55, %v2723_v52  ;;  %2775 = vst [vmem:[%s4419_s15 + $0x30] sm:$0xff] %v2757_v43  ;;  %v2672_v53 = vadd.f32 %v2552_v31, %v2396_v6  ;;  %v2556_v14 = vpop.f32.mrf.mxu0  ;;  %v2402_v42 = vadd.f32 %v4403_v11, %v2126_v60  ;;  %v2811_v50 = vld [vmem:[%s4419_s15 + $0x8] sm:$0xff] (%p3460_p5) }
 0x22f   : > { %2777 = vst [vmem:[%s4419_s15 + $0x40] sm:$0xff] %v2759_v28  ;;  %v2768_v30 = vmul.f32 %v4351_v62, %v2733_v17  ;;  %v2730_v27 = vadd.f32 %v2709_v4, %v2676_v33  ;;  %v2674_v57 = vadd.f32 %v2556_v14, %v2398_v5  ;;  %v2760_v22 = vmul.f32 %v4345_v26, %v2725_v1 }
 0x230   : > { %2776 = vst [vmem:[%s4419_s15 + $0x38] sm:$0xff] %v2758_v63  ;;  %v2726_v35 = vadd.f32 %v4412_v61, %v2672_v53  ;;  %v2558_v37 = vpop.f32.mrf.mxu0  ;;  %v2815_v34 = vld [vmem:[%s4419_s15 + $0x18] sm:$0xff] (%p3460_p5)  ;;  %v2819_v16 = vld [vmem:[%s4419_s15 + $0x28] sm:$0xff] (%p3460_p5)  ;;  %2812 = vst [vmem:[%s2796_s9 + $0x8] sm:$0xff] (%p3460_p5), %v2811_v50 }
 0x231   : > { %2786 = vst [vmem:[%s4419_s15 + $0x88] sm:$0xff] %v2768_v30  ;;  %v2765_v24 = vmul.f32 %v4351_v62, %v2730_v27  ;;  %v2728_v29 = vadd.f32 %v2709_v4, %v2674_v57  ;;  %v2675_v39 = vadd.f32 %v2558_v37, %v2399_v9  ;;  %2778 = vst [vmem:[%s4419_s15 + $0x48] sm:$0xff] %v2760_v22 }
 0x232   : > { %v2761_v40 = vmul.f32 %v4349_v55, %v2726_v35  ;;  %v2562_v44 = vpop.f32.mrf.mxu0  ;;  %v2813_v13 = vld [vmem:[%s4419_s15 + $0x10] sm:$0xff] (%p3460_p5)  ;;  %2816 = vst [vmem:[%s2796_s9 + $0x30] sm:$0xff] (%p3460_p5), %v2815_v34  ;;  %2820 = vst [vmem:[%s2796_s9 + $0x40] sm:$0xff] (%p3460_p5), %v2819_v16 }
 0x233   : > { %2783 = vst [vmem:[%s4419_s15 + $0x70] sm:$0xff] %v2765_v24  ;;  %v2763_v61 = vmul.f32 %v4345_v26, %v2728_v29  ;;  %v2729_v45 = vadd.f32 %v2709_v4, %v2675_v39  ;;  %v2677_v47 = vadd.f32 %v2562_v44, %v2401_v38  ;;  %2814 = vst [vmem:[%s2796_s9 + $0x10] sm:$0xff] (%p3460_p5), %v2813_v13 }
 0x234   : > { %2779 = vst [vmem:[%s4419_s15 + $0x50] sm:$0xff] %v2761_v40  ;;  %v2564_v36 = vpop.f32.mrf.mxu0  ;;  %v2831_v49 = vld [vmem:[%s4419_s15 + $0x58] sm:$0xff] (%p3460_p5) }
 0x235   : > { %2781 = vst [vmem:[%s4419_s15 + $0x60] sm:$0xff] %v2763_v61  ;;  %v2764_v62 = vmul.f32 %v4349_v55, %v2729_v45  ;;  %v2731_v46 = vadd.f32 %v4436_v19, %v2677_v47  ;;  %v2678_v3 = vadd.f32 %v2564_v36, %v2402_v42  ;;  %2832 = vst [vmem:[%s2796_s9 + $0xa0] sm:$0xff] (%p3460_p5), %v2831_v49 }
 0x236   : > { %v2825_v18 = vld [vmem:[%s4419_s15 + $0x40] sm:$0xff] (%p3460_p5) }
 0x237   : > { %2782 = vst [vmem:[%s4419_s15 + $0x68] sm:$0xff] %v2764_v62  ;;  %v2766_v48 = vmul.f32 %v4345_v26, %v2731_v46  ;;  %v2732_v41 = vadd.f32 %v4436_v19, %v2678_v3  ;;  %2793 = sbr.rel (!%p3460_p5) target bundleno = 580 (0x244), region = 63  ;;  %v2809_v26 = vld [vmem:[%s4419_s15] sm:$0xff] (%p3460_p5)  ;;  %v2821_v19 = vld [vmem:[%s4419_s15 + $0x30] sm:$0xff] (%p3460_p5)  ;;  %v2823_v20 = vld [vmem:[%s4419_s15 + $0x38] sm:$0xff] (%p3460_p5) }
 0x238   : > { %2810 = vst [vmem:[%s2796_s9] sm:$0xff] (%p3460_p5), %v2809_v26  ;;  %2822 = vst [vmem:[%s2796_s9 + $0x60] sm:$0xff] (%p3460_p5), %v2821_v19  ;;  %v2827_v21 = vld [vmem:[%s4419_s15 + $0x48] sm:$0xff] (%p3460_p5) }
 0x239   : > { %2784 = vst [vmem:[%s4419_s15 + $0x78] sm:$0xff] %v2766_v48  ;;  %v2767_v11 = vmul.f32 %v4349_v55, %v2732_v41  ;;  %v2817_v55 = vld [vmem:[%s4419_s15 + $0x20] sm:$0xff] (%p3460_p5)  ;;  %2824 = vst [vmem:[%s2796_s9 + $0x68] sm:$0xff] (%p3460_p5), %v2823_v20  ;;  %v2843_v2 = vld [vmem:[%s4419_s15 + $0x88] sm:$0xff] (%p3460_p5) }
 0x23a   : > { %2818 = vst [vmem:[%s2796_s9 + $0x38] sm:$0xff] (%p3460_p5), %v2817_v55  ;;  %2826 = vst [vmem:[%s2796_s9 + $0x70] sm:$0xff] (%p3460_p5), %v2825_v18  ;;  %v2837_v58 = vld [vmem:[%s4419_s15 + $0x70] sm:$0xff] (%p3460_p5) }
 0x23b   : > { %2785 = vst [vmem:[%s4419_s15 + $0x80] sm:$0xff] %v2767_v11  ;;  %v2829_v25 = vld [vmem:[%s4419_s15 + $0x50] sm:$0xff] (%p3460_p5)  ;;  %2828 = vst [vmem:[%s2796_s9 + $0x90] sm:$0xff] (%p3460_p5), %v2827_v21 }
 0x23c   : > { %2830 = vst [vmem:[%s2796_s9 + $0x98] sm:$0xff] %v2829_v25  ;;  %v2833_v51 = vld [vmem:[%s4419_s15 + $0x60] sm:$0xff]  ;;  %2838 = vst [vmem:[%s2796_s9 + $0xd0] sm:$0xff] %v2837_v58 }
 0x23d   : > { %2834 = vst [vmem:[%s2796_s9 + $0xc0] sm:$0xff] %v2833_v51  ;;  %2844 = vst [vmem:[%s2796_s9 + $0x100] sm:$0xff] %v2843_v2 }
 0x23e   : > { %v2835_v56 = vld [vmem:[%s4419_s15 + $0x68] sm:$0xff] }
 0x23f   : > { %2836 = vst [vmem:[%s2796_s9 + $0xc8] sm:$0xff] %v2835_v56 }
 0x240   : > { %v2839_v59 = vld [vmem:[%s4419_s15 + $0x78] sm:$0xff] }
 0x241   : > { %2840 = vst [vmem:[%s2796_s9 + $0xf0] sm:$0xff] %v2839_v59 }
 0x242   : > { %v2841_v0 = vld [vmem:[%s4419_s15 + $0x80] sm:$0xff] }
 0x243   : > { %2842 = vst [vmem:[%s2796_s9 + $0xf8] sm:$0xff] %v2841_v0 }
 0x244 PF: > { %p11_p11 = scmp.ge.s32.totalorder %s3448_s19, 4   ;;  %s4558_s15 = smov %s3388_s16 }
 0x245   : > { %s4559_s16 = smov %s3458_s22  ;;  %s4560_s17 = smov %s3448_s19 }
 0x246   :  { %13 = sbr.rel (!%p11_p11) target bundleno = 2 (0x2), region = 128 }

</bundles_post_ra>
